<compile_context>
chip_gen: v7x
topology: tpu7x:2x2x1
jax: 0.10.0
libtpu: 0.0.40
codegen_flags: <defaults>
</compile_context>

<pallas_src>
import functools
import math

import jax
import jax.numpy as jnp
from jax import lax
from jax.experimental import pallas as pl
from jax.experimental.pallas import tpu as pltpu


def _round_up(x, m):
    return ((x + m - 1) // m) * m


def _layernorm_ch(x, w, b, eps):
    # torch LayerNorm over the channel dim; x: (C, T), w/b: (C, 1); biased var.
    mu = jnp.mean(x, axis=0, keepdims=True)
    var = jnp.mean((x - mu) ** 2, axis=0, keepdims=True)
    return (x - mu) * lax.rsqrt(var + eps) * w + b


# --------------------------- fused forward kernel ---------------------------

def make_fused_kernel(*, num_layers, num_heads, channels, kv_size, n_valid,
                      npad, batch_per_block, vis):
    C = channels
    H = num_heads
    L = num_layers
    BPB = batch_per_block
    total = BPB * npad

    inv_heads = 1.0 / H
    # InstanceNorm(scores / sqrt(KV), eps=1e-5) == InstanceNorm(scores, 1e-5*KV)
    in_eps = 1e-5 * kv_size
    inv_cc = 1.0 / (C * C)
    g_c0 = 0.7978845608028654   # sqrt(2/pi)
    g_c1 = 0.044715

    def kernel(x_ref, pos_ref,
               alnw_ref, alnb_ref, wqkv_ref, wo_ref,
               flnw_ref, flnb_ref, w1_ref, b1_ref, w2_ref, b2_ref,
               elnw_ref, elnb_ref, cw_ref, cb_ref, bns_ref, bnb_ref,
               out_ref, *maybe_probs_ref):
        probs_ref = maybe_probs_ref[0] if vis else None

        x = x_ref[0]                                        # (C, total) original en1

        # lane mask for real tokens (per folded batch chunk): padded columns must
        # not leak into the N-contraction producing channel-attention scores.
        lane = lax.broadcasted_iota(jnp.int32, (1, total), 1)
        if npad & (npad - 1) == 0:
            local = jnp.bitwise_and(lane, npad - 1)
        else:
            local = lane % npad
        mask = (local < n_valid).astype(jnp.float32)        # (1, total)

        emb = x + pos_ref[...]                              # Channel_Embeddings (dropout=id)

        for l in range(L):                                  # static unroll
            # ---- Block_ViT attention half: LN -> Attention_org -> residual ----
            h_in = _layernorm_ch(emb, alnw_ref[l], alnb_ref[l], 1e-6) * mask

            # fused Q/K/V for all heads; cast to bf16 ONCE.
            # rows = [q_0..q_{H-1}, k_0.., v_0..]  -> (3*H*C, total)
            qkv = jnp.dot(wqkv_ref[l], h_in.astype(jnp.bfloat16),
                          preferred_element_type=jnp.float32).astype(jnp.bfloat16)

            ctx_chunks = []
            for b in range(BPB):                            # static unroll
                lo = b * npad
                p_list = []
                pacc = None
                for hh in range(H):                         # static unroll
                    q = qkv[hh * C:(hh + 1) * C, lo:lo + npad]
                    k = qkv[(H + hh) * C:(H + hh + 1) * C, lo:lo + npad]

                    # scores[cq, ck] = sum_n q[cq, n] * k[ck, n]  (== Q^T @ K in torch)
                    s = lax.dot_general(q, k, (((1,), (1,)), ((), ())),
                                        preferred_element_type=jnp.float32)  # (C, C)

                    # InstanceNorm2d(num_heads), affine=False: normalize whole
                    # (C, C) map per (batch, head), biased var; eps folds sqrt(KV).
                    rsum = jnp.sum(s, axis=1, keepdims=True)
                    mu = jnp.sum(rsum, axis=0, keepdims=True) * inv_cc       # (1, 1)
                    sq = (s - mu) ** 2
                    rsq = jnp.sum(sq, axis=1, keepdims=True)
                    var = jnp.sum(rsq, axis=0, keepdims=True) * inv_cc       # (1, 1)
                    sn = (s - mu) * lax.rsqrt(var + in_eps)

                    # softmax over last dim (dim=3 in torch), exact division
                    sn = sn - jnp.max(sn, axis=-1, keepdims=True)
                    e = jnp.exp(sn)
                    p = e / jnp.sum(e, axis=-1, keepdims=True)               # (C, C)
                    p_list.append(p)
                    if vis:
                        pacc = p if pacc is None else pacc + p

                if vis:
                    # vis=True weights: mean of softmax probs over heads
                    probs_ref[b, l * C:(l + 1) * C, :] = pacc * inv_heads

                # fused per-head context: concat probs along lanes -> (C, H*C),
                # single dot against stacked V rows (H*C, npad).
                p_cat = (p_list[0] if H == 1
                         else jnp.concatenate(p_list, axis=1)).astype(jnp.bfloat16)
                v_stack = qkv[2 * H * C:3 * H * C, lo:lo + npad]             # (H*C, npad)
                ctx_chunks.append(jnp.dot(p_cat, v_stack,
                                          preferred_element_type=jnp.float32))

            ctx = (ctx_chunks[0] if BPB == 1
                   else jnp.concatenate(ctx_chunks, axis=1))                 # (C, total)

            # out1 (no bias); wo pre-scaled by 1/H (mean over heads folded in)
            o = jnp.dot(wo_ref[l], ctx.astype(jnp.bfloat16),
                        preferred_element_type=jnp.float32)                  # (C, total)
            emb = emb + o                                                    # residual

            # ---- Block_ViT FFN half: LN -> fc1 -> GELU -> fc2 -> residual ----
            y = _layernorm_ch(emb, flnw_ref[l], flnb_ref[l], 1e-6)
            h1 = jnp.dot(w1_ref[l], y.astype(jnp.bfloat16),
                         preferred_element_type=jnp.float32) + b1_ref[l]     # (4C, total)
            # tanh-approx GELU (EUP); use lax.erf for exact torch parity.
            h1 = 0.5 * h1 * (1.0 + jnp.tanh(g_c0 * (h1 + g_c1 * h1 * h1 * h1)))
            o2 = jnp.dot(w2_ref[l], h1.astype(jnp.bfloat16),
                         preferred_element_type=jnp.float32) + b2_ref[l]     # (C, total)
            emb = emb + o2                                                   # residual

        # ---- encoder_norm1 -> Reconstruct (1x1 conv + eval BN + ReLU) + en1 ----
        y = _layernorm_ch(emb, elnw_ref[...], elnb_ref[...], 1e-6)
        conv = jnp.dot(cw_ref[...], y.astype(jnp.bfloat16),
                       preferred_element_type=jnp.float32) + cb_ref[...]
        bn = conv * bns_ref[...] + bnb_ref[...]
        out_ref[0] = jnp.maximum(bn, 0.0) + x

    return kernel


# ------------------------------ pallas wrapper -------------------------------

def _const_spec(shape):
    nd = len(shape)
    return pl.BlockSpec(shape, lambda g, _nd=nd: (0,) * _nd)


def _default_batch_per_block(B):
    # v7x has 2 TensorCores/chip: keep grid=(B,) so 'parallel' shards batches
    # across cores.  Single-TC v5e/v6e: fold the batch into lanes (grid=(1,)).
    try:
        kind = jax.devices()[0].device_kind.lower()
    except Exception:
        kind = ""
    if "v7" in kind and B > 1:
        return 1
    return B


def channel_transformer_forward(en1, kp, *, num_layers, num_heads, vis=True,
                                batch_per_block=None):
    """en1: NCHW (B, C, 17, 12). Returns (x1 NCHW, [per-layer (B, C, C) weights])."""
    B, C, Hh, Ww = en1.shape
    N = Hh * Ww
    Npad = kp["pos_emb"].shape[1]
    L = num_layers
    Ch4 = kp["w1"].shape[1]         # 4*C
    QKV = kp["wqkv"].shape[1]       # 3*H*C

    if batch_per_block is None:
        batch_per_block = _default_batch_per_block(B)
    bpb = max(1, min(int(batch_per_block), B))
    while B % bpb != 0:
        bpb -= 1
    nblk = B // bpb
    total = bpb * Npad

    # torch flatten(2); no transpose needed in channels-first/tokens-last layout.
    x_cn = en1.reshape(B, C, N)
    x_pad = jnp.pad(x_cn, ((0, 0), (0, 0), (0, Npad - N)))
    x_fold = (x_pad.reshape(nblk, bpb, C, Npad)
              .transpose(0, 2, 1, 3).reshape(nblk, C, total))
    pos_fold = jnp.tile(kp["pos_emb"], (1, bpb))             # (C, total)

    kernel = make_fused_kernel(num_layers=L, num_heads=num_heads, channels=C,
                               kv_size=C, n_valid=N, npad=Npad,
                               batch_per_block=bpb, vis=vis)

    out_shapes = [jax.ShapeDtypeStruct((nblk, C, total), jnp.float32)]
    out_specs = [pl.BlockSpec((1, C, total), lambda g: (g, 0, 0))]
    if vis:
        out_shapes.append(jax.ShapeDtypeStruct((B, L * C, C), jnp.float32))
        out_specs.append(pl.BlockSpec((bpb, L * C, C), lambda g: (g, 0, 0)))

    results = pl.pallas_call(
        kernel,
        out_shape=tuple(out_shapes),
        grid=(nblk,),
        in_specs=[
            pl.BlockSpec((1, C, total), lambda g: (g, 0, 0)),
            _const_spec((C, total)),
            _const_spec((L, C, 1)), _const_spec((L, C, 1)),
            _const_spec((L, QKV, C)), _const_spec((L, C, C)),
            _const_spec((L, C, 1)), _const_spec((L, C, 1)),
            _const_spec((L, Ch4, C)), _const_spec((L, Ch4, 1)),
            _const_spec((L, C, Ch4)), _const_spec((L, C, 1)),
            _const_spec((C, 1)), _const_spec((C, 1)),
            _const_spec((C, C)), _const_spec((C, 1)),
            _const_spec((C, 1)), _const_spec((C, 1)),
        ],
        out_specs=tuple(out_specs),
        compiler_params=pltpu.CompilerParams(dimension_semantics=("parallel",)),
    )(x_fold, pos_fold,
      kp["attn_ln_w"], kp["attn_ln_b"], kp["wqkv"], kp["wo"],
      kp["ffn_ln_w"], kp["ffn_ln_b"], kp["w1"], kp["b1"], kp["w2"], kp["b2"],
      kp["enc_ln_w"], kp["enc_ln_b"], kp["conv_w"], kp["conv_b"],
      kp["bn_scale"], kp["bn_shift"])

    out_fold = results[0]
    out_pad = (out_fold.reshape(nblk, C, bpb, Npad)
               .transpose(0, 2, 1, 3).reshape(B, C, Npad))
    x1 = out_pad[:, :, :N].reshape(B, C, Hh, Ww)

    if vis:
        probs = results[1]
        attn_weights = [probs[:, l * C:(l + 1) * C, :] for l in range(L)]
    else:
        attn_weights = []
    return x1, attn_weights


# ------------------------------ parameter prep -------------------------------

def init_params(key, C, num_layers, num_heads, n_patches):
    """Torch-layout reference parameters."""
    def uni(k, shape, fan_in):
        b = 1.0 / math.sqrt(fan_in)
        return jax.random.uniform(k, shape, jnp.float32, -b, b)

    keys = jax.random.split(key, num_layers * 8 + 4)
    ki = iter(keys)
    layers = []
    for _ in range(num_layers):
        layers.append(dict(
            attn_ln_w=jnp.ones((C,), jnp.float32),
            attn_ln_b=jnp.zeros((C,), jnp.float32),
            wq=uni(next(ki), (num_heads, C, C), C),
            wk=uni(next(ki), (num_heads, C, C), C),
            wv=uni(next(ki), (num_heads, C, C), C),
            wo=uni(next(ki), (C, C), C),
            ffn_ln_w=jnp.ones((C,), jnp.float32),
            ffn_ln_b=jnp.zeros((C,), jnp.float32),
            w1=uni(next(ki), (4 * C, C), C),
            b1=1e-6 * jax.random.normal(next(ki), (4 * C,), jnp.float32),
            w2=uni(next(ki), (C, 4 * C), 4 * C),
            b2=1e-6 * jax.random.normal(next(ki), (C,), jnp.float32),
        ))
    return dict(
        pos_emb=jnp.zeros((1, n_patches, C), jnp.float32),   # torch: zeros init
        layers=layers,
        enc_ln_w=jnp.ones((C,), jnp.float32),
        enc_ln_b=jnp.zeros((C,), jnp.float32),
        conv_w=uni(next(ki), (C, C), C),                     # 1x1 Conv2d (Cout, Cin)
        conv_b=uni(next(ki), (C,), C),
        bn_gamma=jnp.ones((C,), jnp.float32),
        bn_beta=jnp.zeros((C,), jnp.float32),
        bn_mean=jnp.zeros((C,), jnp.float32),                # eval running stats
        bn_var=jnp.ones((C,), jnp.float32),
    )


def prepare_kernel_params(params, n_pad):
    """Convert torch-layout params to fused / channels-first kernel params."""
    layers = params["layers"]
    H, C, _ = layers[0]["wq"].shape
    inv_h = 1.0 / H

    col = lambda v: v[:, None]                               # (D,) -> (D, 1)
    stack_col = lambda key: jnp.stack([col(ly[key]) for ly in layers])

    # fused Q/K/V weights for all heads: rows = [q_0..q_{H-1}, k_0.., v_0..]
    wqkv = jnp.stack([
        jnp.concatenate([ly["wq"].reshape(H * C, C),
                         ly["wk"].reshape(H * C, C),
                         ly["wv"].reshape(H * C, C)], axis=0)
        for ly in layers]).astype(jnp.bfloat16)              # (L, 3*H*C, C)

    pos = jnp.transpose(params["pos_emb"][0], (1, 0))        # (C, N) channels-first
    pos = jnp.pad(pos, ((0, 0), (0, n_pad - pos.shape[1])))

    bn_eps = 1e-5
    bn_scale = params["bn_gamma"] * lax.rsqrt(params["bn_var"] + bn_eps)
    bn_shift = params["bn_beta"] - params["bn_mean"] * bn_scale

    return dict(
        pos_emb=pos,
        attn_ln_w=stack_col("attn_ln_w"), attn_ln_b=stack_col("attn_ln_b"),
        wqkv=wqkv,
        # fold the mean-over-heads of the context into out1's weight (exact)
        wo=jnp.stack([ly["wo"] * inv_h for ly in layers]).astype(jnp.bfloat16),
        ffn_ln_w=stack_col("ffn_ln_w"), ffn_ln_b=stack_col("ffn_ln_b"),
        w1=jnp.stack([ly["w1"] for ly in layers]).astype(jnp.bfloat16),
        b1=stack_col("b1"),
        w2=jnp.stack([ly["w2"] for ly in layers]).astype(jnp.bfloat16),
        b2=stack_col("b2"),
        enc_ln_w=col(params["enc_ln_w"]), enc_ln_b=col(params["enc_ln_b"]),
        conv_w=params["conv_w"].astype(jnp.bfloat16),
        conv_b=col(params["conv_b"]),
        bn_scale=col(bn_scale), bn_shift=col(bn_shift),
    )


# ----------------------------------- main ------------------------------------

if __name__ == "__main__":
    key = jax.random.PRNGKey(0)
    k_in, k_p = jax.random.split(key)

    # Reconstruct hardcodes h=17, w=12, so img_size must be (17, 12).
    B, C, Hh, Ww = 2, 32, 17, 12
    num_layers, num_heads = 2, 2
    N = Hh * Ww
    Npad = _round_up(N, 128)                                 # 204 -> 256 lanes

    en1 = jax.random.normal(k_in, (B, C, Hh, Ww), jnp.float32)
    params = init_params(k_p, C, num_layers, num_heads, N)
    kparams = prepare_kernel_params(params, Npad)

    fwd = jax.jit(functools.partial(channel_transformer_forward,
                                    num_layers=num_layers, num_heads=num_heads,
                                    vis=True))
    x1, attn_weights = fwd(en1, kparams)

    jax.block_until_ready(x1)
    for w in attn_weights:
        jax.block_until_ready(w)

    assert x1.shape == (B, C, Hh, Ww)
    assert len(attn_weights) == num_layers
    assert all(w.shape == (B, C, C) for w in attn_weights)
    assert bool(jnp.all(jnp.isfinite(x1)))
    # vis weights are mean-over-heads of softmax rows -> each row sums to ~1.
    assert bool(jnp.allclose(jnp.sum(attn_weights[0], axis=-1), 1.0, atol=1e-3))
    print("KERNEL_OK")
</pallas_src>

<mosaic_0001>
module attributes {stable_mosaic.version = 11 : i64} {
  func.func @kernel(%arg0: i32, %arg1: memref<1x32x512xf32, #tpu.memory_space<vmem>>, %arg2: memref<32x512xf32, #tpu.memory_space<vmem>>, %arg3: memref<2x32x1xf32, #tpu.memory_space<vmem>>, %arg4: memref<2x32x1xf32, #tpu.memory_space<vmem>>, %arg5: memref<2x192x32xbf16, #tpu.memory_space<vmem>>, %arg6: memref<2x32x32xbf16, #tpu.memory_space<vmem>>, %arg7: memref<2x32x1xf32, #tpu.memory_space<vmem>>, %arg8: memref<2x32x1xf32, #tpu.memory_space<vmem>>, %arg9: memref<2x128x32xbf16, #tpu.memory_space<vmem>>, %arg10: memref<2x128x1xf32, #tpu.memory_space<vmem>>, %arg11: memref<2x32x128xbf16, #tpu.memory_space<vmem>>, %arg12: memref<2x32x1xf32, #tpu.memory_space<vmem>>, %arg13: memref<32x1xf32, #tpu.memory_space<vmem>>, %arg14: memref<32x1xf32, #tpu.memory_space<vmem>>, %arg15: memref<32x32xbf16, #tpu.memory_space<vmem>>, %arg16: memref<32x1xf32, #tpu.memory_space<vmem>>, %arg17: memref<32x1xf32, #tpu.memory_space<vmem>>, %arg18: memref<32x1xf32, #tpu.memory_space<vmem>>, %arg19: memref<1x32x512xf32, #tpu.memory_space<vmem>>, %arg20: memref<2x64x32xf32, #tpu.memory_space<vmem>>) attributes {dimension_semantics = [#tpu.dimension_semantics<parallel>], iteration_bounds = array<i64: 1>, scalar_prefetch = 0 : i64, scratch_operands = 0 : i64, tpu.core_type = #tpu.core_type<tc>, window_params = [{transform_indices = @transform_0, window_bounds = array<i64: 1, 32, 512>}, {pipeline_mode = #tpu.pipeline_mode<synchronous>, transform_indices = @transform_1, window_bounds = array<i64: 32, 512>}, {pipeline_mode = #tpu.pipeline_mode<synchronous>, transform_indices = @transform_2, window_bounds = array<i64: 2, 32, 1>}, {pipeline_mode = #tpu.pipeline_mode<synchronous>, transform_indices = @transform_3, window_bounds = array<i64: 2, 32, 1>}, {pipeline_mode = #tpu.pipeline_mode<synchronous>, transform_indices = @transform_4, window_bounds = array<i64: 2, 192, 32>}, {pipeline_mode = #tpu.pipeline_mode<synchronous>, transform_indices = @transform_5, window_bounds = array<i64: 2, 32, 32>}, {pipeline_mode = #tpu.pipeline_mode<synchronous>, transform_indices = @transform_6, window_bounds = array<i64: 2, 32, 1>}, {pipeline_mode = #tpu.pipeline_mode<synchronous>, transform_indices = @transform_7, window_bounds = array<i64: 2, 32, 1>}, {pipeline_mode = #tpu.pipeline_mode<synchronous>, transform_indices = @transform_8, window_bounds = array<i64: 2, 128, 32>}, {pipeline_mode = #tpu.pipeline_mode<synchronous>, transform_indices = @transform_9, window_bounds = array<i64: 2, 128, 1>}, {pipeline_mode = #tpu.pipeline_mode<synchronous>, transform_indices = @transform_10, window_bounds = array<i64: 2, 32, 128>}, {pipeline_mode = #tpu.pipeline_mode<synchronous>, transform_indices = @transform_11, window_bounds = array<i64: 2, 32, 1>}, {pipeline_mode = #tpu.pipeline_mode<synchronous>, transform_indices = @transform_12, window_bounds = array<i64: 32, 1>}, {pipeline_mode = #tpu.pipeline_mode<synchronous>, transform_indices = @transform_13, window_bounds = array<i64: 32, 1>}, {pipeline_mode = #tpu.pipeline_mode<synchronous>, transform_indices = @transform_14, window_bounds = array<i64: 32, 32>}, {pipeline_mode = #tpu.pipeline_mode<synchronous>, transform_indices = @transform_15, window_bounds = array<i64: 32, 1>}, {pipeline_mode = #tpu.pipeline_mode<synchronous>, transform_indices = @transform_16, window_bounds = array<i64: 32, 1>}, {pipeline_mode = #tpu.pipeline_mode<synchronous>, transform_indices = @transform_17, window_bounds = array<i64: 32, 1>}, {transform_indices = @transform_18, window_bounds = array<i64: 1, 32, 512>}, {transform_indices = @transform_19, window_bounds = array<i64: 2, 64, 32>}]} {
    %c0 = arith.constant 0 : index
    %c0_0 = arith.constant 0 : index
    %c0_1 = arith.constant 0 : index
    %0 = vector.load %arg1[%c0, %c0_0, %c0_1] : memref<1x32x512xf32, #tpu.memory_space<vmem>>, vector<1x32x512xf32>
    %1 = vector.shape_cast %0 : vector<1x32x512xf32> to vector<32x512xf32>
    %2 = tpu.iota {dimensions = array<i32: 1>} : vector<1x512xi32>
    %c255_i32 = arith.constant 255 : i32
    %3 = vector.broadcast %c255_i32 : i32 to vector<1x512xi32>
    %4 = arith.andi %2, %3 : vector<1x512xi32>
    %c204_i32 = arith.constant 204 : i32
    %5 = vector.broadcast %c204_i32 : i32 to vector<1x512xi32>
    %6 = arith.cmpi slt, %4, %5 : vector<1x512xi32>
    %7 = arith.extui %6 : vector<1x512xi1> to vector<1x512xi32>
    %8 = arith.sitofp %7 : vector<1x512xi32> to vector<1x512xf32>
    %c0_2 = arith.constant 0 : index
    %c0_3 = arith.constant 0 : index
    %9 = vector.load %arg2[%c0_2, %c0_3] : memref<32x512xf32, #tpu.memory_space<vmem>>, vector<32x512xf32>
    %10 = arith.addf %1, %9 : vector<32x512xf32>
    %c0_4 = arith.constant 0 : index
    %c0_5 = arith.constant 0 : index
    %c0_6 = arith.constant 0 : index
    %11 = vector.load %arg3[%c0_4, %c0_5, %c0_6] : memref<2x32x1xf32, #tpu.memory_space<vmem>>, vector<1x32x1xf32>
    %12 = vector.shape_cast %11 : vector<1x32x1xf32> to vector<32x1xf32>
    %c0_7 = arith.constant 0 : index
    %c0_8 = arith.constant 0 : index
    %c0_9 = arith.constant 0 : index
    %13 = vector.load %arg4[%c0_7, %c0_8, %c0_9] : memref<2x32x1xf32, #tpu.memory_space<vmem>>, vector<1x32x1xf32>
    %14 = vector.shape_cast %13 : vector<1x32x1xf32> to vector<32x1xf32>
    %cst = arith.constant dense<0.000000e+00> : vector<512xf32>
    %15 = vector.multi_reduction <add>, %10, %cst [0] : vector<32x512xf32> to vector<512xf32>
    %16 = vector.shape_cast %15 : vector<512xf32> to vector<1x512xf32>
    %cst_10 = arith.constant 3.200000e+01 : f32
    %17 = vector.broadcast %cst_10 : f32 to vector<1x512xf32>
    %18 = arith.divf %16, %17 : vector<1x512xf32>
    %19 = vector.broadcast %18 : vector<1x512xf32> to vector<32x512xf32>
    %20 = arith.subf %10, %19 : vector<32x512xf32>
    %21 = arith.mulf %20, %20 : vector<32x512xf32>
    %cst_11 = arith.constant dense<0.000000e+00> : vector<512xf32>
    %22 = vector.multi_reduction <add>, %21, %cst_11 [0] : vector<32x512xf32> to vector<512xf32>
    %23 = vector.shape_cast %22 : vector<512xf32> to vector<1x512xf32>
    %cst_12 = arith.constant 3.200000e+01 : f32
    %24 = vector.broadcast %cst_12 : f32 to vector<1x512xf32>
    %25 = arith.divf %23, %24 : vector<1x512xf32>
    %26 = vector.broadcast %18 : vector<1x512xf32> to vector<32x512xf32>
    %27 = arith.subf %10, %26 : vector<32x512xf32>
    %cst_13 = arith.constant 9.99999997E-7 : f32
    %28 = vector.broadcast %cst_13 : f32 to vector<1x512xf32>
    %29 = arith.addf %25, %28 : vector<1x512xf32>
    %30 = math.rsqrt %29 : vector<1x512xf32>
    %31 = vector.broadcast %30 : vector<1x512xf32> to vector<32x512xf32>
    %32 = arith.mulf %27, %31 : vector<32x512xf32>
    %33 = vector.broadcast %12 : vector<32x1xf32> to vector<32x512xf32>
    %34 = arith.mulf %32, %33 : vector<32x512xf32>
    %35 = vector.broadcast %14 : vector<32x1xf32> to vector<32x512xf32>
    %36 = arith.addf %34, %35 : vector<32x512xf32>
    %37 = vector.broadcast %8 : vector<1x512xf32> to vector<32x512xf32>
    %38 = arith.mulf %36, %37 : vector<32x512xf32>
    %c0_14 = arith.constant 0 : index
    %c0_15 = arith.constant 0 : index
    %c0_16 = arith.constant 0 : index
    %39 = vector.load %arg5[%c0_14, %c0_15, %c0_16] : memref<2x192x32xbf16, #tpu.memory_space<vmem>>, vector<1x192x32xbf16>
    %40 = vector.shape_cast %39 : vector<1x192x32xbf16> to vector<192x32xbf16>
    %41 = arith.truncf %38 : vector<32x512xf32> to vector<32x512xbf16>
    %cst_17 = arith.constant dense<0.000000e+00> : vector<192x512xf32>
    %42 = tpu.matmul %40, %41, %cst_17 {dimension_numbers = #tpu.dot_dimension_numbers<[1], [0], [0], [1], [0, 0, 1, 1], [], []>} : vector<192x32xbf16>, vector<32x512xbf16>, vector<192x512xf32> -> vector<192x512xf32>
    %43 = arith.truncf %42 : vector<192x512xf32> to vector<192x512xbf16>
    %44 = vector.extract_strided_slice %43 {offsets = [0, 0], sizes = [32, 256], strides = [1, 1]} : vector<192x512xbf16> to vector<32x256xbf16>
    %45 = vector.extract_strided_slice %43 {offsets = [64, 0], sizes = [32, 256], strides = [1, 1]} : vector<192x512xbf16> to vector<32x256xbf16>
    %cst_18 = arith.constant dense<0.000000e+00> : vector<32x32xf32>
    %46 = tpu.matmul %44, %45, %cst_18 {dimension_numbers = #tpu.dot_dimension_numbers<[1], [1], [0], [0], [0, 0, 1, 0], [], []>} : vector<32x256xbf16>, vector<32x256xbf16>, vector<32x32xf32> -> vector<32x32xf32>
    %cst_19 = arith.constant dense<0.000000e+00> : vector<32xf32>
    %47 = vector.multi_reduction <add>, %46, %cst_19 [1] : vector<32x32xf32> to vector<32xf32>
    %48 = vector.shape_cast %47 : vector<32xf32> to vector<32x1xf32>
    %cst_20 = arith.constant dense<0.000000e+00> : vector<1xf32>
    %49 = vector.multi_reduction <add>, %48, %cst_20 [0] : vector<32x1xf32> to vector<1xf32>
    %50 = vector.shape_cast %49 : vector<1xf32> to vector<1x1xf32>
    %cst_21 = arith.constant 9.765625E-4 : f32
    %51 = vector.broadcast %cst_21 : f32 to vector<1x1xf32>
    %52 = arith.mulf %50, %51 : vector<1x1xf32>
    %53 = vector.broadcast %52 : vector<1x1xf32> to vector<32x32xf32>
    %54 = arith.subf %46, %53 : vector<32x32xf32>
    %55 = arith.mulf %54, %54 : vector<32x32xf32>
    %cst_22 = arith.constant dense<0.000000e+00> : vector<32xf32>
    %56 = vector.multi_reduction <add>, %55, %cst_22 [1] : vector<32x32xf32> to vector<32xf32>
    %57 = vector.shape_cast %56 : vector<32xf32> to vector<32x1xf32>
    %cst_23 = arith.constant dense<0.000000e+00> : vector<1xf32>
    %58 = vector.multi_reduction <add>, %57, %cst_23 [0] : vector<32x1xf32> to vector<1xf32>
    %59 = vector.shape_cast %58 : vector<1xf32> to vector<1x1xf32>
    %cst_24 = arith.constant 9.765625E-4 : f32
    %60 = vector.broadcast %cst_24 : f32 to vector<1x1xf32>
    %61 = arith.mulf %59, %60 : vector<1x1xf32>
    %62 = vector.broadcast %52 : vector<1x1xf32> to vector<32x32xf32>
    %63 = arith.subf %46, %62 : vector<32x32xf32>
    %cst_25 = arith.constant 3.200000e-04 : f32
    %64 = vector.broadcast %cst_25 : f32 to vector<1x1xf32>
    %65 = arith.addf %61, %64 : vector<1x1xf32>
    %66 = math.rsqrt %65 : vector<1x1xf32>
    %67 = vector.broadcast %66 : vector<1x1xf32> to vector<32x32xf32>
    %68 = arith.mulf %63, %67 : vector<32x32xf32>
    %cst_26 = arith.constant dense<0xFF800000> : vector<32xf32>
    %69 = vector.multi_reduction <maximumf>, %68, %cst_26 [1] : vector<32x32xf32> to vector<32xf32>
    %70 = vector.shape_cast %69 : vector<32xf32> to vector<32x1xf32>
    %71 = vector.broadcast %70 : vector<32x1xf32> to vector<32x32xf32>
    %72 = arith.subf %68, %71 : vector<32x32xf32>
    %73 = math.exp %72 : vector<32x32xf32>
    %cst_27 = arith.constant dense<0.000000e+00> : vector<32xf32>
    %74 = vector.multi_reduction <add>, %73, %cst_27 [1] : vector<32x32xf32> to vector<32xf32>
    %75 = vector.shape_cast %74 : vector<32xf32> to vector<32x1xf32>
    %76 = vector.broadcast %75 : vector<32x1xf32> to vector<32x32xf32>
    %77 = arith.divf %73, %76 : vector<32x32xf32>
    %78 = vector.extract_strided_slice %43 {offsets = [32, 0], sizes = [32, 256], strides = [1, 1]} : vector<192x512xbf16> to vector<32x256xbf16>
    %79 = vector.extract_strided_slice %43 {offsets = [96, 0], sizes = [32, 256], strides = [1, 1]} : vector<192x512xbf16> to vector<32x256xbf16>
    %cst_28 = arith.constant dense<0.000000e+00> : vector<32x32xf32>
    %80 = tpu.matmul %78, %79, %cst_28 {dimension_numbers = #tpu.dot_dimension_numbers<[1], [1], [0], [0], [0, 0, 1, 0], [], []>} : vector<32x256xbf16>, vector<32x256xbf16>, vector<32x32xf32> -> vector<32x32xf32>
    %cst_29 = arith.constant dense<0.000000e+00> : vector<32xf32>
    %81 = vector.multi_reduction <add>, %80, %cst_29 [1] : vector<32x32xf32> to vector<32xf32>
    %82 = vector.shape_cast %81 : vector<32xf32> to vector<32x1xf32>
    %cst_30 = arith.constant dense<0.000000e+00> : vector<1xf32>
    %83 = vector.multi_reduction <add>, %82, %cst_30 [0] : vector<32x1xf32> to vector<1xf32>
    %84 = vector.shape_cast %83 : vector<1xf32> to vector<1x1xf32>
    %cst_31 = arith.constant 9.765625E-4 : f32
    %85 = vector.broadcast %cst_31 : f32 to vector<1x1xf32>
    %86 = arith.mulf %84, %85 : vector<1x1xf32>
    %87 = vector.broadcast %86 : vector<1x1xf32> to vector<32x32xf32>
    %88 = arith.subf %80, %87 : vector<32x32xf32>
    %89 = arith.mulf %88, %88 : vector<32x32xf32>
    %cst_32 = arith.constant dense<0.000000e+00> : vector<32xf32>
    %90 = vector.multi_reduction <add>, %89, %cst_32 [1] : vector<32x32xf32> to vector<32xf32>
    %91 = vector.shape_cast %90 : vector<32xf32> to vector<32x1xf32>
    %cst_33 = arith.constant dense<0.000000e+00> : vector<1xf32>
    %92 = vector.multi_reduction <add>, %91, %cst_33 [0] : vector<32x1xf32> to vector<1xf32>
    %93 = vector.shape_cast %92 : vector<1xf32> to vector<1x1xf32>
    %cst_34 = arith.constant 9.765625E-4 : f32
    %94 = vector.broadcast %cst_34 : f32 to vector<1x1xf32>
    %95 = arith.mulf %93, %94 : vector<1x1xf32>
    %96 = vector.broadcast %86 : vector<1x1xf32> to vector<32x32xf32>
    %97 = arith.subf %80, %96 : vector<32x32xf32>
    %cst_35 = arith.constant 3.200000e-04 : f32
    %98 = vector.broadcast %cst_35 : f32 to vector<1x1xf32>
    %99 = arith.addf %95, %98 : vector<1x1xf32>
    %100 = math.rsqrt %99 : vector<1x1xf32>
    %101 = vector.broadcast %100 : vector<1x1xf32> to vector<32x32xf32>
    %102 = arith.mulf %97, %101 : vector<32x32xf32>
    %cst_36 = arith.constant dense<0xFF800000> : vector<32xf32>
    %103 = vector.multi_reduction <maximumf>, %102, %cst_36 [1] : vector<32x32xf32> to vector<32xf32>
    %104 = vector.shape_cast %103 : vector<32xf32> to vector<32x1xf32>
    %105 = vector.broadcast %104 : vector<32x1xf32> to vector<32x32xf32>
    %106 = arith.subf %102, %105 : vector<32x32xf32>
    %107 = math.exp %106 : vector<32x32xf32>
    %cst_37 = arith.constant dense<0.000000e+00> : vector<32xf32>
    %108 = vector.multi_reduction <add>, %107, %cst_37 [1] : vector<32x32xf32> to vector<32xf32>
    %109 = vector.shape_cast %108 : vector<32xf32> to vector<32x1xf32>
    %110 = vector.broadcast %109 : vector<32x1xf32> to vector<32x32xf32>
    %111 = arith.divf %107, %110 : vector<32x32xf32>
    %112 = arith.addf %77, %111 : vector<32x32xf32>
    %cst_38 = arith.constant 5.000000e-01 : f32
    %113 = vector.broadcast %cst_38 : f32 to vector<32x32xf32>
    %114 = arith.mulf %112, %113 : vector<32x32xf32>
    %c0_39 = arith.constant 0 : index
    %c0_40 = arith.constant 0 : index
    %c0_41 = arith.constant 0 : index
    %115 = vector.load %arg20[%c0_39, %c0_40, %c0_41] : memref<2x64x32xf32, #tpu.memory_space<vmem>>, vector<1x32x32xf32>
    %116 = vector.shape_cast %115 : vector<1x32x32xf32> to vector<32x32xf32>
    %117 = vector.shape_cast %114 : vector<32x32xf32> to vector<1x32x32xf32>
    tpu.vector_store %arg20[%c0_39, %c0_40, %c0_41], %117 {strides = array<i32>} : memref<2x64x32xf32, #tpu.memory_space<vmem>>, vector<1x32x32xf32>,
    %118 = tpu.concatenate %77, %111 in 1 : vector<32x32xf32>, vector<32x32xf32> -> vector<32x64xf32>
    %119 = arith.truncf %118 : vector<32x64xf32> to vector<32x64xbf16>
    %120 = vector.extract_strided_slice %43 {offsets = [128, 0], sizes = [64, 256], strides = [1, 1]} : vector<192x512xbf16> to vector<64x256xbf16>
    %cst_42 = arith.constant dense<0.000000e+00> : vector<32x256xf32>
    %121 = tpu.matmul %119, %120, %cst_42 {dimension_numbers = #tpu.dot_dimension_numbers<[1], [0], [0], [1], [0, 0, 1, 1], [], []>} : vector<32x64xbf16>, vector<64x256xbf16>, vector<32x256xf32> -> vector<32x256xf32>
    %122 = vector.extract_strided_slice %43 {offsets = [0, 256], sizes = [32, 256], strides = [1, 1]} : vector<192x512xbf16> to vector<32x256xbf16>
    %123 = vector.extract_strided_slice %43 {offsets = [64, 256], sizes = [32, 256], strides = [1, 1]} : vector<192x512xbf16> to vector<32x256xbf16>
    %cst_43 = arith.constant dense<0.000000e+00> : vector<32x32xf32>
    %124 = tpu.matmul %122, %123, %cst_43 {dimension_numbers = #tpu.dot_dimension_numbers<[1], [1], [0], [0], [0, 0, 1, 0], [], []>} : vector<32x256xbf16>, vector<32x256xbf16>, vector<32x32xf32> -> vector<32x32xf32>
    %cst_44 = arith.constant dense<0.000000e+00> : vector<32xf32>
    %125 = vector.multi_reduction <add>, %124, %cst_44 [1] : vector<32x32xf32> to vector<32xf32>
    %126 = vector.shape_cast %125 : vector<32xf32> to vector<32x1xf32>
    %cst_45 = arith.constant dense<0.000000e+00> : vector<1xf32>
    %127 = vector.multi_reduction <add>, %126, %cst_45 [0] : vector<32x1xf32> to vector<1xf32>
    %128 = vector.shape_cast %127 : vector<1xf32> to vector<1x1xf32>
    %cst_46 = arith.constant 9.765625E-4 : f32
    %129 = vector.broadcast %cst_46 : f32 to vector<1x1xf32>
    %130 = arith.mulf %128, %129 : vector<1x1xf32>
    %131 = vector.broadcast %130 : vector<1x1xf32> to vector<32x32xf32>
    %132 = arith.subf %124, %131 : vector<32x32xf32>
    %133 = arith.mulf %132, %132 : vector<32x32xf32>
    %cst_47 = arith.constant dense<0.000000e+00> : vector<32xf32>
    %134 = vector.multi_reduction <add>, %133, %cst_47 [1] : vector<32x32xf32> to vector<32xf32>
    %135 = vector.shape_cast %134 : vector<32xf32> to vector<32x1xf32>
    %cst_48 = arith.constant dense<0.000000e+00> : vector<1xf32>
    %136 = vector.multi_reduction <add>, %135, %cst_48 [0] : vector<32x1xf32> to vector<1xf32>
    %137 = vector.shape_cast %136 : vector<1xf32> to vector<1x1xf32>
    %cst_49 = arith.constant 9.765625E-4 : f32
    %138 = vector.broadcast %cst_49 : f32 to vector<1x1xf32>
    %139 = arith.mulf %137, %138 : vector<1x1xf32>
    %140 = vector.broadcast %130 : vector<1x1xf32> to vector<32x32xf32>
    %141 = arith.subf %124, %140 : vector<32x32xf32>
    %cst_50 = arith.constant 3.200000e-04 : f32
    %142 = vector.broadcast %cst_50 : f32 to vector<1x1xf32>
    %143 = arith.addf %139, %142 : vector<1x1xf32>
    %144 = math.rsqrt %143 : vector<1x1xf32>
    %145 = vector.broadcast %144 : vector<1x1xf32> to vector<32x32xf32>
    %146 = arith.mulf %141, %145 : vector<32x32xf32>
    %cst_51 = arith.constant dense<0xFF800000> : vector<32xf32>
    %147 = vector.multi_reduction <maximumf>, %146, %cst_51 [1] : vector<32x32xf32> to vector<32xf32>
    %148 = vector.shape_cast %147 : vector<32xf32> to vector<32x1xf32>
    %149 = vector.broadcast %148 : vector<32x1xf32> to vector<32x32xf32>
    %150 = arith.subf %146, %149 : vector<32x32xf32>
    %151 = math.exp %150 : vector<32x32xf32>
    %cst_52 = arith.constant dense<0.000000e+00> : vector<32xf32>
    %152 = vector.multi_reduction <add>, %151, %cst_52 [1] : vector<32x32xf32> to vector<32xf32>
    %153 = vector.shape_cast %152 : vector<32xf32> to vector<32x1xf32>
    %154 = vector.broadcast %153 : vector<32x1xf32> to vector<32x32xf32>
    %155 = arith.divf %151, %154 : vector<32x32xf32>
    %156 = vector.extract_strided_slice %43 {offsets = [32, 256], sizes = [32, 256], strides = [1, 1]} : vector<192x512xbf16> to vector<32x256xbf16>
    %157 = vector.extract_strided_slice %43 {offsets = [96, 256], sizes = [32, 256], strides = [1, 1]} : vector<192x512xbf16> to vector<32x256xbf16>
    %cst_53 = arith.constant dense<0.000000e+00> : vector<32x32xf32>
    %158 = tpu.matmul %156, %157, %cst_53 {dimension_numbers = #tpu.dot_dimension_numbers<[1], [1], [0], [0], [0, 0, 1, 0], [], []>} : vector<32x256xbf16>, vector<32x256xbf16>, vector<32x32xf32> -> vector<32x32xf32>
    %cst_54 = arith.constant dense<0.000000e+00> : vector<32xf32>
    %159 = vector.multi_reduction <add>, %158, %cst_54 [1] : vector<32x32xf32> to vector<32xf32>
    %160 = vector.shape_cast %159 : vector<32xf32> to vector<32x1xf32>
    %cst_55 = arith.constant dense<0.000000e+00> : vector<1xf32>
    %161 = vector.multi_reduction <add>, %160, %cst_55 [0] : vector<32x1xf32> to vector<1xf32>
    %162 = vector.shape_cast %161 : vector<1xf32> to vector<1x1xf32>
    %cst_56 = arith.constant 9.765625E-4 : f32
    %163 = vector.broadcast %cst_56 : f32 to vector<1x1xf32>
    %164 = arith.mulf %162, %163 : vector<1x1xf32>
    %165 = vector.broadcast %164 : vector<1x1xf32> to vector<32x32xf32>
    %166 = arith.subf %158, %165 : vector<32x32xf32>
    %167 = arith.mulf %166, %166 : vector<32x32xf32>
    %cst_57 = arith.constant dense<0.000000e+00> : vector<32xf32>
    %168 = vector.multi_reduction <add>, %167, %cst_57 [1] : vector<32x32xf32> to vector<32xf32>
    %169 = vector.shape_cast %168 : vector<32xf32> to vector<32x1xf32>
    %cst_58 = arith.constant dense<0.000000e+00> : vector<1xf32>
    %170 = vector.multi_reduction <add>, %169, %cst_58 [0] : vector<32x1xf32> to vector<1xf32>
    %171 = vector.shape_cast %170 : vector<1xf32> to vector<1x1xf32>
    %cst_59 = arith.constant 9.765625E-4 : f32
    %172 = vector.broadcast %cst_59 : f32 to vector<1x1xf32>
    %173 = arith.mulf %171, %172 : vector<1x1xf32>
    %174 = vector.broadcast %164 : vector<1x1xf32> to vector<32x32xf32>
    %175 = arith.subf %158, %174 : vector<32x32xf32>
    %cst_60 = arith.constant 3.200000e-04 : f32
    %176 = vector.broadcast %cst_60 : f32 to vector<1x1xf32>
    %177 = arith.addf %173, %176 : vector<1x1xf32>
    %178 = math.rsqrt %177 : vector<1x1xf32>
    %179 = vector.broadcast %178 : vector<1x1xf32> to vector<32x32xf32>
    %180 = arith.mulf %175, %179 : vector<32x32xf32>
    %cst_61 = arith.constant dense<0xFF800000> : vector<32xf32>
    %181 = vector.multi_reduction <maximumf>, %180, %cst_61 [1] : vector<32x32xf32> to vector<32xf32>
    %182 = vector.shape_cast %181 : vector<32xf32> to vector<32x1xf32>
    %183 = vector.broadcast %182 : vector<32x1xf32> to vector<32x32xf32>
    %184 = arith.subf %180, %183 : vector<32x32xf32>
    %185 = math.exp %184 : vector<32x32xf32>
    %cst_62 = arith.constant dense<0.000000e+00> : vector<32xf32>
    %186 = vector.multi_reduction <add>, %185, %cst_62 [1] : vector<32x32xf32> to vector<32xf32>
    %187 = vector.shape_cast %186 : vector<32xf32> to vector<32x1xf32>
    %188 = vector.broadcast %187 : vector<32x1xf32> to vector<32x32xf32>
    %189 = arith.divf %185, %188 : vector<32x32xf32>
    %190 = arith.addf %155, %189 : vector<32x32xf32>
    %cst_63 = arith.constant 5.000000e-01 : f32
    %191 = vector.broadcast %cst_63 : f32 to vector<32x32xf32>
    %192 = arith.mulf %190, %191 : vector<32x32xf32>
    %c1 = arith.constant 1 : index
    %c0_64 = arith.constant 0 : index
    %c0_65 = arith.constant 0 : index
    %193 = vector.load %arg20[%c1, %c0_64, %c0_65] : memref<2x64x32xf32, #tpu.memory_space<vmem>>, vector<1x32x32xf32>
    %194 = vector.shape_cast %193 : vector<1x32x32xf32> to vector<32x32xf32>
    %195 = vector.shape_cast %192 : vector<32x32xf32> to vector<1x32x32xf32>
    tpu.vector_store %arg20[%c1, %c0_64, %c0_65], %195 {strides = array<i32>} : memref<2x64x32xf32, #tpu.memory_space<vmem>>, vector<1x32x32xf32>,
    %196 = tpu.concatenate %155, %189 in 1 : vector<32x32xf32>, vector<32x32xf32> -> vector<32x64xf32>
    %197 = arith.truncf %196 : vector<32x64xf32> to vector<32x64xbf16>
    %198 = vector.extract_strided_slice %43 {offsets = [128, 256], sizes = [64, 256], strides = [1, 1]} : vector<192x512xbf16> to vector<64x256xbf16>
    %cst_66 = arith.constant dense<0.000000e+00> : vector<32x256xf32>
    %199 = tpu.matmul %197, %198, %cst_66 {dimension_numbers = #tpu.dot_dimension_numbers<[1], [0], [0], [1], [0, 0, 1, 1], [], []>} : vector<32x64xbf16>, vector<64x256xbf16>, vector<32x256xf32> -> vector<32x256xf32>
    %200 = tpu.concatenate %121, %199 in 1 : vector<32x256xf32>, vector<32x256xf32> -> vector<32x512xf32>
    %c0_67 = arith.constant 0 : index
    %c0_68 = arith.constant 0 : index
    %c0_69 = arith.constant 0 : index
    %201 = vector.load %arg6[%c0_67, %c0_68, %c0_69] : memref<2x32x32xbf16, #tpu.memory_space<vmem>>, vector<1x32x32xbf16>
    %202 = vector.shape_cast %201 : vector<1x32x32xbf16> to vector<32x32xbf16>
    %203 = arith.truncf %200 : vector<32x512xf32> to vector<32x512xbf16>
    %cst_70 = arith.constant dense<0.000000e+00> : vector<32x512xf32>
    %204 = tpu.matmul %202, %203, %cst_70 {dimension_numbers = #tpu.dot_dimension_numbers<[1], [0], [0], [1], [0, 0, 1, 1], [], []>} : vector<32x32xbf16>, vector<32x512xbf16>, vector<32x512xf32> -> vector<32x512xf32>
    %205 = arith.addf %10, %204 : vector<32x512xf32>
    %c0_71 = arith.constant 0 : index
    %c0_72 = arith.constant 0 : index
    %c0_73 = arith.constant 0 : index
    %206 = vector.load %arg7[%c0_71, %c0_72, %c0_73] : memref<2x32x1xf32, #tpu.memory_space<vmem>>, vector<1x32x1xf32>
    %207 = vector.shape_cast %206 : vector<1x32x1xf32> to vector<32x1xf32>
    %c0_74 = arith.constant 0 : index
    %c0_75 = arith.constant 0 : index
    %c0_76 = arith.constant 0 : index
    %208 = vector.load %arg8[%c0_74, %c0_75, %c0_76] : memref<2x32x1xf32, #tpu.memory_space<vmem>>, vector<1x32x1xf32>
    %209 = vector.shape_cast %208 : vector<1x32x1xf32> to vector<32x1xf32>
    %cst_77 = arith.constant dense<0.000000e+00> : vector<512xf32>
    %210 = vector.multi_reduction <add>, %205, %cst_77 [0] : vector<32x512xf32> to vector<512xf32>
    %211 = vector.shape_cast %210 : vector<512xf32> to vector<1x512xf32>
    %cst_78 = arith.constant 3.200000e+01 : f32
    %212 = vector.broadcast %cst_78 : f32 to vector<1x512xf32>
    %213 = arith.divf %211, %212 : vector<1x512xf32>
    %214 = vector.broadcast %213 : vector<1x512xf32> to vector<32x512xf32>
    %215 = arith.subf %205, %214 : vector<32x512xf32>
    %216 = arith.mulf %215, %215 : vector<32x512xf32>
    %cst_79 = arith.constant dense<0.000000e+00> : vector<512xf32>
    %217 = vector.multi_reduction <add>, %216, %cst_79 [0] : vector<32x512xf32> to vector<512xf32>
    %218 = vector.shape_cast %217 : vector<512xf32> to vector<1x512xf32>
    %cst_80 = arith.constant 3.200000e+01 : f32
    %219 = vector.broadcast %cst_80 : f32 to vector<1x512xf32>
    %220 = arith.divf %218, %219 : vector<1x512xf32>
    %221 = vector.broadcast %213 : vector<1x512xf32> to vector<32x512xf32>
    %222 = arith.subf %205, %221 : vector<32x512xf32>
    %cst_81 = arith.constant 9.99999997E-7 : f32
    %223 = vector.broadcast %cst_81 : f32 to vector<1x512xf32>
    %224 = arith.addf %220, %223 : vector<1x512xf32>
    %225 = math.rsqrt %224 : vector<1x512xf32>
    %226 = vector.broadcast %225 : vector<1x512xf32> to vector<32x512xf32>
    %227 = arith.mulf %222, %226 : vector<32x512xf32>
    %228 = vector.broadcast %207 : vector<32x1xf32> to vector<32x512xf32>
    %229 = arith.mulf %227, %228 : vector<32x512xf32>
    %230 = vector.broadcast %209 : vector<32x1xf32> to vector<32x512xf32>
    %231 = arith.addf %229, %230 : vector<32x512xf32>
    %c0_82 = arith.constant 0 : index
    %c0_83 = arith.constant 0 : index
    %c0_84 = arith.constant 0 : index
    %232 = vector.load %arg9[%c0_82, %c0_83, %c0_84] : memref<2x128x32xbf16, #tpu.memory_space<vmem>>, vector<1x128x32xbf16>
    %233 = vector.shape_cast %232 : vector<1x128x32xbf16> to vector<128x32xbf16>
    %234 = arith.truncf %231 : vector<32x512xf32> to vector<32x512xbf16>
    %cst_85 = arith.constant dense<0.000000e+00> : vector<128x512xf32>
    %235 = tpu.matmul %233, %234, %cst_85 {dimension_numbers = #tpu.dot_dimension_numbers<[1], [0], [0], [1], [0, 0, 1, 1], [], []>} : vector<128x32xbf16>, vector<32x512xbf16>, vector<128x512xf32> -> vector<128x512xf32>
    %c0_86 = arith.constant 0 : index
    %c0_87 = arith.constant 0 : index
    %c0_88 = arith.constant 0 : index
    %236 = vector.load %arg10[%c0_86, %c0_87, %c0_88] : memref<2x128x1xf32, #tpu.memory_space<vmem>>, vector<1x128x1xf32>
    %237 = vector.shape_cast %236 : vector<1x128x1xf32> to vector<128x1xf32>
    %238 = vector.broadcast %237 : vector<128x1xf32> to vector<128x512xf32>
    %239 = arith.addf %235, %238 : vector<128x512xf32>
    %cst_89 = arith.constant 5.000000e-01 : f32
    %240 = vector.broadcast %cst_89 : f32 to vector<128x512xf32>
    %241 = arith.mulf %240, %239 : vector<128x512xf32>
    %cst_90 = arith.constant 4.471500e-02 : f32
    %242 = vector.broadcast %cst_90 : f32 to vector<128x512xf32>
    %243 = arith.mulf %242, %239 : vector<128x512xf32>
    %244 = arith.mulf %243, %239 : vector<128x512xf32>
    %245 = arith.mulf %244, %239 : vector<128x512xf32>
    %246 = arith.addf %239, %245 : vector<128x512xf32>
    %cst_91 = arith.constant 0.797884583 : f32
    %247 = vector.broadcast %cst_91 : f32 to vector<128x512xf32>
    %248 = arith.mulf %247, %246 : vector<128x512xf32>
    %249 = math.tanh %248 : vector<128x512xf32>
    %cst_92 = arith.constant 1.000000e+00 : f32
    %250 = vector.broadcast %cst_92 : f32 to vector<128x512xf32>
    %251 = arith.addf %250, %249 : vector<128x512xf32>
    %252 = arith.mulf %241, %251 : vector<128x512xf32>
    %c0_93 = arith.constant 0 : index
    %c0_94 = arith.constant 0 : index
    %c0_95 = arith.constant 0 : index
    %253 = vector.load %arg11[%c0_93, %c0_94, %c0_95] : memref<2x32x128xbf16, #tpu.memory_space<vmem>>, vector<1x32x128xbf16>
    %254 = vector.shape_cast %253 : vector<1x32x128xbf16> to vector<32x128xbf16>
    %255 = arith.truncf %252 : vector<128x512xf32> to vector<128x512xbf16>
    %cst_96 = arith.constant dense<0.000000e+00> : vector<32x512xf32>
    %256 = tpu.matmul %254, %255, %cst_96 {dimension_numbers = #tpu.dot_dimension_numbers<[1], [0], [0], [1], [0, 0, 1, 1], [], []>} : vector<32x128xbf16>, vector<128x512xbf16>, vector<32x512xf32> -> vector<32x512xf32>
    %c0_97 = arith.constant 0 : index
    %c0_98 = arith.constant 0 : index
    %c0_99 = arith.constant 0 : index
    %257 = vector.load %arg12[%c0_97, %c0_98, %c0_99] : memref<2x32x1xf32, #tpu.memory_space<vmem>>, vector<1x32x1xf32>
    %258 = vector.shape_cast %257 : vector<1x32x1xf32> to vector<32x1xf32>
    %259 = vector.broadcast %258 : vector<32x1xf32> to vector<32x512xf32>
    %260 = arith.addf %256, %259 : vector<32x512xf32>
    %261 = arith.addf %205, %260 : vector<32x512xf32>
    %c1_100 = arith.constant 1 : index
    %c0_101 = arith.constant 0 : index
    %c0_102 = arith.constant 0 : index
    %262 = vector.load %arg3[%c1_100, %c0_101, %c0_102] : memref<2x32x1xf32, #tpu.memory_space<vmem>>, vector<1x32x1xf32>
    %263 = vector.shape_cast %262 : vector<1x32x1xf32> to vector<32x1xf32>
    %c1_103 = arith.constant 1 : index
    %c0_104 = arith.constant 0 : index
    %c0_105 = arith.constant 0 : index
    %264 = vector.load %arg4[%c1_103, %c0_104, %c0_105] : memref<2x32x1xf32, #tpu.memory_space<vmem>>, vector<1x32x1xf32>
    %265 = vector.shape_cast %264 : vector<1x32x1xf32> to vector<32x1xf32>
    %cst_106 = arith.constant dense<0.000000e+00> : vector<512xf32>
    %266 = vector.multi_reduction <add>, %261, %cst_106 [0] : vector<32x512xf32> to vector<512xf32>
    %267 = vector.shape_cast %266 : vector<512xf32> to vector<1x512xf32>
    %cst_107 = arith.constant 3.200000e+01 : f32
    %268 = vector.broadcast %cst_107 : f32 to vector<1x512xf32>
    %269 = arith.divf %267, %268 : vector<1x512xf32>
    %270 = vector.broadcast %269 : vector<1x512xf32> to vector<32x512xf32>
    %271 = arith.subf %261, %270 : vector<32x512xf32>
    %272 = arith.mulf %271, %271 : vector<32x512xf32>
    %cst_108 = arith.constant dense<0.000000e+00> : vector<512xf32>
    %273 = vector.multi_reduction <add>, %272, %cst_108 [0] : vector<32x512xf32> to vector<512xf32>
    %274 = vector.shape_cast %273 : vector<512xf32> to vector<1x512xf32>
    %cst_109 = arith.constant 3.200000e+01 : f32
    %275 = vector.broadcast %cst_109 : f32 to vector<1x512xf32>
    %276 = arith.divf %274, %275 : vector<1x512xf32>
    %277 = vector.broadcast %269 : vector<1x512xf32> to vector<32x512xf32>
    %278 = arith.subf %261, %277 : vector<32x512xf32>
    %cst_110 = arith.constant 9.99999997E-7 : f32
    %279 = vector.broadcast %cst_110 : f32 to vector<1x512xf32>
    %280 = arith.addf %276, %279 : vector<1x512xf32>
    %281 = math.rsqrt %280 : vector<1x512xf32>
    %282 = vector.broadcast %281 : vector<1x512xf32> to vector<32x512xf32>
    %283 = arith.mulf %278, %282 : vector<32x512xf32>
    %284 = vector.broadcast %263 : vector<32x1xf32> to vector<32x512xf32>
    %285 = arith.mulf %283, %284 : vector<32x512xf32>
    %286 = vector.broadcast %265 : vector<32x1xf32> to vector<32x512xf32>
    %287 = arith.addf %285, %286 : vector<32x512xf32>
    %288 = vector.broadcast %8 : vector<1x512xf32> to vector<32x512xf32>
    %289 = arith.mulf %287, %288 : vector<32x512xf32>
    %c1_111 = arith.constant 1 : index
    %c0_112 = arith.constant 0 : index
    %c0_113 = arith.constant 0 : index
    %290 = vector.load %arg5[%c1_111, %c0_112, %c0_113] : memref<2x192x32xbf16, #tpu.memory_space<vmem>>, vector<1x192x32xbf16>
    %291 = vector.shape_cast %290 : vector<1x192x32xbf16> to vector<192x32xbf16>
    %292 = arith.truncf %289 : vector<32x512xf32> to vector<32x512xbf16>
    %cst_114 = arith.constant dense<0.000000e+00> : vector<192x512xf32>
    %293 = tpu.matmul %291, %292, %cst_114 {dimension_numbers = #tpu.dot_dimension_numbers<[1], [0], [0], [1], [0, 0, 1, 1], [], []>} : vector<192x32xbf16>, vector<32x512xbf16>, vector<192x512xf32> -> vector<192x512xf32>
    %294 = arith.truncf %293 : vector<192x512xf32> to vector<192x512xbf16>
    %295 = vector.extract_strided_slice %294 {offsets = [0, 0], sizes = [32, 256], strides = [1, 1]} : vector<192x512xbf16> to vector<32x256xbf16>
    %296 = vector.extract_strided_slice %294 {offsets = [64, 0], sizes = [32, 256], strides = [1, 1]} : vector<192x512xbf16> to vector<32x256xbf16>
    %cst_115 = arith.constant dense<0.000000e+00> : vector<32x32xf32>
    %297 = tpu.matmul %295, %296, %cst_115 {dimension_numbers = #tpu.dot_dimension_numbers<[1], [1], [0], [0], [0, 0, 1, 0], [], []>} : vector<32x256xbf16>, vector<32x256xbf16>, vector<32x32xf32> -> vector<32x32xf32>
    %cst_116 = arith.constant dense<0.000000e+00> : vector<32xf32>
    %298 = vector.multi_reduction <add>, %297, %cst_116 [1] : vector<32x32xf32> to vector<32xf32>
    %299 = vector.shape_cast %298 : vector<32xf32> to vector<32x1xf32>
    %cst_117 = arith.constant dense<0.000000e+00> : vector<1xf32>
    %300 = vector.multi_reduction <add>, %299, %cst_117 [0] : vector<32x1xf32> to vector<1xf32>
    %301 = vector.shape_cast %300 : vector<1xf32> to vector<1x1xf32>
    %cst_118 = arith.constant 9.765625E-4 : f32
    %302 = vector.broadcast %cst_118 : f32 to vector<1x1xf32>
    %303 = arith.mulf %301, %302 : vector<1x1xf32>
    %304 = vector.broadcast %303 : vector<1x1xf32> to vector<32x32xf32>
    %305 = arith.subf %297, %304 : vector<32x32xf32>
    %306 = arith.mulf %305, %305 : vector<32x32xf32>
    %cst_119 = arith.constant dense<0.000000e+00> : vector<32xf32>
    %307 = vector.multi_reduction <add>, %306, %cst_119 [1] : vector<32x32xf32> to vector<32xf32>
    %308 = vector.shape_cast %307 : vector<32xf32> to vector<32x1xf32>
    %cst_120 = arith.constant dense<0.000000e+00> : vector<1xf32>
    %309 = vector.multi_reduction <add>, %308, %cst_120 [0] : vector<32x1xf32> to vector<1xf32>
    %310 = vector.shape_cast %309 : vector<1xf32> to vector<1x1xf32>
    %cst_121 = arith.constant 9.765625E-4 : f32
    %311 = vector.broadcast %cst_121 : f32 to vector<1x1xf32>
    %312 = arith.mulf %310, %311 : vector<1x1xf32>
    %313 = vector.broadcast %303 : vector<1x1xf32> to vector<32x32xf32>
    %314 = arith.subf %297, %313 : vector<32x32xf32>
    %cst_122 = arith.constant 3.200000e-04 : f32
    %315 = vector.broadcast %cst_122 : f32 to vector<1x1xf32>
    %316 = arith.addf %312, %315 : vector<1x1xf32>
    %317 = math.rsqrt %316 : vector<1x1xf32>
    %318 = vector.broadcast %317 : vector<1x1xf32> to vector<32x32xf32>
    %319 = arith.mulf %314, %318 : vector<32x32xf32>
    %cst_123 = arith.constant dense<0xFF800000> : vector<32xf32>
    %320 = vector.multi_reduction <maximumf>, %319, %cst_123 [1] : vector<32x32xf32> to vector<32xf32>
    %321 = vector.shape_cast %320 : vector<32xf32> to vector<32x1xf32>
    %322 = vector.broadcast %321 : vector<32x1xf32> to vector<32x32xf32>
    %323 = arith.subf %319, %322 : vector<32x32xf32>
    %324 = math.exp %323 : vector<32x32xf32>
    %cst_124 = arith.constant dense<0.000000e+00> : vector<32xf32>
    %325 = vector.multi_reduction <add>, %324, %cst_124 [1] : vector<32x32xf32> to vector<32xf32>
    %326 = vector.shape_cast %325 : vector<32xf32> to vector<32x1xf32>
    %327 = vector.broadcast %326 : vector<32x1xf32> to vector<32x32xf32>
    %328 = arith.divf %324, %327 : vector<32x32xf32>
    %329 = vector.extract_strided_slice %294 {offsets = [32, 0], sizes = [32, 256], strides = [1, 1]} : vector<192x512xbf16> to vector<32x256xbf16>
    %330 = vector.extract_strided_slice %294 {offsets = [96, 0], sizes = [32, 256], strides = [1, 1]} : vector<192x512xbf16> to vector<32x256xbf16>
    %cst_125 = arith.constant dense<0.000000e+00> : vector<32x32xf32>
    %331 = tpu.matmul %329, %330, %cst_125 {dimension_numbers = #tpu.dot_dimension_numbers<[1], [1], [0], [0], [0, 0, 1, 0], [], []>} : vector<32x256xbf16>, vector<32x256xbf16>, vector<32x32xf32> -> vector<32x32xf32>
    %cst_126 = arith.constant dense<0.000000e+00> : vector<32xf32>
    %332 = vector.multi_reduction <add>, %331, %cst_126 [1] : vector<32x32xf32> to vector<32xf32>
    %333 = vector.shape_cast %332 : vector<32xf32> to vector<32x1xf32>
    %cst_127 = arith.constant dense<0.000000e+00> : vector<1xf32>
    %334 = vector.multi_reduction <add>, %333, %cst_127 [0] : vector<32x1xf32> to vector<1xf32>
    %335 = vector.shape_cast %334 : vector<1xf32> to vector<1x1xf32>
    %cst_128 = arith.constant 9.765625E-4 : f32
    %336 = vector.broadcast %cst_128 : f32 to vector<1x1xf32>
    %337 = arith.mulf %335, %336 : vector<1x1xf32>
    %338 = vector.broadcast %337 : vector<1x1xf32> to vector<32x32xf32>
    %339 = arith.subf %331, %338 : vector<32x32xf32>
    %340 = arith.mulf %339, %339 : vector<32x32xf32>
    %cst_129 = arith.constant dense<0.000000e+00> : vector<32xf32>
    %341 = vector.multi_reduction <add>, %340, %cst_129 [1] : vector<32x32xf32> to vector<32xf32>
    %342 = vector.shape_cast %341 : vector<32xf32> to vector<32x1xf32>
    %cst_130 = arith.constant dense<0.000000e+00> : vector<1xf32>
    %343 = vector.multi_reduction <add>, %342, %cst_130 [0] : vector<32x1xf32> to vector<1xf32>
    %344 = vector.shape_cast %343 : vector<1xf32> to vector<1x1xf32>
    %cst_131 = arith.constant 9.765625E-4 : f32
    %345 = vector.broadcast %cst_131 : f32 to vector<1x1xf32>
    %346 = arith.mulf %344, %345 : vector<1x1xf32>
    %347 = vector.broadcast %337 : vector<1x1xf32> to vector<32x32xf32>
    %348 = arith.subf %331, %347 : vector<32x32xf32>
    %cst_132 = arith.constant 3.200000e-04 : f32
    %349 = vector.broadcast %cst_132 : f32 to vector<1x1xf32>
    %350 = arith.addf %346, %349 : vector<1x1xf32>
    %351 = math.rsqrt %350 : vector<1x1xf32>
    %352 = vector.broadcast %351 : vector<1x1xf32> to vector<32x32xf32>
    %353 = arith.mulf %348, %352 : vector<32x32xf32>
    %cst_133 = arith.constant dense<0xFF800000> : vector<32xf32>
    %354 = vector.multi_reduction <maximumf>, %353, %cst_133 [1] : vector<32x32xf32> to vector<32xf32>
    %355 = vector.shape_cast %354 : vector<32xf32> to vector<32x1xf32>
    %356 = vector.broadcast %355 : vector<32x1xf32> to vector<32x32xf32>
    %357 = arith.subf %353, %356 : vector<32x32xf32>
    %358 = math.exp %357 : vector<32x32xf32>
    %cst_134 = arith.constant dense<0.000000e+00> : vector<32xf32>
    %359 = vector.multi_reduction <add>, %358, %cst_134 [1] : vector<32x32xf32> to vector<32xf32>
    %360 = vector.shape_cast %359 : vector<32xf32> to vector<32x1xf32>
    %361 = vector.broadcast %360 : vector<32x1xf32> to vector<32x32xf32>
    %362 = arith.divf %358, %361 : vector<32x32xf32>
    %363 = arith.addf %328, %362 : vector<32x32xf32>
    %cst_135 = arith.constant 5.000000e-01 : f32
    %364 = vector.broadcast %cst_135 : f32 to vector<32x32xf32>
    %365 = arith.mulf %363, %364 : vector<32x32xf32>
    %c0_136 = arith.constant 0 : index
    %c32 = arith.constant 32 : index
    %c0_137 = arith.constant 0 : index
    %366 = vector.load %arg20[%c0_136, %c32, %c0_137] : memref<2x64x32xf32, #tpu.memory_space<vmem>>, vector<1x32x32xf32>
    %367 = vector.shape_cast %366 : vector<1x32x32xf32> to vector<32x32xf32>
    %368 = vector.shape_cast %365 : vector<32x32xf32> to vector<1x32x32xf32>
    tpu.vector_store %arg20[%c0_136, %c32, %c0_137], %368 {strides = array<i32>} : memref<2x64x32xf32, #tpu.memory_space<vmem>>, vector<1x32x32xf32>,
    %369 = tpu.concatenate %328, %362 in 1 : vector<32x32xf32>, vector<32x32xf32> -> vector<32x64xf32>
    %370 = arith.truncf %369 : vector<32x64xf32> to vector<32x64xbf16>
    %371 = vector.extract_strided_slice %294 {offsets = [128, 0], sizes = [64, 256], strides = [1, 1]} : vector<192x512xbf16> to vector<64x256xbf16>
    %cst_138 = arith.constant dense<0.000000e+00> : vector<32x256xf32>
    %372 = tpu.matmul %370, %371, %cst_138 {dimension_numbers = #tpu.dot_dimension_numbers<[1], [0], [0], [1], [0, 0, 1, 1], [], []>} : vector<32x64xbf16>, vector<64x256xbf16>, vector<32x256xf32> -> vector<32x256xf32>
    %373 = vector.extract_strided_slice %294 {offsets = [0, 256], sizes = [32, 256], strides = [1, 1]} : vector<192x512xbf16> to vector<32x256xbf16>
    %374 = vector.extract_strided_slice %294 {offsets = [64, 256], sizes = [32, 256], strides = [1, 1]} : vector<192x512xbf16> to vector<32x256xbf16>
    %cst_139 = arith.constant dense<0.000000e+00> : vector<32x32xf32>
    %375 = tpu.matmul %373, %374, %cst_139 {dimension_numbers = #tpu.dot_dimension_numbers<[1], [1], [0], [0], [0, 0, 1, 0], [], []>} : vector<32x256xbf16>, vector<32x256xbf16>, vector<32x32xf32> -> vector<32x32xf32>
    %cst_140 = arith.constant dense<0.000000e+00> : vector<32xf32>
    %376 = vector.multi_reduction <add>, %375, %cst_140 [1] : vector<32x32xf32> to vector<32xf32>
    %377 = vector.shape_cast %376 : vector<32xf32> to vector<32x1xf32>
    %cst_141 = arith.constant dense<0.000000e+00> : vector<1xf32>
    %378 = vector.multi_reduction <add>, %377, %cst_141 [0] : vector<32x1xf32> to vector<1xf32>
    %379 = vector.shape_cast %378 : vector<1xf32> to vector<1x1xf32>
    %cst_142 = arith.constant 9.765625E-4 : f32
    %380 = vector.broadcast %cst_142 : f32 to vector<1x1xf32>
    %381 = arith.mulf %379, %380 : vector<1x1xf32>
    %382 = vector.broadcast %381 : vector<1x1xf32> to vector<32x32xf32>
    %383 = arith.subf %375, %382 : vector<32x32xf32>
    %384 = arith.mulf %383, %383 : vector<32x32xf32>
    %cst_143 = arith.constant dense<0.000000e+00> : vector<32xf32>
    %385 = vector.multi_reduction <add>, %384, %cst_143 [1] : vector<32x32xf32> to vector<32xf32>
    %386 = vector.shape_cast %385 : vector<32xf32> to vector<32x1xf32>
    %cst_144 = arith.constant dense<0.000000e+00> : vector<1xf32>
    %387 = vector.multi_reduction <add>, %386, %cst_144 [0] : vector<32x1xf32> to vector<1xf32>
    %388 = vector.shape_cast %387 : vector<1xf32> to vector<1x1xf32>
    %cst_145 = arith.constant 9.765625E-4 : f32
    %389 = vector.broadcast %cst_145 : f32 to vector<1x1xf32>
    %390 = arith.mulf %388, %389 : vector<1x1xf32>
    %391 = vector.broadcast %381 : vector<1x1xf32> to vector<32x32xf32>
    %392 = arith.subf %375, %391 : vector<32x32xf32>
    %cst_146 = arith.constant 3.200000e-04 : f32
    %393 = vector.broadcast %cst_146 : f32 to vector<1x1xf32>
    %394 = arith.addf %390, %393 : vector<1x1xf32>
    %395 = math.rsqrt %394 : vector<1x1xf32>
    %396 = vector.broadcast %395 : vector<1x1xf32> to vector<32x32xf32>
    %397 = arith.mulf %392, %396 : vector<32x32xf32>
    %cst_147 = arith.constant dense<0xFF800000> : vector<32xf32>
    %398 = vector.multi_reduction <maximumf>, %397, %cst_147 [1] : vector<32x32xf32> to vector<32xf32>
    %399 = vector.shape_cast %398 : vector<32xf32> to vector<32x1xf32>
    %400 = vector.broadcast %399 : vector<32x1xf32> to vector<32x32xf32>
    %401 = arith.subf %397, %400 : vector<32x32xf32>
    %402 = math.exp %401 : vector<32x32xf32>
    %cst_148 = arith.constant dense<0.000000e+00> : vector<32xf32>
    %403 = vector.multi_reduction <add>, %402, %cst_148 [1] : vector<32x32xf32> to vector<32xf32>
    %404 = vector.shape_cast %403 : vector<32xf32> to vector<32x1xf32>
    %405 = vector.broadcast %404 : vector<32x1xf32> to vector<32x32xf32>
    %406 = arith.divf %402, %405 : vector<32x32xf32>
    %407 = vector.extract_strided_slice %294 {offsets = [32, 256], sizes = [32, 256], strides = [1, 1]} : vector<192x512xbf16> to vector<32x256xbf16>
    %408 = vector.extract_strided_slice %294 {offsets = [96, 256], sizes = [32, 256], strides = [1, 1]} : vector<192x512xbf16> to vector<32x256xbf16>
    %cst_149 = arith.constant dense<0.000000e+00> : vector<32x32xf32>
    %409 = tpu.matmul %407, %408, %cst_149 {dimension_numbers = #tpu.dot_dimension_numbers<[1], [1], [0], [0], [0, 0, 1, 0], [], []>} : vector<32x256xbf16>, vector<32x256xbf16>, vector<32x32xf32> -> vector<32x32xf32>
    %cst_150 = arith.constant dense<0.000000e+00> : vector<32xf32>
    %410 = vector.multi_reduction <add>, %409, %cst_150 [1] : vector<32x32xf32> to vector<32xf32>
    %411 = vector.shape_cast %410 : vector<32xf32> to vector<32x1xf32>
    %cst_151 = arith.constant dense<0.000000e+00> : vector<1xf32>
    %412 = vector.multi_reduction <add>, %411, %cst_151 [0] : vector<32x1xf32> to vector<1xf32>
    %413 = vector.shape_cast %412 : vector<1xf32> to vector<1x1xf32>
    %cst_152 = arith.constant 9.765625E-4 : f32
    %414 = vector.broadcast %cst_152 : f32 to vector<1x1xf32>
    %415 = arith.mulf %413, %414 : vector<1x1xf32>
    %416 = vector.broadcast %415 : vector<1x1xf32> to vector<32x32xf32>
    %417 = arith.subf %409, %416 : vector<32x32xf32>
    %418 = arith.mulf %417, %417 : vector<32x32xf32>
    %cst_153 = arith.constant dense<0.000000e+00> : vector<32xf32>
    %419 = vector.multi_reduction <add>, %418, %cst_153 [1] : vector<32x32xf32> to vector<32xf32>
    %420 = vector.shape_cast %419 : vector<32xf32> to vector<32x1xf32>
    %cst_154 = arith.constant dense<0.000000e+00> : vector<1xf32>
    %421 = vector.multi_reduction <add>, %420, %cst_154 [0] : vector<32x1xf32> to vector<1xf32>
    %422 = vector.shape_cast %421 : vector<1xf32> to vector<1x1xf32>
    %cst_155 = arith.constant 9.765625E-4 : f32
    %423 = vector.broadcast %cst_155 : f32 to vector<1x1xf32>
    %424 = arith.mulf %422, %423 : vector<1x1xf32>
    %425 = vector.broadcast %415 : vector<1x1xf32> to vector<32x32xf32>
    %426 = arith.subf %409, %425 : vector<32x32xf32>
    %cst_156 = arith.constant 3.200000e-04 : f32
    %427 = vector.broadcast %cst_156 : f32 to vector<1x1xf32>
    %428 = arith.addf %424, %427 : vector<1x1xf32>
    %429 = math.rsqrt %428 : vector<1x1xf32>
    %430 = vector.broadcast %429 : vector<1x1xf32> to vector<32x32xf32>
    %431 = arith.mulf %426, %430 : vector<32x32xf32>
    %cst_157 = arith.constant dense<0xFF800000> : vector<32xf32>
    %432 = vector.multi_reduction <maximumf>, %431, %cst_157 [1] : vector<32x32xf32> to vector<32xf32>
    %433 = vector.shape_cast %432 : vector<32xf32> to vector<32x1xf32>
    %434 = vector.broadcast %433 : vector<32x1xf32> to vector<32x32xf32>
    %435 = arith.subf %431, %434 : vector<32x32xf32>
    %436 = math.exp %435 : vector<32x32xf32>
    %cst_158 = arith.constant dense<0.000000e+00> : vector<32xf32>
    %437 = vector.multi_reduction <add>, %436, %cst_158 [1] : vector<32x32xf32> to vector<32xf32>
    %438 = vector.shape_cast %437 : vector<32xf32> to vector<32x1xf32>
    %439 = vector.broadcast %438 : vector<32x1xf32> to vector<32x32xf32>
    %440 = arith.divf %436, %439 : vector<32x32xf32>
    %441 = arith.addf %406, %440 : vector<32x32xf32>
    %cst_159 = arith.constant 5.000000e-01 : f32
    %442 = vector.broadcast %cst_159 : f32 to vector<32x32xf32>
    %443 = arith.mulf %441, %442 : vector<32x32xf32>
    %c1_160 = arith.constant 1 : index
    %c32_161 = arith.constant 32 : index
    %c0_162 = arith.constant 0 : index
    %444 = vector.load %arg20[%c1_160, %c32_161, %c0_162] : memref<2x64x32xf32, #tpu.memory_space<vmem>>, vector<1x32x32xf32>
    %445 = vector.shape_cast %444 : vector<1x32x32xf32> to vector<32x32xf32>
    %446 = vector.shape_cast %443 : vector<32x32xf32> to vector<1x32x32xf32>
    tpu.vector_store %arg20[%c1_160, %c32_161, %c0_162], %446 {strides = array<i32>} : memref<2x64x32xf32, #tpu.memory_space<vmem>>, vector<1x32x32xf32>,
    %447 = tpu.concatenate %406, %440 in 1 : vector<32x32xf32>, vector<32x32xf32> -> vector<32x64xf32>
    %448 = arith.truncf %447 : vector<32x64xf32> to vector<32x64xbf16>
    %449 = vector.extract_strided_slice %294 {offsets = [128, 256], sizes = [64, 256], strides = [1, 1]} : vector<192x512xbf16> to vector<64x256xbf16>
    %cst_163 = arith.constant dense<0.000000e+00> : vector<32x256xf32>
    %450 = tpu.matmul %448, %449, %cst_163 {dimension_numbers = #tpu.dot_dimension_numbers<[1], [0], [0], [1], [0, 0, 1, 1], [], []>} : vector<32x64xbf16>, vector<64x256xbf16>, vector<32x256xf32> -> vector<32x256xf32>
    %451 = tpu.concatenate %372, %450 in 1 : vector<32x256xf32>, vector<32x256xf32> -> vector<32x512xf32>
    %c1_164 = arith.constant 1 : index
    %c0_165 = arith.constant 0 : index
    %c0_166 = arith.constant 0 : index
    %452 = vector.load %arg6[%c1_164, %c0_165, %c0_166] : memref<2x32x32xbf16, #tpu.memory_space<vmem>>, vector<1x32x32xbf16>
    %453 = vector.shape_cast %452 : vector<1x32x32xbf16> to vector<32x32xbf16>
    %454 = arith.truncf %451 : vector<32x512xf32> to vector<32x512xbf16>
    %cst_167 = arith.constant dense<0.000000e+00> : vector<32x512xf32>
    %455 = tpu.matmul %453, %454, %cst_167 {dimension_numbers = #tpu.dot_dimension_numbers<[1], [0], [0], [1], [0, 0, 1, 1], [], []>} : vector<32x32xbf16>, vector<32x512xbf16>, vector<32x512xf32> -> vector<32x512xf32>
    %456 = arith.addf %261, %455 : vector<32x512xf32>
    %c1_168 = arith.constant 1 : index
    %c0_169 = arith.constant 0 : index
    %c0_170 = arith.constant 0 : index
    %457 = vector.load %arg7[%c1_168, %c0_169, %c0_170] : memref<2x32x1xf32, #tpu.memory_space<vmem>>, vector<1x32x1xf32>
    %458 = vector.shape_cast %457 : vector<1x32x1xf32> to vector<32x1xf32>
    %c1_171 = arith.constant 1 : index
    %c0_172 = arith.constant 0 : index
    %c0_173 = arith.constant 0 : index
    %459 = vector.load %arg8[%c1_171, %c0_172, %c0_173] : memref<2x32x1xf32, #tpu.memory_space<vmem>>, vector<1x32x1xf32>
    %460 = vector.shape_cast %459 : vector<1x32x1xf32> to vector<32x1xf32>
    %cst_174 = arith.constant dense<0.000000e+00> : vector<512xf32>
    %461 = vector.multi_reduction <add>, %456, %cst_174 [0] : vector<32x512xf32> to vector<512xf32>
    %462 = vector.shape_cast %461 : vector<512xf32> to vector<1x512xf32>
    %cst_175 = arith.constant 3.200000e+01 : f32
    %463 = vector.broadcast %cst_175 : f32 to vector<1x512xf32>
    %464 = arith.divf %462, %463 : vector<1x512xf32>
    %465 = vector.broadcast %464 : vector<1x512xf32> to vector<32x512xf32>
    %466 = arith.subf %456, %465 : vector<32x512xf32>
    %467 = arith.mulf %466, %466 : vector<32x512xf32>
    %cst_176 = arith.constant dense<0.000000e+00> : vector<512xf32>
    %468 = vector.multi_reduction <add>, %467, %cst_176 [0] : vector<32x512xf32> to vector<512xf32>
    %469 = vector.shape_cast %468 : vector<512xf32> to vector<1x512xf32>
    %cst_177 = arith.constant 3.200000e+01 : f32
    %470 = vector.broadcast %cst_177 : f32 to vector<1x512xf32>
    %471 = arith.divf %469, %470 : vector<1x512xf32>
    %472 = vector.broadcast %464 : vector<1x512xf32> to vector<32x512xf32>
    %473 = arith.subf %456, %472 : vector<32x512xf32>
    %cst_178 = arith.constant 9.99999997E-7 : f32
    %474 = vector.broadcast %cst_178 : f32 to vector<1x512xf32>
    %475 = arith.addf %471, %474 : vector<1x512xf32>
    %476 = math.rsqrt %475 : vector<1x512xf32>
    %477 = vector.broadcast %476 : vector<1x512xf32> to vector<32x512xf32>
    %478 = arith.mulf %473, %477 : vector<32x512xf32>
    %479 = vector.broadcast %458 : vector<32x1xf32> to vector<32x512xf32>
    %480 = arith.mulf %478, %479 : vector<32x512xf32>
    %481 = vector.broadcast %460 : vector<32x1xf32> to vector<32x512xf32>
    %482 = arith.addf %480, %481 : vector<32x512xf32>
    %c1_179 = arith.constant 1 : index
    %c0_180 = arith.constant 0 : index
    %c0_181 = arith.constant 0 : index
    %483 = vector.load %arg9[%c1_179, %c0_180, %c0_181] : memref<2x128x32xbf16, #tpu.memory_space<vmem>>, vector<1x128x32xbf16>
    %484 = vector.shape_cast %483 : vector<1x128x32xbf16> to vector<128x32xbf16>
    %485 = arith.truncf %482 : vector<32x512xf32> to vector<32x512xbf16>
    %cst_182 = arith.constant dense<0.000000e+00> : vector<128x512xf32>
    %486 = tpu.matmul %484, %485, %cst_182 {dimension_numbers = #tpu.dot_dimension_numbers<[1], [0], [0], [1], [0, 0, 1, 1], [], []>} : vector<128x32xbf16>, vector<32x512xbf16>, vector<128x512xf32> -> vector<128x512xf32>
    %c1_183 = arith.constant 1 : index
    %c0_184 = arith.constant 0 : index
    %c0_185 = arith.constant 0 : index
    %487 = vector.load %arg10[%c1_183, %c0_184, %c0_185] : memref<2x128x1xf32, #tpu.memory_space<vmem>>, vector<1x128x1xf32>
    %488 = vector.shape_cast %487 : vector<1x128x1xf32> to vector<128x1xf32>
    %489 = vector.broadcast %488 : vector<128x1xf32> to vector<128x512xf32>
    %490 = arith.addf %486, %489 : vector<128x512xf32>
    %cst_186 = arith.constant 5.000000e-01 : f32
    %491 = vector.broadcast %cst_186 : f32 to vector<128x512xf32>
    %492 = arith.mulf %491, %490 : vector<128x512xf32>
    %cst_187 = arith.constant 4.471500e-02 : f32
    %493 = vector.broadcast %cst_187 : f32 to vector<128x512xf32>
    %494 = arith.mulf %493, %490 : vector<128x512xf32>
    %495 = arith.mulf %494, %490 : vector<128x512xf32>
    %496 = arith.mulf %495, %490 : vector<128x512xf32>
    %497 = arith.addf %490, %496 : vector<128x512xf32>
    %cst_188 = arith.constant 0.797884583 : f32
    %498 = vector.broadcast %cst_188 : f32 to vector<128x512xf32>
    %499 = arith.mulf %498, %497 : vector<128x512xf32>
    %500 = math.tanh %499 : vector<128x512xf32>
    %cst_189 = arith.constant 1.000000e+00 : f32
    %501 = vector.broadcast %cst_189 : f32 to vector<128x512xf32>
    %502 = arith.addf %501, %500 : vector<128x512xf32>
    %503 = arith.mulf %492, %502 : vector<128x512xf32>
    %c1_190 = arith.constant 1 : index
    %c0_191 = arith.constant 0 : index
    %c0_192 = arith.constant 0 : index
    %504 = vector.load %arg11[%c1_190, %c0_191, %c0_192] : memref<2x32x128xbf16, #tpu.memory_space<vmem>>, vector<1x32x128xbf16>
    %505 = vector.shape_cast %504 : vector<1x32x128xbf16> to vector<32x128xbf16>
    %506 = arith.truncf %503 : vector<128x512xf32> to vector<128x512xbf16>
    %cst_193 = arith.constant dense<0.000000e+00> : vector<32x512xf32>
    %507 = tpu.matmul %505, %506, %cst_193 {dimension_numbers = #tpu.dot_dimension_numbers<[1], [0], [0], [1], [0, 0, 1, 1], [], []>} : vector<32x128xbf16>, vector<128x512xbf16>, vector<32x512xf32> -> vector<32x512xf32>
    %c1_194 = arith.constant 1 : index
    %c0_195 = arith.constant 0 : index
    %c0_196 = arith.constant 0 : index
    %508 = vector.load %arg12[%c1_194, %c0_195, %c0_196] : memref<2x32x1xf32, #tpu.memory_space<vmem>>, vector<1x32x1xf32>
    %509 = vector.shape_cast %508 : vector<1x32x1xf32> to vector<32x1xf32>
    %510 = vector.broadcast %509 : vector<32x1xf32> to vector<32x512xf32>
    %511 = arith.addf %507, %510 : vector<32x512xf32>
    %512 = arith.addf %456, %511 : vector<32x512xf32>
    %c0_197 = arith.constant 0 : index
    %c0_198 = arith.constant 0 : index
    %513 = vector.load %arg13[%c0_197, %c0_198] : memref<32x1xf32, #tpu.memory_space<vmem>>, vector<32x1xf32>
    %c0_199 = arith.constant 0 : index
    %c0_200 = arith.constant 0 : index
    %514 = vector.load %arg14[%c0_199, %c0_200] : memref<32x1xf32, #tpu.memory_space<vmem>>, vector<32x1xf32>
    %cst_201 = arith.constant dense<0.000000e+00> : vector<512xf32>
    %515 = vector.multi_reduction <add>, %512, %cst_201 [0] : vector<32x512xf32> to vector<512xf32>
    %516 = vector.shape_cast %515 : vector<512xf32> to vector<1x512xf32>
    %cst_202 = arith.constant 3.200000e+01 : f32
    %517 = vector.broadcast %cst_202 : f32 to vector<1x512xf32>
    %518 = arith.divf %516, %517 : vector<1x512xf32>
    %519 = vector.broadcast %518 : vector<1x512xf32> to vector<32x512xf32>
    %520 = arith.subf %512, %519 : vector<32x512xf32>
    %521 = arith.mulf %520, %520 : vector<32x512xf32>
    %cst_203 = arith.constant dense<0.000000e+00> : vector<512xf32>
    %522 = vector.multi_reduction <add>, %521, %cst_203 [0] : vector<32x512xf32> to vector<512xf32>
    %523 = vector.shape_cast %522 : vector<512xf32> to vector<1x512xf32>
    %cst_204 = arith.constant 3.200000e+01 : f32
    %524 = vector.broadcast %cst_204 : f32 to vector<1x512xf32>
    %525 = arith.divf %523, %524 : vector<1x512xf32>
    %526 = vector.broadcast %518 : vector<1x512xf32> to vector<32x512xf32>
    %527 = arith.subf %512, %526 : vector<32x512xf32>
    %cst_205 = arith.constant 9.99999997E-7 : f32
    %528 = vector.broadcast %cst_205 : f32 to vector<1x512xf32>
    %529 = arith.addf %525, %528 : vector<1x512xf32>
    %530 = math.rsqrt %529 : vector<1x512xf32>
    %531 = vector.broadcast %530 : vector<1x512xf32> to vector<32x512xf32>
    %532 = arith.mulf %527, %531 : vector<32x512xf32>
    %533 = vector.broadcast %513 : vector<32x1xf32> to vector<32x512xf32>
    %534 = arith.mulf %532, %533 : vector<32x512xf32>
    %535 = vector.broadcast %514 : vector<32x1xf32> to vector<32x512xf32>
    %536 = arith.addf %534, %535 : vector<32x512xf32>
    %c0_206 = arith.constant 0 : index
    %c0_207 = arith.constant 0 : index
    %537 = vector.load %arg15[%c0_206, %c0_207] : memref<32x32xbf16, #tpu.memory_space<vmem>>, vector<32x32xbf16>
    %538 = arith.truncf %536 : vector<32x512xf32> to vector<32x512xbf16>
    %cst_208 = arith.constant dense<0.000000e+00> : vector<32x512xf32>
    %539 = tpu.matmul %537, %538, %cst_208 {dimension_numbers = #tpu.dot_dimension_numbers<[1], [0], [0], [1], [0, 0, 1, 1], [], []>} : vector<32x32xbf16>, vector<32x512xbf16>, vector<32x512xf32> -> vector<32x512xf32>
    %c0_209 = arith.constant 0 : index
    %c0_210 = arith.constant 0 : index
    %540 = vector.load %arg16[%c0_209, %c0_210] : memref<32x1xf32, #tpu.memory_space<vmem>>, vector<32x1xf32>
    %541 = vector.broadcast %540 : vector<32x1xf32> to vector<32x512xf32>
    %542 = arith.addf %539, %541 : vector<32x512xf32>
    %c0_211 = arith.constant 0 : index
    %c0_212 = arith.constant 0 : index
    %543 = vector.load %arg17[%c0_211, %c0_212] : memref<32x1xf32, #tpu.memory_space<vmem>>, vector<32x1xf32>
    %544 = vector.broadcast %543 : vector<32x1xf32> to vector<32x512xf32>
    %545 = arith.mulf %542, %544 : vector<32x512xf32>
    %c0_213 = arith.constant 0 : index
    %c0_214 = arith.constant 0 : index
    %546 = vector.load %arg18[%c0_213, %c0_214] : memref<32x1xf32, #tpu.memory_space<vmem>>, vector<32x1xf32>
    %547 = vector.broadcast %546 : vector<32x1xf32> to vector<32x512xf32>
    %548 = arith.addf %545, %547 : vector<32x512xf32>
    %cst_215 = arith.constant 0.000000e+00 : f32
    %549 = vector.broadcast %cst_215 : f32 to vector<32x512xf32>
    %550 = arith.maximumf %548, %549 : vector<32x512xf32>
    %551 = arith.addf %550, %1 : vector<32x512xf32>
    %c0_216 = arith.constant 0 : index
    %c0_217 = arith.constant 0 : index
    %c0_218 = arith.constant 0 : index
    %552 = vector.load %arg19[%c0_216, %c0_217, %c0_218] : memref<1x32x512xf32, #tpu.memory_space<vmem>>, vector<1x32x512xf32>
    %553 = vector.shape_cast %552 : vector<1x32x512xf32> to vector<32x512xf32>
    %554 = vector.shape_cast %551 : vector<32x512xf32> to vector<1x32x512xf32>
    tpu.vector_store %arg19[%c0_216, %c0_217, %c0_218], %554 {strides = array<i32>} : memref<1x32x512xf32, #tpu.memory_space<vmem>>, vector<1x32x512xf32>,
    return
  }
  func.func @transform_0(%arg0: i32) -> (i32, i32, i32) {
    %c0_i32 = arith.constant 0 : i32
    %c0_i32_0 = arith.constant 0 : i32
    %c0_i32_1 = arith.constant 0 : i32
    return %arg0, %c0_i32, %c0_i32_0 : i32, i32, i32
  }
  func.func @transform_1(%arg0: i32) -> (i32, i32) {
    %c0_i32 = arith.constant 0 : i32
    %c0_i32_0 = arith.constant 0 : i32
    %c0_i32_1 = arith.constant 0 : i32
    return %c0_i32, %c0_i32_0 : i32, i32
  }
  func.func @transform_2(%arg0: i32) -> (i32, i32, i32) {
    %c0_i32 = arith.constant 0 : i32
    %c0_i32_0 = arith.constant 0 : i32
    %c0_i32_1 = arith.constant 0 : i32
    %c0_i32_2 = arith.constant 0 : i32
    return %c0_i32, %c0_i32_0, %c0_i32_1 : i32, i32, i32
  }
  func.func @transform_3(%arg0: i32) -> (i32, i32, i32) {
    %c0_i32 = arith.constant 0 : i32
    %c0_i32_0 = arith.constant 0 : i32
    %c0_i32_1 = arith.constant 0 : i32
    %c0_i32_2 = arith.constant 0 : i32
    return %c0_i32, %c0_i32_0, %c0_i32_1 : i32, i32, i32
  }
  func.func @transform_4(%arg0: i32) -> (i32, i32, i32) {
    %c0_i32 = arith.constant 0 : i32
    %c0_i32_0 = arith.constant 0 : i32
    %c0_i32_1 = arith.constant 0 : i32
    %c0_i32_2 = arith.constant 0 : i32
    return %c0_i32, %c0_i32_0, %c0_i32_1 : i32, i32, i32
  }
  func.func @transform_5(%arg0: i32) -> (i32, i32, i32) {
    %c0_i32 = arith.constant 0 : i32
    %c0_i32_0 = arith.constant 0 : i32
    %c0_i32_1 = arith.constant 0 : i32
    %c0_i32_2 = arith.constant 0 : i32
    return %c0_i32, %c0_i32_0, %c0_i32_1 : i32, i32, i32
  }
  func.func @transform_6(%arg0: i32) -> (i32, i32, i32) {
    %c0_i32 = arith.constant 0 : i32
    %c0_i32_0 = arith.constant 0 : i32
    %c0_i32_1 = arith.constant 0 : i32
    %c0_i32_2 = arith.constant 0 : i32
    return %c0_i32, %c0_i32_0, %c0_i32_1 : i32, i32, i32
  }
  func.func @transform_7(%arg0: i32) -> (i32, i32, i32) {
    %c0_i32 = arith.constant 0 : i32
    %c0_i32_0 = arith.constant 0 : i32
    %c0_i32_1 = arith.constant 0 : i32
    %c0_i32_2 = arith.constant 0 : i32
    return %c0_i32, %c0_i32_0, %c0_i32_1 : i32, i32, i32
  }
  func.func @transform_8(%arg0: i32) -> (i32, i32, i32) {
    %c0_i32 = arith.constant 0 : i32
    %c0_i32_0 = arith.constant 0 : i32
    %c0_i32_1 = arith.constant 0 : i32
    %c0_i32_2 = arith.constant 0 : i32
    return %c0_i32, %c0_i32_0, %c0_i32_1 : i32, i32, i32
  }
  func.func @transform_9(%arg0: i32) -> (i32, i32, i32) {
    %c0_i32 = arith.constant 0 : i32
    %c0_i32_0 = arith.constant 0 : i32
    %c0_i32_1 = arith.constant 0 : i32
    %c0_i32_2 = arith.constant 0 : i32
    return %c0_i32, %c0_i32_0, %c0_i32_1 : i32, i32, i32
  }
  func.func @transform_10(%arg0: i32) -> (i32, i32, i32) {
    %c0_i32 = arith.constant 0 : i32
    %c0_i32_0 = arith.constant 0 : i32
    %c0_i32_1 = arith.constant 0 : i32
    %c0_i32_2 = arith.constant 0 : i32
    return %c0_i32, %c0_i32_0, %c0_i32_1 : i32, i32, i32
  }
  func.func @transform_11(%arg0: i32) -> (i32, i32, i32) {
    %c0_i32 = arith.constant 0 : i32
    %c0_i32_0 = arith.constant 0 : i32
    %c0_i32_1 = arith.constant 0 : i32
    %c0_i32_2 = arith.constant 0 : i32
    return %c0_i32, %c0_i32_0, %c0_i32_1 : i32, i32, i32
  }
  func.func @transform_12(%arg0: i32) -> (i32, i32) {
    %c0_i32 = arith.constant 0 : i32
    %c0_i32_0 = arith.constant 0 : i32
    %c0_i32_1 = arith.constant 0 : i32
    return %c0_i32, %c0_i32_0 : i32, i32
  }
  func.func @transform_13(%arg0: i32) -> (i32, i32) {
    %c0_i32 = arith.constant 0 : i32
    %c0_i32_0 = arith.constant 0 : i32
    %c0_i32_1 = arith.constant 0 : i32
    return %c0_i32, %c0_i32_0 : i32, i32
  }
  func.func @transform_14(%arg0: i32) -> (i32, i32) {
    %c0_i32 = arith.constant 0 : i32
    %c0_i32_0 = arith.constant 0 : i32
    %c0_i32_1 = arith.constant 0 : i32
    return %c0_i32, %c0_i32_0 : i32, i32
  }
  func.func @transform_15(%arg0: i32) -> (i32, i32) {
    %c0_i32 = arith.constant 0 : i32
    %c0_i32_0 = arith.constant 0 : i32
    %c0_i32_1 = arith.constant 0 : i32
    return %c0_i32, %c0_i32_0 : i32, i32
  }
  func.func @transform_16(%arg0: i32) -> (i32, i32) {
    %c0_i32 = arith.constant 0 : i32
    %c0_i32_0 = arith.constant 0 : i32
    %c0_i32_1 = arith.constant 0 : i32
    return %c0_i32, %c0_i32_0 : i32, i32
  }
  func.func @transform_17(%arg0: i32) -> (i32, i32) {
    %c0_i32 = arith.constant 0 : i32
    %c0_i32_0 = arith.constant 0 : i32
    %c0_i32_1 = arith.constant 0 : i32
    return %c0_i32, %c0_i32_0 : i32, i32
  }
  func.func @transform_18(%arg0: i32) -> (i32, i32, i32) {
    %c0_i32 = arith.constant 0 : i32
    %c0_i32_0 = arith.constant 0 : i32
    %c0_i32_1 = arith.constant 0 : i32
    return %arg0, %c0_i32, %c0_i32_0 : i32, i32, i32
  }
  func.func @transform_19(%arg0: i32) -> (i32, i32, i32) {
    %c0_i32 = arith.constant 0 : i32
    %c0_i32_0 = arith.constant 0 : i32
    %c0_i32_1 = arith.constant 0 : i32
    return %arg0, %c0_i32, %c0_i32_0 : i32, i32, i32
  }
}

</mosaic_0001>

<bundles_post_ra>
// kernel: channel_transformer_forward.1
= control target key start
LH: loop header
LB: loop body
LE: loop exit
PB: predicated region body
PF: predicated region fallthrough
CT: control target
= control target key end

     0   :  { %v11505_v0 = vmov 0   ;;  %vm456_vm2 = vcmask 261120   ;;  %s7582_s23 = smov 32   ;;  %vm1183_vm3 = vcmask 523264   ;;  %s11480_s3 = inlined_call_operand.vmem [shape: f32[2,32,1], index: 3, kind: input, shape index: {}]   ;;  %s11481_s2 = inlined_call_operand.vmem [shape: f32[2,32,1], index: 2, kind: input, shape index: {}]   ;;  %s11482_s0 = inlined_call_operand.vmem [shape: f32[1,32,512], index: 0, kind: input, shape index: {}]   ;;  %s11483_s1 = inlined_call_operand.vmem [shape: f32[32,512], index: 1, kind: input, shape index: {}]   ;;  %s11484_s4 = inlined_call_operand.vmem [shape: bf16[2,192,32], index: 4, kind: input, shape index: {}]   ;;  %s11485_s19 = inlined_call_operand.vmem [shape: f32[2,64,32], index: 19, kind: output, shape index: {1}]   ;;  %s11486_s5 = inlined_call_operand.vmem [shape: bf16[2,32,32], index: 5, kind: input, shape index: {}]   ;;  %s11487_s6 = inlined_call_operand.vmem [shape: f32[2,32,1], index: 6, kind: input, shape index: {}]   ;;  %s11488_s7 = inlined_call_operand.vmem [shape: f32[2,32,1], index: 7, kind: input, shape index: {}]   ;;  %s11489_s9 = inlined_call_operand.vmem [shape: f32[2,128,1], index: 9, kind: input, shape index: {}]   ;;  %s11490_s8 = inlined_call_operand.vmem [shape: bf16[2,128,32], index: 8, kind: input, shape index: {}]   ;;  %s11491_s11 = inlined_call_operand.vmem [shape: f32[2,32,1], index: 11, kind: input, shape index: {}]   ;;  %s11492_s10 = inlined_call_operand.vmem [shape: bf16[2,32,128], index: 10, kind: input, shape index: {}]   ;;  %s11493_s12 = inlined_call_operand.vmem [shape: f32[32,1], index: 12, kind: input, shape index: {}]   ;;  %s11494_s13 = inlined_call_operand.vmem [shape: f32[32,1], index: 13, kind: input, shape index: {}]   ;;  %s11495_s15 = inlined_call_operand.vmem [shape: f32[32,1], index: 15, kind: input, shape index: {}]   ;;  %s11496_s16 = inlined_call_operand.vmem [shape: f32[32,1], index: 16, kind: input, shape index: {}]   ;;  %s11497_s17 = inlined_call_operand.vmem [shape: f32[32,1], index: 17, kind: input, shape index: {}]   ;;  %s11498_s14 = inlined_call_operand.vmem [shape: bf16[32,32], index: 14, kind: input, shape index: {}]   ;;  %s11499_s18 = inlined_call_operand.vmem [shape: f32[1,32,512], index: 18, kind: output, shape index: {0}]  }
   0x1   :  { %11616 = sst [smem:[#allocation31_spill]] %s11480_s3  ;;  %7003 = vset.pattern.permute.xlu1 %v11505_v0  ;;  %7002 = vset.pattern.permute.xlu0 %v11505_v0 }
   0x2   :  { %11617 = sst [smem:[#allocation32_spill]] %s11481_s2  ;;  %s11621_s20 = sld [smem:[#allocation31_spill]]  ;;  %525 = vmatprep.mubr.bf16.mxu0 %v11505_v0  ;;  %678 = vmatprep.mubr.bf16.mxu1 %v11505_v0 }
   0x3   :  { %11618 = sst [smem:[#allocation33_spill]] %s11482_s0  ;;  %s11622_s22 = sld [smem:[#allocation32_spill]] }
   0x4   :  { %11619 = sst [smem:[#allocation34_spill]] %s11483_s1  ;;  %s11623_s30 = sld [smem:[#allocation33_spill]] }
   0x5   :  { %11620 = sst [smem:[#allocation35_spill]] %s11499_s18  ;;  %s11624_s24 = sld [smem:[#allocation34_spill]] }
   0x8   :  { %v135_v1 = vld [vmem:[%s11621_s20] sm:$0xff]  ;;  %v136_v3 = vld [vmem:[%s11621_s20 + $0x8] sm:$0xff]  ;;  %v138_v11 = vld [vmem:[%s11621_s20 + $0x18] sm:$0xff] }
   0x9   :  { %v131_v2 = vld [vmem:[%s11622_s22] sm:$0xff]  ;;  %314 = vperm.xlu1 %7003, %v135_v1   ;;  %v132_v4 = vld [vmem:[%s11622_s22 + $0x8] sm:$0xff]  ;;  %v134_v5 = vld [vmem:[%s11622_s22 + $0x18] sm:$0xff] }
   0xa   :  { %278 = vperm.xlu0 %7002, %v131_v2   ;;  %v133_v6 = vld [vmem:[%s11622_s22 + $0x10] sm:$0xff]  ;;  %v63_v7 = vld [vmem:[%s11623_s30 + $0x8] sm:$0xff]  ;;  %v65_v13 = vld [vmem:[%s11623_s30 + $0x18] sm:$0xff] }
   0xb   :  { %v67_v8 = vld [vmem:[%s11623_s30 + $0x28] sm:$0xff]  ;;  %v137_v12 = vld [vmem:[%s11621_s20 + $0x10] sm:$0xff]  ;;  %v69_v14 = vld [vmem:[%s11623_s30 + $0x38] sm:$0xff] }
   0xc   :  { %v100_v9 = vld [vmem:[%s11624_s24 + $0x8] sm:$0xff]  ;;  %v102_v16 = vld [vmem:[%s11624_s24 + $0x18] sm:$0xff]  ;;  %v62_v21 = vld [vmem:[%s11623_s30] sm:$0xff] }
   0xd   :  { %319 = vperm.xlu1 %7003, %v136_v3   ;;  %v104_v10 = vld [vmem:[%s11624_s24 + $0x28] sm:$0xff]  ;;  %v106_v17 = vld [vmem:[%s11624_s24 + $0x38] sm:$0xff]  ;;  %v7738_v18 = vadd.f32 %v100_v9, %v63_v7  ;;  %v66_v22 = vld [vmem:[%s11623_s30 + $0x20] sm:$0xff]  ;;  %v7779_v33 = vadd.f32 %v102_v16, %v65_v13 }
   0xe   :  { %283 = vperm.xlu0 %7002, %v132_v4   ;;  %v71_v15 = vld [vmem:[%s11623_s30 + $0x48] sm:$0xff]  ;;  %v7740_v19 = vadd.f32 %v104_v10, %v67_v8  ;;  %v99_v23 = vld [vmem:[%s11624_s24] sm:$0xff]  ;;  %v64_v25 = vld [vmem:[%s11623_s30 + $0x10] sm:$0xff]  ;;  %v7781_v34 = vadd.f32 %v106_v17, %v69_v14 }
   0xf   :  { %v108_v20 = vld [vmem:[%s11624_s24 + $0x48] sm:$0xff]  ;;  %v103_v24 = vld [vmem:[%s11624_s24 + $0x20] sm:$0xff]  ;;  %v68_v26 = vld [vmem:[%s11623_s30 + $0x30] sm:$0xff]  ;;  %v7792_v38 = vadd.f32 %v99_v23, %v62_v21 }
  0x10   :  { %v101_v27 = vld [vmem:[%s11624_s24 + $0x10] sm:$0xff]  ;;  %v7769_v29 = vadd.f32 %v108_v20, %v71_v15  ;;  %v148_v30 = vadd.f32 %v7740_v19, %v7738_v18  ;;  %v75_v31 = vld [vmem:[%s11623_s30 + $0x68] sm:$0xff]  ;;  %v73_v35 = vld [vmem:[%s11623_s30 + $0x58] sm:$0xff]  ;;  %v7794_v39 = vadd.f32 %v103_v24, %v66_v22  ;;  %v166_v50 = vadd.f32 %v7781_v34, %v7779_v33 }
  0x11   :  { %293 = vperm.xlu1 %7003, %v134_v5   ;;  %v105_v28 = vld [vmem:[%s11624_s24 + $0x30] sm:$0xff]  ;;  %v112_v32 = vld [vmem:[%s11624_s24 + $0x68] sm:$0xff]  ;;  %v110_v36 = vld [vmem:[%s11624_s24 + $0x58] sm:$0xff]  ;;  %v7796_v40 = vadd.f32 %v101_v27, %v64_v25 }
  0x12   :  { %288 = vperm.xlu0 %7002, %v133_v6   ;;  %v70_v37 = vld [vmem:[%s11623_s30 + $0x40] sm:$0xff]  ;;  %v7798_v41 = vadd.f32 %v105_v28, %v68_v26  ;;  %v72_v43 = vld [vmem:[%s11623_s30 + $0x50] sm:$0xff]  ;;  %v7809_v45 = vadd.f32 %v112_v32, %v75_v31  ;;  %v149_v46 = vadd.f32 %v148_v30, %v7769_v29  ;;  %v77_v47 = vld [vmem:[%s11623_s30 + $0x78] sm:$0xff]  ;;  %v7818_v49 = vadd.f32 %v110_v36, %v73_v35 }
  0x13   :  { %v107_v42 = vld [vmem:[%s11624_s24 + $0x40] sm:$0xff]  ;;  %v109_v44 = vld [vmem:[%s11624_s24 + $0x50] sm:$0xff]  ;;  %v114_v48 = vld [vmem:[%s11624_s24 + $0x78] sm:$0xff]  ;;  %v139_v54 = vadd.f32 %v7794_v39, %v7792_v38 }
  0x14   :  { %v74_v51 = vld [vmem:[%s11623_s30 + $0x60] sm:$0xff]  ;;  %v7828_v53 = vadd.f32 %v107_v42, %v70_v37  ;;  %v76_v55 = vld [vmem:[%s11623_s30 + $0x70] sm:$0xff]  ;;  %v7835_v56 = vadd.f32 %v109_v44, %v72_v43  ;;  %v157_v57 = vadd.f32 %v7798_v41, %v7796_v40  ;;  %v150_v59 = vadd.f32 %v149_v46, %v7809_v45 }
  0x15   :  { %329 = vperm.xlu1 %7003, %v138_v11   ;;  %v111_v52 = vld [vmem:[%s11624_s24 + $0x60] sm:$0xff]  ;;  %v113_v58 = vld [vmem:[%s11624_s24 + $0x70] sm:$0xff]  ;;  %v7843_v60 = vadd.f32 %v114_v48, %v77_v47  ;;  %v167_v61 = vadd.f32 %v166_v50, %v7818_v49 }
  0x16   :  { %324 = vperm.xlu0 %7002, %v137_v12   ;;  %v7846_v62 = vadd.f32 %v111_v52, %v74_v51  ;;  %v140_v63 = vadd.f32 %v139_v54, %v7828_v53  ;;  %v7849_v1 = vadd.f32 %v113_v58, %v76_v55  ;;  %v158_v2 = vadd.f32 %v157_v57, %v7835_v56 }
  0x17   :  { %11625 = vst [vmem:[#allocation2_spill] sm:$0xff] %v7843_v60  ;;  %v151_v3 = vrot.slane %v150_v59, 4  ;;  %v168_v4 = vadd.f32 %v167_v61, %v7843_v60 }
  0x18   :  { %11626 = vst [vmem:[#allocation3_spill] sm:$0xff] %v7849_v1  ;;  %v141_v5 = vadd.f32 %v140_v63, %v7846_v62  ;;  %v159_v6 = vadd.f32 %v158_v2, %v7849_v1 }
  0x19   :  { %v169_v7 = vrot.slane %v168_v4, 4  ;;  %v152_v10 = vadd.f32 %v151_v3, %v150_v59 }
  0x1a   :  { %v142_v8 = vrot.slane %v141_v5, 4  ;;  %v160_v9 = vrot.slane %v159_v6, 4 }
  0x1b   :  { %v170_v11 = vadd.f32 %v169_v7, %v168_v4  ;;  %v153_v13 = vrot.slane %v152_v10, 2 }
  0x1c   :  { %v143_v12 = vadd.f32 %v142_v8, %v141_v5  ;;  %v161_v14 = vadd.f32 %v160_v9, %v159_v6 }
  0x1d   :  { %v171_v15 = vrot.slane %v170_v11, 2  ;;  %v154_v17 = vadd.f32 %v153_v13, %v152_v10 }
  0x1e   :  { %v144_v16 = vrot.slane %v143_v12, 2  ;;  %v162_v20 = vrot.slane %v161_v14, 2 }
  0x1f   :  { %v172_v21 = vadd.f32 %v171_v15, %v170_v11  ;;  %v155_v23 = vrot.slane %v154_v17, 1 }
  0x20   :  { %v145_v22 = vadd.f32 %v144_v16, %v143_v12  ;;  %v163_v24 = vadd.f32 %v162_v20, %v161_v14 }
  0x21   :  { %v173_v25 = vrot.slane %v172_v21, 1  ;;  %v156_v27 = vadd.f32 %v155_v23, %v154_v17 }
  0x22   :  { %v146_v26 = vrot.slane %v145_v22, 1  ;;  %v164_v28 = vrot.slane %v163_v24, 1 }
  0x23   :  { %v174_v30 = vadd.f32 %v173_v25, %v172_v21  ;;  %v177_v32 = vmul.f32 0.03125, %v156_v27 }
  0x24   :  { %v147_v31 = vadd.f32 %v146_v26, %v145_v22  ;;  %v165_v35 = vadd.f32 %v164_v28, %v163_v24 }
  0x25   :  { %v179_v36 = vmul.f32 0.03125, %v174_v30  ;;  %v7856_v42 = vsub.f32 %v7738_v18, %v177_v32  ;;  %v7859_v43 = vsub.f32 %v7740_v19, %v177_v32  ;;  %v7868_v48 = vsub.f32 %v7769_v29, %v177_v32 }
  0x26   :  { %v176_v37 = vmul.f32 0.03125, %v147_v31  ;;  %v178_v44 = vmul.f32 0.03125, %v165_v35  ;;  %v7894_v63 = vsub.f32 %v7809_v45, %v177_v32 }
  0x27   :  { %v7862_v46 = vsub.f32 %v7779_v33, %v179_v36  ;;  %v7865_v47 = vsub.f32 %v7781_v34, %v179_v36  ;;  %v197_v52 = vmul.f32 %v7856_v42, %v7856_v42  ;;  %v201_v54 = vmul.f32 %v7859_v43, %v7859_v43 }
  0x28   :  { %v7871_v50 = vsub.f32 %v7792_v38, %v176_v37  ;;  %v7874_v51 = vsub.f32 %v7794_v39, %v176_v37  ;;  %v7881_v55 = vsub.f32 %v7796_v40, %v178_v44  ;;  %v7884_v57 = vsub.f32 %v7798_v41, %v178_v44 }
  0x29   :  { %v7887_v58 = vsub.f32 %v7818_v49, %v179_v36  ;;  %v199_v59 = vmul.f32 %v7862_v46, %v7862_v46  ;;  %v203_v61 = vmul.f32 %v7865_v47, %v7865_v47  ;;  %v205_v2 = vmul.f32 %v7868_v48, %v7868_v48 }
  0x2a   :  { %v7899_v3 = vsub.f32 %v7828_v53, %v176_v37  ;;  %v196_v4 = vmul.f32 %v7871_v50, %v7871_v50  ;;  %v200_v5 = vmul.f32 %v7874_v51, %v7874_v51  ;;  %v221_v6 = vadd.f32 %v201_v54, %v197_v52 }
  0x2b   :  { %v7906_v7 = vsub.f32 %v7835_v56, %v178_v44  ;;  %v198_v8 = vmul.f32 %v7881_v55, %v7881_v55  ;;  %v202_v9 = vmul.f32 %v7884_v57, %v7884_v57  ;;  %v7913_v10 = vsub.f32 %v7843_v60, %v179_v36 }
  0x2c   :  { %v207_v11 = vmul.f32 %v7887_v58, %v7887_v58  ;;  %v239_v12 = vadd.f32 %v203_v61, %v199_v59  ;;  %v209_v13 = vmul.f32 %v7894_v63, %v7894_v63  ;;  %v7920_v14 = vsub.f32 %v7846_v62, %v176_v37 }
  0x2d   :  { %v204_v15 = vmul.f32 %v7899_v3, %v7899_v3  ;;  %v212_v16 = vadd.f32 %v200_v5, %v196_v4  ;;  %v222_v17 = vadd.f32 %v221_v6, %v205_v2  ;;  %v7925_v20 = vsub.f32 %v7849_v1, %v178_v44 }
  0x2e   :  { %v206_v21 = vmul.f32 %v7906_v7, %v7906_v7  ;;  %v230_v22 = vadd.f32 %v202_v9, %v198_v8  ;;  %v211_v23 = vmul.f32 %v7913_v10, %v7913_v10  ;;  %v240_v24 = vadd.f32 %v239_v12, %v207_v11 }
  0x2f   :  { %v208_v25 = vmul.f32 %v7920_v14, %v7920_v14  ;;  %v213_v26 = vadd.f32 %v212_v16, %v204_v15  ;;  %v223_v27 = vadd.f32 %v222_v17, %v209_v13  ;;  %v210_v28 = vmul.f32 %v7925_v20, %v7925_v20 }
  0x30   :  { %v231_v30 = vadd.f32 %v230_v22, %v206_v21  ;;  %v241_v31 = vadd.f32 %v240_v24, %v211_v23 }
  0x31   :  { %v214_v32 = vadd.f32 %v213_v26, %v208_v25  ;;  %v224_v35 = vrot.slane %v223_v27, 4 }
  0x32   :  { %v232_v36 = vadd.f32 %v231_v30, %v210_v28  ;;  %v242_v37 = vrot.slane %v241_v31, 4 }
  0x33   :  { %v215_v44 = vrot.slane %v214_v32, 4  ;;  %v225_v52 = vadd.f32 %v224_v35, %v223_v27 }
  0x34   :  { %v233_v54 = vrot.slane %v232_v36, 4  ;;  %v243_v59 = vadd.f32 %v242_v37, %v241_v31  ;;  %v78_v37 = vlaneseq }
  0x35   :  { %v216_v61 = vadd.f32 %v215_v44, %v214_v32  ;;  %v226_v2 = vrot.slane %v225_v52, 2 }
  0x36   :  { %v234_v4 = vadd.f32 %v233_v54, %v232_v36  ;;  %v244_v5 = vrot.slane %v243_v59, 2  ;;  %v79_v44 = vand.u32 127, %v78_v37 }
  0x37   :  { %v217_v6 = vrot.slane %v216_v61, 2  ;;  %v227_v8 = vadd.f32 %v226_v2, %v225_v52 }
  0x38   :  { %v235_v9 = vrot.slane %v234_v4, 2  ;;  %v245_v11 = vadd.f32 %v244_v5, %v243_v59  ;;  %v80_v52 = vadd.s32 128, %v79_v44  ;;  %v82_v54 = vadd.s32 384, %v79_v44 }
  0x39   :  { %v218_v12 = vadd.f32 %v217_v6, %v216_v61  ;;  %v228_v13 = vrot.slane %v227_v8, 1 }
  0x3a   :  { %v236_v15 = vadd.f32 %v235_v9, %v234_v4  ;;  %v246_v16 = vrot.slane %v245_v11, 1  ;;  %v84_v4 = vand.u32 255, %v80_v52  ;;  %v86_v5 = vand.u32 255, %v82_v54 }
  0x3b   :  { %v219_v17 = vrot.slane %v218_v12, 1  ;;  %v229_v21 = vadd.f32 %v228_v13, %v227_v8 }
  0x3c   :  { %v237_v22 = vrot.slane %v236_v15, 1  ;;  %v247_v23 = vadd.f32 %v246_v16, %v245_v11  ;;  %vm88_vm0 = vcmp.lt.s32.totalorder %v84_v4, 204  ;;  %vm90_vm1 = vcmp.lt.s32.totalorder %v86_v5, 204 }
  0x3d   :  { %v220_v24 = vadd.f32 %v219_v17, %v218_v12  ;;  %v249_v25 = vmul.f32 0.03125, %v229_v21 }
  0x3e   :  { %v238_v26 = vadd.f32 %v237_v22, %v236_v15  ;;  %v251_v27 = vmul.f32 0.03125, %v247_v23 }
  0x3f   :  { %v248_v28 = vmul.f32 0.03125, %v220_v24  ;;  %v253_v30 = vadd.f32 1e-06, %v249_v25  ;;  %v7581_v25 = vmov 0.0  }
  0x40   :  { %v250_v31 = vmul.f32 0.03125, %v238_v26  ;;  %v255_v32 = vadd.f32 1e-06, %v251_v27  ;;  %v7945_v26 = vsel %vm88_vm0, 1.0, %v7581_v25 }
  0x41   :  { %v252_v35 = vadd.f32 1e-06, %v248_v28  ;;  %7094 = vrsqrt.f32 %v253_v30  ;;  %11627 = vst [vmem:[#allocation4_spill] sm:$0xff] %v7945_v26 }
  0x42   :  { %v254_v36 = vadd.f32 1e-06, %v250_v31  ;;  %7096 = vrsqrt.f32 %v255_v32 }
  0x43   :  { %7098 = vrsqrt.f32 %v252_v35 }
  0x44   :  { %7100 = vrsqrt.f32 %v254_v36 }
  0x4b   :  { %v7095_v59 = vpop.eup %7094 }
  0x4c   :  { %v7097_v61 = vpop.eup %7096  ;;  %v261_v8 = vmul.f32 %v7095_v59, %v7856_v42  ;;  %v265_v16 = vmul.f32 %v7095_v59, %v7859_v43  ;;  %v269_v24 = vmul.f32 %v7095_v59, %v7868_v48 }
  0x4d   :  { %v7099_v2 = vpop.eup %7098  ;;  %v263_v9 = vmul.f32 %v7097_v61, %v7862_v46  ;;  %v267_v21 = vmul.f32 %v7097_v61, %v7865_v47  ;;  %v273_v46 = vmul.f32 %v7095_v59, %v7894_v63  ;;  %v275_v43 = vmul.f32 %v7097_v61, %v7913_v10 }
  0x4e   :  { %v7101_v6 = vpop.eup %7100  ;;  %v260_v13 = vmul.f32 %v7099_v2, %v7871_v50  ;;  %v264_v23 = vmul.f32 %v7099_v2, %v7874_v51  ;;  %v7947_v50 = vsel %vm90_vm1, 1.0, %v7581_v25  ;;  %v271_v47 = vmul.f32 %v7097_v61, %v7887_v58 }
  0x4f   :  { %v262_v15 = vmul.f32 %v7101_v6, %v7881_v55  ;;  %v266_v42 = vmul.f32 %v7101_v6, %v7884_v57  ;;  %11628 = vst [vmem:[#allocation5_spill] sm:$0xff] %v7947_v50  ;;  %v268_v48 = vmul.f32 %v7099_v2, %v7899_v3  ;;  %v272_v36 = vmul.f32 %v7099_v2, %v7920_v14 }
  0x50   :  { %v270_v52 = vmul.f32 %v7101_v6, %v7906_v7  ;;  %v274_v10 = vmul.f32 %v7101_v6, %v7925_v20 }
  0x88   :  { %v315_v11 = vpop.permute.xlu1 %314 }
  0x89   :  { %v279_v12 = vpop.permute.xlu0 %278 }
  0x8a   :  { %v297_v17 = vmul.f32 %v279_v12, %v261_v8  ;;  %v299_v22 = vmul.f32 %v279_v12, %v263_v9  ;;  %v296_v28 = vmul.f32 %v279_v12, %v260_v13  ;;  %v298_v30 = vmul.f32 %v279_v12, %v262_v15 }
  0x8c   :  { %v320_v55 = vpop.permute.xlu1 %319  ;;  %v333_v31 = vadd.f32 %v315_v11, %v297_v17  ;;  %v335_v32 = vadd.f32 %v315_v11, %v299_v22  ;;  %v332_v59 = vadd.f32 %v315_v11, %v296_v28  ;;  %v334_v4 = vadd.f32 %v315_v11, %v298_v30 }
  0x8d   :  { %v284_v27 = vpop.permute.xlu0 %283 }
  0x8e   :  { %v301_v51 = vmul.f32 %v284_v27, %v265_v16  ;;  %v303_v57 = vmul.f32 %v284_v27, %v267_v21  ;;  %v300_v63 = vmul.f32 %v284_v27, %v264_v23  ;;  %v302_v35 = vmul.f32 %v284_v27, %v266_v42 }
  0x8f   :  { %v349_v12 = vmul.f32 %v7945_v26, %v333_v31  ;;  %v351_v3 = vmul.f32 %v7947_v50, %v335_v32 }
  0x90   :  { %v337_v37 = vadd.f32 %v320_v55, %v301_v51  ;;  %v339_v44 = vadd.f32 %v320_v55, %v303_v57  ;;  %v294_v54 = vpop.permute.xlu1 %293  ;;  %v336_v61 = vadd.f32 %v320_v55, %v300_v63  ;;  %v338_v5 = vadd.f32 %v320_v55, %v302_v35 }
  0x91   :  { %v289_v58 = vpop.permute.xlu0 %288  ;;  %v309_v8 = vmul.f32 %v294_v54, %v273_v46  ;;  %v311_v9 = vmul.f32 %v294_v54, %v275_v43  ;;  %v308_v16 = vmul.f32 %v294_v54, %v272_v36  ;;  %v310_v42 = vmul.f32 %v294_v54, %v274_v10  ;;  %v7044_v36 = vld [vmem:[%s11484_s4] sm:$0xff]   ;;  %v7049_v54 = vld [vmem:[%s11484_s4 + $0x28] sm:$0xff]  }
  0x92   :  { %v305_v13 = vmul.f32 %v289_v58, %v269_v24  ;;  %v307_v14 = vmul.f32 %v289_v58, %v271_v47  ;;  %v353_v2 = vmul.f32 %v7945_v26, %v337_v37  ;;  %v355_v7 = vmul.f32 %v7947_v50, %v339_v44  ;;  %v7045_v37 = vld [vmem:[%s11484_s4 + $0x8] sm:$0xff]   ;;  %v7046_v44 = vld [vmem:[%s11484_s4 + $0x10] sm:$0xff]   ;;  %v7048_v10 = vld [vmem:[%s11484_s4 + $0x20] sm:$0xff]  }
  0x93   :  { %v388_v15 = vpack.c.bf16 %v336_v61, %v332_v59  ;;  %v390_v20 = vpack.c.bf16 %v338_v5, %v334_v4  ;;  %v304_v6 = vmul.f32 %v289_v58, %v268_v48  ;;  %v306_v23 = vmul.f32 %v289_v58, %v270_v52  ;;  %v7047_v52 = vld [vmem:[%s11484_s4 + $0x18] sm:$0xff]   ;;  %v7050_v58 = vld [vmem:[%s11484_s4 + $0x30] sm:$0xff]   ;;  %v7052_v61 = vld [vmem:[%s11484_s4 + $0x40] sm:$0xff]  }
  0x94   :  { %v330_v17 = vpop.permute.xlu1 %329  ;;  %v389_v11 = vpack.c.bf16 %v353_v2, %v349_v12  ;;  %v391_v22 = vpack.c.bf16 %v355_v7, %v351_v3  ;;  %v7051_v59 = vld [vmem:[%s11484_s4 + $0x38] sm:$0xff]   ;;  %v7053_v4 = vld [vmem:[%s11484_s4 + $0x48] sm:$0xff]   ;;  %v7054_v5 = vld [vmem:[%s11484_s4 + $0x50] sm:$0xff]  }
  0x95   :  { %v325_v21 = vpop.permute.xlu0 %324  ;;  %v345_v25 = vadd.f32 %v330_v17, %v309_v8  ;;  %v347_v27 = vadd.f32 %v330_v17, %v311_v9  ;;  %v344_v43 = vadd.f32 %v330_v17, %v308_v16  ;;  %v346_v57 = vadd.f32 %v330_v17, %v310_v42  ;;  %v7055_v8 = vld [vmem:[%s11484_s4 + $0x58] sm:$0xff]  }
  0x96   :  { %v341_v46 = vadd.f32 %v325_v21, %v305_v13  ;;  %v343_v55 = vadd.f32 %v325_v21, %v307_v14  ;;  %493 = vmatprep.subr.bf16.mxu0 %v389_v11  ;;  %646 = vmatprep.subr.bf16.mxu1 %v391_v22  ;;  %v340_v24 = vadd.f32 %v325_v21, %v304_v6 }
  0x97   :  { %v342_v47 = vadd.f32 %v325_v21, %v306_v23  ;;  %494 = vmatpush1.bf16.msra.mxu0 %v388_v15  ;;  %647 = vmatpush1.bf16.msra.mxu1 %v390_v20  ;;  %v361_v30 = vmul.f32 %v7945_v26, %v345_v25  ;;  %v363_v31 = vmul.f32 %v7947_v50, %v347_v27 }
  0x98   :  { %v357_v28 = vmul.f32 %v7945_v26, %v341_v46  ;;  %v359_v51 = vmul.f32 %v7947_v50, %v343_v55  ;;  %v392_v35 = vpack.c.bf16 %v344_v43, %v340_v24 }
  0x99   :  { %v394_v48 = vpack.c.bf16 %v346_v57, %v342_v47 }
  0x9a   :  { %v393_v32 = vpack.c.bf16 %v361_v30, %v357_v28  ;;  %v395_v63 = vpack.c.bf16 %v363_v31, %v359_v51 }
  0x9c   :  { %495 = vmatprep.subr.bf16.mxu0 %v393_v32  ;;  %648 = vmatprep.subr.bf16.mxu1 %v395_v63 }
  0x9d   :  { %496 = vmatpush1.bf16.msra.mxu0 %v392_v35  ;;  %649 = vmatpush1.bf16.msra.mxu1 %v394_v48 }
  0xa0   :  { %6769 = vmatmul.mubr.msk.bf16.vlgmr.msra.gmra.mrb[0].mxu0 %vm456_vm2, %v7044_v36  ;;  %6781 = vmatmul.mubr.msk.bf16.vlgmr.msra.gmra.mrb[0].mxu1 %vm456_vm2, %v7044_v36 }
  0xa1   :  { %535 = vmatprep.mubr.bf16.mxu0 %v11505_v0  ;;  %688 = vmatprep.mubr.bf16.mxu1 %v11505_v0 }
  0xa8   :  { %6770 = vmatmul.mubr.msk.bf16.gmra.mrb[4].mxu0 %vm456_vm2, %v7045_v37  ;;  %6782 = vmatmul.mubr.msk.bf16.gmra.mrb[4].mxu1 %vm456_vm2, %v7045_v37 }
  0xa9   :  { %545 = vmatprep.mubr.bf16.mxu0 %v11505_v0  ;;  %698 = vmatprep.mubr.bf16.mxu1 %v11505_v0 }
  0xb0   :  { %6771 = vmatmul.mubr.msk.bf16.gmra.mrb[8].mxu0 %vm456_vm2, %v7046_v44  ;;  %6783 = vmatmul.mubr.msk.bf16.gmra.mrb[8].mxu1 %vm456_vm2, %v7046_v44 }
  0xb1   :  { %555 = vmatprep.mubr.bf16.mxu0 %v11505_v0  ;;  %708 = vmatprep.mubr.bf16.mxu1 %v11505_v0 }
  0xb8   :  { %6772 = vmatmul.mubr.msk.bf16.gmra.mrb[12].mxu0 %vm456_vm2, %v7047_v52  ;;  %6784 = vmatmul.mubr.msk.bf16.gmra.mrb[12].mxu1 %vm456_vm2, %v7047_v52 }
  0xb9   :  { %565 = vmatprep.mubr.bf16.mxu0 %v11505_v0  ;;  %718 = vmatprep.mubr.bf16.mxu1 %v11505_v0 }
  0xc0   :  { %6773 = vmatmul.mubr.msk.bf16.gmra.mrb[16].mxu0 %vm456_vm2, %v7048_v10  ;;  %6785 = vmatmul.mubr.msk.bf16.gmra.mrb[16].mxu1 %vm456_vm2, %v7048_v10 }
  0xc1   :  { %575 = vmatprep.mubr.bf16.mxu0 %v11505_v0  ;;  %728 = vmatprep.mubr.bf16.mxu1 %v11505_v0 }
  0xc8   :  { %6774 = vmatmul.mubr.msk.bf16.gmra.mrb[20].mxu0 %vm456_vm2, %v7049_v54  ;;  %6786 = vmatmul.mubr.msk.bf16.gmra.mrb[20].mxu1 %vm456_vm2, %v7049_v54 }
  0xc9   :  { %585 = vmatprep.mubr.bf16.mxu0 %v11505_v0  ;;  %738 = vmatprep.mubr.bf16.mxu1 %v11505_v0 }
  0xd0   :  { %6775 = vmatmul.mubr.msk.bf16.gmra.mrb[24].mxu0 %vm456_vm2, %v7050_v58  ;;  %6787 = vmatmul.mubr.msk.bf16.gmra.mrb[24].mxu1 %vm456_vm2, %v7050_v58 }
  0xd1   :  { %595 = vmatprep.mubr.bf16.mxu0 %v11505_v0  ;;  %748 = vmatprep.mubr.bf16.mxu1 %v11505_v0 }
  0xd8   :  { %6776 = vmatmul.mubr.msk.bf16.gmra.mrb[28].mxu0 %vm456_vm2, %v7051_v59  ;;  %6788 = vmatmul.mubr.msk.bf16.gmra.mrb[28].mxu1 %vm456_vm2, %v7051_v59 }
  0xd9   :  { %605 = vmatprep.mubr.bf16.mxu0 %v11505_v0  ;;  %758 = vmatprep.mubr.bf16.mxu1 %v11505_v0 }
  0xe0   :  { %6777 = vmatmul.mubr.msk.bf16.gmra.mrb[32].mxu0 %vm456_vm2, %v7052_v61  ;;  %6789 = vmatmul.mubr.msk.bf16.gmra.mrb[32].mxu1 %vm456_vm2, %v7052_v61 }
  0xe1   :  { %615 = vmatprep.mubr.bf16.mxu0 %v11505_v0  ;;  %768 = vmatprep.mubr.bf16.mxu1 %v11505_v0 }
  0xe8   :  { %6778 = vmatmul.mubr.msk.bf16.gmra.mrb[36].mxu0 %vm456_vm2, %v7053_v4  ;;  %6790 = vmatmul.mubr.msk.bf16.gmra.mrb[36].mxu1 %vm456_vm2, %v7053_v4 }
  0xe9   :  { %625 = vmatprep.mubr.bf16.mxu0 %v11505_v0  ;;  %778 = vmatprep.mubr.bf16.mxu1 %v11505_v0 }
  0xf0   :  { %6779 = vmatmul.mubr.msk.bf16.gmra.mrb[40].mxu0 %vm456_vm2, %v7054_v5  ;;  %6791 = vmatmul.mubr.msk.bf16.gmra.mrb[40].mxu1 %vm456_vm2, %v7054_v5 }
  0xf1   :  { %635 = vmatprep.mubr.bf16.mxu0 %v11505_v0  ;;  %788 = vmatprep.mubr.bf16.mxu1 %v11505_v0 }
  0xf8   :  { %6780 = vmatmul.mubr.msk.bf16.gmra.mrb[44].mxu0 %vm456_vm2, %v7055_v8  ;;  %6792 = vmatmul.mubr.msk.bf16.gmra.mrb[44].mxu1 %vm456_vm2, %v7055_v8 }
 0x173   :  { %v8045_v9 = vpop.f32.mrb[0].mxu0  ;;  %v8047_v3 = vpop.f32.mrb[0].mxu1 }
 0x174   :  { %v529_v12 = vpop.f32.mrb[1].mxu0  ;;  %v8051_v14 = vpop.f32.mrb[1].mxu1 }
 0x175   :  { %v8049_v13 = vpop.f32.mrb[2].mxu0  ;;  %v8055_v15 = vpop.f32.mrb[2].mxu1 }
 0x176   :  { %v533_v7 = vpop.f32.mrb[3].mxu0  ;;  %v8059_v16 = vpop.f32.mrb[3].mxu1 }
 0x177   :  { %v800_v20 = vpack.c.bf16 %v533_v7, %v529_v12 }
 0x179   :  { %879 = vmatprep.mubr.bf16.mxu0 %v800_v20 }
 0x17b   :  { %v8063_v21 = vpop.f32.mrb[4].mxu0  ;;  %v8067_v22 = vpop.f32.mrb[4].mxu1 }
 0x17c   :  { %v8065_v11 = vpop.f32.mrb[5].mxu0  ;;  %v8071_v42 = vpop.f32.mrb[5].mxu1 }
 0x17d   :  { %v8069_v23 = vpop.f32.mrb[6].mxu0  ;;  %v8077_v55 = vpop.f32.mrb[6].mxu1 }
 0x17e   :  { %v8075_v25 = vpop.f32.mrb[7].mxu0  ;;  %v8083_v43 = vpop.f32.mrb[7].mxu1 }
 0x183   :  { %v8087_v28 = vpop.f32.mrb[8].mxu0  ;;  %v8089_v51 = vpop.f32.mrb[8].mxu1 }
 0x184   :  { %v549_v30 = vpop.f32.mrb[9].mxu0  ;;  %v8093_v57 = vpop.f32.mrb[9].mxu1 }
 0x185   :  { %v8091_v31 = vpop.f32.mrb[10].mxu0  ;;  %v8097_v35 = vpop.f32.mrb[10].mxu1 }
 0x186   :  { %v553_v63 = vpop.f32.mrb[11].mxu0  ;;  %v8101_v37 = vpop.f32.mrb[11].mxu1 }
 0x187   :  { %v808_v48 = vpack.c.bf16 %v553_v63, %v549_v30 }
 0x189   :  { %1030 = vmatprep.mubr.bf16.mxu1 %v808_v48 }
 0x18b   :  { %v8105_v52 = vpop.f32.mrb[12].mxu0  ;;  %v8109_v54 = vpop.f32.mrb[12].mxu1 }
 0x18c   :  { %v8107_v10 = vpop.f32.mrb[13].mxu0  ;;  %v8113_v59 = vpop.f32.mrb[13].mxu1 }
 0x18d   :  { %v8111_v58 = vpop.f32.mrb[14].mxu0  ;;  %v8119_v5 = vpop.f32.mrb[14].mxu1 }
 0x18e   :  { %v8117_v4 = vpop.f32.mrb[15].mxu0  ;;  %v8125_v7 = vpop.f32.mrb[15].mxu1 }
 0x193   :  { %v567_v30 = vpop.f32.mrb[16].mxu0  ;;  %v8129_v48 = vpop.f32.mrb[16].mxu1 }
 0x194   :  { %v569_v63 = vpop.f32.mrb[17].mxu0  ;;  %v722_v44 = vpop.f32.mrb[17].mxu1 }
 0x195   :  { %v571_v36 = vpop.f32.mrb[18].mxu0  ;;  %v8131_v6 = vpop.f32.mrb[18].mxu1 }
 0x196   :  { %v815_v24 = vpack.c.bf16 %v571_v36, %v567_v30  ;;  %v573_v47 = vpop.f32.mrb[19].mxu0  ;;  %v817_v61 = vpack.c.bf16 %v8131_v6, %v8129_v48  ;;  %v726_v12 = vpop.f32.mrb[19].mxu1 }
 0x197   :  { %v816_v17 = vpack.c.bf16 %v573_v47, %v569_v63  ;;  %v818_v8 = vpack.c.bf16 %v726_v12, %v722_v44 }
 0x199   :  { %847 = vmatprep.subr.bf16.mxu0 %v816_v17 }
 0x19a   :  { %848 = vmatpush1.bf16.xpose.msra.mxu0 %v815_v24 }
 0x19b   :  { %v577_v32 = vpop.f32.mrb[20].mxu0  ;;  %v8135_v0 = vpop.f32.mrb[20].mxu1 }
 0x19c   :  { %v579_v20 = vpop.f32.mrb[21].mxu0  ;;  %v732_v27 = vpop.f32.mrb[21].mxu1 }
 0x19d   :  { %v581_v46 = vpop.f32.mrb[22].mxu0  ;;  %v734_v36 = vpop.f32.mrb[22].mxu1 }
 0x19e   :  { %v819_v2 = vpack.c.bf16 %v581_v46, %v577_v32  ;;  %v583_v50 = vpop.f32.mrb[23].mxu0  ;;  %v821_v26 = vpack.c.bf16 %v734_v36, %v8135_v0  ;;  %v736_v47 = vpop.f32.mrb[23].mxu1  ;;  %v11630_v32 = vpack.c.bf16 %v8075_v25, %v8065_v11  ;;  %v11631_v25 = vpack.c.bf16 %v8069_v23, %v8063_v21 }
 0x19f   :  { %v820_v30 = vpack.c.bf16 %v583_v50, %v579_v20  ;;  %v822_v63 = vpack.c.bf16 %v736_v47, %v732_v27  ;;  %v11629_v27 = vpack.c.bf16 %v8049_v13, %v8045_v9  ;;  %v11633_v9 = vpack.c.bf16 %v8091_v31, %v8087_v28 }
 0x1a0   :  { %v11634_v21 = vpack.c.bf16 %v8117_v4, %v8107_v10  ;;  %v11636_v28 = vpack.c.bf16 %v8059_v16, %v8051_v14 }
 0x1a1   :  { %849 = vmatprep.subr.bf16.mxu0 %v820_v30 }
 0x1a2   :  { %850 = vmatpush1.bf16.xpose.msra.mxu0 %v819_v2 }
 0x1a3   :  { %v587_v6 = vpop.f32.mrb[24].mxu0  ;;  %v8138_v17 = vpop.f32.mrb[24].mxu1 }
 0x1a4   :  { %v589_v44 = vpop.f32.mrb[25].mxu0  ;;  %v8140_v12 = vpop.f32.mrb[25].mxu1 }
 0x1a5   :  { %v591_v24 = vpop.f32.mrb[26].mxu0  ;;  %v8142_v1 = vpop.f32.mrb[26].mxu1 }
 0x1a6   :  { %v823_v48 = vpack.c.bf16 %v591_v24, %v587_v6  ;;  %v593_v60 = vpop.f32.mrb[27].mxu0  ;;  %v8146_v0 = vpop.f32.mrb[27].mxu1 }
 0x1a7   :  { %v824_v46 = vpack.c.bf16 %v593_v60, %v589_v44  ;;  %v826_v2 = vpack.c.bf16 %v8146_v0, %v8140_v12 }
 0x1a9   :  { %880 = vmatmul.mubr.bf16.vlgmr.msra.gmra.mrb[48].mxu0 %v11629_v27  ;;  %998 = vmatprep.subr.bf16.mxu1 %v824_v46 }
 0x1aa   :  { %887 = vmatprep.mubr.bf16.mxu0 %v11630_v32  ;;  %999 = vmatpush1.bf16.xpose.msra.mxu1 %v823_v48  ;;  %v11632_v48 = vmov 0  }
 0x1ab   :  { %v597_v20 = vpop.f32.mrb[28].mxu0  ;;  %v8156_v36 = vpop.f32.mrb[28].mxu1 }
 0x1ac   :  { %v599_v60 = vpop.f32.mrb[29].mxu0  ;;  %v8158_v47 = vpop.f32.mrb[29].mxu1 }
 0x1ad   :  { %v601_v30 = vpop.f32.mrb[30].mxu0  ;;  %v8160_v24 = vpop.f32.mrb[30].mxu1 }
 0x1ae   :  { %v827_v6 = vpack.c.bf16 %v601_v30, %v597_v20  ;;  %v603_v44 = vpop.f32.mrb[31].mxu0  ;;  %v8164_v13 = vpop.f32.mrb[31].mxu1 }
 0x1af   :  { %v828_v50 = vpack.c.bf16 %v603_v44, %v599_v60 }
 0x1b1   :  { %888 = vmatmul.mubr.bf16.gmra.mrb[52].mxu0 %v11631_v25  ;;  %1000 = vmatprep.subr.bf16.mxu1 %v828_v50 }
 0x1b2   :  { %1001 = vmatpush1.bf16.xpose.msra.mxu1 %v827_v6  ;;  %1222 = vmatprep.mubr.bf16.mxu0 %v11632_v48 }
 0x1b3   :  { %1243 = vmatprep.subr.bf16.mxu1 %v818_v8  ;;  %v607_v46 = vpop.f32.mrb[32].mxu0  ;;  %v760_v32 = vpop.f32.mrb[32].mxu1 }
 0x1b4   :  { %v609_v27 = vpop.f32.mrb[33].mxu0 }
 0x1b5   :  { %v611_v20 = vpop.f32.mrb[34].mxu0 }
 0x1b6   :  { %v831_v60 = vpack.c.bf16 %v611_v20, %v607_v46  ;;  %v613_v30 = vpop.f32.mrb[35].mxu0  ;;  %v11637_v20 = vpack.c.bf16 %v8055_v15, %v8047_v3  ;;  %v762_v3 = vpop.f32.mrb[33].mxu1 }
 0x1b7   :  { %v832_v44 = vpack.c.bf16 %v613_v30, %v609_v27  ;;  %v11635_v27 = vpack.c.bf16 %v8111_v58, %v8105_v52  ;;  %v11638_v52 = vpack.c.bf16 %v8083_v43, %v8071_v42  ;;  %v764_v15 = vpop.f32.mrb[34].mxu1 }
 0x1b8   :  { %v766_v42 = vpop.f32.mrb[35].mxu1 }
 0x1b9   :  { %1031 = vmatmul.mubr.bf16.vlgmr.msra.gmra.mrb[48].mxu1 %v11633_v9  ;;  %1190 = vmatprep.subr.bf16.mxu0 %v832_v44  ;;  %v11639_v44 = vpack.c.bf16 %v8077_v55, %v8067_v22  ;;  %v834_v43 = vpack.c.bf16 %v766_v42, %v762_v3 }
 0x1ba   :  { %1038 = vmatprep.mubr.bf16.mxu1 %v11634_v21  ;;  %1244 = vmatpush1.bf16.xpose.msra.mxu1 %v817_v61  ;;  %v833_v21 = vpack.c.bf16 %v764_v15, %v760_v32 }
 0x1bb   :  { %1245 = vmatprep.subr.bf16.mxu1 %v822_v63  ;;  %v617_v23 = vpop.f32.mrb[36].mxu0  ;;  %1191 = vmatpush1.bf16.msra.mxu0 %v831_v60 }
 0x1bc   :  { %v619_v8 = vpop.f32.mrb[37].mxu0 }
 0x1bd   :  { %v621_v50 = vpop.f32.mrb[38].mxu0 }
 0x1be   :  { %v835_v6 = vpack.c.bf16 %v621_v50, %v617_v23  ;;  %v623_v25 = vpop.f32.mrb[39].mxu0  ;;  %v770_v23 = vpop.f32.mrb[36].mxu1 }
 0x1bf   :  { %v836_v46 = vpack.c.bf16 %v623_v25, %v619_v8  ;;  %v772_v8 = vpop.f32.mrb[37].mxu1 }
 0x1c0   :  { %v774_v50 = vpop.f32.mrb[38].mxu1 }
 0x1c1   :  { %1039 = vmatmul.mubr.bf16.gmra.mrb[52].mxu1 %v11635_v27  ;;  %1192 = vmatprep.subr.bf16.mxu0 %v836_v46  ;;  %v776_v22 = vpop.f32.mrb[39].mxu1 }
 0x1c2   :  { %1246 = vmatpush1.bf16.xpose.msra.mxu1 %v821_v26  ;;  %1275 = vmatprep.mubr.bf16.mxu1 %v11636_v28  ;;  %v838_v55 = vpack.c.bf16 %v776_v22, %v772_v8 }
 0x1c3   :  { %v627_v31 = vpop.f32.mrb[40].mxu0  ;;  %1193 = vmatpush1.bf16.msra.mxu0 %v835_v6  ;;  %1586 = vmatprep.subr.bf16.mxu1 %v834_v43  ;;  %v837_v6 = vpack.c.bf16 %v774_v50, %v770_v23  ;;  %v780_v25 = vpop.f32.mrb[40].mxu1 }
 0x1c4   :  { %v629_v10 = vpop.f32.mrb[41].mxu0  ;;  %v782_v46 = vpop.f32.mrb[41].mxu1 }
 0x1c5   :  { %v631_v61 = vpop.f32.mrb[42].mxu0  ;;  %v784_v27 = vpop.f32.mrb[42].mxu1 }
 0x1c6   :  { %v839_v4 = vpack.c.bf16 %v631_v61, %v627_v31  ;;  %v633_v63 = vpop.f32.mrb[43].mxu0  ;;  %v786_v12 = vpop.f32.mrb[43].mxu1 }
 0x1c7   :  { %v840_v9 = vpack.c.bf16 %v633_v63, %v629_v10  ;;  %v842_v0 = vpack.c.bf16 %v786_v12, %v782_v46 }
 0x1c9   :  { %1276 = vmatmul.mubr.bf16.vlgmr.msra.gmra.mrb[56].mxu1 %v11637_v20  ;;  %1194 = vmatprep.subr.bf16.mxu0 %v840_v9 }
 0x1ca   :  { %1283 = vmatprep.mubr.bf16.mxu1 %v11638_v52  ;;  %1195 = vmatpush1.bf16.msra.mxu0 %v839_v4 }
 0x1cb   :  { %v637_v26 = vpop.f32.mrb[44].mxu0  ;;  %1587 = vmatpush1.bf16.msra.mxu1 %v833_v21  ;;  %v790_v28 = vpop.f32.mrb[44].mxu1 }
 0x1cc   :  { %v639_v14 = vpop.f32.mrb[45].mxu0  ;;  %1588 = vmatprep.subr.bf16.mxu1 %v838_v55  ;;  %v792_v32 = vpop.f32.mrb[45].mxu1 }
 0x1cd   :  { %v641_v16 = vpop.f32.mrb[46].mxu0  ;;  %v794_v31 = vpop.f32.mrb[46].mxu1 }
 0x1ce   :  { %v843_v58 = vpack.c.bf16 %v641_v16, %v637_v26  ;;  %v643_v60 = vpop.f32.mrb[47].mxu0  ;;  %v796_v10 = vpop.f32.mrb[47].mxu1  ;;  %v845_v61 = vpack.c.bf16 %v794_v31, %v790_v28 }
 0x1cf   :  { %v844_v30 = vpack.c.bf16 %v643_v60, %v639_v14  ;;  %1589 = vmatpush1.bf16.msra.mxu1 %v837_v6  ;;  %v846_v4 = vpack.c.bf16 %v796_v10, %v792_v32 }
 0x1d0   :  { %1590 = vmatprep.subr.bf16.mxu1 %v842_v0 }
 0x1d1   :  { %1284 = vmatmul.mubr.bf16.gmra.mrb[60].mxu1 %v11639_v44  ;;  %1196 = vmatprep.subr.bf16.mxu0 %v844_v30 }
 0x1d2   :  { %1618 = vmatprep.mubr.bf16.mxu1 %v11632_v48  ;;  %1197 = vmatpush1.bf16.msra.mxu0 %v843_v58 }
 0x1d3   :  { %1394 = vmatprep.subr.bf16.mxu0 %v826_v2  ;;  %v841_v2 = vpack.c.bf16 %v784_v27, %v780_v25 }
 0x1d5   :  { %1591 = vmatpush1.bf16.msra.mxu1 %v841_v2 }
 0x1d6   :  { %1592 = vmatprep.subr.bf16.mxu1 %v846_v4 }
 0x1d9   :  { %1593 = vmatpush1.bf16.msra.mxu1 %v845_v61 }
 0x27c   :  { %v8197_v63 = vpop.f32.mrb[48].mxu0 }
 0x27d   :  { %v883_v9 = vpop.f32.mrb[49].mxu0  ;;  %v896_v43 = vsel %vm456_vm2, %v8197_v63, 0.0 }
 0x27e   :  { %v8199_v20 = vpop.f32.mrb[50].mxu0 }
 0x27f   :  { %v886_v52 = vpop.f32.mrb[51].mxu0  ;;  %v899_v46 = vsel %vm456_vm2, %v8199_v20, 0.0 }
 0x284   :  { %v8201_v26 = vpop.f32.mrb[52].mxu0 }
 0x285   :  { %v891_v14 = vpop.f32.mrb[53].mxu0  ;;  %v902_v55 = vsel %vm456_vm2, %v8201_v26, 0.0 }
 0x286   :  { %v8203_v16 = vpop.f32.mrb[54].mxu0 }
 0x287   :  { %v894_v58 = vpop.f32.mrb[55].mxu0  ;;  %v905_v2 = vsel %vm456_vm2, %v8203_v16, 0.0 }
 0x28c   :  { %v1032_v60 = vpop.f32.mrb[48].mxu1 }
 0x28d   :  { %v1034_v30 = vpop.f32.mrb[49].mxu1  ;;  %v1047_v44 = vsel %vm456_vm2, %v1032_v60, 0.0 }
 0x28e   :  { %1048 = vadd.xlane.f32.xlu0 %v1047_v44  ;;  %v1035_v3 = vpop.f32.mrb[50].mxu1 }
 0x28f   :  { %v1037_v15 = vpop.f32.mrb[51].mxu1  ;;  %v1050_v42 = vsel %vm456_vm2, %v1035_v3, 0.0 }
 0x290   :  { %1051 = vadd.xlane.f32.xlu1 %v1050_v42 }
 0x294   :  { %v1040_v21 = vpop.f32.mrb[52].mxu1  ;;  %897 = vadd.xlane.f32.xlu1 %v896_v43 }
 0x295   :  { %v1042_v23 = vpop.f32.mrb[53].mxu1  ;;  %v1053_v8 = vsel %vm456_vm2, %v1040_v21, 0.0 }
 0x296   :  { %1054 = vadd.xlane.f32.xlu0 %v1053_v8  ;;  %v1043_v50 = vpop.f32.mrb[54].mxu1 }
 0x297   :  { %v1045_v22 = vpop.f32.mrb[55].mxu1  ;;  %v1056_v6 = vsel %vm456_vm2, %v1043_v50, 0.0 }
 0x298   :  { %903 = vadd.xlane.f32.xlu1 %v902_v55 }
 0x29a   :  { %1057 = vadd.xlane.f32.xlu0 %v1056_v6 }
 0x29c   :  { %v8213_v25 = vpop.f32.mrb[56].mxu1 }
 0x29d   :  { %v1279_v27 = vpop.f32.mrb[57].mxu1 }
 0x29e   :  { %900 = vadd.xlane.f32.xlu0 %v899_v46  ;;  %v8217_v12 = vpop.f32.mrb[58].mxu1 }
 0x29f   :  { %v1282_v0 = vpop.f32.mrb[59].mxu1 }
 0x2a2   :  { %906 = vadd.xlane.f32.xlu0 %v905_v2 }
 0x2a4   :  { %v8221_v28 = vpop.f32.mrb[60].mxu1 }
 0x2a5   :  { %v1287_v32 = vpop.f32.mrb[61].mxu1 }
 0x2a6   :  { %v8223_v31 = vpop.f32.mrb[62].mxu1 }
 0x2a7   :  { %v1290_v10 = vpop.f32.mrb[63].mxu1 }
 0x31b   :  { %v1049_v61 = vpop.xlane.xlu0 %1048 }
 0x31d   :  { %v1052_v4 = vpop.xlane.xlu1 %1051 }
 0x31e   :  { %v1059_v52 = vadd.f32 %v1052_v4, %v1049_v61 }
 0x321   :  { %v898_v58 = vpop.xlane.xlu1 %897 }
 0x323   :  { %v1055_v9 = vpop.xlane.xlu0 %1054 }
 0x324   :  { %v1060_v14 = vadd.f32 %v1059_v52, %v1055_v9 }
 0x325   :  { %v904_v8 = vpop.xlane.xlu1 %903 }
 0x327   :  { %v1058_v30 = vpop.xlane.xlu0 %1057 }
 0x328   :  { %v1061_v44 = vadd.f32 %v1060_v14, %v1058_v30 }
 0x32a   :  { %v1062_v15 = vrot.slane %v1061_v44, 4 }
 0x32b   :  { %v901_v42 = vpop.xlane.xlu0 %900 }
 0x32c   :  { %v1063_v43 = vadd.f32 %v1062_v15, %v1061_v44  ;;  %v908_v23 = vadd.f32 %v901_v42, %v898_v58 }
 0x32e   :  { %v1064_v22 = vrot.slane %v1063_v43, 2  ;;  %v909_v55 = vadd.f32 %v908_v23, %v904_v8 }
 0x32f   :  { %v907_v6 = vpop.xlane.xlu0 %906 }
 0x330   :  { %v1065_v46 = vadd.f32 %v1064_v22, %v1063_v43  ;;  %v910_v27 = vadd.f32 %v909_v55, %v907_v6 }
 0x332   :  { %v1066_v0 = vrot.slane %v1065_v46, 1  ;;  %v911_v2 = vrot.slane %v910_v27, 4 }
 0x334   :  { %v1067_v32 = vadd.f32 %v1066_v0, %v1065_v46  ;;  %v912_v10 = vadd.f32 %v911_v2, %v910_v27 }
 0x336   :  { %v1068_v11 = vmul.f32 0.0009765625, %v1067_v32  ;;  %v913_v61 = vrot.slane %v912_v10, 2 }
 0x338   :  { %v914_v4 = vadd.f32 %v913_v61, %v912_v10  ;;  %v8225_v9 = vsub.f32 %v1032_v60, %v1068_v11  ;;  %v8227_v52 = vsub.f32 %v1035_v3, %v1068_v11  ;;  %v8229_v14 = vsub.f32 %v1040_v21, %v1068_v11 }
 0x339   :  { %v8231_v58 = vsub.f32 %v1043_v50, %v1068_v11 }
 0x33a   :  { %v915_v30 = vrot.slane %v914_v4, 1  ;;  %v1073_v44 = vmul.f32 %v8225_v9, %v8225_v9  ;;  %v1074_v15 = vmul.f32 %v8227_v52, %v8227_v52  ;;  %v1075_v42 = vmul.f32 %v8229_v14, %v8229_v14 }
 0x33b   :  { %v1076_v60 = vmul.f32 %v8231_v58, %v8231_v58 }
 0x33c   :  { %v916_v43 = vadd.f32 %v915_v30, %v914_v4  ;;  %v1077_v3 = vsel %vm456_vm2, %v1073_v44, 0.0  ;;  %v1080_v21 = vsel %vm456_vm2, %v1074_v15, 0.0  ;;  %v1083_v50 = vsel %vm456_vm2, %v1075_v42, 0.0 }
 0x33d   :  { %1078 = vadd.xlane.f32.xlu1 %v1077_v3  ;;  %1081 = vadd.xlane.f32.xlu0 %v1080_v21  ;;  %v1086_v23 = vsel %vm456_vm2, %v1076_v60, 0.0 }
 0x33e   :  { %v917_v11 = vmul.f32 0.0009765625, %v916_v43 }
 0x340   :  { %v8246_v8 = vsub.f32 %v8199_v20, %v917_v11  ;;  %v8249_v22 = vsub.f32 %v8197_v63, %v917_v11  ;;  %v8252_v55 = vsub.f32 %v8203_v16, %v917_v11  ;;  %v8255_v6 = vsub.f32 %v8201_v26, %v917_v11 }
 0x341   :  { %1084 = vadd.xlane.f32.xlu1 %v1083_v50  ;;  %1087 = vadd.xlane.f32.xlu0 %v1086_v23 }
 0x342   :  { %v923_v46 = vmul.f32 %v8246_v8, %v8246_v8  ;;  %v922_v27 = vmul.f32 %v8249_v22, %v8249_v22  ;;  %v925_v63 = vmul.f32 %v8252_v55, %v8252_v55  ;;  %v924_v16 = vmul.f32 %v8255_v6, %v8255_v6 }
 0x344   :  { %v929_v20 = vsel %vm456_vm2, %v923_v46, 0.0  ;;  %v926_v0 = vsel %vm456_vm2, %v922_v27, 0.0  ;;  %v935_v26 = vsel %vm456_vm2, %v925_v63, 0.0  ;;  %v932_v2 = vsel %vm456_vm2, %v924_v16, 0.0 }
 0x345   :  { %930 = vadd.xlane.f32.xlu0 %v929_v20  ;;  %927 = vadd.xlane.f32.xlu1 %v926_v0 }
 0x349   :  { %936 = vadd.xlane.f32.xlu0 %v935_v26  ;;  %933 = vadd.xlane.f32.xlu1 %v932_v2 }
 0x3ca   :  { %v1079_v32 = vpop.xlane.xlu1 %1078  ;;  %v1082_v10 = vpop.xlane.xlu0 %1081 }
 0x3cb   :  { %v1089_v61 = vadd.f32 %v1082_v10, %v1079_v32 }
 0x3ce   :  { %v1085_v4 = vpop.xlane.xlu1 %1084  ;;  %v1088_v30 = vpop.xlane.xlu0 %1087 }
 0x3cf   :  { %v1090_v44 = vadd.f32 %v1089_v61, %v1085_v4 }
 0x3d1   :  { %v1091_v15 = vadd.f32 %v1090_v44, %v1088_v30 }
 0x3d2   :  { %v928_v42 = vpop.xlane.xlu1 %927  ;;  %v931_v60 = vpop.xlane.xlu0 %930 }
 0x3d3   :  { %v1092_v43 = vrot.slane %v1091_v15, 4  ;;  %v938_v21 = vadd.f32 %v931_v60, %v928_v42 }
 0x3d5   :  { %v1093_v3 = vadd.f32 %v1092_v43, %v1091_v15 }
 0x3d6   :  { %v934_v11 = vpop.xlane.xlu1 %933  ;;  %v937_v46 = vpop.xlane.xlu0 %936 }
 0x3d7   :  { %v1094_v50 = vrot.slane %v1093_v3, 2  ;;  %v939_v23 = vadd.f32 %v938_v21, %v934_v11 }
 0x3d9   :  { %v1095_v27 = vadd.f32 %v1094_v50, %v1093_v3  ;;  %v940_v20 = vadd.f32 %v939_v23, %v937_v46 }
 0x3db   :  { %v1096_v0 = vrot.slane %v1095_v27, 1  ;;  %v941_v63 = vrot.slane %v940_v20, 4 }
 0x3dd   :  { %v1097_v16 = vadd.f32 %v1096_v0, %v1095_v27  ;;  %v942_v26 = vadd.f32 %v941_v63, %v940_v20 }
 0x3df   :  { %v1098_v2 = vmul.f32 0.0009765625, %v1097_v16  ;;  %v943_v32 = vrot.slane %v942_v26, 2 }
 0x3e1   :  { %v1099_v10 = vadd.f32 0.00032, %v1098_v2  ;;  %v944_v61 = vadd.f32 %v943_v32, %v942_v26 }
 0x3e3   :  { %7102 = vrsqrt.f32 %v1099_v10  ;;  %v945_v4 = vrot.slane %v944_v61, 1 }
 0x3e5   :  { %v946_v30 = vadd.f32 %v945_v4, %v944_v61 }
 0x3e7   :  { %v947_v44 = vmul.f32 0.0009765625, %v946_v30 }
 0x3e9   :  { %v948_v15 = vadd.f32 0.00032, %v947_v44 }
 0x3eb   :  { %7104 = vrsqrt.f32 %v948_v15 }
 0x3ed   :  { %v7103_v42 = vpop.eup %7102 }
 0x3ee   :  { %v1102_v60 = vmul.f32 %v7103_v42, %v8227_v52  ;;  %v1101_v43 = vmul.f32 %v7103_v42, %v8225_v9  ;;  %v1104_v11 = vmul.f32 %v7103_v42, %v8231_v58  ;;  %v1103_v50 = vmul.f32 %v7103_v42, %v8229_v14 }
 0x3f0   :  { %v1108_v3 = vsel %vm456_vm2, %v1102_v60, -inf  ;;  %v1105_v21 = vsel %vm456_vm2, %v1101_v43, -inf  ;;  %v1114_v23 = vsel %vm456_vm2, %v1104_v11, -inf  ;;  %v1111_v46 = vsel %vm456_vm2, %v1103_v50, -inf }
 0x3f1   :  { %1109 = vmax.xlane.f32.xlu0 %v1108_v3  ;;  %1106 = vmax.xlane.f32.xlu1 %v1105_v21 }
 0x3f5   :  { %v7105_v27 = vpop.eup %7104  ;;  %1115 = vmax.xlane.f32.xlu0 %v1114_v23  ;;  %1112 = vmax.xlane.f32.xlu1 %v1111_v46 }
 0x3f6   :  { %v951_v52 = vmul.f32 %v7105_v27, %v8246_v8  ;;  %v950_v9 = vmul.f32 %v7105_v27, %v8249_v22  ;;  %v953_v58 = vmul.f32 %v7105_v27, %v8252_v55  ;;  %v952_v14 = vmul.f32 %v7105_v27, %v8255_v6 }
 0x3f8   :  { %v957_v20 = vsel %vm456_vm2, %v951_v52, -inf  ;;  %v954_v0 = vsel %vm456_vm2, %v950_v9, -inf  ;;  %v963_v63 = vsel %vm456_vm2, %v953_v58, -inf  ;;  %v960_v16 = vsel %vm456_vm2, %v952_v14, -inf }
 0x3f9   :  { %958 = vmax.xlane.f32.xlu0 %v957_v20  ;;  %955 = vmax.xlane.f32.xlu1 %v954_v0 }
 0x3fd   :  { %964 = vmax.xlane.f32.xlu0 %v963_v63  ;;  %961 = vmax.xlane.f32.xlu1 %v960_v16 }
 0x47e   :  { %v1107_v26 = vpop.xlane.xlu1 %1106  ;;  %v1110_v8 = vpop.xlane.xlu0 %1109 }
 0x47f   :  { %v1117_v2 = vsub.f32 %v1101_v43, %v1107_v26  ;;  %v1118_v22 = vsub.f32 %v1102_v60, %v1110_v8 }
 0x481   :  { %v1121_v32 = vmul.f32 1.442695, %v1117_v2  ;;  %v1123_v10 = vmul.f32 1.442695, %v1118_v22 }
 0x482   :  { %v1113_v61 = vpop.xlane.xlu1 %1112  ;;  %v1116_v4 = vpop.xlane.xlu0 %1115 }
 0x483   :  { %7106 = vpow2.f32 %v1121_v32  ;;  %v1119_v55 = vsub.f32 %v1103_v50, %v1113_v61  ;;  %v1120_v30 = vsub.f32 %v1104_v11, %v1116_v4 }
 0x484   :  { %7108 = vpow2.f32 %v1123_v10 }
 0x485   :  { %v1125_v6 = vmul.f32 1.442695, %v1119_v55  ;;  %v1127_v44 = vmul.f32 1.442695, %v1120_v30 }
 0x486   :  { %v956_v15 = vpop.xlane.xlu1 %955  ;;  %v959_v42 = vpop.xlane.xlu0 %958 }
 0x487   :  { %7110 = vpow2.f32 %v1125_v6  ;;  %v966_v3 = vsub.f32 %v950_v9, %v956_v15  ;;  %v967_v21 = vsub.f32 %v951_v52, %v959_v42 }
 0x488   :  { %7112 = vpow2.f32 %v1127_v44 }
 0x489   :  { %v970_v23 = vmul.f32 1.442695, %v966_v3  ;;  %v972_v46 = vmul.f32 1.442695, %v967_v21 }
 0x48a   :  { %v962_v43 = vpop.xlane.xlu1 %961  ;;  %v965_v60 = vpop.xlane.xlu0 %964 }
 0x48b   :  { %7114 = vpow2.f32 %v970_v23  ;;  %v968_v27 = vsub.f32 %v952_v14, %v962_v43  ;;  %v969_v20 = vsub.f32 %v953_v58, %v965_v60 }
 0x48c   :  { %7116 = vpow2.f32 %v972_v46 }
 0x48d   :  { %v7107_v0 = vpop.eup %7106  ;;  %v974_v50 = vmul.f32 1.442695, %v968_v27  ;;  %v976_v11 = vmul.f32 1.442695, %v969_v20 }
 0x48e   :  { %v7109_v63 = vpop.eup %7108  ;;  %v1129_v16 = vsel %vm456_vm2, %v7107_v0, 0.0 }
 0x48f   :  { %7118 = vpow2.f32 %v974_v50  ;;  %1130 = vadd.xlane.f32.xlu1 %v1129_v16  ;;  %v1132_v9 = vsel %vm456_vm2, %v7109_v63, 0.0 }
 0x490   :  { %7120 = vpow2.f32 %v976_v11  ;;  %1133 = vadd.xlane.f32.xlu0 %v1132_v9 }
 0x491   :  { %v7111_v52 = vpop.eup %7110 }
 0x492   :  { %v7113_v26 = vpop.eup %7112  ;;  %v1135_v8 = vsel %vm456_vm2, %v7111_v52, 0.0 }
 0x493   :  { %1136 = vadd.xlane.f32.xlu1 %v1135_v8  ;;  %v1138_v58 = vsel %vm456_vm2, %v7113_v26, 0.0 }
 0x494   :  { %1139 = vadd.xlane.f32.xlu0 %v1138_v58 }
 0x495   :  { %v7115_v14 = vpop.eup %7114 }
 0x496   :  { %v7117_v2 = vpop.eup %7116  ;;  %v978_v22 = vsel %vm456_vm2, %v7115_v14, 0.0 }
 0x497   :  { %979 = vadd.xlane.f32.xlu1 %v978_v22  ;;  %v981_v32 = vsel %vm456_vm2, %v7117_v2, 0.0 }
 0x498   :  { %982 = vadd.xlane.f32.xlu0 %v981_v32 }
 0x499   :  { %v7119_v10 = vpop.eup %7118 }
 0x49a   :  { %v7121_v61 = vpop.eup %7120  ;;  %v984_v4 = vsel %vm456_vm2, %v7119_v10, 0.0 }
 0x49b   :  { %985 = vadd.xlane.f32.xlu1 %v984_v4  ;;  %v987_v55 = vsel %vm456_vm2, %v7121_v61, 0.0 }
 0x49c   :  { %988 = vadd.xlane.f32.xlu0 %v987_v55 }
 0x51c   :  { %v1131_v30 = vpop.xlane.xlu1 %1130 }
 0x51d   :  { %7122 = vrcp.f32 %v1131_v30  ;;  %v1134_v6 = vpop.xlane.xlu0 %1133 }
 0x51e   :  { %7124 = vrcp.f32 %v1134_v6 }
 0x520   :  { %v1137_v44 = vpop.xlane.xlu1 %1136 }
 0x521   :  { %7126 = vrcp.f32 %v1137_v44  ;;  %v1140_v15 = vpop.xlane.xlu0 %1139 }
 0x522   :  { %7128 = vrcp.f32 %v1140_v15 }
 0x524   :  { %v980_v42 = vpop.xlane.xlu1 %979 }
 0x525   :  { %7130 = vrcp.f32 %v980_v42  ;;  %v983_v3 = vpop.xlane.xlu0 %982 }
 0x526   :  { %7132 = vrcp.f32 %v983_v3 }
 0x527   :  { %v7123_v21 = vpop.eup %7122 }
 0x528   :  { %v7125_v23 = vpop.eup %7124  ;;  %v986_v46 = vpop.xlane.xlu1 %985  ;;  %v1142_v43 = vmul.f32 %v7123_v21, %v7107_v0 }
 0x529   :  { %7134 = vrcp.f32 %v986_v46  ;;  %v989_v60 = vpop.xlane.xlu0 %988  ;;  %v1144_v27 = vmul.f32 %v7125_v23, %v7109_v63 }
 0x52a   :  { %7136 = vrcp.f32 %v989_v60 }
 0x52b   :  { %v7127_v20 = vpop.eup %7126  ;;  %v7004_v50 = vpack.i.bf16 %v1144_v27, %v1142_v43 }
 0x52c   :  { %v7129_v11 = vpop.eup %7128  ;;  %v1146_v16 = vmul.f32 %v7127_v20, %v7111_v52  ;;  %v11640_v20 = vpack.c.bf16 %v8142_v1, %v8138_v17  ;;  %v11643_v1 = vpack.c.bf16 %v8101_v37, %v8093_v57  ;;  %v11644_v17 = vpack.c.bf16 %v8097_v35, %v8089_v51 }
 0x52d   :  { %7005 = vrot.lane.b32.xlu1 %v7004_v50, %s7582_s23  ;;  %v1148_v9 = vmul.f32 %v7129_v11, %v7113_v26  ;;  %v11641_v50 = vpack.c.bf16 %v8164_v13, %v8158_v47  ;;  %v11645_v47 = vpack.c.bf16 %v8125_v7, %v8113_v59  ;;  %v11646_v13 = vpack.c.bf16 %v8119_v5, %v8109_v54 }
 0x52f   :  { %v7131_v8 = vpop.eup %7130  ;;  %v7009_v58 = vpack.i.bf16 %v1148_v9, %v1146_v16 }
 0x530   :  { %v7133_v22 = vpop.eup %7132  ;;  %v991_v32 = vmul.f32 %v7131_v8, %v7115_v14  ;;  %v11642_v8 = vpack.c.bf16 %v8160_v24, %v8156_v36 }
 0x531   :  { %v993_v4 = vmul.f32 %v7133_v22, %v7117_v2  ;;  %7010 = vrot.lane.b32.xlu0 %v7009_v58, %s7582_s23 }
 0x532   :  { %v1149_v0 = vadd.f32 %v1142_v43, %v991_v32 }
 0x533   :  { %v7135_v55 = vpop.eup %7134  ;;  %v1150_v30 = vadd.f32 %v1144_v27, %v993_v4 }
 0x534   :  { %v7137_v63 = vpop.eup %7136  ;;  %v1153_v6 = vmul.f32 0.5, %v1149_v0  ;;  %v995_v44 = vmul.f32 %v7135_v55, %v7119_v10 }
 0x535   :  { %v1154_v15 = vmul.f32 0.5, %v1150_v30  ;;  %v997_v42 = vmul.f32 %v7137_v63, %v7121_v61 }
 0x536   :  { %1157 = vst.msk [vmem:[%s11485_s19] sm:$0xff] %vm456_vm2, %v1153_v6  ;;  %v1151_v52 = vadd.f32 %v1146_v16, %v995_v44 }
 0x537   :  { %1158 = vst.msk [vmem:[%s11485_s19 + $0x8] sm:$0xff] %vm456_vm2, %v1154_v15  ;;  %v1152_v26 = vadd.f32 %v1148_v9, %v997_v42 }
 0x538   :  { %v1155_v14 = vmul.f32 0.5, %v1151_v52 }
 0x539   :  { %v1156_v2 = vmul.f32 0.5, %v1152_v26 }
 0x53a   :  { %1159 = vst.msk [vmem:[%s11485_s19 + $0x10] sm:$0xff] %vm456_vm2, %v1155_v14  ;;  %v1292_v14 = vsel %vm456_vm2, %v8213_v25, 0.0 }
 0x53b   :  { %1160 = vst.msk [vmem:[%s11485_s19 + $0x18] sm:$0xff] %vm456_vm2, %v1156_v2  ;;  %v1295_v2 = vsel %vm456_vm2, %v8217_v12, 0.0 }
 0x59f   :  { %v7006_v10 = vpop.permute.xlu1 %7005 }
 0x5a0   :  { %v7008_v61 = vunpack.i.h.bf16 %v7006_v10  ;;  %v7007_v3 = vunpack.i.l.bf16 %v7006_v10  ;;  %v1298_v10 = vsel %vm456_vm2, %v8221_v28, 0.0 }
 0x5a2   :  { %v1177_v21 = vsel %vm456_vm2, %v991_v32, %v7007_v3  ;;  %v1178_v23 = vsel %vm456_vm2, %v993_v4, %v7008_v61  ;;  %v1301_v61 = vsel %vm456_vm2, %v8223_v31, 0.0 }
 0x5a3   :  { %v1181_v46 = vpack.c.bf16 %v1178_v23, %v1177_v21  ;;  %v7011_v43 = vpop.permute.xlu0 %7010 }
 0x5a4   :  { %v7013_v60 = vunpack.i.h.bf16 %v7011_v43  ;;  %v7012_v27 = vunpack.i.l.bf16 %v7011_v43 }
 0x5a5   :  { %6793 = vmatmul.mubr.msk.bf16.vlgmr.msra.gmra.mrb[56].mxu0 %vm1183_vm3, %v1181_v46 }
 0x5a6   :  { %1395 = vmatpush1.bf16.xpose.msra.mxu0 %v11640_v20  ;;  %1232 = vmatprep.mubr.bf16.mxu0 %v11632_v48  ;;  %v1180_v11 = vsel %vm456_vm2, %v997_v42, %v7013_v60  ;;  %v1179_v16 = vsel %vm456_vm2, %v995_v44, %v7012_v27 }
 0x5a7   :  { %1396 = vmatprep.subr.bf16.mxu0 %v11641_v50  ;;  %v1182_v9 = vpack.c.bf16 %v1180_v11, %v1179_v16 }
 0x5ad   :  { %6794 = vmatmul.mubr.msk.bf16.gmra.mrb[60].mxu0 %vm1183_vm3, %v1182_v9 }
 0x5ae   :  { %1397 = vmatpush1.bf16.xpose.msra.mxu0 %v11642_v8  ;;  %1426 = vmatprep.mubr.bf16.mxu0 %v11643_v1 }
 0x5b5   :  { %1427 = vmatmul.mubr.bf16.vlgmr.msra.gmra.mrb[64].mxu0 %v11644_v17 }
 0x5b6   :  { %1434 = vmatprep.mubr.bf16.mxu0 %v11645_v47 }
 0x5bd   :  { %1435 = vmatmul.mubr.bf16.gmra.mrb[68].mxu0 %v11646_v13 }
 0x5be   :  { %1699 = vmatprep.mubr.bf16.mxu0 %v11632_v48 }
 0x678   :  { %v1224_v36 = vpop.f32.mrb[56].mxu0 }
 0x679   :  { %v1226_v24 = vpop.f32.mrb[57].mxu0 }
 0x67a   :  { %v1228_v58 = vpop.f32.mrb[58].mxu0 }
 0x67b   :  { %v1643_v22 = vpack.c.bf16 %v1228_v58, %v1224_v36  ;;  %v1230_v57 = vpop.f32.mrb[59].mxu0 }
 0x67c   :  { %v1644_v37 = vpack.c.bf16 %v1230_v57, %v1226_v24 }
 0x67e   :  { %1667 = vmatprep.subr.bf16.mxu0 %v1644_v37 }
 0x67f   :  { %1668 = vmatpush1.bf16.msra.mxu0 %v1643_v22 }
 0x680   :  { %v1234_v51 = vpop.f32.mrb[60].mxu0 }
 0x681   :  { %v1236_v35 = vpop.f32.mrb[61].mxu0 }
 0x682   :  { %v1238_v32 = vpop.f32.mrb[62].mxu0 }
 0x683   :  { %v1647_v4 = vpack.c.bf16 %v1238_v32, %v1234_v51  ;;  %v1240_v59 = vpop.f32.mrb[63].mxu0 }
 0x684   :  { %v1648_v7 = vpack.c.bf16 %v1240_v59, %v1236_v35 }
 0x686   :  { %1669 = vmatprep.subr.bf16.mxu0 %v1648_v7 }
 0x687   :  { %1670 = vmatpush1.bf16.msra.mxu0 %v1647_v4 }
 0x688   :  { %v1428_v54 = vpop.f32.mrb[64].mxu0 }
 0x689   :  { %v1430_v5 = vpop.f32.mrb[65].mxu0  ;;  %v1443_v0 = vsel %vm456_vm2, %v1428_v54, 0.0 }
 0x68a   :  { %1444 = vadd.xlane.f32.xlu1 %v1443_v0  ;;  %v1431_v55 = vpop.f32.mrb[66].mxu0 }
 0x68b   :  { %v1433_v30 = vpop.f32.mrb[67].mxu0  ;;  %v1446_v63 = vsel %vm456_vm2, %v1431_v55, 0.0 }
 0x68c   :  { %1447 = vadd.xlane.f32.xlu0 %v1446_v63 }
 0x690   :  { %v1436_v6 = vpop.f32.mrb[68].mxu0 }
 0x691   :  { %v1438_v44 = vpop.f32.mrb[69].mxu0  ;;  %v1449_v15 = vsel %vm456_vm2, %v1436_v6, 0.0 }
 0x692   :  { %1450 = vadd.xlane.f32.xlu1 %v1449_v15  ;;  %v1439_v42 = vpop.f32.mrb[70].mxu0 }
 0x693   :  { %v1441_v52 = vpop.f32.mrb[71].mxu0  ;;  %v1452_v26 = vsel %vm456_vm2, %v1439_v42, 0.0 }
 0x694   :  { %1453 = vadd.xlane.f32.xlu0 %v1452_v26 }
 0x696   :  { %1293 = vadd.xlane.f32.xlu1 %v1292_v14 }
 0x698   :  { %1296 = vadd.xlane.f32.xlu0 %v1295_v2 }
 0x69a   :  { %1299 = vadd.xlane.f32.xlu1 %v1298_v10 }
 0x69c   :  { %1302 = vadd.xlane.f32.xlu0 %v1301_v61 }
 0x717   :  { %v1445_v3 = vpop.xlane.xlu1 %1444 }
 0x719   :  { %v1448_v21 = vpop.xlane.xlu0 %1447 }
 0x71a   :  { %v1455_v23 = vadd.f32 %v1448_v21, %v1445_v3 }
 0x71f   :  { %v1451_v46 = vpop.xlane.xlu1 %1450 }
 0x720   :  { %v1456_v43 = vadd.f32 %v1455_v23, %v1451_v46 }
 0x721   :  { %v1454_v60 = vpop.xlane.xlu0 %1453 }
 0x722   :  { %v1457_v27 = vadd.f32 %v1456_v43, %v1454_v60 }
 0x723   :  { %v1294_v20 = vpop.xlane.xlu1 %1293 }
 0x724   :  { %v1458_v50 = vrot.slane %v1457_v27, 4 }
 0x725   :  { %v1297_v11 = vpop.xlane.xlu0 %1296 }
 0x726   :  { %v1459_v16 = vadd.f32 %v1458_v50, %v1457_v27  ;;  %v1304_v9 = vadd.f32 %v1297_v11, %v1294_v20 }
 0x727   :  { %v1300_v8 = vpop.xlane.xlu1 %1299 }
 0x728   :  { %v1460_v1 = vrot.slane %v1459_v16, 2  ;;  %v1305_v17 = vadd.f32 %v1304_v9, %v1300_v8 }
 0x729   :  { %v1303_v47 = vpop.xlane.xlu0 %1302 }
 0x72a   :  { %v1461_v13 = vadd.f32 %v1460_v1, %v1459_v16  ;;  %v1306_v36 = vadd.f32 %v1305_v17, %v1303_v47 }
 0x72c   :  { %v1462_v24 = vrot.slane %v1461_v13, 1  ;;  %v1307_v58 = vrot.slane %v1306_v36, 4 }
 0x72e   :  { %v1463_v22 = vadd.f32 %v1462_v24, %v1461_v13  ;;  %v1308_v57 = vadd.f32 %v1307_v58, %v1306_v36 }
 0x730   :  { %v1464_v37 = vmul.f32 0.0009765625, %v1463_v22  ;;  %v1309_v51 = vrot.slane %v1308_v57, 2 }
 0x732   :  { %v1310_v35 = vadd.f32 %v1309_v51, %v1308_v57  ;;  %v8352_v32 = vsub.f32 %v1431_v55, %v1464_v37  ;;  %v8354_v4 = vsub.f32 %v1428_v54, %v1464_v37  ;;  %v8356_v59 = vsub.f32 %v1439_v42, %v1464_v37 }
 0x733   :  { %v8358_v7 = vsub.f32 %v1436_v6, %v1464_v37 }
 0x734   :  { %v1311_v5 = vrot.slane %v1310_v35, 1  ;;  %v1470_v0 = vmul.f32 %v8352_v32, %v8352_v32  ;;  %v1469_v30 = vmul.f32 %v8354_v4, %v8354_v4  ;;  %v1472_v63 = vmul.f32 %v8356_v59, %v8356_v59 }
 0x735   :  { %v1471_v55 = vmul.f32 %v8358_v7, %v8358_v7 }
 0x736   :  { %v1312_v44 = vadd.f32 %v1311_v5, %v1310_v35  ;;  %v1476_v54 = vsel %vm456_vm2, %v1470_v0, 0.0  ;;  %v1473_v15 = vsel %vm456_vm2, %v1469_v30, 0.0  ;;  %v1482_v42 = vsel %vm456_vm2, %v1472_v63, 0.0 }
 0x737   :  { %1477 = vadd.xlane.f32.xlu0 %v1476_v54  ;;  %1474 = vadd.xlane.f32.xlu1 %v1473_v15  ;;  %v1479_v52 = vsel %vm456_vm2, %v1471_v55, 0.0 }
 0x738   :  { %v1313_v6 = vmul.f32 0.0009765625, %v1312_v44 }
 0x73a   :  { %v8373_v26 = vsub.f32 %v8217_v12, %v1313_v6  ;;  %v8376_v14 = vsub.f32 %v8213_v25, %v1313_v6  ;;  %v8379_v2 = vsub.f32 %v8223_v31, %v1313_v6  ;;  %v8382_v10 = vsub.f32 %v8221_v28, %v1313_v6 }
 0x73b   :  { %1483 = vadd.xlane.f32.xlu0 %v1482_v42  ;;  %1480 = vadd.xlane.f32.xlu1 %v1479_v52 }
 0x73c   :  { %v1319_v61 = vmul.f32 %v8373_v26, %v8373_v26  ;;  %v1318_v3 = vmul.f32 %v8376_v14, %v8376_v14  ;;  %v1321_v25 = vmul.f32 %v8379_v2, %v8379_v2  ;;  %v1320_v31 = vmul.f32 %v8382_v10, %v8382_v10 }
 0x73e   :  { %v1325_v12 = vsel %vm456_vm2, %v1319_v61, 0.0  ;;  %v1322_v21 = vsel %vm456_vm2, %v1318_v3, 0.0  ;;  %v1331_v28 = vsel %vm456_vm2, %v1321_v25, 0.0  ;;  %v1328_v23 = vsel %vm456_vm2, %v1320_v31, 0.0 }
 0x73f   :  { %1326 = vadd.xlane.f32.xlu0 %v1325_v12  ;;  %1323 = vadd.xlane.f32.xlu1 %v1322_v21 }
 0x743   :  { %1332 = vadd.xlane.f32.xlu0 %v1331_v28  ;;  %1329 = vadd.xlane.f32.xlu1 %v1328_v23 }
 0x7c4   :  { %v1475_v46 = vpop.xlane.xlu1 %1474  ;;  %v1478_v43 = vpop.xlane.xlu0 %1477 }
 0x7c5   :  { %v1485_v60 = vadd.f32 %v1478_v43, %v1475_v46 }
 0x7c8   :  { %v1481_v27 = vpop.xlane.xlu1 %1480  ;;  %v1484_v20 = vpop.xlane.xlu0 %1483 }
 0x7c9   :  { %v1486_v50 = vadd.f32 %v1485_v60, %v1481_v27 }
 0x7cb   :  { %v1487_v11 = vadd.f32 %v1486_v50, %v1484_v20 }
 0x7cc   :  { %v1324_v16 = vpop.xlane.xlu1 %1323  ;;  %v1327_v9 = vpop.xlane.xlu0 %1326 }
 0x7cd   :  { %v1488_v8 = vrot.slane %v1487_v11, 4  ;;  %v1334_v17 = vadd.f32 %v1327_v9, %v1324_v16 }
 0x7cf   :  { %v1489_v1 = vadd.f32 %v1488_v8, %v1487_v11 }
 0x7d0   :  { %v1330_v47 = vpop.xlane.xlu1 %1329  ;;  %v1333_v24 = vpop.xlane.xlu0 %1332 }
 0x7d1   :  { %v1490_v13 = vrot.slane %v1489_v1, 2  ;;  %v1335_v36 = vadd.f32 %v1334_v17, %v1330_v47 }
 0x7d3   :  { %v1491_v58 = vadd.f32 %v1490_v13, %v1489_v1  ;;  %v1336_v22 = vadd.f32 %v1335_v36, %v1333_v24 }
 0x7d5   :  { %v1492_v57 = vrot.slane %v1491_v58, 1  ;;  %v1337_v37 = vrot.slane %v1336_v22, 4 }
 0x7d7   :  { %v1493_v51 = vadd.f32 %v1492_v57, %v1491_v58  ;;  %v1338_v35 = vadd.f32 %v1337_v37, %v1336_v22 }
 0x7d9   :  { %v1494_v5 = vmul.f32 0.0009765625, %v1493_v51  ;;  %v1339_v0 = vrot.slane %v1338_v35, 2 }
 0x7db   :  { %v1495_v30 = vadd.f32 0.00032, %v1494_v5  ;;  %v1340_v63 = vadd.f32 %v1339_v0, %v1338_v35 }
 0x7dd   :  { %7138 = vrsqrt.f32 %v1495_v30  ;;  %v1341_v55 = vrot.slane %v1340_v63, 1 }
 0x7df   :  { %v1342_v44 = vadd.f32 %v1341_v55, %v1340_v63 }
 0x7e1   :  { %v1343_v54 = vmul.f32 0.0009765625, %v1342_v44 }
 0x7e3   :  { %v1344_v15 = vadd.f32 0.00032, %v1343_v54 }
 0x7e5   :  { %7140 = vrsqrt.f32 %v1344_v15 }
 0x7e7   :  { %v7139_v6 = vpop.eup %7138 }
 0x7e8   :  { %v1498_v42 = vmul.f32 %v7139_v6, %v8352_v32  ;;  %v1497_v52 = vmul.f32 %v7139_v6, %v8354_v4  ;;  %v1500_v12 = vmul.f32 %v7139_v6, %v8356_v59  ;;  %v1499_v21 = vmul.f32 %v7139_v6, %v8358_v7 }
 0x7ea   :  { %v1504_v61 = vsel %vm456_vm2, %v1498_v42, -inf  ;;  %v1501_v3 = vsel %vm456_vm2, %v1497_v52, -inf  ;;  %v1510_v25 = vsel %vm456_vm2, %v1500_v12, -inf  ;;  %v1507_v31 = vsel %vm456_vm2, %v1499_v21, -inf }
 0x7eb   :  { %1505 = vmax.xlane.f32.xlu0 %v1504_v61  ;;  %1502 = vmax.xlane.f32.xlu1 %v1501_v3 }
 0x7ef   :  { %v7141_v28 = vpop.eup %7140  ;;  %1511 = vmax.xlane.f32.xlu0 %v1510_v25  ;;  %1508 = vmax.xlane.f32.xlu1 %v1507_v31 }
 0x7f0   :  { %v1347_v32 = vmul.f32 %v7141_v28, %v8373_v26  ;;  %v1346_v4 = vmul.f32 %v7141_v28, %v8376_v14  ;;  %v1349_v59 = vmul.f32 %v7141_v28, %v8379_v2  ;;  %v1348_v7 = vmul.f32 %v7141_v28, %v8382_v10  ;;  %v8415_v26 = vld [vmem:[%s11486_s5] sm:$0xff]   ;;  %v8423_v14 = vld [vmem:[%s11486_s5 + $0x8] sm:$0xff]  }
 0x7f1   :  { %6803 = vmatmul.mubr.msk.bf16.vlgmr.msra.gmra.mrb[72].mxu0 %vm456_vm2, %v8415_v26 }
 0x7f2   :  { %v1353_v23 = vsel %vm456_vm2, %v1347_v32, -inf  ;;  %v1350_v46 = vsel %vm456_vm2, %v1346_v4, -inf  ;;  %v1359_v43 = vsel %vm456_vm2, %v1349_v59, -inf  ;;  %v1356_v60 = vsel %vm456_vm2, %v1348_v7, -inf  ;;  %1709 = vmatprep.mubr.bf16.mxu0 %v11632_v48 }
 0x7f3   :  { %1354 = vmax.xlane.f32.xlu0 %v1353_v23  ;;  %1351 = vmax.xlane.f32.xlu1 %v1350_v46 }
 0x7f7   :  { %1360 = vmax.xlane.f32.xlu0 %v1359_v43  ;;  %1357 = vmax.xlane.f32.xlu1 %v1356_v60 }
 0x7f9   :  { %6804 = vmatmul.mubr.msk.bf16.gmra.mrb[76].mxu0 %vm456_vm2, %v8423_v14 }
 0x7fa   :  { %2221 = vmatprep.mubr.bf16.mxu0 %v11632_v48 }
 0x878   :  { %v1503_v2 = vpop.xlane.xlu1 %1502  ;;  %v1506_v10 = vpop.xlane.xlu0 %1505 }
 0x879   :  { %v1513_v27 = vsub.f32 %v1497_v52, %v1503_v2  ;;  %v1514_v20 = vsub.f32 %v1498_v42, %v1506_v10 }
 0x87b   :  { %v1517_v50 = vmul.f32 1.442695, %v1513_v27  ;;  %v1519_v11 = vmul.f32 1.442695, %v1514_v20 }
 0x87c   :  { %v1509_v16 = vpop.xlane.xlu1 %1508  ;;  %v1512_v9 = vpop.xlane.xlu0 %1511 }
 0x87d   :  { %7142 = vpow2.f32 %v1517_v50  ;;  %v1515_v8 = vsub.f32 %v1499_v21, %v1509_v16  ;;  %v1516_v1 = vsub.f32 %v1500_v12, %v1512_v9 }
 0x87e   :  { %7144 = vpow2.f32 %v1519_v11 }
 0x87f   :  { %v1521_v17 = vmul.f32 1.442695, %v1515_v8  ;;  %v1523_v47 = vmul.f32 1.442695, %v1516_v1 }
 0x880   :  { %v1352_v13 = vpop.xlane.xlu1 %1351  ;;  %v1355_v36 = vpop.xlane.xlu0 %1354 }
 0x881   :  { %7146 = vpow2.f32 %v1521_v17  ;;  %v1362_v24 = vsub.f32 %v1346_v4, %v1352_v13  ;;  %v1363_v58 = vsub.f32 %v1347_v32, %v1355_v36 }
 0x882   :  { %7148 = vpow2.f32 %v1523_v47 }
 0x883   :  { %v1366_v22 = vmul.f32 1.442695, %v1362_v24  ;;  %v1368_v57 = vmul.f32 1.442695, %v1363_v58 }
 0x884   :  { %v1358_v37 = vpop.xlane.xlu1 %1357  ;;  %v1361_v51 = vpop.xlane.xlu0 %1360 }
 0x885   :  { %7150 = vpow2.f32 %v1366_v22  ;;  %v1364_v35 = vsub.f32 %v1348_v7, %v1358_v37  ;;  %v1365_v5 = vsub.f32 %v1349_v59, %v1361_v51  ;;  %v1789_v37 = vld [vmem:[%s11487_s6] sm:$0xff] }
 0x886   :  { %7152 = vpow2.f32 %v1368_v57 }
 0x887   :  { %v7143_v0 = vpop.eup %7142  ;;  %v1370_v30 = vmul.f32 1.442695, %v1364_v35  ;;  %v1372_v63 = vmul.f32 1.442695, %v1365_v5 }
 0x888   :  { %v7145_v55 = vpop.eup %7144  ;;  %v1525_v44 = vsel %vm456_vm2, %v7143_v0, 0.0 }
 0x889   :  { %7154 = vpow2.f32 %v1370_v30  ;;  %1526 = vadd.xlane.f32.xlu1 %v1525_v44  ;;  %v1528_v54 = vsel %vm456_vm2, %v7145_v55, 0.0  ;;  %v1793_v44 = vld [vmem:[%s11488_s7] sm:$0xff] }
 0x88a   :  { %7156 = vpow2.f32 %v1372_v63  ;;  %1529 = vadd.xlane.f32.xlu0 %v1528_v54 }
 0x88b   :  { %v7147_v15 = vpop.eup %7146 }
 0x88c   :  { %v7149_v6 = vpop.eup %7148  ;;  %v1531_v42 = vsel %vm456_vm2, %v7147_v15, 0.0 }
 0x88d   :  { %1532 = vadd.xlane.f32.xlu1 %v1531_v42  ;;  %v1534_v52 = vsel %vm456_vm2, %v7149_v6, 0.0 }
 0x88e   :  { %1535 = vadd.xlane.f32.xlu0 %v1534_v52 }
 0x88f   :  { %v7151_v61 = vpop.eup %7150 }
 0x890   :  { %v7153_v3 = vpop.eup %7152  ;;  %v1374_v12 = vsel %vm456_vm2, %v7151_v61, 0.0 }
 0x891   :  { %1375 = vadd.xlane.f32.xlu1 %v1374_v12  ;;  %v1377_v21 = vsel %vm456_vm2, %v7153_v3, 0.0 }
 0x892   :  { %1378 = vadd.xlane.f32.xlu0 %v1377_v21  ;;  %v1794_v21 = vld [vmem:[%s11488_s7 + $0x8] sm:$0xff] }
 0x893   :  { %v7155_v25 = vpop.eup %7154 }
 0x894   :  { %v7157_v31 = vpop.eup %7156  ;;  %v1380_v28 = vsel %vm456_vm2, %v7155_v25, 0.0 }
 0x895   :  { %1381 = vadd.xlane.f32.xlu1 %v1380_v28  ;;  %v1383_v32 = vsel %vm456_vm2, %v7157_v31, 0.0 }
 0x896   :  { %1384 = vadd.xlane.f32.xlu0 %v1383_v32 }
 0x8c4   :  { %v8436_v4 = vpop.f32.mrb[72].mxu0 }
 0x8c5   :  { %v8438_v23 = vpop.f32.mrb[73].mxu0 }
 0x8c6   :  { %v8440_v46 = vpop.f32.mrb[74].mxu0 }
 0x8c7   :  { %v8442_v59 = vpop.f32.mrb[75].mxu0 }
 0x8cc   :  { %v8444_v7 = vpop.f32.mrb[76].mxu0 }
 0x8cd   :  { %v8446_v43 = vpop.f32.mrb[77].mxu0 }
 0x8ce   :  { %v8448_v60 = vpop.f32.mrb[78].mxu0 }
 0x8cf   :  { %v8450_v2 = vpop.f32.mrb[79].mxu0 }
 0x916   :  { %v1527_v10 = vpop.xlane.xlu1 %1526 }
 0x917   :  { %7158 = vrcp.f32 %v1527_v10  ;;  %v1530_v27 = vpop.xlane.xlu0 %1529  ;;  %v1792_v10 = vld [vmem:[%s11487_s6 + $0x18] sm:$0xff] }
 0x918   :  { %7160 = vrcp.f32 %v1530_v27  ;;  %v1795_v27 = vld [vmem:[%s11488_s7 + $0x10] sm:$0xff] }
 0x91a   :  { %v1533_v20 = vpop.xlane.xlu1 %1532 }
 0x91b   :  { %7162 = vrcp.f32 %v1533_v20  ;;  %v1536_v50 = vpop.xlane.xlu0 %1535  ;;  %v1796_v20 = vld [vmem:[%s11488_s7 + $0x18] sm:$0xff] }
 0x91c   :  { %7164 = vrcp.f32 %v1536_v50  ;;  %v2029_v50 = vld [vmem:[%s11489_s9] sm:$0xff] }
 0x91e   :  { %v1376_v11 = vpop.xlane.xlu1 %1375 }
 0x91f   :  { %7166 = vrcp.f32 %v1376_v11  ;;  %v1379_v16 = vpop.xlane.xlu0 %1378  ;;  %v2030_v11 = vld [vmem:[%s11489_s9 + $0x8] sm:$0xff] }
 0x920   :  { %7168 = vrcp.f32 %v1379_v16  ;;  %v2031_v16 = vld [vmem:[%s11489_s9 + $0x10] sm:$0xff] }
 0x921   :  { %v7159_v9 = vpop.eup %7158 }
 0x922   :  { %v7161_v8 = vpop.eup %7160  ;;  %v1382_v1 = vpop.xlane.xlu1 %1381  ;;  %v1538_v17 = vmul.f32 %v7159_v9, %v7143_v0  ;;  %v8517_v9 = vadd.f32 %v8436_v4, %v7792_v38  ;;  %v8535_v38 = vadd.f32 %v8442_v59, %v7740_v19  ;;  %v2035_v4 = vld [vmem:[%s11489_s9 + $0x30] sm:$0xff]  ;;  %v2036_v59 = vld [vmem:[%s11489_s9 + $0x38] sm:$0xff] }
 0x923   :  { %7170 = vrcp.f32 %v1382_v1  ;;  %v1385_v47 = vpop.xlane.xlu0 %1384  ;;  %v1540_v13 = vmul.f32 %v7161_v8, %v7145_v55  ;;  %v1790_v55 = vld [vmem:[%s11487_s6 + $0x8] sm:$0xff]  ;;  %v8521_v8 = vadd.f32 %v8440_v46, %v7794_v39  ;;  %v2032_v1 = vld [vmem:[%s11489_s9 + $0x18] sm:$0xff] }
 0x924   :  { %7172 = vrcp.f32 %v1385_v47  ;;  %11647 = vst [vmem:[#allocation6_spill] sm:$0xff] %v8517_v9  ;;  %v8531_v47 = vadd.f32 %v8438_v23, %v7738_v18  ;;  %11649 = vst [vmem:[#allocation8_spill] sm:$0xff] %v8535_v38  ;;  %v2034_v39 = vld [vmem:[%s11489_s9 + $0x28] sm:$0xff]  ;;  %v8547_v18 = vadd.f32 %v8444_v7, %v7828_v53  ;;  %v8553_v23 = vadd.f32 %v8446_v43, %v7769_v29 }
 0x925   :  { %v7163_v36 = vpop.eup %7162  ;;  %v7014_v24 = vpack.i.bf16 %v1540_v13, %v1538_v17  ;;  %v1797_v46 = vadd.f32 %v8521_v8, %v8517_v9  ;;  %v8564_v7 = vadd.f32 %v8448_v60, %v7846_v62  ;;  %v8569_v29 = vadd.f32 %v8450_v2, %v7809_v45  ;;  %v2038_v43 = vld [vmem:[%s11489_s9 + $0x48] sm:$0xff]  ;;  %v2040_v45 = vld [vmem:[%s11489_s9 + $0x58] sm:$0xff]  ;;  %v2041_v2 = vld [vmem:[%s11489_s9 + $0x60] sm:$0xff] }
 0x926   :  { %v7165_v58 = vpop.eup %7164  ;;  %v1542_v22 = vmul.f32 %v7163_v36, %v7147_v15  ;;  %11648 = vst [vmem:[#allocation7_spill] sm:$0xff] %v8531_v47  ;;  %11650 = vst [vmem:[#allocation9_spill] sm:$0xff] %v8547_v18  ;;  %v1806_v19 = vadd.f32 %v8535_v38, %v8531_v47 }
 0x927   :  { %7015 = vrot.lane.b32.xlu1 %v7014_v24, %s7582_s23  ;;  %v1544_v57 = vmul.f32 %v7165_v58, %v7149_v6  ;;  %11651 = vst [vmem:[#allocation10_spill] sm:$0xff] %v8553_v23  ;;  %v1798_v53 = vadd.f32 %v1797_v46, %v8547_v18  ;;  %11652 = vst [vmem:[#allocation11_spill] sm:$0xff] %v8564_v7  ;;  %v2039_v24 = vld [vmem:[%s11489_s9 + $0x50] sm:$0xff] }
 0x928   :  { %v1807_v36 = vadd.f32 %v1806_v19, %v8553_v23  ;;  %11653 = vst [vmem:[#allocation12_spill] sm:$0xff] %v8569_v29 }
 0x929   :  { %v7167_v51 = vpop.eup %7166  ;;  %v7019_v35 = vpack.i.bf16 %v1544_v57, %v1542_v22  ;;  %v1799_v58 = vadd.f32 %v1798_v53, %v8564_v7 }
 0x92a   :  { %v7169_v5 = vpop.eup %7168  ;;  %v8456_v30 = vmul.f32 %v7167_v51, %v7151_v61  ;;  %v1808_v62 = vadd.f32 %v1807_v36, %v8569_v29  ;;  %v2043_v51 = vld [vmem:[%s11489_s9 + $0x70] sm:$0xff] }
 0x92b   :  { %v8458_v0 = vmul.f32 %v7169_v5, %v7153_v3  ;;  %1935 = vperm.xlu1 %7003, %v1789_v37   ;;  %7020 = vrot.lane.b32.xlu0 %v7019_v35, %s7582_s23  ;;  %v1800_v60 = vrot.slane %v1799_v58, 4  ;;  %v2042_v37 = vld [vmem:[%s11489_s9 + $0x68] sm:$0xff] }
 0x92c   :  { %v1545_v63 = vadd.f32 %v1538_v17, %v8456_v30  ;;  %v2033_v17 = vld [vmem:[%s11489_s9 + $0x20] sm:$0xff] }
 0x92d   :  { %v7171_v54 = vpop.eup %7170  ;;  %v1546_v15 = vadd.f32 %v1540_v13, %v8458_v0  ;;  %v2037_v13 = vld [vmem:[%s11489_s9 + $0x40] sm:$0xff] }
 0x92e   :  { %v7173_v6 = vpop.eup %7172  ;;  %v1549_v42 = vmul.f32 0.5, %v1545_v63  ;;  %v8469_v52 = vmul.f32 %v7171_v54, %v7155_v25  ;;  %v1791_v25 = vld [vmem:[%s11487_s6 + $0x10] sm:$0xff]  ;;  %v2044_v63 = vld [vmem:[%s11489_s9 + $0x78] sm:$0xff] }
 0x92f   :  { %v1550_v61 = vmul.f32 0.5, %v1546_v15  ;;  %v8471_v3 = vmul.f32 %v7173_v6, %v7157_v31  ;;  %1940 = vperm.xlu1 %7003, %v1790_v55   ;;  %1971 = vperm.xlu0 %7002, %v1793_v44   ;;  %v3027_v55 = vld [vmem:[%s11491_s11] sm:$0xff]  ;;  %v3028_v15 = vld [vmem:[%s11491_s11 + $0x8] sm:$0xff]  ;;  %v3029_v6 = vld [vmem:[%s11491_s11 + $0x10] sm:$0xff] }
 0x930   :  { %6795 = vst.msk [vmem:[%s11485_s19 + $0x40] sm:$0xff] %vm456_vm2, %v1549_v42  ;;  %v1547_v12 = vadd.f32 %v1542_v22, %v8469_v52  ;;  %v1809_v22 = vrot.slane %v1808_v62, 4 }
 0x931   :  { %6796 = vst.msk [vmem:[%s11485_s19 + $0x48] sm:$0xff] %vm456_vm2, %v1550_v61  ;;  %v1548_v31 = vadd.f32 %v1544_v57, %v8471_v3  ;;  %v1801_v57 = vadd.f32 %v1800_v60, %v1799_v58 }
 0x932   :  { %v1551_v28 = vmul.f32 0.5, %v1547_v12  ;;  %v1810_v35 = vadd.f32 %v1809_v22, %v1808_v62  ;;  %v3030_v12 = vld [vmem:[%s11491_s11 + $0x18] sm:$0xff] }
 0x933   :  { %v1552_v32 = vmul.f32 0.5, %v1548_v31  ;;  %1976 = vperm.xlu1 %7003, %v1794_v21   ;;  %1945 = vperm.xlu0 %7002, %v1791_v25   ;;  %v1802_v5 = vrot.slane %v1801_v57, 2  ;;  %v6833_v21 = vld [vmem:[%s11622_s22 + $0x20] sm:$0xff] }
 0x934   :  { %6797 = vst.msk [vmem:[%s11485_s19 + $0x50] sm:$0xff] %vm456_vm2, %v1551_v28  ;;  %v1811_v44 = vrot.slane %v1810_v35, 2  ;;  %v6834_v28 = vld [vmem:[%s11622_s22 + $0x28] sm:$0xff] }
 0x935   :  { %6798 = vst.msk [vmem:[%s11485_s19 + $0x58] sm:$0xff] %vm456_vm2, %v1552_v32  ;;  %v1803_v54 = vadd.f32 %v1802_v5, %v1801_v57  ;;  %v6837_v32 = vld [vmem:[%s11621_s20 + $0x20] sm:$0xff] }
 0x936   :  { %v1812_v42 = vadd.f32 %v1811_v44, %v1810_v35 }
 0x937   :  { %1950 = vperm.xlu1 %7003, %v1792_v10   ;;  %1981 = vperm.xlu0 %7002, %v1795_v27   ;;  %v1804_v61 = vrot.slane %v1803_v54, 1 }
 0x938   :  { %v1813_v25 = vrot.slane %v1812_v42, 1 }
 0x939   :  { %v1805_v31 = vadd.f32 %v1804_v61, %v1803_v54 }
 0x93a   :  { %v1814_v10 = vadd.f32 %v1813_v25, %v1812_v42 }
 0x93b   :  { %1986 = vperm.xlu1 %7003, %v1796_v20   ;;  %2047 = vperm.xlu0 %7002, %v2029_v50   ;;  %v1833_v27 = vmul.f32 0.03125, %v1805_v31  ;;  %v6838_v20 = vld [vmem:[%s11621_s20 + $0x28] sm:$0xff]  ;;  %v6835_v50 = vld [vmem:[%s11622_s22 + $0x30] sm:$0xff] }
 0x93d   :  { %v8640_v19 = vsub.f32 %v8547_v18, %v1833_v27  ;;  %v8657_v58 = vsub.f32 %v8564_v7, %v1833_v27 }
 0x93f   :  { %2052 = vperm.xlu1 %7003, %v2030_v11   ;;  %2057 = vperm.xlu0 %7002, %v2031_v16   ;;  %v1834_v11 = vmul.f32 0.03125, %v1814_v10  ;;  %v8622_v16 = vsub.f32 %v8517_v9, %v1833_v27  ;;  %v1861_v62 = vmul.f32 %v8640_v19, %v8640_v19  ;;  %v1865_v57 = vmul.f32 %v8657_v58, %v8657_v58 }
 0x941   :  { %v8637_v46 = vsub.f32 %v8535_v38, %v1834_v11  ;;  %v8647_v53 = vsub.f32 %v8553_v23, %v1834_v11 }
 0x943   :  { %2062 = vperm.xlu1 %7003, %v2032_v1   ;;  %2067 = vperm.xlu0 %7002, %v2033_v17   ;;  %v8625_v1 = vsub.f32 %v8521_v8, %v1833_v27  ;;  %v6836_v17 = vld [vmem:[%s11622_s22 + $0x38] sm:$0xff] }
 0x947   :  { %2072 = vperm.xlu1 %7003, %v2034_v39   ;;  %2077 = vperm.xlu0 %7002, %v2035_v4   ;;  %v6839_v39 = vld [vmem:[%s11621_s20 + $0x30] sm:$0xff]  ;;  %v8634_v4 = vsub.f32 %v8531_v47, %v1834_v11 }
 0x949   :  { %v1854_v36 = vmul.f32 %v8634_v4, %v8634_v4 }
 0x94b   :  { %2082 = vperm.xlu1 %7003, %v2036_v59   ;;  %2087 = vperm.xlu0 %7002, %v2037_v13   ;;  %v1853_v59 = vmul.f32 %v8622_v16, %v8622_v16  ;;  %v1857_v13 = vmul.f32 %v8625_v1, %v8625_v1 }
 0x94d   :  { %v1869_v60 = vadd.f32 %v1857_v13, %v1853_v59 }
 0x94f   :  { %2092 = vperm.xlu1 %7003, %v2038_v43   ;;  %2097 = vperm.xlu0 %7002, %v2039_v24   ;;  %v1858_v43 = vmul.f32 %v8637_v46, %v8637_v46  ;;  %v6840_v24 = vld [vmem:[%s11621_s20 + $0x38] sm:$0xff] }
 0x951   :  { %v1878_v22 = vadd.f32 %v1858_v43, %v1854_v36 }
 0x953   :  { %2102 = vperm.xlu1 %7003, %v2040_v45   ;;  %2107 = vperm.xlu0 %7002, %v2041_v2   ;;  %v8662_v45 = vsub.f32 %v8569_v29, %v1834_v11  ;;  %v1862_v2 = vmul.f32 %v8647_v53, %v8647_v53 }
 0x955   :  { %v1879_v35 = vadd.f32 %v1878_v22, %v1862_v2 }
 0x957   :  { %2112 = vperm.xlu1 %7003, %v2042_v37   ;;  %2117 = vperm.xlu0 %7002, %v2043_v51   ;;  %v1870_v37 = vadd.f32 %v1869_v60, %v1861_v62  ;;  %v1866_v51 = vmul.f32 %v8662_v45, %v8662_v45 }
 0x959   :  { %v1871_v5 = vadd.f32 %v1870_v37, %v1865_v57 }
 0x95b   :  { %2122 = vperm.xlu1 %7003, %v2044_v63   ;;  %3033 = vperm.xlu0 %7002, %v3027_v55   ;;  %v1880_v63 = vadd.f32 %v1879_v35, %v1866_v51  ;;  %v1872_v55 = vrot.slane %v1871_v5, 4 }
 0x95d   :  { %v1881_v44 = vrot.slane %v1880_v63, 4  ;;  %v1873_v54 = vadd.f32 %v1872_v55, %v1871_v5 }
 0x95f   :  { %3038 = vperm.xlu1 %7003, %v3028_v15   ;;  %3043 = vperm.xlu0 %7002, %v3029_v6   ;;  %v1882_v15 = vadd.f32 %v1881_v44, %v1880_v63  ;;  %v1874_v6 = vrot.slane %v1873_v54, 2 }
 0x961   :  { %v1883_v42 = vrot.slane %v1882_v15, 2  ;;  %v1875_v61 = vadd.f32 %v1874_v6, %v1873_v54 }
 0x963   :  { %3048 = vperm.xlu1 %7003, %v3030_v12   ;;  %3333 = vperm.xlu0 %7002, %v6833_v21   ;;  %v1884_v12 = vadd.f32 %v1883_v42, %v1882_v15  ;;  %v1876_v21 = vrot.slane %v1875_v61, 1 }
 0x965   :  { %v1885_v25 = vrot.slane %v1884_v12, 1  ;;  %v1877_v31 = vadd.f32 %v1876_v21, %v1875_v61 }
 0x967   :  { %3338 = vperm.xlu1 %7003, %v6834_v28   ;;  %3369 = vperm.xlu0 %7002, %v6837_v32   ;;  %v1886_v28 = vadd.f32 %v1885_v25, %v1884_v12  ;;  %v1905_v32 = vmul.f32 0.03125, %v1877_v31 }
 0x969   :  { %v1906_v10 = vmul.f32 0.03125, %v1886_v28  ;;  %v1909_v11 = vadd.f32 1e-06, %v1905_v32 }
 0x96b   :  { %3374 = vperm.xlu1 %7003, %v6838_v20   ;;  %3343 = vperm.xlu0 %7002, %v6835_v50   ;;  %7174 = vrsqrt.f32 %v1909_v11 }
 0x96f   :  { %3348 = vperm.xlu1 %7003, %v6836_v17   ;;  %3379 = vperm.xlu0 %7002, %v6839_v39   ;;  %v1910_v17 = vadd.f32 1e-06, %v1906_v10 }
 0x971   :  { %7176 = vrsqrt.f32 %v1910_v17 }
 0x973   :  { %3384 = vperm.xlu1 %7003, %v6840_v24  }
 0x999   :  { %v7016_v27 = vpop.permute.xlu1 %7015 }
 0x99a   :  { %v7018_v20 = vunpack.i.h.bf16 %v7016_v27  ;;  %v7017_v50 = vunpack.i.l.bf16 %v7016_v27 }
 0x99c   :  { %v1574_v39 = vsel %vm456_vm2, %v8456_v30, %v7017_v50  ;;  %v1575_v59 = vsel %vm456_vm2, %v8458_v0, %v7018_v20  ;;  %v7175_v0 = vpop.eup %7174 }
 0x99d   :  { %v1578_v13 = vpack.c.bf16 %v1575_v59, %v1574_v39  ;;  %v7021_v36 = vpop.permute.xlu0 %7020  ;;  %v7177_v2 = vpop.eup %7176  ;;  %v1917_v57 = vmul.f32 %v7175_v0, %v8622_v16  ;;  %v1921_v37 = vmul.f32 %v7175_v0, %v8625_v1  ;;  %v1929_v6 = vmul.f32 %v7175_v0, %v8657_v58  ;;  %v7058_v39 = vld [vmem:[%s11490_s8] sm:$0xff]   ;;  %v7059_v59 = vld [vmem:[%s11490_s8 + $0x8] sm:$0xff]  }
 0x99e   :  { %v7023_v43 = vunpack.i.h.bf16 %v7021_v36  ;;  %v7022_v24 = vunpack.i.l.bf16 %v7021_v36  ;;  %v1918_v51 = vmul.f32 %v7177_v2, %v8634_v4  ;;  %v1930_v42 = vmul.f32 %v7177_v2, %v8662_v45  ;;  %v7061_v36 = vld [vmem:[%s11490_s8 + $0x18] sm:$0xff]  }
 0x99f   :  { %6799 = vmatmul.mubr.msk.bf16.vlgmr.msra.gmra.mrb[64].mxu1 %vm1183_vm3, %v1578_v13  ;;  %v1925_v61 = vmul.f32 %v7175_v0, %v8640_v19  ;;  %v1926_v25 = vmul.f32 %v7177_v2, %v8647_v53  ;;  %v7060_v13 = vld [vmem:[%s11490_s8 + $0x10] sm:$0xff]  }
 0x9a0   :  { %1628 = vmatprep.mubr.bf16.mxu1 %v11632_v48  ;;  %v1577_v62 = vsel %vm456_vm2, %v8471_v3, %v7023_v43  ;;  %v1576_v60 = vsel %vm456_vm2, %v8469_v52, %v7022_v24  ;;  %v1922_v3 = vmul.f32 %v7177_v2, %v8637_v46  ;;  %v7062_v43 = vld [vmem:[%s11490_s8 + $0x20] sm:$0xff]   ;;  %v7063_v24 = vld [vmem:[%s11490_s8 + $0x28] sm:$0xff]  }
 0x9a1   :  { %v1579_v30 = vpack.c.bf16 %v1577_v62, %v1576_v60  ;;  %v7064_v62 = vld [vmem:[%s11490_s8 + $0x30] sm:$0xff]   ;;  %v7065_v60 = vld [vmem:[%s11490_s8 + $0x38] sm:$0xff]  }
 0x9a7   :  { %6800 = vmatmul.mubr.msk.bf16.gmra.mrb[68].mxu1 %vm1183_vm3, %v1579_v30 }
 0x9a8   :  { %1752 = vmatprep.mubr.bf16.mxu1 %v11632_v48 }
 0x9aa   :  { %v8682_v22 = vpop.permute.xlu1 %1935 }
 0x9ab   :  { %v1953_v5 = vmul.f32 %v8682_v22, %v1917_v57  ;;  %v1954_v55 = vmul.f32 %v8682_v22, %v1918_v51 }
 0x9ae   :  { %v8688_v35 = vpop.permute.xlu1 %1940  ;;  %v8690_v52 = vpop.permute.xlu0 %1971 }
 0x9af   :  { %v1957_v63 = vmul.f32 %v8688_v35, %v1921_v37  ;;  %v1958_v44 = vmul.f32 %v8688_v35, %v1922_v3  ;;  %v1989_v1 = vadd.f32 %v8690_v52, %v1953_v5  ;;  %v1990_v46 = vadd.f32 %v8690_v52, %v1954_v55 }
 0x9b2   :  { %v8696_v54 = vpop.permute.xlu1 %1976  ;;  %v8698_v16 = vpop.permute.xlu0 %1945 }
 0x9b3   :  { %v1993_v4 = vadd.f32 %v8696_v54, %v1957_v63  ;;  %v1994_v15 = vadd.f32 %v8696_v54, %v1958_v44  ;;  %v1961_v32 = vmul.f32 %v8698_v16, %v1925_v61  ;;  %v1962_v58 = vmul.f32 %v8698_v16, %v1926_v25 }
 0x9b5   :  { %v2022_v12 = vpack.c.bf16 %v1994_v15, %v1990_v46  ;;  %v2021_v21 = vpack.c.bf16 %v1993_v4, %v1989_v1 }
 0x9b6   :  { %v8708_v31 = vpop.permute.xlu1 %1950  ;;  %v8710_v28 = vpop.permute.xlu0 %1981 }
 0x9b7   :  { %2189 = vmatprep.subr.bf16.mxu0 %v2022_v12  ;;  %v1965_v10 = vmul.f32 %v8708_v31, %v1929_v6  ;;  %v1966_v45 = vmul.f32 %v8708_v31, %v1930_v42  ;;  %v1997_v19 = vadd.f32 %v8710_v28, %v1961_v32  ;;  %v1998_v20 = vadd.f32 %v8710_v28, %v1962_v58 }
 0x9b8   :  { %2190 = vmatpush1.bf16.msra.mxu0 %v2021_v21 }
 0x9ba   :  { %v8716_v27 = vpop.permute.xlu1 %1986  ;;  %v8768_v4 = vpop.permute.xlu0 %2047 }
 0x9bb   :  { %v2001_v53 = vadd.f32 %v8716_v27, %v1965_v10  ;;  %v2002_v50 = vadd.f32 %v8716_v27, %v1966_v45  ;;  %11654 = vst [vmem:[#allocation13_spill] sm:$0xff] %v8768_v4 }
 0x9bd   :  { %v2026_v11 = vpack.c.bf16 %v2002_v50, %v1998_v20  ;;  %v2025_v17 = vpack.c.bf16 %v2001_v53, %v1997_v19 }
 0x9be   :  { %v8771_v42 = vpop.permute.xlu1 %2052  ;;  %v8783_v50 = vpop.permute.xlu0 %2057 }
 0x9bf   :  { %2191 = vmatprep.subr.bf16.mxu0 %v2026_v11  ;;  %11655 = vst [vmem:[#allocation14_spill] sm:$0xff] %v8771_v42  ;;  %11656 = vst [vmem:[#allocation15_spill] sm:$0xff] %v8783_v50 }
 0x9c0   :  { %2192 = vmatpush1.bf16.msra.mxu0 %v2025_v17 }
 0x9c3   :  { %6815 = vmatmul.mubr.msk.bf16.vlgmr.msra.gmra.mrb[80].mxu0 %vm456_vm2, %v7058_v39 }
 0x9c4   :  { %2231 = vmatprep.mubr.bf16.mxu0 %v11632_v48 }
 0x9cb   :  { %6816 = vmatmul.mubr.msk.bf16.gmra.mrb[84].mxu0 %vm456_vm2, %v7059_v59 }
 0x9cc   :  { %2241 = vmatprep.mubr.bf16.mxu0 %v11632_v48 }
 0x9d3   :  { %6817 = vmatmul.mubr.msk.bf16.gmra.mrb[88].mxu0 %vm456_vm2, %v7060_v13 }
 0x9d4   :  { %2251 = vmatprep.mubr.bf16.mxu0 %v11632_v48 }
 0x9db   :  { %6818 = vmatmul.mubr.msk.bf16.gmra.mrb[92].mxu0 %vm456_vm2, %v7061_v36 }
 0x9dc   :  { %2261 = vmatprep.mubr.bf16.mxu0 %v11632_v48 }
 0x9e3   :  { %6819 = vmatmul.mubr.msk.bf16.gmra.mrb[96].mxu0 %vm456_vm2, %v7062_v43 }
 0x9e4   :  { %2271 = vmatprep.mubr.bf16.mxu0 %v11632_v48 }
 0x9eb   :  { %6820 = vmatmul.mubr.msk.bf16.gmra.mrb[100].mxu0 %vm456_vm2, %v7063_v24  ;;  %v8790_v24 = vpop.permute.xlu1 %2062 }
 0x9ec   :  { %2281 = vmatprep.mubr.bf16.mxu0 %v11632_v48  ;;  %11657 = vst [vmem:[#allocation16_spill] sm:$0xff] %v8790_v24 }
 0x9f3   :  { %6821 = vmatmul.mubr.msk.bf16.gmra.mrb[104].mxu0 %vm456_vm2, %v7064_v62 }
 0x9f4   :  { %2291 = vmatprep.mubr.bf16.mxu0 %v11632_v48 }
 0x9fb   :  { %6822 = vmatmul.mubr.msk.bf16.gmra.mrb[108].mxu0 %vm456_vm2, %v7065_v60 }
 0x9fc   :  { %3095 = vmatprep.mubr.bf16.mxu0 %v11632_v48 }
 0xa72   :  { %v1620_v30 = vpop.f32.mrb[64].mxu1 }
 0xa73   :  { %v1622_v0 = vpop.f32.mrb[65].mxu1 }
 0xa74   :  { %v1624_v2 = vpop.f32.mrb[66].mxu1 }
 0xa75   :  { %v1645_v57 = vpack.c.bf16 %v1624_v2, %v1620_v30  ;;  %v1626_v37 = vpop.f32.mrb[67].mxu1 }
 0xa76   :  { %v1646_v51 = vpack.c.bf16 %v1626_v37, %v1622_v0 }
 0xa78   :  { %1720 = vmatprep.subr.bf16.mxu1 %v1646_v51 }
 0xa79   :  { %1721 = vmatpush1.bf16.msra.mxu1 %v1645_v57 }
 0xa7a   :  { %v1630_v3 = vpop.f32.mrb[68].mxu1 }
 0xa7b   :  { %v1632_v5 = vpop.f32.mrb[69].mxu1 }
 0xa7c   :  { %v1634_v63 = vpop.f32.mrb[70].mxu1 }
 0xa7d   :  { %v1649_v55 = vpack.c.bf16 %v1634_v63, %v1630_v3  ;;  %v1636_v44 = vpop.f32.mrb[71].mxu1 }
 0xa7e   :  { %v1650_v1 = vpack.c.bf16 %v1636_v44, %v1632_v5 }
 0xa80   :  { %1722 = vmatprep.subr.bf16.mxu1 %v1650_v1 }
 0xa81   :  { %1723 = vmatpush1.bf16.msra.mxu1 %v1649_v55 }
 0xa84   :  { %6805 = vmatmul.mubr.msk.bf16.vlgmr.msra.gmra.mrb[72].mxu1 %vm456_vm2, %v8415_v26 }
 0xa85   :  { %1762 = vmatprep.mubr.bf16.mxu1 %v11632_v48 }
 0xa8c   :  { %6806 = vmatmul.mubr.msk.bf16.gmra.mrb[76].mxu1 %vm456_vm2, %v8423_v14 }
 0xa8d   :  { %2334 = vmatprep.mubr.bf16.mxu1 %v11632_v48 }
 0xa96   :  { %v2223_v46 = vpop.f32.mrb[80].mxu0 }
 0xa97   :  { %v2224_v15 = vadd.f32 %v2223_v46, %v8768_v4  ;;  %v2225_v6 = vpop.f32.mrb[81].mxu0 }
 0xa98   :  { %v2226_v61 = vadd.f32 %v2225_v6, %v8768_v4  ;;  %v2227_v12 = vpop.f32.mrb[82].mxu0 }
 0xa99   :  { %v2479_v21 = vmul.f32 0.044715, %v2224_v15  ;;  %v8775_v26 = vadd.f32 %v2227_v12, %v8771_v42  ;;  %v2229_v25 = vpop.f32.mrb[83].mxu0 }
 0xa9a   :  { %v2480_v32 = vmul.f32 0.044715, %v2226_v61  ;;  %v8778_v14 = vadd.f32 %v2229_v25, %v8771_v42 }
 0xa9b   :  { %v2543_v10 = vmul.f32 %v2479_v21, %v2224_v15  ;;  %v2483_v58 = vmul.f32 0.044715, %v8775_v26 }
 0xa9c   :  { %v2544_v45 = vmul.f32 %v2480_v32, %v2226_v61  ;;  %v2484_v19 = vmul.f32 0.044715, %v8778_v14 }
 0xa9d   :  { %v2607_v53 = vmul.f32 %v2543_v10, %v2224_v15  ;;  %v2547_v20 = vmul.f32 %v2483_v58, %v8775_v26  ;;  %v8805_v58 = vpop.permute.xlu0 %2067 }
 0xa9e   :  { %v2608_v11 = vmul.f32 %v2544_v45, %v2226_v61  ;;  %v2548_v17 = vmul.f32 %v2484_v19, %v8778_v14  ;;  %v2233_v39 = vpop.f32.mrb[84].mxu0  ;;  %11658 = vst [vmem:[#allocation17_spill] sm:$0xff] %v8805_v58 }
 0xa9f   :  { %v2671_v59 = vadd.f32 %v2607_v53, %v2224_v15  ;;  %v2611_v13 = vmul.f32 %v2547_v20, %v8775_v26  ;;  %v8788_v36 = vadd.f32 %v2233_v39, %v8783_v50  ;;  %v2235_v43 = vpop.f32.mrb[85].mxu0 }
 0xaa0   :  { %v2612_v62 = vmul.f32 %v2548_v17, %v8778_v14  ;;  %v2236_v60 = vadd.f32 %v2235_v43, %v8783_v50  ;;  %v2237_v30 = vpop.f32.mrb[86].mxu0  ;;  %v2672_v0 = vadd.f32 %v2608_v11, %v2226_v61 }
 0xaa1   :  { %v2735_v2 = vmul.f32 0.7978846, %v2671_v59  ;;  %v2675_v57 = vadd.f32 %v2611_v13, %v8775_v26  ;;  %v2487_v37 = vmul.f32 0.044715, %v8788_v36  ;;  %v8797_v51 = vadd.f32 %v2237_v30, %v8790_v24  ;;  %v2239_v3 = vpop.f32.mrb[87].mxu0  ;;  %v8812_v13 = vpop.permute.xlu1 %2072 }
 0xaa2   :  { %v2488_v5 = vmul.f32 0.044715, %v2236_v60  ;;  %v2240_v63 = vadd.f32 %v2239_v3, %v8790_v24  ;;  %v2676_v55 = vadd.f32 %v2612_v62, %v8778_v14  ;;  %v2736_v44 = vmul.f32 0.7978846, %v2672_v0  ;;  %11659 = vst [vmem:[#allocation18_spill] sm:$0xff] %v8812_v13 }
 0xaa3   :  { %7178 = vtanh.f32 %v2735_v2  ;;  %v2739_v1 = vmul.f32 0.7978846, %v2675_v57  ;;  %v2551_v46 = vmul.f32 %v2487_v37, %v8788_v36  ;;  %v2491_v6 = vmul.f32 0.044715, %v8797_v51 }
 0xaa4   :  { %v2552_v12 = vmul.f32 %v2488_v5, %v2236_v60  ;;  %v2492_v21 = vmul.f32 0.044715, %v2240_v63  ;;  %v2740_v25 = vmul.f32 0.7978846, %v2676_v55  ;;  %7180 = vtanh.f32 %v2736_v44 }
 0xaa5   :  { %7182 = vtanh.f32 %v2739_v1  ;;  %v2615_v32 = vmul.f32 %v2551_v46, %v8788_v36  ;;  %v2555_v10 = vmul.f32 %v2491_v6, %v8797_v51  ;;  %v2415_v59 = vmul.f32 0.5, %v2224_v15 }
 0xaa6   :  { %v2616_v45 = vmul.f32 %v2552_v12, %v2236_v60  ;;  %v2556_v19 = vmul.f32 %v2492_v21, %v2240_v63  ;;  %v2243_v53 = vpop.f32.mrb[88].mxu0  ;;  %7184 = vtanh.f32 %v2740_v25  ;;  %v2416_v0 = vmul.f32 0.5, %v2226_v61 }
 0xaa7   :  { %v2679_v20 = vadd.f32 %v2615_v32, %v8788_v36  ;;  %v2619_v11 = vmul.f32 %v2555_v10, %v8797_v51  ;;  %v8810_v17 = vadd.f32 %v2243_v53, %v8805_v58  ;;  %v2245_v39 = vpop.f32.mrb[89].mxu0  ;;  %v2419_v44 = vmul.f32 0.5, %v8775_v26 }
 0xaa8   :  { %v2620_v43 = vmul.f32 %v2556_v19, %v2240_v63  ;;  %v8815_v62 = vadd.f32 %v2245_v39, %v8805_v58  ;;  %v2247_v30 = vpop.f32.mrb[90].mxu0  ;;  %v2680_v2 = vadd.f32 %v2616_v45, %v2236_v60  ;;  %v2420_v21 = vmul.f32 0.5, %v8778_v14 }
 0xaa9   :  { %v2743_v57 = vmul.f32 0.7978846, %v2679_v20  ;;  %v2683_v37 = vadd.f32 %v2619_v11, %v8797_v51  ;;  %v2495_v3 = vmul.f32 0.044715, %v8810_v17  ;;  %v8820_v5 = vadd.f32 %v2247_v30, %v8812_v13  ;;  %v2249_v55 = vpop.f32.mrb[91].mxu0  ;;  %v8834_v20 = vpop.permute.xlu0 %2077 }
 0xaaa   :  { %v8823_v15 = vadd.f32 %v2249_v55, %v8812_v13  ;;  %v2684_v1 = vadd.f32 %v2620_v43, %v2240_v63  ;;  %v2744_v46 = vmul.f32 0.7978846, %v2680_v2  ;;  %v8829_v25 = vmul.f32 0.5, %v2236_v60  ;;  %11660 = vst [vmem:[#allocation19_spill] sm:$0xff] %v8834_v20 }
 0xaab   :  { %7186 = vtanh.f32 %v2743_v57  ;;  %v2747_v6 = vmul.f32 0.7978846, %v2683_v37  ;;  %v2559_v61 = vmul.f32 %v2495_v3, %v8810_v17  ;;  %v2499_v12 = vmul.f32 0.044715, %v8820_v5 }
 0xaac   :  { %v2748_v32 = vmul.f32 0.7978846, %v2684_v1  ;;  %7188 = vtanh.f32 %v2744_v46  ;;  %v2496_v26 = vmul.f32 0.044715, %v8815_v62  ;;  %v2500_v11 = vmul.f32 0.044715, %v8823_v15  ;;  %v8847_v1 = vpop.permute.xlu1 %2082 }
 0xaad   :  { %v7179_v10 = vpop.eup %7178  ;;  %7190 = vtanh.f32 %v2747_v6  ;;  %v2623_v45 = vmul.f32 %v2559_v61, %v8810_v17  ;;  %v2563_v19 = vmul.f32 %v2499_v12, %v8820_v5  ;;  %v8837_v14 = vmul.f32 0.5, %v2240_v63  ;;  %11661 = vst [vmem:[#allocation20_spill] sm:$0xff] %v8847_v1 }
 0xaae   :  { %v7181_v53 = vpop.eup %7180  ;;  %v2253_v39 = vpop.f32.mrb[92].mxu0  ;;  %v2863_v43 = vadd.f32 1.0, %v7179_v10  ;;  %7192 = vtanh.f32 %v2748_v32  ;;  %v8845_v3 = vmul.f32 0.5, %v8788_v36  ;;  %v8853_v12 = vmul.f32 0.5, %v8797_v51 }
 0xaaf   :  { %v7183_v60 = vpop.eup %7182  ;;  %v2687_v30 = vadd.f32 %v2623_v45, %v8810_v17  ;;  %v2627_v2 = vmul.f32 %v2563_v19, %v8820_v5  ;;  %v8842_v57 = vadd.f32 %v2253_v39, %v8834_v20  ;;  %v2255_v37 = vpop.f32.mrb[93].mxu0  ;;  %v2864_v6 = vadd.f32 1.0, %v7181_v53 }
 0xab0   :  { %v7185_v55 = vpop.eup %7184  ;;  %v8850_v46 = vadd.f32 %v2255_v37, %v8834_v20  ;;  %v2257_v63 = vpop.f32.mrb[94].mxu0  ;;  %v2867_v61 = vadd.f32 1.0, %v7183_v60  ;;  %v2560_v32 = vmul.f32 %v2496_v26, %v8815_v62  ;;  %v2564_v37 = vmul.f32 %v2500_v11, %v8823_v15 }
 0xab1   :  { %v2691_v10 = vadd.f32 %v2627_v2, %v8820_v5  ;;  %v2503_v45 = vmul.f32 0.044715, %v8842_v57  ;;  %v8859_v36 = vadd.f32 %v2257_v63, %v8847_v1  ;;  %v2259_v19 = vpop.f32.mrb[95].mxu0  ;;  %v2751_v39 = vmul.f32 0.7978846, %v2687_v30 }
 0xab2   :  { %v2868_v20 = vadd.f32 1.0, %v7185_v55  ;;  %v2927_v13 = vmul.f32 %v2863_v43, %v2415_v59  ;;  %v2504_v51 = vmul.f32 0.044715, %v8850_v46  ;;  %v8866_v26 = vadd.f32 %v2259_v19, %v8847_v1  ;;  %v8883_v1 = vpop.permute.xlu1 %2092 }
 0xab3   :  { %v2567_v53 = vmul.f32 %v2503_v45, %v8842_v57  ;;  %v2507_v60 = vmul.f32 0.044715, %v8859_v36  ;;  %v2755_v2 = vmul.f32 0.7978846, %v2691_v10  ;;  %v2928_v58 = vmul.f32 %v2864_v6, %v2416_v0  ;;  %v8874_v45 = vpop.permute.xlu0 %2087  ;;  %11663 = vst [vmem:[#allocation22_spill] sm:$0xff] %v8883_v1 }
 0xab4   :  { %v2932_v24 = vmul.f32 %v2868_v20, %v2420_v21  ;;  %v2931_v63 = vmul.f32 %v2867_v61, %v2419_v44  ;;  %v2624_v30 = vmul.f32 %v2560_v32, %v8815_v62  ;;  %v8872_v43 = vmul.f32 0.5, %v8815_v62  ;;  %11662 = vst [vmem:[#allocation21_spill] sm:$0xff] %v8874_v45 }
 0xab5   :  { %v7187_v50 = vpop.eup %7186  ;;  %v2631_v11 = vmul.f32 %v2567_v53, %v8842_v57  ;;  %v2571_v59 = vmul.f32 %v2507_v60, %v8859_v36  ;;  %7194 = vtanh.f32 %v2751_v39  ;;  %v2628_v19 = vmul.f32 %v2564_v37, %v8823_v15 }
 0xab6   :  { %v7189_v55 = vpop.eup %7188  ;;  %v2263_v10 = vpop.f32.mrb[96].mxu0  ;;  %v2996_v0 = vpack.c.bf16 %v2932_v24, %v2928_v58  ;;  %v2995_v21 = vpack.c.bf16 %v2931_v63, %v2927_v13  ;;  %v2568_v6 = vmul.f32 %v2504_v51, %v8850_v46  ;;  %7196 = vtanh.f32 %v2755_v2 }
 0xab7   :  { %v7191_v44 = vpop.eup %7190  ;;  %v2695_v20 = vadd.f32 %v2631_v11, %v8842_v57  ;;  %v2635_v61 = vmul.f32 %v2571_v59, %v8859_v36  ;;  %v8881_v32 = vadd.f32 %v2263_v10, %v8874_v45  ;;  %v2265_v53 = vpop.f32.mrb[97].mxu0  ;;  %v2508_v39 = vmul.f32 0.044715, %v8866_v26 }
 0xab8   :  { %v7193_v60 = vpop.eup %7192  ;;  %v8887_v24 = vadd.f32 %v2265_v53, %v8874_v45  ;;  %3063 = vmatprep.subr.bf16.mxu0 %v2996_v0  ;;  %v2267_v58 = vpop.f32.mrb[98].mxu0  ;;  %v2872_v13 = vadd.f32 1.0, %v7189_v55  ;;  %v2871_v11 = vadd.f32 1.0, %v7187_v50  ;;  %v2875_v59 = vadd.f32 1.0, %v7191_v44 }
 0xab9   :  { %v2511_v37 = vmul.f32 0.044715, %v8881_v32  ;;  %v8891_v51 = vadd.f32 %v2267_v58, %v8883_v1  ;;  %3064 = vmatpush1.bf16.msra.mxu0 %v2995_v21  ;;  %v2269_v63 = vpop.f32.mrb[99].mxu0  ;;  %v2759_v10 = vmul.f32 0.7978846, %v2695_v20  ;;  %v2699_v2 = vadd.f32 %v2635_v61, %v8859_v36 }
 0xaba   :  { %v8895_v42 = vadd.f32 %v2269_v63, %v8883_v1  ;;  %v2876_v53 = vadd.f32 1.0, %v7193_v60  ;;  %v2512_v55 = vmul.f32 0.044715, %v8887_v24  ;;  %v8901_v58 = vmul.f32 0.5, %v8823_v15  ;;  %v8911_v1 = vpop.permute.xlu0 %2097 }
 0xabb   :  { %v2575_v0 = vmul.f32 %v2511_v37, %v8881_v32  ;;  %v2515_v45 = vmul.f32 0.044715, %v8891_v51  ;;  %v2572_v21 = vmul.f32 %v2508_v39, %v8866_v26  ;;  %v2936_v44 = vmul.f32 %v2872_v13, %v8829_v25  ;;  %11664 = vst [vmem:[#allocation23_spill] sm:$0xff] %v8911_v1 }
 0xabc   :  { %v2516_v50 = vmul.f32 0.044715, %v8895_v42  ;;  %v2940_v20 = vmul.f32 %v2876_v53, %v8837_v14  ;;  %v2935_v37 = vmul.f32 %v2871_v11, %v8845_v3  ;;  %v2939_v63 = vmul.f32 %v2875_v59, %v8853_v12  ;;  %v8919_v11 = vpop.permute.xlu1 %2102 }
 0xabd   :  { %v2639_v61 = vmul.f32 %v2575_v0, %v8881_v32  ;;  %v2579_v60 = vmul.f32 %v2515_v45, %v8891_v51  ;;  %7198 = vtanh.f32 %v2759_v10  ;;  %v2763_v4 = vmul.f32 0.7978846, %v2699_v2  ;;  %11665 = vst [vmem:[#allocation24_spill] sm:$0xff] %v8919_v11 }
 0xabe   :  { %v2273_v29 = vpop.f32.mrb[100].mxu0  ;;  %v3000_v39 = vpack.c.bf16 %v2940_v20, %v2936_v44  ;;  %v2688_v7 = vadd.f32 %v2624_v30, %v8815_v62  ;;  %v2576_v25 = vmul.f32 %v2512_v55, %v8887_v24  ;;  %v2999_v53 = vpack.c.bf16 %v2939_v63, %v2935_v37 }
 0xabf   :  { %v2643_v14 = vmul.f32 %v2579_v60, %v8891_v51  ;;  %v8917_v13 = vadd.f32 %v2273_v29, %v8911_v1  ;;  %v2275_v45 = vpop.f32.mrb[101].mxu0  ;;  %v7195_v3 = vpop.eup %7194  ;;  %v2580_v12 = vmul.f32 %v2516_v50, %v8895_v42  ;;  %v2692_v62 = vadd.f32 %v2628_v19, %v8823_v15 }
 0xac0   :  { %v8923_v59 = vadd.f32 %v2275_v45, %v8911_v1  ;;  %3065 = vmatprep.subr.bf16.mxu0 %v3000_v39  ;;  %v2277_v10 = vpop.f32.mrb[102].mxu0  ;;  %v2752_v30 = vmul.f32 0.7978846, %v2688_v7  ;;  %v2703_v2 = vadd.f32 %v2639_v61, %v8881_v32  ;;  %v7197_v50 = vpop.eup %7196  ;;  %v2632_v20 = vmul.f32 %v2568_v6, %v8850_v46 }
 0xac1   :  { %v2707_v29 = vadd.f32 %v2643_v14, %v8891_v51  ;;  %v2519_v0 = vmul.f32 0.044715, %v8917_v13  ;;  %v8930_v55 = vadd.f32 %v2277_v10, %v8919_v11  ;;  %3066 = vmatpush1.bf16.msra.mxu0 %v2999_v53  ;;  %v2279_v44 = vpop.f32.mrb[103].mxu0  ;;  %v2636_v60 = vmul.f32 %v2572_v21, %v8866_v26  ;;  %v8948_v45 = vpop.permute.xlu0 %2107 }
 0xac2   :  { %v2756_v37 = vmul.f32 0.7978846, %v2692_v62  ;;  %7200 = vtanh.f32 %v2752_v30  ;;  %v2520_v15 = vmul.f32 0.044715, %v8923_v59  ;;  %v8938_v61 = vmul.f32 %v2576_v25, %v8887_v24  ;;  %11666 = vst [vmem:[#allocation25_spill] sm:$0xff] %v8948_v45 }
 0xac3   :  { %7202 = vtanh.f32 %v2763_v4  ;;  %v2583_v7 = vmul.f32 %v2519_v0, %v8917_v13  ;;  %v2523_v19 = vmul.f32 0.044715, %v8930_v55  ;;  %v8941_v63 = vmul.f32 %v2580_v12, %v8895_v42 }
 0xac4   :  { %v8944_v39 = vadd.f32 %v2279_v44, %v8919_v11  ;;  %7204 = vtanh.f32 %v2756_v37  ;;  %v2767_v6 = vmul.f32 0.7978846, %v2703_v2  ;;  %v2771_v21 = vmul.f32 0.7978846, %v2707_v29 }
 0xac5   :  { %v2647_v4 = vmul.f32 %v2583_v7, %v8917_v13  ;;  %v2587_v14 = vmul.f32 %v2523_v19, %v8930_v55  ;;  %v2431_v10 = vmul.f32 0.5, %v8810_v17  ;;  %v2435_v25 = vmul.f32 0.5, %v8820_v5  ;;  %v8960_v7 = vpop.permute.xlu1 %2112  ;;  %v8995_v18 = vpop.permute.xlu0 %2117 }
 0xac6   :  { %v2283_v53 = vpop.f32.mrb[104].mxu0  ;;  %v2879_v62 = vadd.f32 1.0, %v7195_v3  ;;  %v2883_v12 = vadd.f32 1.0, %v7197_v50  ;;  %v2584_v0 = vmul.f32 %v2520_v15, %v8923_v59  ;;  %11667 = vst [vmem:[#allocation26_spill] sm:$0xff] %v8960_v7  ;;  %v2524_v17 = vmul.f32 0.044715, %v8944_v39 }
 0xac7   :  { %v2711_v30 = vadd.f32 %v2647_v4, %v8917_v13  ;;  %v2651_v2 = vmul.f32 %v2587_v14, %v8930_v55  ;;  %v8956_v29 = vadd.f32 %v2283_v53, %v8948_v45  ;;  %v2285_v44 = vpop.f32.mrb[105].mxu0  ;;  %v8958_v37 = vpop.eup %7198  ;;  %7206 = vtanh.f32 %v2767_v6 }
 0xac8   :  { %v8964_v5 = vadd.f32 %v2285_v44, %v8948_v45  ;;  %v2287_v3 = vpop.f32.mrb[106].mxu0  ;;  %v8966_v50 = vmul.f32 %v2879_v62, %v2431_v10  ;;  %v8968_v19 = vmul.f32 %v2883_v12, %v2435_v25  ;;  %7208 = vtanh.f32 %v2771_v21 }
 0xac9   :  { %v2715_v15 = vadd.f32 %v2651_v2, %v8930_v55  ;;  %v2527_v4 = vmul.f32 0.044715, %v8956_v29  ;;  %v8973_v14 = vadd.f32 %v2287_v3, %v8960_v7  ;;  %v2289_v53 = vpop.f32.mrb[107].mxu0  ;;  %v2775_v11 = vmul.f32 0.7978846, %v2711_v30 }
 0xaca   :  { %v3003_v44 = vpack.c.bf16 %v8968_v19, %v8966_v50  ;;  %v8978_v45 = vadd.f32 %v2289_v53, %v8960_v7  ;;  %v8981_v10 = vmul.f32 %v2584_v0, %v8923_v59  ;;  %v2528_v25 = vmul.f32 0.044715, %v8964_v5 }
 0xacb   :  { %v2591_v6 = vmul.f32 %v2527_v4, %v8956_v29  ;;  %v2531_v62 = vmul.f32 0.044715, %v8973_v14  ;;  %v2779_v2 = vmul.f32 0.7978846, %v2715_v15  ;;  %v2588_v21 = vmul.f32 %v2524_v17, %v8944_v39 }
 0xacc   :  { %v7201_v12 = vpop.eup %7200  ;;  %v2696_v30 = vadd.f32 %v2632_v20, %v8850_v46  ;;  %v2700_v3 = vadd.f32 %v2636_v60, %v8866_v26  ;;  %v2532_v4 = vmul.f32 0.044715, %v8978_v45  ;;  %7210 = vtanh.f32 %v2775_v11 }
 0xacd   :  { %v7203_v50 = vpop.eup %7202  ;;  %v2655_v19 = vmul.f32 %v2591_v6, %v8956_v29  ;;  %v2880_v53 = vadd.f32 1.0, %v7201_v12  ;;  %v2595_v0 = vmul.f32 %v2531_v62, %v8973_v14  ;;  %v8993_v23 = vmul.f32 0.5, %v8850_v46 }
 0xace   :  { %v7205_v7 = vpop.eup %7204  ;;  %v2293_v1 = vpop.f32.mrb[108].mxu0  ;;  %v2760_v15 = vmul.f32 0.7978846, %v2696_v30  ;;  %v2764_v17 = vmul.f32 0.7978846, %v2700_v3  ;;  %v2592_v60 = vmul.f32 %v2528_v25, %v8964_v5  ;;  %v9001_v47 = vmul.f32 %v2588_v21, %v8944_v39 }
 0xacf   :  { %v2719_v20 = vadd.f32 %v2655_v19, %v8956_v29  ;;  %v2884_v6 = vadd.f32 1.0, %v7205_v7  ;;  %v2659_v12 = vmul.f32 %v2595_v0, %v8973_v14  ;;  %v2295_v62 = vpop.f32.mrb[109].mxu0  ;;  %v9004_v11 = vadd.f32 %v2293_v1, %v8995_v18  ;;  %v9009_v3 = vpop.permute.xlu1 %2122 }
 0xad0   :  { %v9007_v46 = vmul.f32 0.5, %v8866_v26  ;;  %7212 = vtanh.f32 %v2760_v15  ;;  %v2297_v30 = vpop.f32.mrb[110].mxu0  ;;  %v2944_v19 = vmul.f32 %v2880_v53, %v8872_v43  ;;  %v2596_v9 = vmul.f32 %v2532_v4, %v8978_v45 }
 0xad1   :  { %v2948_v7 = vmul.f32 %v2884_v6, %v8901_v58  ;;  %v2723_v25 = vadd.f32 %v2659_v12, %v8973_v14  ;;  %7214 = vtanh.f32 %v2764_v17  ;;  %v2299_v0 = vpop.f32.mrb[111].mxu0  ;;  %v2783_v21 = vmul.f32 0.7978846, %v2719_v20  ;;  %v7207_v15 = vpop.eup %7206 }
 0xad2   :  { %v2535_v1 = vmul.f32 0.044715, %v9004_v11  ;;  %v9017_v26 = vadd.f32 %v2297_v30, %v9009_v3  ;;  %7216 = vtanh.f32 %v2779_v2  ;;  %v9020_v38 = vmul.f32 %v2592_v60, %v8964_v5  ;;  %v7209_v58 = vpop.eup %7208 }
 0xad3   :  { %v3004_v43 = vpack.c.bf16 %v2948_v7, %v2944_v19  ;;  %v2787_v53 = vmul.f32 0.7978846, %v2723_v25  ;;  %v9024_v17 = vadd.f32 %v2295_v62, %v8995_v18  ;;  %v2887_v20 = vadd.f32 1.0, %v8958_v37 }
 0xad4   :  { %v2599_v6 = vmul.f32 %v2535_v1, %v9004_v11  ;;  %v2539_v4 = vmul.f32 0.044715, %v9017_v26  ;;  %v2439_v12 = vmul.f32 0.5, %v8842_v57  ;;  %v2443_v2 = vmul.f32 0.5, %v8859_v36 }
 0xad5   :  { %3067 = vmatprep.subr.bf16.mxu0 %v3004_v43  ;;  %v2891_v30 = vadd.f32 1.0, %v7203_v50  ;;  %v9031_v60 = vadd.f32 %v2299_v0, %v9009_v3  ;;  %7218 = vtanh.f32 %v2783_v21  ;;  %v2660_v19 = vmul.f32 %v2596_v9, %v8978_v45 }
 0xad6   :  { %3068 = vmatpush1.bf16.msra.mxu0 %v3003_v44  ;;  %v2663_v62 = vmul.f32 %v2599_v6, %v9004_v11  ;;  %v2603_v7 = vmul.f32 %v2539_v4, %v9017_v26  ;;  %7220 = vtanh.f32 %v2787_v53  ;;  %v2951_v25 = vmul.f32 %v2887_v20, %v2439_v12  ;;  %v7211_v1 = vpop.eup %7210 }
 0xad7   :  { %v2955_v37 = vmul.f32 %v2891_v30, %v2443_v2  ;;  %v2704_v57 = vadd.f32 %v8938_v61, %v8887_v24  ;;  %v2536_v50 = vmul.f32 0.044715, %v9024_v17  ;;  %v2708_v9 = vadd.f32 %v8941_v63, %v8895_v42 }
 0xad8   :  { %v2727_v36 = vadd.f32 %v2663_v62, %v9004_v11  ;;  %v2667_v0 = vmul.f32 %v2603_v7, %v9017_v26  ;;  %v2540_v21 = vmul.f32 0.044715, %v9031_v60  ;;  %v2447_v53 = vmul.f32 0.5, %v8881_v32 }
 0xad9   :  { %v3007_v44 = vpack.c.bf16 %v2955_v37, %v2951_v25  ;;  %v2768_v43 = vmul.f32 0.7978846, %v2704_v57  ;;  %v2772_v20 = vmul.f32 0.7978846, %v2708_v9  ;;  %v2895_v12 = vadd.f32 1.0, %v7207_v15 }
 0xada   :  { %v7213_v6 = vpop.eup %7212  ;;  %v2791_v4 = vmul.f32 0.7978846, %v2727_v36  ;;  %v2731_v61 = vadd.f32 %v2667_v0, %v9017_v26  ;;  %v2451_v62 = vmul.f32 0.5, %v8891_v51  ;;  %v2899_v7 = vadd.f32 1.0, %v7209_v58 }
 0xadb   :  { %v7215_v2 = vpop.eup %7214  ;;  %v2888_v30 = vadd.f32 1.0, %v7213_v6  ;;  %7222 = vtanh.f32 %v2768_v43  ;;  %v2600_v63 = vmul.f32 %v2536_v50, %v9024_v17  ;;  %v2604_v32 = vmul.f32 %v2540_v21, %v9031_v60 }
 0xadc   :  { %7224 = vtanh.f32 %v2791_v4  ;;  %v2892_v25 = vadd.f32 1.0, %v7215_v2  ;;  %v2795_v37 = vmul.f32 0.7978846, %v2731_v61  ;;  %v7217_v57 = vpop.eup %7216  ;;  %v9049_v36 = vmul.f32 %v2895_v12, %v2447_v53 }
 0xadd   :  { %7226 = vtanh.f32 %v2772_v20  ;;  %v9051_v0 = vmul.f32 %v2899_v7, %v2451_v62  ;;  %v2952_v15 = vmul.f32 %v2888_v30, %v8993_v23  ;;  %v2712_v51 = vadd.f32 %v8981_v10, %v8923_v59 }
 0xade   :  { %v2956_v9 = vmul.f32 %v2892_v25, %v9007_v46  ;;  %7228 = vtanh.f32 %v2795_v37  ;;  %v2716_v50 = vadd.f32 %v9001_v47, %v8944_v39  ;;  %v2455_v21 = vmul.f32 0.5, %v8917_v13 }
 0xadf   :  { %v3011_v58 = vpack.c.bf16 %v9051_v0, %v9049_v36  ;;  %v2459_v43 = vmul.f32 0.5, %v8930_v55  ;;  %v7219_v53 = vpop.eup %7218  ;;  %v2776_v4 = vmul.f32 0.7978846, %v2712_v51  ;;  %v2903_v23 = vadd.f32 1.0, %v7211_v1 }
 0xae0   :  { %v3008_v6 = vpack.c.bf16 %v2956_v9, %v2952_v15  ;;  %v2907_v61 = vadd.f32 1.0, %v7217_v57  ;;  %v7221_v46 = vpop.eup %7220  ;;  %v2664_v20 = vmul.f32 %v2600_v63, %v9024_v17  ;;  %v2668_v10 = vmul.f32 %v2604_v32, %v9031_v60 }
 0xae1   :  { %v2780_v12 = vmul.f32 0.7978846, %v2716_v50  ;;  %v2720_v2 = vadd.f32 %v9020_v38, %v8964_v5  ;;  %7230 = vtanh.f32 %v2776_v4  ;;  %v9067_v47 = vmul.f32 %v2903_v23, %v2455_v21 }
 0xae2   :  { %3069 = vmatprep.subr.bf16.mxu0 %v3008_v6  ;;  %v9069_v13 = vmul.f32 %v2907_v61, %v2459_v43  ;;  %v2724_v55 = vadd.f32 %v2660_v19, %v8978_v45  ;;  %v2463_v30 = vmul.f32 0.5, %v8956_v29  ;;  %v2467_v62 = vmul.f32 0.5, %v8973_v14 }
 0xae3   :  { %3070 = vmatpush1.bf16.msra.mxu0 %v3007_v44  ;;  %7232 = vtanh.f32 %v2780_v12  ;;  %v2784_v1 = vmul.f32 0.7978846, %v2720_v2  ;;  %v2911_v38 = vadd.f32 1.0, %v7219_v53  ;;  %v2915_v25 = vadd.f32 1.0, %v7221_v46 }
 0xae4   :  { %v3015_v7 = vpack.c.bf16 %v9069_v13, %v9067_v47  ;;  %v2788_v63 = vmul.f32 0.7978846, %v2724_v55  ;;  %v2728_v57 = vadd.f32 %v2664_v20, %v9024_v17  ;;  %v2448_v29 = vmul.f32 0.5, %v8887_v24 }
 0xae5   :  { %v7223_v37 = vpop.eup %7222  ;;  %7234 = vtanh.f32 %v2784_v1  ;;  %v2975_v19 = vmul.f32 %v2911_v38, %v2463_v30  ;;  %v2979_v44 = vmul.f32 %v2915_v25, %v2467_v62  ;;  %v2452_v14 = vmul.f32 0.5, %v8895_v42 }
 0xae6   :  { %v7225_v32 = vpop.eup %7224  ;;  %v2896_v15 = vadd.f32 1.0, %v7223_v37  ;;  %7236 = vtanh.f32 %v2788_v63  ;;  %v2732_v51 = vadd.f32 %v2668_v10, %v9031_v60  ;;  %v2792_v50 = vmul.f32 0.7978846, %v2728_v57 }
 0xae7   :  { %v7227_v9 = vpop.eup %7226  ;;  %v3019_v53 = vpack.c.bf16 %v2979_v44, %v2975_v19  ;;  %v2471_v6 = vmul.f32 0.5, %v9004_v11  ;;  %v2919_v4 = vadd.f32 1.0, %v7225_v32  ;;  %v2475_v61 = vmul.f32 0.5, %v9017_v26 }
 0xae8   :  { %v7229_v21 = vpop.eup %7228  ;;  %v2900_v43 = vadd.f32 1.0, %v7227_v9  ;;  %v2796_v23 = vmul.f32 0.7978846, %v2732_v51  ;;  %7238 = vtanh.f32 %v2792_v50  ;;  %v2960_v20 = vmul.f32 %v2896_v15, %v2448_v29  ;;  %v7066_v51 = vld [vmem:[%s11492_s10] sm:$0xff]  }
 0xae9   :  { %v2923_v46 = vadd.f32 1.0, %v7229_v21  ;;  %v2983_v24 = vmul.f32 %v2919_v4, %v2471_v6  ;;  %v2456_v1 = vmul.f32 0.5, %v8923_v59  ;;  %v2460_v11 = vmul.f32 0.5, %v8944_v39 }
 0xaea   :  { %v2964_v12 = vmul.f32 %v2900_v43, %v2452_v14  ;;  %7240 = vtanh.f32 %v2796_v23  ;;  %v2464_v37 = vmul.f32 0.5, %v8964_v5  ;;  %v2468_v57 = vmul.f32 0.5, %v8978_v45 }
 0xaeb   :  { %v2987_v2 = vmul.f32 %v2923_v46, %v2475_v61  ;;  %v7231_v42 = vpop.eup %7230  ;;  %v2472_v36 = vmul.f32 0.5, %v9024_v17  ;;  %v2476_v0 = vmul.f32 0.5, %v9031_v60  ;;  %v7067_v17 = vld [vmem:[%s11492_s10 + $0x8] sm:$0xff]  }
 0xaec   :  { %v3012_v47 = vpack.c.bf16 %v2964_v12, %v2960_v20  ;;  %v2904_v13 = vadd.f32 1.0, %v7231_v42 }
 0xaed   :  { %v7233_v10 = vpop.eup %7232  ;;  %v3023_v55 = vpack.c.bf16 %v2987_v2, %v2983_v24  ;;  %v11668_v24 = vld [vmem:[#allocation3_spill] sm:$0xff] }
 0xaee   :  { %3071 = vmatprep.subr.bf16.mxu0 %v3012_v47  ;;  %v2908_v30 = vadd.f32 1.0, %v7233_v10  ;;  %v2968_v63 = vmul.f32 %v2904_v13, %v2456_v1  ;;  %v11669_v47 = vld [vmem:[#allocation2_spill] sm:$0xff] }
 0xaef   :  { %v7235_v62 = vpop.eup %7234  ;;  %3072 = vmatpush1.bf16.msra.mxu0 %v3011_v58 }
 0xaf0   :  { %v7237_v26 = vpop.eup %7236  ;;  %v2972_v38 = vmul.f32 %v2908_v30, %v2460_v11  ;;  %v2912_v25 = vadd.f32 1.0, %v7235_v62 }
 0xaf1   :  { %v2916_v32 = vadd.f32 1.0, %v7237_v26 }
 0xaf2   :  { %v3016_v15 = vpack.c.bf16 %v2972_v38, %v2968_v63  ;;  %v7239_v19 = vpop.eup %7238  ;;  %v2976_v59 = vmul.f32 %v2912_v25, %v2464_v37 }
 0xaf3   :  { %v2980_v44 = vmul.f32 %v2916_v32, %v2468_v57  ;;  %v2920_v39 = vadd.f32 1.0, %v7239_v19 }
 0xaf4   :  { %3073 = vmatprep.subr.bf16.mxu0 %v3016_v15  ;;  %v7241_v9 = vpop.eup %7240 }
 0xaf5   :  { %3074 = vmatpush1.bf16.msra.mxu0 %v3015_v7  ;;  %v3020_v29 = vpack.c.bf16 %v2980_v44, %v2976_v59  ;;  %v2924_v58 = vadd.f32 1.0, %v7241_v9  ;;  %v2984_v14 = vmul.f32 %v2920_v39, %v2472_v36 }
 0xaf7   :  { %3075 = vmatprep.subr.bf16.mxu0 %v3020_v29  ;;  %v2988_v5 = vmul.f32 %v2924_v58, %v2476_v0 }
 0xaf9   :  { %3076 = vmatpush1.bf16.msra.mxu0 %v3019_v53  ;;  %v3024_v45 = vpack.c.bf16 %v2988_v5, %v2984_v14 }
 0xafb   :  { %3077 = vmatprep.subr.bf16.mxu0 %v3024_v45 }
 0xafd   :  { %3078 = vmatpush1.bf16.msra.mxu0 %v3023_v55 }
 0xb00   :  { %3096 = vmatmul.mubr.bf16.vlgmr.msra.gmra.mrb[112].mxu0 %v7066_v51 }
 0xb01   :  { %3105 = vmatprep.mubr.bf16.mxu0 %v11632_v48 }
 0xb08   :  { %3106 = vmatmul.mubr.bf16.gmra.mrb[116].mxu0 %v7067_v17 }
 0xb09   :  { %3580 = vmatprep.mubr.bf16.mxu0 %v11632_v48 }
 0xb57   :  { %v1754_v60 = vpop.f32.mrb[72].mxu1 }
 0xb58   :  { %v1756_v7 = vpop.f32.mrb[73].mxu1  ;;  %v9106_v6 = vadd.f32 %v1754_v60, %v7796_v40 }
 0xb59   :  { %v1758_v50 = vpop.f32.mrb[74].mxu1  ;;  %v9109_v4 = vadd.f32 %v1756_v7, %v7779_v33 }
 0xb5a   :  { %v1760_v21 = vpop.f32.mrb[75].mxu1  ;;  %v9100_v43 = vadd.f32 %v1758_v50, %v7798_v41 }
 0xb5b   :  { %v9103_v53 = vadd.f32 %v1760_v21, %v7781_v34 }
 0xb5c   :  { %v1815_v61 = vadd.f32 %v9100_v43, %v9106_v6 }
 0xb5d   :  { %v1824_v41 = vadd.f32 %v9103_v53, %v9109_v4 }
 0xb5f   :  { %v1764_v23 = vpop.f32.mrb[76].mxu1 }
 0xb60   :  { %v9114_v46 = vadd.f32 %v1764_v23, %v7835_v56  ;;  %v1766_v20 = vpop.f32.mrb[77].mxu1 }
 0xb61   :  { %v9119_v34 = vadd.f32 %v1766_v20, %v7818_v49  ;;  %v1768_v12 = vpop.f32.mrb[78].mxu1 }
 0xb62   :  { %v1816_v40 = vadd.f32 %v1815_v61, %v9114_v46  ;;  %v9123_v33 = vadd.f32 %v1768_v12, %v11668_v24  ;;  %v1770_v2 = vpop.f32.mrb[79].mxu1 }
 0xb63   :  { %v1825_v42 = vadd.f32 %v1824_v41, %v9119_v34  ;;  %v9127_v10 = vadd.f32 %v1770_v2, %v11669_v47 }
 0xb64   :  { %v1817_v56 = vadd.f32 %v1816_v40, %v9123_v33 }
 0xb65   :  { %v1826_v13 = vadd.f32 %v1825_v42, %v9127_v10 }
 0xb66   :  { %v1818_v55 = vrot.slane %v1817_v56, 4 }
 0xb67   :  { %v1827_v1 = vrot.slane %v1826_v13, 4 }
 0xb68   :  { %v1819_v49 = vadd.f32 %v1818_v55, %v1817_v56 }
 0xb69   :  { %v1828_v11 = vadd.f32 %v1827_v1, %v1826_v13 }
 0xb6a   :  { %v1820_v30 = vrot.slane %v1819_v49, 2 }
 0xb6b   :  { %v1829_v62 = vrot.slane %v1828_v11, 2 }
 0xb6c   :  { %v1821_v26 = vadd.f32 %v1820_v30, %v1819_v49 }
 0xb6d   :  { %v1830_v63 = vadd.f32 %v1829_v62, %v1828_v11 }
 0xb6e   :  { %v1822_v38 = vrot.slane %v1821_v26, 1 }
 0xb6f   :  { %v1831_v25 = vrot.slane %v1830_v63, 1 }
 0xb70   :  { %v1823_v37 = vadd.f32 %v1822_v38, %v1821_v26 }
 0xb71   :  { %v1832_v57 = vadd.f32 %v1831_v25, %v1830_v63 }
 0xb72   :  { %v1835_v32 = vmul.f32 0.03125, %v1823_v37 }
 0xb73   :  { %v1836_v15 = vmul.f32 0.03125, %v1832_v57 }
 0xb74   :  { %v1839_v19 = vsub.f32 %v9106_v6, %v1835_v32  ;;  %v1843_v59 = vsub.f32 %v9100_v43, %v1835_v32  ;;  %v1847_v44 = vsub.f32 %v9114_v46, %v1835_v32  ;;  %v1851_v36 = vsub.f32 %v9123_v33, %v1835_v32 }
 0xb75   :  { %v1840_v39 = vsub.f32 %v9109_v4, %v1836_v15  ;;  %v1844_v9 = vsub.f32 %v9103_v53, %v1836_v15  ;;  %v1848_v29 = vsub.f32 %v9119_v34, %v1836_v15  ;;  %v1852_v14 = vsub.f32 %v9127_v10, %v1836_v15 }
 0xb76   :  { %v1855_v0 = vmul.f32 %v1839_v19, %v1839_v19  ;;  %v1859_v58 = vmul.f32 %v1843_v59, %v1843_v59  ;;  %v1863_v51 = vmul.f32 %v1847_v44, %v1847_v44  ;;  %v1867_v50 = vmul.f32 %v1851_v36, %v1851_v36 }
 0xb77   :  { %v1856_v5 = vmul.f32 %v1840_v39, %v1840_v39  ;;  %v1860_v45 = vmul.f32 %v1844_v9, %v1844_v9  ;;  %v1864_v60 = vmul.f32 %v1848_v29, %v1848_v29  ;;  %v1868_v23 = vmul.f32 %v1852_v14, %v1852_v14 }
 0xb78   :  { %v1887_v17 = vadd.f32 %v1859_v58, %v1855_v0 }
 0xb79   :  { %v1896_v7 = vadd.f32 %v1860_v45, %v1856_v5 }
 0xb7a   :  { %v1888_v21 = vadd.f32 %v1887_v17, %v1863_v51 }
 0xb7b   :  { %v1897_v61 = vadd.f32 %v1896_v7, %v1864_v60 }
 0xb7c   :  { %v1889_v20 = vadd.f32 %v1888_v21, %v1867_v50 }
 0xb7d   :  { %v1898_v41 = vadd.f32 %v1897_v61, %v1868_v23 }
 0xb7e   :  { %v1890_v12 = vrot.slane %v1889_v20, 4 }
 0xb7f   :  { %v1899_v40 = vrot.slane %v1898_v41, 4 }
 0xb80   :  { %v1891_v24 = vadd.f32 %v1890_v12, %v1889_v20 }
 0xb81   :  { %v1900_v2 = vadd.f32 %v1899_v40, %v1898_v41  ;;  %v7539_v41 = vld [vmem:[%s11490_s8 + $0x28] sm:$0xff]   ;;  %v9185_v40 = vpop.permute.xlu0 %3033 }
 0xb82   :  { %v1892_v42 = vrot.slane %v1891_v24, 2 }
 0xb83   :  { %v1901_v47 = vrot.slane %v1900_v2, 2 }
 0xb84   :  { %v1893_v56 = vadd.f32 %v1892_v42, %v1891_v24 }
 0xb85   :  { %v1902_v13 = vadd.f32 %v1901_v47, %v1900_v2  ;;  %v9187_v2 = vpop.permute.xlu1 %3038 }
 0xb86   :  { %v1894_v55 = vrot.slane %v1893_v56, 1 }
 0xb87   :  { %v1903_v1 = vrot.slane %v1902_v13, 1 }
 0xb88   :  { %v1895_v49 = vadd.f32 %v1894_v55, %v1893_v56 }
 0xb89   :  { %v1904_v11 = vadd.f32 %v1903_v1, %v1902_v13 }
 0xb8a   :  { %v1907_v30 = vmul.f32 0.03125, %v1895_v49 }
 0xb8b   :  { %v1908_v62 = vmul.f32 0.03125, %v1904_v11  ;;  %v7540_v11 = vld [vmem:[%s11490_s8 + $0x30] sm:$0xff]  }
 0xb8c   :  { %v1911_v26 = vadd.f32 1e-06, %v1907_v30  ;;  %v9200_v30 = vpop.permute.xlu0 %3043 }
 0xb8d   :  { %v1912_v63 = vadd.f32 1e-06, %v1908_v62  ;;  %v11671_v62 = vld [vmem:[#allocation8_spill] sm:$0xff] }
 0xb8e   :  { %7242 = vrsqrt.f32 %v1911_v26 }
 0xb8f   :  { %7244 = vrsqrt.f32 %v1912_v63 }
 0xb98   :  { %v7243_v38 = vpop.eup %7242 }
 0xb99   :  { %v7245_v25 = vpop.eup %7244  ;;  %v1931_v37 = vmul.f32 %v7243_v38, %v1851_v36  ;;  %v1919_v57 = vmul.f32 %v7243_v38, %v1839_v19  ;;  %v1923_v32 = vmul.f32 %v7243_v38, %v1843_v59  ;;  %v1927_v15 = vmul.f32 %v7243_v38, %v1847_v44  ;;  %v11673_v38 = vld [vmem:[#allocation6_spill] sm:$0xff] }
 0xb9a   :  { %v1932_v0 = vmul.f32 %v7245_v25, %v1852_v14  ;;  %v1920_v58 = vmul.f32 %v7245_v25, %v1840_v39  ;;  %v1924_v5 = vmul.f32 %v7245_v25, %v1844_v9  ;;  %v1928_v45 = vmul.f32 %v7245_v25, %v1848_v29 }
 0xb9b   :  { %v1955_v51 = vmul.f32 %v8682_v22, %v1919_v57  ;;  %v1959_v17 = vmul.f32 %v8688_v35, %v1923_v32  ;;  %v1967_v19 = vmul.f32 %v8708_v31, %v1931_v37  ;;  %v1963_v39 = vmul.f32 %v8698_v16, %v1927_v15  ;;  %v9210_v57 = vpop.permute.xlu1 %3048  ;;  %v11675_v32 = vld [vmem:[#allocation7_spill] sm:$0xff] }
 0xb9c   :  { %v1956_v60 = vmul.f32 %v8682_v22, %v1920_v58  ;;  %v1960_v7 = vmul.f32 %v8688_v35, %v1924_v5  ;;  %v1964_v50 = vmul.f32 %v8698_v16, %v1928_v45  ;;  %v1968_v21 = vmul.f32 %v8708_v31, %v1932_v0  ;;  %v7536_v16 = vld [vmem:[%s11490_s8 + $0x10] sm:$0xff]   ;;  %v11677_v45 = vld [vmem:[#allocation9_spill] sm:$0xff] }
 0xb9d   :  { %v1991_v59 = vadd.f32 %v8690_v52, %v1955_v51  ;;  %v1995_v44 = vadd.f32 %v8696_v54, %v1959_v17  ;;  %v1999_v23 = vadd.f32 %v8710_v28, %v1963_v39  ;;  %v2003_v31 = vadd.f32 %v8716_v27, %v1967_v19 }
 0xb9e   :  { %v1992_v9 = vadd.f32 %v8690_v52, %v1956_v60  ;;  %v1996_v29 = vadd.f32 %v8696_v54, %v1960_v7  ;;  %v2000_v22 = vadd.f32 %v8710_v28, %v1964_v50  ;;  %v2004_v35 = vadd.f32 %v8716_v27, %v1968_v21  ;;  %v7534_v52 = vld [vmem:[%s11490_s8] sm:$0xff]   ;;  %v7535_v54 = vld [vmem:[%s11490_s8 + $0x8] sm:$0xff]   ;;  %v7537_v28 = vld [vmem:[%s11490_s8 + $0x18] sm:$0xff]  }
 0xb9f   :  { %v2023_v14 = vpack.c.bf16 %v1995_v44, %v1991_v59  ;;  %v2027_v20 = vpack.c.bf16 %v2003_v31, %v1999_v23  ;;  %v7538_v27 = vld [vmem:[%s11490_s8 + $0x20] sm:$0xff]   ;;  %v11681_v44 = vld [vmem:[#allocation11_spill] sm:$0xff] }
 0xba0   :  { %v2024_v36 = vpack.c.bf16 %v1996_v29, %v1992_v9  ;;  %v2028_v61 = vpack.c.bf16 %v2004_v35, %v2000_v22  ;;  %v11679_v50 = vld [vmem:[#allocation10_spill] sm:$0xff]  ;;  %v11683_v29 = vld [vmem:[#allocation12_spill] sm:$0xff] }
 0xba2   :  { %2302 = vmatprep.subr.bf16.mxu1 %v2024_v36  ;;  %v7541_v36 = vld [vmem:[%s11490_s8 + $0x38] sm:$0xff]  }
 0xba3   :  { %2303 = vmatpush1.bf16.msra.mxu1 %v2023_v14 }
 0xba4   :  { %2304 = vmatprep.subr.bf16.mxu1 %v2028_v61 }
 0xba7   :  { %2305 = vmatpush1.bf16.msra.mxu1 %v2027_v20 }
 0xbaa   :  { %6823 = vmatmul.mubr.msk.bf16.vlgmr.msra.gmra.mrb[80].mxu1 %vm456_vm2, %v7534_v52 }
 0xbab   :  { %2344 = vmatprep.mubr.bf16.mxu1 %v11632_v48 }
 0xbb2   :  { %6824 = vmatmul.mubr.msk.bf16.gmra.mrb[84].mxu1 %vm456_vm2, %v7535_v54 }
 0xbb3   :  { %2354 = vmatprep.mubr.bf16.mxu1 %v11632_v48 }
 0xbba   :  { %6825 = vmatmul.mubr.msk.bf16.gmra.mrb[88].mxu1 %vm456_vm2, %v7536_v16 }
 0xbbb   :  { %2364 = vmatprep.mubr.bf16.mxu1 %v11632_v48 }
 0xbc2   :  { %6826 = vmatmul.mubr.msk.bf16.gmra.mrb[92].mxu1 %vm456_vm2, %v7537_v28 }
 0xbc3   :  { %2374 = vmatprep.mubr.bf16.mxu1 %v11632_v48 }
 0xbca   :  { %6827 = vmatmul.mubr.msk.bf16.gmra.mrb[96].mxu1 %vm456_vm2, %v7538_v27 }
 0xbcb   :  { %2384 = vmatprep.mubr.bf16.mxu1 %v11632_v48 }
 0xbd2   :  { %6828 = vmatmul.mubr.msk.bf16.gmra.mrb[100].mxu1 %vm456_vm2, %v7539_v41 }
 0xbd3   :  { %v3097_v12 = vpop.f32.mrb[112].mxu0  ;;  %2394 = vmatprep.mubr.bf16.mxu1 %v11632_v48 }
 0xbd4   :  { %v3099_v24 = vpop.f32.mrb[113].mxu0  ;;  %v3098_v55 = vadd.f32 %v3097_v12, %v9185_v40 }
 0xbd5   :  { %v3101_v42 = vpop.f32.mrb[114].mxu0  ;;  %v3100_v1 = vadd.f32 %v3099_v24, %v9185_v40 }
 0xbd6   :  { %v3102_v47 = vadd.f32 %v3101_v42, %v9187_v2  ;;  %v3103_v56 = vpop.f32.mrb[115].mxu0  ;;  %v9207_v25 = vadd.f32 %v3098_v55, %v11673_v38 }
 0xbd7   :  { %v3104_v13 = vadd.f32 %v3103_v56, %v9187_v2  ;;  %v9213_v15 = vadd.f32 %v3100_v1, %v11675_v32 }
 0xbd8   :  { %v9194_v49 = vadd.f32 %v3102_v47, %v8521_v8  ;;  %11674 = vst [vmem:[#allocation8_spill] sm:$0xff] %v9207_v25 }
 0xbd9   :  { %v9203_v26 = vadd.f32 %v3104_v13, %v11671_v62  ;;  %11676 = vst [vmem:[#allocation6_spill] sm:$0xff] %v9213_v15 }
 0xbda   :  { %11670 = vst [vmem:[#allocation3_spill] sm:$0xff] %v9194_v49  ;;  %6829 = vmatmul.mubr.msk.bf16.gmra.mrb[104].mxu1 %vm456_vm2, %v7540_v11  ;;  %v3195_v5 = vadd.f32 %v9194_v49, %v9207_v25 }
 0xbdb   :  { %11672 = vst [vmem:[#allocation2_spill] sm:$0xff] %v9203_v26  ;;  %v3107_v63 = vpop.f32.mrb[116].mxu0  ;;  %2404 = vmatprep.mubr.bf16.mxu1 %v11632_v48  ;;  %v3204_v7 = vadd.f32 %v9203_v26, %v9213_v15 }
 0xbdc   :  { %v3108_v8 = vadd.f32 %v3107_v63, %v9200_v30  ;;  %v3109_v37 = vpop.f32.mrb[117].mxu0 }
 0xbdd   :  { %v3110_v0 = vadd.f32 %v3109_v37, %v9200_v30  ;;  %v3111_v58 = vpop.f32.mrb[118].mxu0 }
 0xbde   :  { %v9219_v51 = vadd.f32 %v3108_v8, %v11677_v45  ;;  %v3112_v17 = vadd.f32 %v3111_v58, %v9210_v57  ;;  %v3113_v60 = vpop.f32.mrb[119].mxu0 }
 0xbdf   :  { %v9225_v21 = vadd.f32 %v3110_v0, %v11679_v50  ;;  %v3114_v19 = vadd.f32 %v3113_v60, %v9210_v57 }
 0xbe0   :  { %11678 = vst [vmem:[#allocation7_spill] sm:$0xff] %v9219_v51  ;;  %v3196_v59 = vadd.f32 %v3195_v5, %v9219_v51  ;;  %v9230_v39 = vadd.f32 %v3112_v17, %v11681_v44 }
 0xbe1   :  { %11680 = vst [vmem:[#allocation9_spill] sm:$0xff] %v9225_v21  ;;  %v3205_v9 = vadd.f32 %v3204_v7, %v9225_v21  ;;  %v9234_v22 = vadd.f32 %v3114_v19, %v11683_v29 }
 0xbe2   :  { %11682 = vst [vmem:[#allocation10_spill] sm:$0xff] %v9230_v39  ;;  %v3197_v35 = vadd.f32 %v3196_v59, %v9230_v39  ;;  %6830 = vmatmul.mubr.msk.bf16.gmra.mrb[108].mxu1 %vm456_vm2, %v7541_v36 }
 0xbe3   :  { %11684 = vst [vmem:[#allocation11_spill] sm:$0xff] %v9234_v22  ;;  %v3206_v14 = vadd.f32 %v3205_v9, %v9234_v22  ;;  %3148 = vmatprep.mubr.bf16.mxu1 %v11632_v48 }
 0xbe4   :  { %v3198_v23 = vrot.slane %v3197_v35, 4 }
 0xbe5   :  { %v3207_v31 = vrot.slane %v3206_v14, 4 }
 0xbe6   :  { %v3199_v61 = vadd.f32 %v3198_v23, %v3197_v35 }
 0xbe7   :  { %v3208_v20 = vadd.f32 %v3207_v31, %v3206_v14 }
 0xbe8   :  { %v3200_v52 = vrot.slane %v3199_v61, 2 }
 0xbe9   :  { %v3209_v54 = vrot.slane %v3208_v20, 2 }
 0xbea   :  { %v3201_v16 = vadd.f32 %v3200_v52, %v3199_v61 }
 0xbeb   :  { %v3210_v28 = vadd.f32 %v3209_v54, %v3208_v20 }
 0xbec   :  { %v3202_v27 = vrot.slane %v3201_v16, 1 }
 0xbed   :  { %v3211_v41 = vrot.slane %v3210_v28, 1 }
 0xbee   :  { %v3203_v12 = vadd.f32 %v3202_v27, %v3201_v16  ;;  %v9251_v27 = vpop.permute.xlu0 %3333 }
 0xbef   :  { %v3212_v24 = vadd.f32 %v3211_v41, %v3210_v28  ;;  %v9253_v41 = vpop.permute.xlu1 %3338 }
 0xbf0   :  { %v3231_v42 = vmul.f32 0.03125, %v3203_v12 }
 0xbf1   :  { %v3232_v47 = vmul.f32 0.03125, %v3212_v24 }
 0xbf2   :  { %v3235_v56 = vsub.f32 %v9207_v25, %v3231_v42  ;;  %v3239_v13 = vsub.f32 %v9194_v49, %v3231_v42  ;;  %v3243_v55 = vsub.f32 %v9219_v51, %v3231_v42  ;;  %v3247_v63 = vsub.f32 %v9230_v39, %v3231_v42 }
 0xbf3   :  { %v3236_v1 = vsub.f32 %v9213_v15, %v3232_v47  ;;  %v3240_v11 = vsub.f32 %v9203_v26, %v3232_v47  ;;  %v3244_v62 = vsub.f32 %v9225_v21, %v3232_v47  ;;  %v3248_v37 = vsub.f32 %v9234_v22, %v3232_v47  ;;  %v9255_v47 = vpop.permute.xlu0 %3369  ;;  %v11698_v22 = vld [vmem:[#allocation20_spill] sm:$0xff] }
 0xbf4   :  { %v3251_v38 = vmul.f32 %v3235_v56, %v3235_v56  ;;  %v3255_v8 = vmul.f32 %v3239_v13, %v3239_v13  ;;  %v3259_v58 = vmul.f32 %v3243_v55, %v3243_v55  ;;  %v3263_v60 = vmul.f32 %v3247_v63, %v3247_v63  ;;  %11685 = vst [vmem:[#allocation12_spill] sm:$0xff] %v9255_v47 }
 0xbf5   :  { %v3252_v32 = vmul.f32 %v3236_v1, %v3236_v1  ;;  %v3256_v0 = vmul.f32 %v3240_v11, %v3240_v11  ;;  %v3260_v45 = vmul.f32 %v3244_v62, %v3244_v62  ;;  %v3264_v50 = vmul.f32 %v3248_v37, %v3248_v37 }
 0xbf6   :  { %v3267_v5 = vadd.f32 %v3255_v8, %v3251_v38  ;;  %v9257_v38 = vpop.permute.xlu1 %3374 }
 0xbf7   :  { %v3276_v17 = vadd.f32 %v3256_v0, %v3252_v32  ;;  %11686 = vst [vmem:[#allocation27_spill] sm:$0xff] %v9257_v38  ;;  %v9259_v8 = vpop.permute.xlu0 %3343 }
 0xbf8   :  { %v3268_v7 = vadd.f32 %v3267_v5, %v3259_v58 }
 0xbf9   :  { %v3277_v19 = vadd.f32 %v3276_v17, %v3260_v45 }
 0xbfa   :  { %v3269_v59 = vadd.f32 %v3268_v7, %v3263_v60  ;;  %v9261_v32 = vpop.permute.xlu1 %3348 }
 0xbfb   :  { %v3278_v44 = vadd.f32 %v3277_v19, %v3264_v50  ;;  %11687 = vst [vmem:[#allocation28_spill] sm:$0xff] %v9261_v32 }
 0xbfc   :  { %v3270_v9 = vrot.slane %v3269_v59, 4 }
 0xbfd   :  { %v3279_v29 = vrot.slane %v3278_v44, 4 }
 0xbfe   :  { %v3271_v35 = vadd.f32 %v3270_v9, %v3269_v59 }
 0xbff   :  { %v3280_v36 = vadd.f32 %v3279_v29, %v3278_v44 }
 0xc00   :  { %v3272_v14 = vrot.slane %v3271_v35, 2 }
 0xc01   :  { %v3281_v23 = vrot.slane %v3280_v36, 2 }
 0xc02   :  { %v3273_v31 = vadd.f32 %v3272_v14, %v3271_v35 }
 0xc03   :  { %v3282_v61 = vadd.f32 %v3281_v23, %v3280_v36 }
 0xc04   :  { %v3274_v20 = vrot.slane %v3273_v31, 1 }
 0xc05   :  { %v3283_v52 = vrot.slane %v3282_v61, 1 }
 0xc06   :  { %v3275_v54 = vadd.f32 %v3274_v20, %v3273_v31 }
 0xc07   :  { %v3284_v16 = vadd.f32 %v3283_v52, %v3282_v61  ;;  %v11690_v61 = vld [vmem:[#allocation4_spill] sm:$0xff] }
 0xc08   :  { %v3303_v28 = vmul.f32 0.03125, %v3275_v54 }
 0xc09   :  { %v3304_v12 = vmul.f32 0.03125, %v3284_v16 }
 0xc0a   :  { %v3307_v24 = vadd.f32 1e-06, %v3303_v28 }
 0xc0b   :  { %v3308_v42 = vadd.f32 1e-06, %v3304_v12 }
 0xc0c   :  { %7246 = vrsqrt.f32 %v3307_v24 }
 0xc0d   :  { %7248 = vrsqrt.f32 %v3308_v42 }
 0xc16   :  { %v7247_v0 = vpop.eup %7246 }
 0xc17   :  { %v7249_v58 = vpop.eup %7248  ;;  %v3315_v5 = vmul.f32 %v7247_v0, %v3235_v56  ;;  %v3319_v45 = vmul.f32 %v7247_v0, %v3239_v13  ;;  %v3327_v19 = vmul.f32 %v7247_v0, %v3247_v63  ;;  %v3323_v9 = vmul.f32 %v7247_v0, %v3243_v55  ;;  %v9269_v56 = vpop.permute.xlu0 %3379 }
 0xc18   :  { %v3328_v17 = vmul.f32 %v7249_v58, %v3248_v37  ;;  %v3316_v60 = vmul.f32 %v7249_v58, %v3236_v1  ;;  %v3320_v7 = vmul.f32 %v7249_v58, %v3240_v11  ;;  %v3324_v50 = vmul.f32 %v7249_v58, %v3244_v62  ;;  %11688 = vst [vmem:[#allocation29_spill] sm:$0xff] %v9269_v56  ;;  %v9271_v13 = vpop.permute.xlu1 %3384 }
 0xc19   :  { %v3351_v59 = vmul.f32 %v9251_v27, %v3315_v5  ;;  %v3355_v44 = vmul.f32 %v9253_v41, %v3319_v45  ;;  %11689 = vst [vmem:[#allocation30_spill] sm:$0xff] %v9271_v13  ;;  %v3363_v63 = vmul.f32 %v9261_v32, %v3327_v19  ;;  %v3359_v31 = vmul.f32 %v9259_v8, %v3323_v9  ;;  %v7068_v5 = vld [vmem:[%s11484_s4 + $0x60] sm:$0xff]   ;;  %v7069_v45 = vld [vmem:[%s11484_s4 + $0x68] sm:$0xff]  }
 0xc1a   :  { %v3352_v29 = vmul.f32 %v9251_v27, %v3316_v60  ;;  %v3356_v35 = vmul.f32 %v9253_v41, %v3320_v7  ;;  %v3360_v36 = vmul.f32 %v9259_v8, %v3324_v50  ;;  %v3364_v14 = vmul.f32 %v9261_v32, %v3328_v17  ;;  %v7070_v60 = vld [vmem:[%s11484_s4 + $0x70] sm:$0xff]   ;;  %v11691_v7 = vld [vmem:[#allocation13_spill] sm:$0xff] }
 0xc1b   :  { %v3387_v37 = vadd.f32 %v9255_v47, %v3351_v59  ;;  %v3391_v23 = vadd.f32 %v9257_v38, %v3355_v44  ;;  %v3395_v24 = vadd.f32 %v9269_v56, %v3359_v31  ;;  %v3399_v42 = vadd.f32 %v9271_v13, %v3363_v63 }
 0xc1c   :  { %v3388_v1 = vadd.f32 %v9255_v47, %v3352_v29  ;;  %v3392_v11 = vadd.f32 %v9257_v38, %v3356_v35  ;;  %v3396_v62 = vadd.f32 %v9269_v56, %v3360_v36  ;;  %v3400_v55 = vadd.f32 %v9271_v13, %v3364_v14  ;;  %v11692_v29 = vld [vmem:[#allocation14_spill] sm:$0xff] }
 0xc1d   :  { %v3444_v12 = vpack.c.bf16 %v3391_v23, %v3387_v37  ;;  %v3448_v58 = vpack.c.bf16 %v3399_v42, %v3395_v24 }
 0xc1e   :  { %v3404_v20 = vmul.f32 %v11690_v61, %v3388_v1  ;;  %v3408_v52 = vmul.f32 %v11690_v61, %v3392_v11  ;;  %v3412_v54 = vmul.f32 %v11690_v61, %v3396_v62  ;;  %v3416_v16 = vmul.f32 %v11690_v61, %v3400_v55 }
 0xc20   :  { %v3445_v28 = vpack.c.bf16 %v3408_v52, %v3404_v20  ;;  %v3449_v0 = vpack.c.bf16 %v3416_v16, %v3412_v54  ;;  %v7071_v52 = vld [vmem:[%s11484_s4 + $0x78] sm:$0xff]  }
 0xc22   :  { %3548 = vmatprep.subr.bf16.mxu0 %v3445_v28  ;;  %v11693_v28 = vld [vmem:[#allocation15_spill] sm:$0xff] }
 0xc23   :  { %3549 = vmatpush1.bf16.msra.mxu0 %v3444_v12 }
 0xc24   :  { %3550 = vmatprep.subr.bf16.mxu0 %v3449_v0 }
 0xc27   :  { %3551 = vmatpush1.bf16.msra.mxu0 %v3448_v58 }
 0xc2a   :  { %6877 = vmatmul.mubr.msk.bf16.vlgmr.msra.gmra.mrb[120].mxu0 %vm456_vm2, %v7068_v5 }
 0xc2b   :  { %3590 = vmatprep.mubr.bf16.mxu0 %v11632_v48 }
 0xc32   :  { %6878 = vmatmul.mubr.msk.bf16.gmra.mrb[124].mxu0 %vm456_vm2, %v7069_v45 }
 0xc33   :  { %3600 = vmatprep.mubr.bf16.mxu0 %v11632_v48 }
 0xc3a   :  { %6879 = vmatmul.mubr.msk.bf16.gmra.mrb[128].mxu0 %vm456_vm2, %v7070_v60 }
 0xc3b   :  { %3610 = vmatprep.mubr.bf16.mxu0 %v11632_v48 }
 0xc42   :  { %6880 = vmatmul.mubr.msk.bf16.gmra.mrb[132].mxu0 %vm456_vm2, %v7071_v52 }
 0xc43   :  { %3620 = vmatprep.mubr.bf16.mxu0 %v11632_v48 }
 0xc7d   :  { %v2336_v17 = vpop.f32.mrb[80].mxu1 }
 0xc7e   :  { %v2337_v50 = vadd.f32 %v2336_v17, %v11691_v7  ;;  %v2338_v19 = vpop.f32.mrb[81].mxu1 }
 0xc7f   :  { %v2339_v59 = vadd.f32 %v2338_v19, %v11691_v7  ;;  %v2340_v44 = vpop.f32.mrb[82].mxu1  ;;  %v11694_v7 = vld [vmem:[#allocation16_spill] sm:$0xff] }
 0xc80   :  { %v2481_v9 = vmul.f32 0.044715, %v2337_v50  ;;  %v9303_v35 = vadd.f32 %v2340_v44, %v11692_v29  ;;  %v2342_v36 = vpop.f32.mrb[83].mxu1 }
 0xc81   :  { %v2482_v14 = vmul.f32 0.044715, %v2339_v59  ;;  %v9306_v1 = vadd.f32 %v2342_v36, %v11692_v29 }
 0xc82   :  { %v2545_v11 = vmul.f32 %v2481_v9, %v2337_v50  ;;  %v2485_v62 = vmul.f32 0.044715, %v9303_v35 }
 0xc83   :  { %v2546_v55 = vmul.f32 %v2482_v14, %v2339_v59  ;;  %v2486_v63 = vmul.f32 0.044715, %v9306_v1 }
 0xc84   :  { %v2609_v37 = vmul.f32 %v2545_v11, %v2337_v50  ;;  %v2549_v23 = vmul.f32 %v2485_v62, %v9303_v35 }
 0xc85   :  { %v2610_v31 = vmul.f32 %v2546_v55, %v2339_v59  ;;  %v2550_v61 = vmul.f32 %v2486_v63, %v9306_v1  ;;  %v2346_v20 = vpop.f32.mrb[84].mxu1 }
 0xc86   :  { %v2673_v54 = vadd.f32 %v2609_v37, %v2337_v50  ;;  %v2613_v16 = vmul.f32 %v2549_v23, %v9303_v35  ;;  %v9319_v12 = vadd.f32 %v2346_v20, %v11693_v28  ;;  %v2348_v24 = vpop.f32.mrb[85].mxu1 }
 0xc87   :  { %v2614_v42 = vmul.f32 %v2550_v61, %v9306_v1  ;;  %v2349_v0 = vadd.f32 %v2348_v24, %v11693_v28  ;;  %v2350_v58 = vpop.f32.mrb[86].mxu1  ;;  %v2674_v5 = vadd.f32 %v2610_v31, %v2339_v59 }
 0xc88   :  { %v2737_v45 = vmul.f32 0.7978846, %v2673_v54  ;;  %v2677_v17 = vadd.f32 %v2613_v16, %v9303_v35  ;;  %v2489_v60 = vmul.f32 0.044715, %v9319_v12  ;;  %v9326_v19 = vadd.f32 %v2350_v58, %v11694_v7  ;;  %v2352_v44 = vpop.f32.mrb[87].mxu1  ;;  %v7072_v16 = vld [vmem:[%s11484_s4 + $0x80] sm:$0xff]  }
 0xc89   :  { %v2490_v9 = vmul.f32 0.044715, %v2349_v0  ;;  %v2353_v29 = vadd.f32 %v2352_v44, %v11694_v7  ;;  %v2678_v36 = vadd.f32 %v2614_v42, %v9306_v1  ;;  %v2738_v14 = vmul.f32 0.7978846, %v2674_v5  ;;  %v11695_v42 = vld [vmem:[#allocation17_spill] sm:$0xff]  ;;  %6881 = vmatmul.mubr.msk.bf16.gmra.mrb[136].mxu0 %vm456_vm2, %v7072_v16 }
 0xc8a   :  { %7250 = vtanh.f32 %v2737_v45  ;;  %v2741_v11 = vmul.f32 0.7978846, %v2677_v17  ;;  %v2553_v62 = vmul.f32 %v2489_v60, %v9319_v12  ;;  %v2493_v55 = vmul.f32 0.044715, %v9326_v19  ;;  %3630 = vmatprep.mubr.bf16.mxu0 %v11632_v48 }
 0xc8b   :  { %v2554_v63 = vmul.f32 %v2490_v9, %v2349_v0  ;;  %v2494_v37 = vmul.f32 0.044715, %v2353_v29  ;;  %v2742_v23 = vmul.f32 0.7978846, %v2678_v36  ;;  %7252 = vtanh.f32 %v2738_v14 }
 0xc8c   :  { %7254 = vtanh.f32 %v2741_v11  ;;  %v2617_v31 = vmul.f32 %v2553_v62, %v9319_v12  ;;  %v2557_v61 = vmul.f32 %v2493_v55, %v9326_v19  ;;  %v2417_v45 = vmul.f32 0.5, %v2337_v50  ;;  %v11696_v62 = vld [vmem:[#allocation18_spill] sm:$0xff] }
 0xc8d   :  { %v2618_v20 = vmul.f32 %v2554_v63, %v2349_v0  ;;  %v2558_v54 = vmul.f32 %v2494_v37, %v2353_v29  ;;  %v2356_v52 = vpop.f32.mrb[88].mxu1  ;;  %7256 = vtanh.f32 %v2742_v23  ;;  %v2418_v44 = vmul.f32 0.5, %v2339_v59 }
 0xc8e   :  { %v2681_v28 = vadd.f32 %v2617_v31, %v9319_v12  ;;  %v2621_v24 = vmul.f32 %v2557_v61, %v9326_v19  ;;  %v9342_v58 = vadd.f32 %v2356_v52, %v11695_v42  ;;  %v2358_v5 = vpop.f32.mrb[89].mxu1  ;;  %v2421_v50 = vmul.f32 0.5, %v9303_v35 }
 0xc8f   :  { %v2622_v17 = vmul.f32 %v2558_v54, %v2353_v29  ;;  %v9345_v60 = vadd.f32 %v2358_v5, %v11695_v42  ;;  %v2360_v7 = vpop.f32.mrb[90].mxu1  ;;  %v2682_v9 = vadd.f32 %v2618_v20, %v2349_v0  ;;  %v2422_v54 = vmul.f32 0.5, %v9306_v1  ;;  %v7073_v1 = vld [vmem:[%s11484_s4 + $0x88] sm:$0xff]  }
 0xc90   :  { %v2745_v36 = vmul.f32 0.7978846, %v2681_v28  ;;  %v2685_v14 = vadd.f32 %v2621_v24, %v9326_v19  ;;  %v2497_v11 = vmul.f32 0.044715, %v9342_v58  ;;  %v9350_v55 = vadd.f32 %v2360_v7, %v11696_v62  ;;  %v2362_v63 = vpop.f32.mrb[91].mxu1 }
 0xc91   :  { %v9353_v37 = vadd.f32 %v2362_v63, %v11696_v62  ;;  %v2686_v23 = vadd.f32 %v2622_v17, %v2353_v29  ;;  %v2746_v31 = vmul.f32 0.7978846, %v2682_v9  ;;  %v9361_v52 = vmul.f32 0.5, %v2349_v0  ;;  %v11697_v62 = vld [vmem:[#allocation19_spill] sm:$0xff]  ;;  %6882 = vmatmul.mubr.msk.bf16.gmra.mrb[140].mxu0 %vm456_vm2, %v7073_v1 }
 0xc92   :  { %7258 = vtanh.f32 %v2745_v36  ;;  %v2749_v59 = vmul.f32 0.7978846, %v2685_v14  ;;  %v2561_v61 = vmul.f32 %v2497_v11, %v9342_v58  ;;  %v2501_v20 = vmul.f32 0.044715, %v9350_v55  ;;  %3640 = vmatprep.mubr.bf16.mxu0 %v11632_v48 }
 0xc93   :  { %v2750_v28 = vmul.f32 0.7978846, %v2686_v23  ;;  %7260 = vtanh.f32 %v2746_v31  ;;  %v2498_v16 = vmul.f32 0.044715, %v9345_v60  ;;  %v2502_v17 = vmul.f32 0.044715, %v9353_v37 }
 0xc94   :  { %v7251_v24 = vpop.eup %7250  ;;  %7262 = vtanh.f32 %v2749_v59  ;;  %v2625_v35 = vmul.f32 %v2561_v61, %v9342_v58  ;;  %v2565_v42 = vmul.f32 %v2501_v20, %v9350_v55  ;;  %v9367_v36 = vmul.f32 0.5, %v2353_v29 }
 0xc95   :  { %v7253_v5 = vpop.eup %7252  ;;  %v2366_v7 = vpop.f32.mrb[92].mxu1  ;;  %v2865_v9 = vadd.f32 1.0, %v7251_v24  ;;  %7264 = vtanh.f32 %v2750_v28  ;;  %v9378_v31 = vmul.f32 0.5, %v9319_v12  ;;  %v9384_v24 = vmul.f32 0.5, %v9326_v19 }
 0xc96   :  { %v7255_v0 = vpop.eup %7254  ;;  %v2689_v14 = vadd.f32 %v2625_v35, %v9342_v58  ;;  %v2629_v11 = vmul.f32 %v2565_v42, %v9350_v55  ;;  %v9375_v63 = vadd.f32 %v2366_v7, %v11697_v62  ;;  %v2368_v23 = vpop.f32.mrb[93].mxu1  ;;  %v2866_v20 = vadd.f32 1.0, %v7253_v5 }
 0xc97   :  { %v7257_v59 = vpop.eup %7256  ;;  %v9381_v29 = vadd.f32 %v2368_v23, %v11697_v62  ;;  %v2370_v61 = vpop.f32.mrb[94].mxu1  ;;  %v2869_v28 = vadd.f32 1.0, %v7255_v0  ;;  %v2562_v35 = vmul.f32 %v2498_v16, %v9345_v60  ;;  %v2566_v62 = vmul.f32 %v2502_v17, %v9353_v37 }
 0xc98   :  { %v2693_v42 = vadd.f32 %v2629_v11, %v9350_v55  ;;  %v2505_v7 = vmul.f32 0.044715, %v9375_v63  ;;  %v9390_v39 = vadd.f32 %v2370_v61, %v11698_v22  ;;  %v2372_v12 = vpop.f32.mrb[95].mxu1  ;;  %v2753_v21 = vmul.f32 0.7978846, %v2689_v14 }
 0xc99   :  { %v2870_v23 = vadd.f32 1.0, %v7257_v59  ;;  %v2929_v15 = vmul.f32 %v2865_v9, %v2417_v45  ;;  %v2506_v5 = vmul.f32 0.044715, %v9381_v29  ;;  %v9398_v0 = vadd.f32 %v2372_v12, %v11698_v22 }
 0xc9a   :  { %v2569_v19 = vmul.f32 %v2505_v7, %v9375_v63  ;;  %v2509_v16 = vmul.f32 0.044715, %v9390_v39  ;;  %v2757_v11 = vmul.f32 0.7978846, %v2693_v42  ;;  %v2930_v61 = vmul.f32 %v2866_v20, %v2418_v44  ;;  %v9411_v44 = vld [vmem:[%s11484_s4 + $0x90] sm:$0xff]  }
 0xc9b   :  { %v2934_v14 = vmul.f32 %v2870_v23, %v2422_v54  ;;  %v2933_v51 = vmul.f32 %v2869_v28, %v2421_v50  ;;  %v2626_v45 = vmul.f32 %v2562_v35, %v9345_v60  ;;  %v9405_v59 = vmul.f32 0.5, %v9345_v60  ;;  %11699 = vst [vmem:[#allocation4_spill] sm:$0xff] %v9411_v44  ;;  %v11700_v35 = vld [vmem:[#allocation21_spill] sm:$0xff]  ;;  %6883 = vmatmul.mubr.msk.bf16.gmra.mrb[144].mxu0 %vm456_vm2, %v9411_v44 }
 0xc9c   :  { %v7259_v17 = vpop.eup %7258  ;;  %v2633_v9 = vmul.f32 %v2569_v19, %v9375_v63  ;;  %v2573_v1 = vmul.f32 %v2509_v16, %v9390_v39  ;;  %7266 = vtanh.f32 %v2753_v21  ;;  %v2630_v22 = vmul.f32 %v2566_v62, %v9353_v37  ;;  %3650 = vmatprep.mubr.bf16.mxu0 %v11632_v48 }
 0xc9d   :  { %v7261_v7 = vpop.eup %7260  ;;  %v2376_v12 = vpop.f32.mrb[96].mxu1  ;;  %v2998_v25 = vpack.c.bf16 %v2934_v14, %v2930_v61  ;;  %v2997_v42 = vpack.c.bf16 %v2933_v51, %v2929_v15  ;;  %v2570_v20 = vmul.f32 %v2506_v5, %v9381_v29  ;;  %7268 = vtanh.f32 %v2757_v11  ;;  %v11701_v14 = vld [vmem:[#allocation22_spill] sm:$0xff] }
 0xc9e   :  { %v7263_v50 = vpop.eup %7262  ;;  %v2697_v54 = vadd.f32 %v2633_v9, %v9375_v63  ;;  %v2637_v28 = vmul.f32 %v2573_v1, %v9390_v39  ;;  %v9417_v23 = vadd.f32 %v2376_v12, %v11700_v35  ;;  %v2378_v21 = vpop.f32.mrb[97].mxu1  ;;  %v2510_v15 = vmul.f32 0.044715, %v9398_v0 }
 0xc9f   :  { %v7265_v62 = vpop.eup %7264  ;;  %v9421_v51 = vadd.f32 %v2378_v21, %v11700_v35  ;;  %3116 = vmatprep.subr.bf16.mxu1 %v2998_v25  ;;  %v2380_v19 = vpop.f32.mrb[98].mxu1  ;;  %v2874_v16 = vadd.f32 1.0, %v7261_v7  ;;  %v2873_v1 = vadd.f32 1.0, %v7259_v17  ;;  %v2877_v12 = vadd.f32 1.0, %v7263_v50 }
 0xca0   :  { %v2513_v61 = vmul.f32 0.044715, %v9417_v23  ;;  %v9425_v5 = vadd.f32 %v2380_v19, %v11701_v14  ;;  %3117 = vmatpush1.bf16.msra.mxu1 %v2997_v42  ;;  %v2382_v9 = vpop.f32.mrb[99].mxu1  ;;  %v2761_v26 = vmul.f32 0.7978846, %v2697_v54  ;;  %v2701_v11 = vadd.f32 %v2637_v28, %v9390_v39 }
 0xca1   :  { %v9429_v49 = vadd.f32 %v2382_v9, %v11701_v14  ;;  %v2878_v35 = vadd.f32 1.0, %v7265_v62  ;;  %v2514_v7 = vmul.f32 0.044715, %v9421_v51  ;;  %v9437_v42 = vmul.f32 0.5, %v9353_v37 }
 0xca2   :  { %v2577_v25 = vmul.f32 %v2513_v61, %v9417_v23  ;;  %v2517_v21 = vmul.f32 0.044715, %v9425_v5  ;;  %v2574_v17 = vmul.f32 %v2510_v15, %v9398_v0  ;;  %v2938_v54 = vmul.f32 %v2874_v16, %v9361_v52  ;;  %v9452_v52 = vld [vmem:[%s11484_s4 + $0x98] sm:$0xff]  }
 0xca3   :  { %v2518_v50 = vmul.f32 0.044715, %v9429_v49  ;;  %v2942_v28 = vmul.f32 %v2878_v35, %v9367_v36  ;;  %v2937_v61 = vmul.f32 %v2873_v1, %v9378_v31  ;;  %v2941_v14 = vmul.f32 %v2877_v12, %v9384_v24  ;;  %11702 = vst [vmem:[#allocation13_spill] sm:$0xff] %v9452_v52  ;;  %v11703_v35 = vld [vmem:[#allocation23_spill] sm:$0xff]  ;;  %6884 = vmatmul.mubr.msk.bf16.gmra.mrb[148].mxu0 %vm456_vm2, %v9452_v52 }
 0xca4   :  { %v2641_v62 = vmul.f32 %v2577_v25, %v9417_v23  ;;  %v2581_v19 = vmul.f32 %v2517_v21, %v9425_v5  ;;  %7270 = vtanh.f32 %v2761_v26  ;;  %v2765_v9 = vmul.f32 0.7978846, %v2701_v11  ;;  %3660 = vmatprep.mubr.bf16.mxu0 %v11632_v48 }
 0xca5   :  { %v2386_v44 = vpop.f32.mrb[100].mxu1  ;;  %v3002_v13 = vpack.c.bf16 %v2942_v28, %v2938_v54  ;;  %v2690_v15 = vadd.f32 %v2626_v45, %v9345_v60  ;;  %v2578_v36 = vmul.f32 %v2514_v7, %v9421_v51  ;;  %v3001_v24 = vpack.c.bf16 %v2941_v14, %v2937_v61  ;;  %v11704_v54 = vld [vmem:[#allocation24_spill] sm:$0xff] }
 0xca6   :  { %v2645_v16 = vmul.f32 %v2581_v19, %v9425_v5  ;;  %v9457_v25 = vadd.f32 %v2386_v44, %v11703_v35  ;;  %v2388_v31 = vpop.f32.mrb[101].mxu1  ;;  %v7267_v26 = vpop.eup %7266  ;;  %v2582_v1 = vmul.f32 %v2518_v50, %v9429_v49  ;;  %v2694_v45 = vadd.f32 %v2630_v22, %v9353_v37 }
 0xca7   :  { %v9461_v12 = vadd.f32 %v2388_v31, %v11703_v35  ;;  %3118 = vmatprep.subr.bf16.mxu1 %v3002_v13  ;;  %v2390_v60 = vpop.f32.mrb[102].mxu1  ;;  %v2754_v11 = vmul.f32 0.7978846, %v2690_v15  ;;  %v2705_v7 = vadd.f32 %v2641_v62, %v9417_v23  ;;  %v7269_v50 = vpop.eup %7268  ;;  %v2634_v61 = vmul.f32 %v2570_v20, %v9381_v29 }
 0xca8   :  { %v2709_v21 = vadd.f32 %v2645_v16, %v9425_v5  ;;  %v2521_v44 = vmul.f32 0.044715, %v9457_v25  ;;  %v9468_v28 = vadd.f32 %v2390_v60, %v11704_v54  ;;  %3119 = vmatpush1.bf16.msra.mxu1 %v3001_v24  ;;  %v2392_v19 = vpop.f32.mrb[103].mxu1  ;;  %v2638_v13 = vmul.f32 %v2574_v17, %v9398_v0 }
 0xca9   :  { %v2758_v14 = vmul.f32 0.7978846, %v2694_v45  ;;  %7272 = vtanh.f32 %v2754_v11  ;;  %v2522_v22 = vmul.f32 0.044715, %v9461_v12  ;;  %v9479_v15 = vmul.f32 %v2578_v36, %v9421_v51 }
 0xcaa   :  { %7274 = vtanh.f32 %v2765_v9  ;;  %v2585_v37 = vmul.f32 %v2521_v44, %v9457_v25  ;;  %v2525_v62 = vmul.f32 0.044715, %v9468_v28  ;;  %v9482_v20 = vmul.f32 %v2582_v1, %v9429_v49 }
 0xcab   :  { %v9485_v17 = vadd.f32 %v2392_v19, %v11704_v54  ;;  %7276 = vtanh.f32 %v2758_v14  ;;  %v2769_v16 = vmul.f32 0.7978846, %v2705_v7  ;;  %v2773_v9 = vmul.f32 0.7978846, %v2709_v21  ;;  %v11705_v19 = vld [vmem:[#allocation25_spill] sm:$0xff] }
 0xcac   :  { %v2649_v35 = vmul.f32 %v2585_v37, %v9457_v25  ;;  %v2589_v31 = vmul.f32 %v2525_v62, %v9468_v28  ;;  %v2433_v60 = vmul.f32 0.5, %v9342_v58  ;;  %v2437_v45 = vmul.f32 0.5, %v9350_v55 }
 0xcad   :  { %v2396_v24 = vpop.f32.mrb[104].mxu1  ;;  %v2881_v36 = vadd.f32 1.0, %v7267_v26  ;;  %v2885_v11 = vadd.f32 1.0, %v7269_v50  ;;  %v2586_v44 = vmul.f32 %v2522_v22, %v9461_v12  ;;  %v2526_v37 = vmul.f32 0.044715, %v9485_v17 }
 0xcae   :  { %v2713_v1 = vadd.f32 %v2649_v35, %v9457_v25  ;;  %v2653_v54 = vmul.f32 %v2589_v31, %v9468_v28  ;;  %v9495_v7 = vadd.f32 %v2396_v24, %v11705_v19  ;;  %v2398_v21 = vpop.f32.mrb[105].mxu1  ;;  %v7271_v14 = vpop.eup %7270  ;;  %7278 = vtanh.f32 %v2769_v16  ;;  %v11706_v35 = vld [vmem:[#allocation26_spill] sm:$0xff] }
 0xcaf   :  { %v9499_v62 = vadd.f32 %v2398_v21, %v11705_v19  ;;  %v2400_v58 = vpop.f32.mrb[106].mxu1  ;;  %v9501_v55 = vmul.f32 %v2881_v36, %v2433_v60  ;;  %v9503_v26 = vmul.f32 %v2885_v11, %v2437_v45  ;;  %7280 = vtanh.f32 %v2773_v9 }
 0xcb0   :  { %v2717_v50 = vadd.f32 %v2653_v54, %v9468_v28  ;;  %v2529_v22 = vmul.f32 0.044715, %v9495_v7  ;;  %v9508_v31 = vadd.f32 %v2400_v58, %v11706_v35  ;;  %v2402_v24 = vpop.f32.mrb[107].mxu1  ;;  %v2777_v52 = vmul.f32 0.7978846, %v2713_v1 }
 0xcb1   :  { %v3005_v19 = vpack.c.bf16 %v9503_v26, %v9501_v55  ;;  %v9513_v21 = vadd.f32 %v2402_v24, %v11706_v35  ;;  %v9516_v60 = vmul.f32 %v2586_v44, %v9461_v12  ;;  %v2530_v45 = vmul.f32 0.044715, %v9499_v62 }
 0xcb2   :  { %v2593_v16 = vmul.f32 %v2529_v22, %v9495_v7  ;;  %v2533_v36 = vmul.f32 0.044715, %v9508_v31  ;;  %v2781_v54 = vmul.f32 0.7978846, %v2717_v50  ;;  %v2590_v9 = vmul.f32 %v2526_v37, %v9485_v17 }
 0xcb3   :  { %v7273_v11 = vpop.eup %7272  ;;  %v2698_v1 = vadd.f32 %v2634_v61, %v9381_v29  ;;  %v2702_v58 = vadd.f32 %v2638_v13, %v9398_v0  ;;  %v2534_v22 = vmul.f32 0.044715, %v9513_v21  ;;  %7282 = vtanh.f32 %v2777_v52 }
 0xcb4   :  { %v7275_v55 = vpop.eup %7274  ;;  %v2657_v26 = vmul.f32 %v2593_v16, %v9495_v7  ;;  %v2882_v35 = vadd.f32 1.0, %v7273_v11  ;;  %v2597_v44 = vmul.f32 %v2533_v36, %v9508_v31  ;;  %v9528_v38 = vmul.f32 0.5, %v9381_v29 }
 0xcb5   :  { %v7277_v24 = vpop.eup %7276  ;;  %v2406_v56 = vpop.f32.mrb[108].mxu1  ;;  %v2762_v50 = vmul.f32 0.7978846, %v2698_v1  ;;  %v2766_v37 = vmul.f32 0.7978846, %v2702_v58  ;;  %v2594_v13 = vmul.f32 %v2530_v45, %v9499_v62  ;;  %v9534_v36 = vmul.f32 %v2590_v9, %v9485_v17 }
 0xcb6   :  { %v2721_v61 = vadd.f32 %v2657_v26, %v9495_v7  ;;  %v2886_v47 = vadd.f32 1.0, %v7277_v24  ;;  %v2661_v16 = vmul.f32 %v2597_v44, %v9508_v31  ;;  %v2408_v11 = vpop.f32.mrb[109].mxu1  ;;  %v9537_v32 = vadd.f32 %v2406_v56, %v8995_v18 }
 0xcb7   :  { %v9540_v52 = vmul.f32 0.5, %v9398_v0  ;;  %7284 = vtanh.f32 %v2762_v50  ;;  %v2410_v29 = vpop.f32.mrb[110].mxu1  ;;  %v2946_v1 = vmul.f32 %v2882_v35, %v9405_v59  ;;  %v2598_v9 = vmul.f32 %v2534_v22, %v9513_v21 }
 0xcb8   :  { %v2950_v58 = vmul.f32 %v2886_v47, %v9437_v42  ;;  %v2725_v45 = vadd.f32 %v2661_v16, %v9508_v31  ;;  %7286 = vtanh.f32 %v2766_v37  ;;  %v2412_v26 = vpop.f32.mrb[111].mxu1  ;;  %v2785_v44 = vmul.f32 0.7978846, %v2721_v61  ;;  %v7279_v0 = vpop.eup %7278 }
 0xcb9   :  { %v2537_v24 = vmul.f32 0.044715, %v9537_v32  ;;  %v9548_v56 = vadd.f32 %v2410_v29, %v9009_v3  ;;  %7288 = vtanh.f32 %v2781_v54  ;;  %v9551_v50 = vmul.f32 %v2594_v13, %v9499_v62  ;;  %v7281_v47 = vpop.eup %7280 }
 0xcba   :  { %v3006_v59 = vpack.c.bf16 %v2950_v58, %v2946_v1  ;;  %v2789_v35 = vmul.f32 0.7978846, %v2725_v45  ;;  %v9555_v37 = vadd.f32 %v2408_v11, %v8995_v18  ;;  %v2889_v61 = vadd.f32 1.0, %v7271_v14 }
 0xcbb   :  { %v2601_v42 = vmul.f32 %v2537_v24, %v9537_v32  ;;  %v2541_v22 = vmul.f32 0.044715, %v9548_v56  ;;  %v2441_v16 = vmul.f32 0.5, %v9375_v63  ;;  %v2445_v29 = vmul.f32 0.5, %v9390_v39 }
 0xcbc   :  { %3120 = vmatprep.subr.bf16.mxu1 %v3006_v59  ;;  %v2893_v54 = vadd.f32 1.0, %v7275_v55  ;;  %v9561_v13 = vadd.f32 %v2412_v26, %v9009_v3  ;;  %7290 = vtanh.f32 %v2785_v44  ;;  %v2662_v1 = vmul.f32 %v2598_v9, %v9513_v21 }
 0xcbd   :  { %3121 = vmatpush1.bf16.msra.mxu1 %v3005_v19  ;;  %v2665_v58 = vmul.f32 %v2601_v42, %v9537_v32  ;;  %v2605_v18 = vmul.f32 %v2541_v22, %v9548_v56  ;;  %7292 = vtanh.f32 %v2789_v35  ;;  %v2953_v11 = vmul.f32 %v2889_v61, %v2441_v16  ;;  %v7283_v45 = vpop.eup %7282 }
 0xcbe   :  { %v2957_v14 = vmul.f32 %v2893_v54, %v2445_v29  ;;  %v2706_v63 = vadd.f32 %v9479_v15, %v9421_v51  ;;  %v2538_v3 = vmul.f32 0.044715, %v9555_v37  ;;  %v2710_v19 = vadd.f32 %v9482_v20, %v9429_v49 }
 0xcbf   :  { %v2729_v39 = vadd.f32 %v2665_v58, %v9537_v32  ;;  %v2669_v55 = vmul.f32 %v2605_v18, %v9548_v56  ;;  %v2542_v44 = vmul.f32 0.044715, %v9561_v13  ;;  %v2449_v24 = vmul.f32 0.5, %v9417_v23 }
 0xcc0   :  { %v3009_v26 = vpack.c.bf16 %v2957_v14, %v2953_v11  ;;  %v2770_v9 = vmul.f32 0.7978846, %v2706_v63  ;;  %v2774_v42 = vmul.f32 0.7978846, %v2710_v19  ;;  %v2897_v22 = vadd.f32 1.0, %v7279_v0 }
 0xcc1   :  { %v7285_v59 = vpop.eup %7284  ;;  %v2793_v35 = vmul.f32 0.7978846, %v2729_v39  ;;  %v2733_v15 = vadd.f32 %v2669_v55, %v9548_v56  ;;  %v2453_v29 = vmul.f32 0.5, %v9425_v5  ;;  %v2901_v54 = vadd.f32 1.0, %v7281_v47 }
 0xcc2   :  { %v7287_v61 = vpop.eup %7286  ;;  %v2890_v16 = vadd.f32 1.0, %v7285_v59  ;;  %7294 = vtanh.f32 %v2770_v9  ;;  %v2602_v20 = vmul.f32 %v2538_v3, %v9555_v37  ;;  %v2606_v23 = vmul.f32 %v2542_v44, %v9561_v13 }
 0xcc3   :  { %7296 = vtanh.f32 %v2793_v35  ;;  %v2894_v58 = vadd.f32 1.0, %v7287_v61  ;;  %v2797_v18 = vmul.f32 0.7978846, %v2733_v15  ;;  %v7289_v11 = vpop.eup %7288  ;;  %v9579_v14 = vmul.f32 %v2897_v22, %v2449_v24 }
 0xcc4   :  { %7298 = vtanh.f32 %v2774_v42  ;;  %v9581_v63 = vmul.f32 %v2901_v54, %v2453_v29  ;;  %v2954_v0 = vmul.f32 %v2890_v16, %v9528_v38  ;;  %v2714_v5 = vadd.f32 %v9516_v60, %v9461_v12 }
 0xcc5   :  { %v2958_v39 = vmul.f32 %v2894_v58, %v9540_v52  ;;  %7300 = vtanh.f32 %v2797_v18  ;;  %v2718_v3 = vadd.f32 %v9534_v36, %v9485_v17  ;;  %v2457_v55 = vmul.f32 0.5, %v9457_v25 }
 0xcc6   :  { %v3013_v47 = vpack.c.bf16 %v9581_v63, %v9579_v14  ;;  %v2461_v19 = vmul.f32 0.5, %v9468_v28  ;;  %v7291_v44 = vpop.eup %7290  ;;  %v2778_v24 = vmul.f32 0.7978846, %v2714_v5  ;;  %v2905_v38 = vadd.f32 1.0, %v7283_v45 }
 0xcc7   :  { %v3010_v9 = vpack.c.bf16 %v2958_v39, %v2954_v0  ;;  %v2909_v59 = vadd.f32 1.0, %v7289_v11  ;;  %v7293_v52 = vpop.eup %7292  ;;  %v2666_v35 = vmul.f32 %v2602_v20, %v9555_v37  ;;  %v2670_v60 = vmul.f32 %v2606_v23, %v9561_v13 }
 0xcc8   :  { %v2782_v15 = vmul.f32 0.7978846, %v2718_v3  ;;  %v2722_v42 = vadd.f32 %v9551_v50, %v9499_v62  ;;  %7302 = vtanh.f32 %v2778_v24  ;;  %v9597_v36 = vmul.f32 %v2905_v38, %v2457_v55 }
 0xcc9   :  { %3122 = vmatprep.subr.bf16.mxu1 %v3010_v9  ;;  %v9599_v25 = vmul.f32 %v2909_v59, %v2461_v19  ;;  %v2726_v28 = vadd.f32 %v2662_v1, %v9513_v21  ;;  %v2465_v22 = vmul.f32 0.5, %v9495_v7  ;;  %v2469_v61 = vmul.f32 0.5, %v9508_v31 }
 0xcca   :  { %3123 = vmatpush1.bf16.msra.mxu1 %v3009_v26  ;;  %7304 = vtanh.f32 %v2782_v15  ;;  %v2786_v45 = vmul.f32 0.7978846, %v2722_v42  ;;  %v2913_v50 = vadd.f32 1.0, %v7291_v44  ;;  %v2917_v54 = vadd.f32 1.0, %v7293_v52 }
 0xccb   :  { %v3017_v16 = vpack.c.bf16 %v9599_v25, %v9597_v36  ;;  %v2790_v29 = vmul.f32 0.7978846, %v2726_v28  ;;  %v2730_v58 = vadd.f32 %v2666_v35, %v9555_v37  ;;  %v2450_v7 = vmul.f32 0.5, %v9421_v51 }
 0xccc   :  { %v7295_v20 = vpop.eup %7294  ;;  %7306 = vtanh.f32 %v2786_v45  ;;  %v2977_v1 = vmul.f32 %v2913_v50, %v2465_v22  ;;  %v2981_v26 = vmul.f32 %v2917_v54, %v2469_v61  ;;  %v2454_v31 = vmul.f32 0.5, %v9429_v49 }
 0xccd   :  { %v7297_v18 = vpop.eup %7296  ;;  %v2898_v11 = vadd.f32 1.0, %v7295_v20  ;;  %7308 = vtanh.f32 %v2790_v29  ;;  %v2734_v0 = vadd.f32 %v2670_v60, %v9561_v13  ;;  %v2794_v39 = vmul.f32 0.7978846, %v2730_v58 }
 0xcce   :  { %v7299_v23 = vpop.eup %7298  ;;  %v3021_v55 = vpack.c.bf16 %v2981_v26, %v2977_v1  ;;  %v2473_v19 = vmul.f32 0.5, %v9537_v32  ;;  %v2921_v44 = vadd.f32 1.0, %v7297_v18  ;;  %v2477_v24 = vmul.f32 0.5, %v9548_v56 }
 0xccf   :  { %v7301_v5 = vpop.eup %7300  ;;  %v2902_v3 = vadd.f32 1.0, %v7299_v23  ;;  %v2798_v9 = vmul.f32 0.7978846, %v2734_v0  ;;  %7310 = vtanh.f32 %v2794_v39  ;;  %v2962_v59 = vmul.f32 %v2898_v11, %v2450_v7  ;;  %v7542_v7 = vld [vmem:[%s11492_s10] sm:$0xff]  }
 0xcd0   :  { %v2925_v38 = vadd.f32 1.0, %v7301_v5  ;;  %v2985_v51 = vmul.f32 %v2921_v44, %v2473_v19  ;;  %v2458_v25 = vmul.f32 0.5, %v9461_v12  ;;  %v2462_v32 = vmul.f32 0.5, %v9485_v17  ;;  %v9632_v44 = vld [vmem:[%s11484_s4 + $0xa0] sm:$0xff]  }
 0xcd1   :  { %v2966_v52 = vmul.f32 %v2902_v3, %v2454_v31  ;;  %7312 = vtanh.f32 %v2798_v9  ;;  %v2466_v50 = vmul.f32 0.5, %v9499_v62  ;;  %v2470_v54 = vmul.f32 0.5, %v9513_v21  ;;  %6885 = vmatmul.mubr.msk.bf16.gmra.mrb[152].mxu0 %vm456_vm2, %v9632_v44 }
 0xcd2   :  { %v2989_v35 = vmul.f32 %v2925_v38, %v2477_v24  ;;  %v7303_v49 = vpop.eup %7302  ;;  %v2474_v14 = vmul.f32 0.5, %v9555_v37  ;;  %v2478_v63 = vmul.f32 0.5, %v9561_v13  ;;  %v7543_v37 = vld [vmem:[%s11492_s10 + $0x8] sm:$0xff]   ;;  %3670 = vmatprep.mubr.bf16.mxu0 %v11632_v48 }
 0xcd3   :  { %v3014_v15 = vpack.c.bf16 %v2966_v52, %v2962_v59  ;;  %v2906_v42 = vadd.f32 1.0, %v7303_v49 }
 0xcd4   :  { %v7305_v60 = vpop.eup %7304  ;;  %v3025_v36 = vpack.c.bf16 %v2989_v35, %v2985_v51 }
 0xcd5   :  { %3124 = vmatprep.subr.bf16.mxu1 %v3014_v15  ;;  %v2910_v28 = vadd.f32 1.0, %v7305_v60  ;;  %v2970_v22 = vmul.f32 %v2906_v42, %v2458_v25 }
 0xcd6   :  { %v7307_v45 = vpop.eup %7306  ;;  %3125 = vmatpush1.bf16.msra.mxu1 %v3013_v47 }
 0xcd7   :  { %v7309_v56 = vpop.eup %7308  ;;  %v2974_v61 = vmul.f32 %v2910_v28, %v2462_v32  ;;  %v2914_v29 = vadd.f32 1.0, %v7307_v45 }
 0xcd8   :  { %v2918_v20 = vadd.f32 1.0, %v7309_v56 }
 0xcd9   :  { %v3018_v58 = vpack.c.bf16 %v2974_v61, %v2970_v22  ;;  %v7311_v18 = vpop.eup %7310  ;;  %v2978_v12 = vmul.f32 %v2914_v29, %v2466_v50 }
 0xcda   :  { %v2982_v11 = vmul.f32 %v2918_v20, %v2470_v54  ;;  %v2922_v17 = vadd.f32 1.0, %v7311_v18  ;;  %v9672_v20 = vld [vmem:[%s11484_s4 + $0xb0] sm:$0xff]  }
 0xcdb   :  { %3126 = vmatprep.subr.bf16.mxu1 %v3018_v58  ;;  %v7313_v1 = vpop.eup %7312 }
 0xcdc   :  { %3127 = vmatpush1.bf16.msra.mxu1 %v3017_v16  ;;  %v3022_v26 = vpack.c.bf16 %v2982_v11, %v2978_v12  ;;  %v2926_v47 = vadd.f32 1.0, %v7313_v1  ;;  %v2986_v23 = vmul.f32 %v2922_v17, %v2474_v14 }
 0xcde   :  { %3128 = vmatprep.subr.bf16.mxu1 %v3022_v26  ;;  %v2990_v62 = vmul.f32 %v2926_v47, %v2478_v63  ;;  %v9680_v26 = vld [vmem:[%s11484_s4 + $0xb8] sm:$0xff]  }
 0xce0   :  { %3129 = vmatpush1.bf16.msra.mxu1 %v3021_v55  ;;  %v3026_v21 = vpack.c.bf16 %v2990_v62, %v2986_v23 }
 0xce2   :  { %3130 = vmatprep.subr.bf16.mxu1 %v3026_v21 }
 0xce4   :  { %3131 = vmatpush1.bf16.msra.mxu1 %v3025_v36  ;;  %v9656_v36 = vld [vmem:[%s11484_s4 + $0xa8] sm:$0xff]  }
 0xce5   :  { %6886 = vmatmul.mubr.msk.bf16.gmra.mrb[156].mxu0 %vm456_vm2, %v9656_v36 }
 0xce6   :  { %3680 = vmatprep.mubr.bf16.mxu0 %v11632_v48 }
 0xce7   :  { %3149 = vmatmul.mubr.bf16.vlgmr.msra.gmra.mrb[112].mxu1 %v7542_v7 }
 0xce8   :  { %3158 = vmatprep.mubr.bf16.mxu1 %v11632_v48 }
 0xced   :  { %6887 = vmatmul.mubr.msk.bf16.gmra.mrb[160].mxu0 %vm456_vm2, %v9672_v20 }
 0xcee   :  { %3690 = vmatprep.mubr.bf16.mxu0 %v11632_v48 }
 0xcef   :  { %3159 = vmatmul.mubr.bf16.gmra.mrb[116].mxu1 %v7543_v37 }
 0xcf0   :  { %3733 = vmatprep.mubr.bf16.mxu1 %v11632_v48 }
 0xcf5   :  { %6888 = vmatmul.mubr.msk.bf16.gmra.mrb[164].mxu0 %vm456_vm2, %v9680_v26 }
 0xcfd   :  { %v3582_v13 = vpop.f32.mrb[120].mxu0 }
 0xcfe   :  { %v3584_v16 = vpop.f32.mrb[121].mxu0 }
 0xcff   :  { %v3586_v31 = vpop.f32.mrb[122].mxu0 }
 0xd00   :  { %v3854_v0 = vpack.c.bf16 %v3586_v31, %v3582_v13  ;;  %v3588_v39 = vpop.f32.mrb[123].mxu0 }
 0xd01   :  { %v3855_v5 = vpack.c.bf16 %v3588_v39, %v3584_v16 }
 0xd03   :  { %3934 = vmatprep.mubr.bf16.mxu0 %v3855_v5 }
 0xd05   :  { %v3592_v3 = vpop.f32.mrb[124].mxu0 }
 0xd06   :  { %v3594_v55 = vpop.f32.mrb[125].mxu0 }
 0xd07   :  { %v3596_v19 = vpop.f32.mrb[126].mxu0 }
 0xd08   :  { %v3858_v9 = vpack.c.bf16 %v3596_v19, %v3592_v3  ;;  %v3598_v24 = vpop.f32.mrb[127].mxu0 }
 0xd09   :  { %v3859_v38 = vpack.c.bf16 %v3598_v24, %v3594_v55 }
 0xd0d   :  { %v9636_v59 = vpop.f32.mrb[128].mxu0 }
 0xd0e   :  { %v9638_v52 = vpop.f32.mrb[129].mxu0 }
 0xd0f   :  { %v9641_v51 = vpop.f32.mrb[130].mxu0 }
 0xd10   :  { %v9645_v49 = vpop.f32.mrb[131].mxu0 }
 0xd15   :  { %v9649_v60 = vpop.f32.mrb[132].mxu0 }
 0xd16   :  { %v9651_v42 = vpop.f32.mrb[133].mxu0 }
 0xd17   :  { %v9658_v25 = vpop.f32.mrb[134].mxu0 }
 0xd18   :  { %v9662_v28 = vpop.f32.mrb[135].mxu0 }
 0xd5c   :  { %v3622_v56 = vpop.f32.mrb[136].mxu0 }
 0xd5d   :  { %v3624_v22 = vpop.f32.mrb[137].mxu0 }
 0xd5e   :  { %v3626_v61 = vpop.f32.mrb[138].mxu0 }
 0xd5f   :  { %v3870_v29 = vpack.c.bf16 %v3626_v61, %v3622_v56  ;;  %v3628_v50 = vpop.f32.mrb[139].mxu0 }
 0xd60   :  { %v3871_v54 = vpack.c.bf16 %v3628_v50, %v3624_v22 }
 0xd62   :  { %3902 = vmatprep.subr.bf16.mxu0 %v3871_v54 }
 0xd63   :  { %3903 = vmatpush1.bf16.xpose.msra.mxu0 %v3870_v29 }
 0xd64   :  { %v3632_v58 = vpop.f32.mrb[140].mxu0 }
 0xd65   :  { %v3634_v18 = vpop.f32.mrb[141].mxu0 }
 0xd66   :  { %v3636_v12 = vpop.f32.mrb[142].mxu0 }
 0xd67   :  { %v3874_v11 = vpack.c.bf16 %v3636_v12, %v3632_v58  ;;  %v3638_v17 = vpop.f32.mrb[143].mxu0 }
 0xd68   :  { %v3875_v1 = vpack.c.bf16 %v3638_v17, %v3634_v18 }
 0xd6a   :  { %3904 = vmatprep.subr.bf16.mxu0 %v3875_v1 }
 0xd6b   :  { %3905 = vmatpush1.bf16.xpose.msra.mxu0 %v3874_v11 }
 0xd6e   :  { %v9725_v18 = vpop.f32.mrb[144].mxu0 }
 0xd6f   :  { %v9727_v12 = vpop.f32.mrb[145].mxu0 }
 0xd70   :  { %v9729_v17 = vpop.f32.mrb[146].mxu0 }
 0xd71   :  { %v3878_v1 = vpack.c.bf16 %v9729_v17, %v9725_v18  ;;  %v7547_v18 = vld [vmem:[%s11484_s4 + $0x78] sm:$0xff]   ;;  %v7548_v17 = vld [vmem:[%s11484_s4 + $0x80] sm:$0xff]  }
 0xd72   :  { %3935 = vmatmul.mubr.bf16.vlgmr.msra.gmra.mrb[168].mxu0 %v3854_v0 }
 0xd73   :  { %3942 = vmatprep.mubr.bf16.mxu0 %v3859_v38 }
 0xd7a   :  { %3943 = vmatmul.mubr.bf16.gmra.mrb[172].mxu0 %v3858_v9 }
 0xd7b   :  { %4276 = vmatprep.mubr.bf16.mxu0 %v11632_v48 }
 0xdba   :  { %v3150_v14 = vpop.f32.mrb[112].mxu1 }
 0xdbb   :  { %v3152_v63 = vpop.f32.mrb[113].mxu1  ;;  %v3151_v7 = vadd.f32 %v3150_v14, %v9185_v40 }
 0xdbc   :  { %v3154_v47 = vpop.f32.mrb[114].mxu1  ;;  %v3153_v37 = vadd.f32 %v3152_v63, %v9185_v40 }
 0xdbd   :  { %v3155_v23 = vadd.f32 %v3154_v47, %v9187_v2  ;;  %v3156_v62 = vpop.f32.mrb[115].mxu1  ;;  %v9696_v0 = vadd.f32 %v3151_v7, %v9106_v6 }
 0xdbe   :  { %v3157_v21 = vadd.f32 %v3156_v62, %v9187_v2  ;;  %v9700_v3 = vadd.f32 %v3153_v37, %v9109_v4  ;;  %v9736_v37 = vpop.f32.mrb[147].mxu0 }
 0xdbf   :  { %v9690_v13 = vadd.f32 %v3155_v23, %v9100_v43 }
 0xdc0   :  { %v9693_v16 = vadd.f32 %v3157_v21, %v9103_v53 }
 0xdc1   :  { %v3213_v43 = vadd.f32 %v9690_v13, %v9696_v0 }
 0xdc2   :  { %v3160_v31 = vpop.f32.mrb[116].mxu1  ;;  %v3222_v6 = vadd.f32 %v9693_v16, %v9700_v3 }
 0xdc3   :  { %v3161_v39 = vadd.f32 %v3160_v31, %v9200_v30  ;;  %v3162_v5 = vpop.f32.mrb[117].mxu1 }
 0xdc4   :  { %v3163_v2 = vadd.f32 %v3162_v5, %v9200_v30  ;;  %v3164_v55 = vpop.f32.mrb[118].mxu1 }
 0xdc5   :  { %v9706_v40 = vadd.f32 %v3161_v39, %v9114_v46  ;;  %v3165_v53 = vadd.f32 %v3164_v55, %v9210_v57  ;;  %v3166_v19 = vpop.f32.mrb[119].mxu1 }
 0xdc6   :  { %v9712_v9 = vadd.f32 %v3163_v2, %v9119_v34  ;;  %v3167_v4 = vadd.f32 %v3166_v19, %v9210_v57 }
 0xdc7   :  { %v3214_v30 = vadd.f32 %v3213_v43, %v9706_v40  ;;  %v9717_v24 = vadd.f32 %v3165_v53, %v9123_v33 }
 0xdc8   :  { %v3223_v38 = vadd.f32 %v3222_v6, %v9712_v9  ;;  %v9721_v46 = vadd.f32 %v3167_v4, %v9127_v10 }
 0xdc9   :  { %v3215_v56 = vadd.f32 %v3214_v30, %v9717_v24 }
 0xdca   :  { %v3224_v22 = vadd.f32 %v3223_v38, %v9721_v46  ;;  %v3879_v38 = vpack.c.bf16 %v9736_v37, %v9727_v12  ;;  %v7546_v12 = vld [vmem:[%s11484_s4 + $0x70] sm:$0xff]  }
 0xdcb   :  { %v3216_v61 = vrot.slane %v3215_v56, 4  ;;  %v11713_v37 = vld [vmem:[#allocation4_spill] sm:$0xff] }
 0xdcc   :  { %v3225_v29 = vrot.slane %v3224_v22, 4 }
 0xdcd   :  { %v3217_v34 = vadd.f32 %v3216_v61, %v3215_v56 }
 0xdce   :  { %v3226_v50 = vadd.f32 %v3225_v29, %v3224_v22 }
 0xdcf   :  { %v3218_v54 = vrot.slane %v3217_v34, 2 }
 0xdd0   :  { %v3227_v57 = vrot.slane %v3226_v50, 2 }
 0xdd1   :  { %v3219_v58 = vadd.f32 %v3218_v54, %v3217_v34 }
 0xdd2   :  { %v3228_v33 = vadd.f32 %v3227_v57, %v3226_v50  ;;  %v9745_v57 = vpop.f32.mrb[148].mxu0 }
 0xdd3   :  { %v3220_v11 = vrot.slane %v3219_v58, 1 }
 0xdd4   :  { %v3229_v10 = vrot.slane %v3228_v33, 1 }
 0xdd5   :  { %v3221_v14 = vadd.f32 %v3220_v11, %v3219_v58 }
 0xdd6   :  { %v3230_v63 = vadd.f32 %v3229_v10, %v3228_v33  ;;  %v9747_v33 = vpop.f32.mrb[149].mxu0 }
 0xdd7   :  { %v3233_v47 = vmul.f32 0.03125, %v3221_v14  ;;  %v9749_v10 = vpop.f32.mrb[150].mxu0 }
 0xdd8   :  { %v3234_v23 = vmul.f32 0.03125, %v3230_v63  ;;  %v3882_v63 = vpack.c.bf16 %v9749_v10, %v9745_v57 }
 0xdd9   :  { %v3237_v62 = vsub.f32 %v9696_v0, %v3233_v47  ;;  %v3241_v21 = vsub.f32 %v9690_v13, %v3233_v47  ;;  %v3245_v7 = vsub.f32 %v9706_v40, %v3233_v47  ;;  %v3249_v2 = vsub.f32 %v9717_v24, %v3233_v47  ;;  %v3658_v47 = vpop.f32.mrb[151].mxu0 }
 0xdda   :  { %v3238_v31 = vsub.f32 %v9700_v3, %v3234_v23  ;;  %v3242_v39 = vsub.f32 %v9693_v16, %v3234_v23  ;;  %v3246_v5 = vsub.f32 %v9712_v9, %v3234_v23  ;;  %v3250_v53 = vsub.f32 %v9721_v46, %v3234_v23  ;;  %v3662_v57 = vpop.f32.mrb[152].mxu0 }
 0xddb   :  { %v3253_v55 = vmul.f32 %v3237_v62, %v3237_v62  ;;  %v3257_v43 = vmul.f32 %v3241_v21, %v3241_v21  ;;  %v3261_v4 = vmul.f32 %v3245_v7, %v3245_v7  ;;  %v3265_v61 = vmul.f32 %v3249_v2, %v3249_v2  ;;  %v3664_v10 = vpop.f32.mrb[153].mxu0 }
 0xddc   :  { %v3254_v19 = vmul.f32 %v3238_v31, %v3238_v31  ;;  %v3258_v6 = vmul.f32 %v3242_v39, %v3242_v39  ;;  %v3262_v56 = vmul.f32 %v3246_v5, %v3246_v5  ;;  %v3266_v34 = vmul.f32 %v3250_v53, %v3250_v53 }
 0xddd   :  { %v3285_v30 = vadd.f32 %v3257_v43, %v3253_v55  ;;  %v3883_v55 = vpack.c.bf16 %v3658_v47, %v9747_v33 }
 0xdde   :  { %v3294_v22 = vadd.f32 %v3258_v6, %v3254_v19 }
 0xddf   :  { %v3286_v29 = vadd.f32 %v3285_v30, %v3261_v4 }
 0xde0   :  { %v3295_v50 = vadd.f32 %v3294_v22, %v3262_v56 }
 0xde1   :  { %v3287_v54 = vadd.f32 %v3286_v29, %v3265_v61 }
 0xde2   :  { %v3296_v58 = vadd.f32 %v3295_v50, %v3266_v34 }
 0xde3   :  { %v3288_v11 = vrot.slane %v3287_v54, 4 }
 0xde4   :  { %v3297_v14 = vrot.slane %v3296_v58, 4 }
 0xde5   :  { %v3289_v23 = vadd.f32 %v3288_v11, %v3287_v54 }
 0xde6   :  { %v3298_v43 = vadd.f32 %v3297_v14, %v3296_v58 }
 0xde7   :  { %v3290_v19 = vrot.slane %v3289_v23, 2 }
 0xde8   :  { %v3299_v6 = vrot.slane %v3298_v43, 2 }
 0xde9   :  { %v3291_v4 = vadd.f32 %v3290_v19, %v3289_v23 }
 0xdea   :  { %v3300_v30 = vadd.f32 %v3299_v6, %v3298_v43 }
 0xdeb   :  { %v3292_v56 = vrot.slane %v3291_v4, 1 }
 0xdec   :  { %v3301_v22 = vrot.slane %v3300_v30, 1 }
 0xded   :  { %v3293_v61 = vadd.f32 %v3292_v56, %v3291_v4 }
 0xdee   :  { %v3302_v29 = vadd.f32 %v3301_v22, %v3300_v30 }
 0xdef   :  { %v3305_v34 = vmul.f32 0.03125, %v3293_v61 }
 0xdf0   :  { %v3306_v50 = vmul.f32 0.03125, %v3302_v29 }
 0xdf1   :  { %v3309_v32 = vadd.f32 1e-06, %v3305_v34 }
 0xdf2   :  { %v3310_v45 = vadd.f32 1e-06, %v3306_v50 }
 0xdf3   :  { %7314 = vrsqrt.f32 %v3309_v32 }
 0xdf4   :  { %7316 = vrsqrt.f32 %v3310_v45  ;;  %v11707_v45 = vld [vmem:[#allocation28_spill] sm:$0xff] }
 0xdfd   :  { %v7315_v35 = vpop.eup %7314 }
 0xdfe   :  { %v7317_v15 = vpop.eup %7316  ;;  %v3317_v54 = vmul.f32 %v7315_v35, %v3237_v62  ;;  %v3321_v11 = vmul.f32 %v7315_v35, %v3241_v21  ;;  %v3329_v23 = vmul.f32 %v7315_v35, %v3249_v2  ;;  %v3325_v6 = vmul.f32 %v7315_v35, %v3245_v7  ;;  %v11708_v62 = vld [vmem:[#allocation12_spill] sm:$0xff]  ;;  %v11712_v7 = vld [vmem:[#allocation5_spill] sm:$0xff] }
 0xdff   :  { %v3330_v33 = vmul.f32 %v7317_v15, %v3250_v53  ;;  %v3318_v58 = vmul.f32 %v7317_v15, %v3238_v31  ;;  %v3322_v14 = vmul.f32 %v7317_v15, %v3242_v39  ;;  %v3326_v47 = vmul.f32 %v7317_v15, %v3246_v5  ;;  %v11709_v53 = vld [vmem:[#allocation27_spill] sm:$0xff]  ;;  %v11710_v39 = vld [vmem:[#allocation29_spill] sm:$0xff]  ;;  %v11711_v5 = vld [vmem:[#allocation30_spill] sm:$0xff] }
 0xe00   :  { %v3353_v43 = vmul.f32 %v9251_v27, %v3317_v54  ;;  %v3357_v19 = vmul.f32 %v9253_v41, %v3321_v11  ;;  %v3365_v22 = vmul.f32 %v11707_v45, %v3329_v23  ;;  %v7545_v23 = vld [vmem:[%s11484_s4 + $0x68] sm:$0xff]  }
 0xe01   :  { %v3354_v4 = vmul.f32 %v9251_v27, %v3318_v58  ;;  %v3358_v30 = vmul.f32 %v9253_v41, %v3322_v14  ;;  %v3362_v32 = vmul.f32 %v9259_v8, %v3326_v47  ;;  %v3366_v56 = vmul.f32 %v11707_v45, %v3330_v33 }
 0xe02   :  { %v3389_v35 = vadd.f32 %v11708_v62, %v3353_v43  ;;  %v3393_v27 = vadd.f32 %v11709_v53, %v3357_v19  ;;  %v3361_v41 = vmul.f32 %v9259_v8, %v3325_v6  ;;  %v3401_v58 = vadd.f32 %v11711_v5, %v3365_v22  ;;  %v7544_v8 = vld [vmem:[%s11484_s4 + $0x60] sm:$0xff]  }
 0xe03   :  { %v3390_v21 = vadd.f32 %v11708_v62, %v3354_v4  ;;  %v3394_v31 = vadd.f32 %v11709_v53, %v3358_v30  ;;  %v3398_v15 = vadd.f32 %v11710_v39, %v3362_v32  ;;  %v3402_v2 = vadd.f32 %v11711_v5, %v3366_v56 }
 0xe04   :  { %v3446_v11 = vpack.c.bf16 %v3393_v27, %v3389_v35  ;;  %v3397_v33 = vadd.f32 %v11710_v39, %v3361_v41  ;;  %v11715_v4 = vpack.c.bf16 %v9645_v49, %v9638_v52  ;;  %v11716_v62 = vpack.c.bf16 %v9641_v51, %v9636_v59 }
 0xe05   :  { %v3406_v61 = vmul.f32 %v11712_v7, %v3390_v21  ;;  %v3410_v29 = vmul.f32 %v11712_v7, %v3394_v31  ;;  %v3414_v34 = vmul.f32 %v11712_v7, %v3398_v15  ;;  %v3418_v50 = vmul.f32 %v11712_v7, %v3402_v2 }
 0xe06   :  { %v3450_v47 = vpack.c.bf16 %v3401_v58, %v3397_v33  ;;  %v11718_v15 = vpack.c.bf16 %v9658_v25, %v9649_v60 }
 0xe07   :  { %v3447_v54 = vpack.c.bf16 %v3410_v29, %v3406_v61  ;;  %v3451_v14 = vpack.c.bf16 %v3418_v50, %v3414_v34 }
 0xe09   :  { %3701 = vmatprep.subr.bf16.mxu1 %v3447_v54 }
 0xe0a   :  { %3702 = vmatpush1.bf16.msra.mxu1 %v3446_v11 }
 0xe0b   :  { %3703 = vmatprep.subr.bf16.mxu1 %v3451_v14 }
 0xe0e   :  { %3704 = vmatpush1.bf16.msra.mxu1 %v3450_v47 }
 0xe0f   :  { %4053 = vmatprep.subr.bf16.mxu1 %v3879_v38  ;;  %v11714_v38 = vld [vmem:[#allocation13_spill] sm:$0xff] }
 0xe11   :  { %6889 = vmatmul.mubr.msk.bf16.vlgmr.msra.gmra.mrb[120].mxu1 %vm456_vm2, %v7544_v8 }
 0xe12   :  { %3743 = vmatprep.mubr.bf16.mxu1 %v11632_v48 }
 0xe17   :  { %4054 = vmatpush1.bf16.xpose.msra.mxu1 %v3878_v1  ;;  %v7549_v1 = vld [vmem:[%s11484_s4 + $0x88] sm:$0xff]  }
 0xe18   :  { %4055 = vmatprep.subr.bf16.mxu1 %v3883_v55 }
 0xe19   :  { %6890 = vmatmul.mubr.msk.bf16.gmra.mrb[124].mxu1 %vm456_vm2, %v7545_v23 }
 0xe1a   :  { %3753 = vmatprep.mubr.bf16.mxu1 %v11632_v48 }
 0xe1f   :  { %4056 = vmatpush1.bf16.xpose.msra.mxu1 %v3882_v63  ;;  %v3666_v63 = vpop.f32.mrb[154].mxu0 }
 0xe20   :  { %v3886_v55 = vpack.c.bf16 %v3666_v63, %v3662_v57  ;;  %v3668_v43 = vpop.f32.mrb[155].mxu0 }
 0xe21   :  { %6891 = vmatmul.mubr.msk.bf16.gmra.mrb[128].mxu1 %vm456_vm2, %v7546_v12  ;;  %v3887_v19 = vpack.c.bf16 %v3668_v43, %v3664_v10 }
 0xe22   :  { %3763 = vmatprep.mubr.bf16.mxu1 %v11632_v48 }
 0xe23   :  { %4244 = vmatprep.subr.bf16.mxu0 %v3887_v19 }
 0xe24   :  { %4245 = vmatpush1.bf16.msra.mxu0 %v3886_v55 }
 0xe29   :  { %6892 = vmatmul.mubr.msk.bf16.gmra.mrb[132].mxu1 %vm456_vm2, %v7547_v18 }
 0xe2a   :  { %3773 = vmatprep.mubr.bf16.mxu1 %v11632_v48 }
 0xe31   :  { %6893 = vmatmul.mubr.msk.bf16.gmra.mrb[136].mxu1 %vm456_vm2, %v7548_v17 }
 0xe32   :  { %3783 = vmatprep.mubr.bf16.mxu1 %v11632_v48 }
 0xe39   :  { %6894 = vmatmul.mubr.msk.bf16.gmra.mrb[140].mxu1 %vm456_vm2, %v7549_v1 }
 0xe3a   :  { %3793 = vmatprep.mubr.bf16.mxu1 %v11632_v48 }
 0xe41   :  { %6895 = vmatmul.mubr.msk.bf16.gmra.mrb[144].mxu1 %vm456_vm2, %v11713_v37 }
 0xe42   :  { %3803 = vmatprep.mubr.bf16.mxu1 %v11632_v48 }
 0xe49   :  { %6896 = vmatmul.mubr.msk.bf16.gmra.mrb[148].mxu1 %vm456_vm2, %v11714_v38 }
 0xe4a   :  { %3813 = vmatprep.mubr.bf16.mxu1 %v11632_v48 }
 0xe51   :  { %6897 = vmatmul.mubr.msk.bf16.gmra.mrb[152].mxu1 %vm456_vm2, %v9632_v44  ;;  %v3672_v44 = vpop.f32.mrb[156].mxu0 }
 0xe52   :  { %3823 = vmatprep.mubr.bf16.mxu1 %v11632_v48  ;;  %v3674_v6 = vpop.f32.mrb[157].mxu0 }
 0xe59   :  { %6898 = vmatmul.mubr.msk.bf16.gmra.mrb[156].mxu1 %vm456_vm2, %v9656_v36  ;;  %v3676_v36 = vpop.f32.mrb[158].mxu0 }
 0xe5a   :  { %3833 = vmatprep.mubr.bf16.mxu1 %v11632_v48  ;;  %v3890_v30 = vpack.c.bf16 %v3676_v36, %v3672_v44 }
 0xe61   :  { %6899 = vmatmul.mubr.msk.bf16.gmra.mrb[160].mxu1 %vm456_vm2, %v9672_v20  ;;  %v3678_v20 = vpop.f32.mrb[159].mxu0 }
 0xe62   :  { %3843 = vmatprep.mubr.bf16.mxu1 %v11632_v48  ;;  %v3891_v32 = vpack.c.bf16 %v3678_v20, %v3674_v6  ;;  %v3682_v45 = vpop.f32.mrb[160].mxu0 }
 0xe63   :  { %v3684_v56 = vpop.f32.mrb[161].mxu0 }
 0xe64   :  { %4246 = vmatprep.subr.bf16.mxu0 %v3891_v32  ;;  %v3686_v21 = vpop.f32.mrb[162].mxu0 }
 0xe65   :  { %4247 = vmatpush1.bf16.msra.mxu0 %v3890_v30  ;;  %v3894_v53 = vpack.c.bf16 %v3686_v21, %v3682_v45  ;;  %v3688_v31 = vpop.f32.mrb[163].mxu0 }
 0xe66   :  { %v3895_v52 = vpack.c.bf16 %v3688_v31, %v3684_v56  ;;  %v3692_v49 = vpop.f32.mrb[164].mxu0 }
 0xe67   :  { %v3694_v39 = vpop.f32.mrb[165].mxu0 }
 0xe68   :  { %4248 = vmatprep.subr.bf16.mxu0 %v3895_v52  ;;  %v3696_v5 = vpop.f32.mrb[166].mxu0 }
 0xe69   :  { %6900 = vmatmul.mubr.msk.bf16.gmra.mrb[164].mxu1 %vm456_vm2, %v9680_v26  ;;  %v11717_v26 = vpack.c.bf16 %v9662_v28, %v9651_v42  ;;  %4249 = vmatpush1.bf16.msra.mxu0 %v3894_v53  ;;  %v3898_v2 = vpack.c.bf16 %v3696_v5, %v3692_v49  ;;  %v3698_v59 = vpop.f32.mrb[167].mxu0 }
 0xe6a   :  { %4085 = vmatprep.mubr.bf16.mxu1 %v11715_v4  ;;  %v3899_v51 = vpack.c.bf16 %v3698_v59, %v3694_v39  ;;  %v9842_v22 = vpop.f32.mrb[168].mxu0 }
 0xe6b   :  { %v3938_v42 = vpop.f32.mrb[169].mxu0 }
 0xe6c   :  { %4250 = vmatprep.subr.bf16.mxu0 %v3899_v51  ;;  %v9844_v28 = vpop.f32.mrb[170].mxu0 }
 0xe6d   :  { %4251 = vmatpush1.bf16.msra.mxu0 %v3898_v2  ;;  %v3941_v35 = vpop.f32.mrb[171].mxu0 }
 0xe6e   :  { %v9846_v27 = vpop.f32.mrb[172].mxu0 }
 0xe6f   :  { %v3946_v41 = vpop.f32.mrb[173].mxu0 }
 0xe70   :  { %v9848_v7 = vpop.f32.mrb[174].mxu0 }
 0xe71   :  { %4086 = vmatmul.mubr.bf16.vlgmr.msra.gmra.mrb[168].mxu1 %v11716_v62  ;;  %v3949_v61 = vpop.f32.mrb[175].mxu0 }
 0xe72   :  { %4093 = vmatprep.mubr.bf16.mxu1 %v11717_v26 }
 0xe79   :  { %4094 = vmatmul.mubr.bf16.gmra.mrb[172].mxu1 %v11718_v15 }
 0xee4   :  { %v3735_v60 = vpop.f32.mrb[120].mxu1 }
 0xee5   :  { %v3737_v25 = vpop.f32.mrb[121].mxu1 }
 0xee6   :  { %v3739_v29 = vpop.f32.mrb[122].mxu1 }
 0xee7   :  { %v3856_v34 = vpack.c.bf16 %v3739_v29, %v3735_v60  ;;  %v3741_v50 = vpop.f32.mrb[123].mxu1 }
 0xee8   :  { %v3857_v54 = vpack.c.bf16 %v3741_v50, %v3737_v25 }
 0xeea   :  { %4329 = vmatprep.mubr.bf16.mxu1 %v3857_v54 }
 0xeec   :  { %v3745_v11 = vpop.f32.mrb[124].mxu1 }
 0xeed   :  { %v3747_v33 = vpop.f32.mrb[125].mxu1 }
 0xeee   :  { %v3749_v58 = vpop.f32.mrb[126].mxu1 }
 0xeef   :  { %v3860_v14 = vpack.c.bf16 %v3749_v58, %v3745_v11  ;;  %v3751_v47 = vpop.f32.mrb[127].mxu1 }
 0xef0   :  { %v3861_v8 = vpack.c.bf16 %v3751_v47, %v3747_v33 }
 0xef4   :  { %v9850_v23 = vpop.f32.mrb[128].mxu1 }
 0xef5   :  { %v9852_v12 = vpop.f32.mrb[129].mxu1 }
 0xef6   :  { %v9854_v18 = vpop.f32.mrb[130].mxu1 }
 0xef7   :  { %v3864_v17 = vpack.c.bf16 %v9854_v18, %v9850_v23  ;;  %v9858_v1 = vpop.f32.mrb[131].mxu1 }
 0xef8   :  { %v3865_v37 = vpack.c.bf16 %v9858_v1, %v9852_v12 }
 0xefc   :  { %v9862_v38 = vpop.f32.mrb[132].mxu1 }
 0xefd   :  { %v9864_v57 = vpop.f32.mrb[133].mxu1 }
 0xefe   :  { %v9866_v10 = vpop.f32.mrb[134].mxu1 }
 0xeff   :  { %v9870_v55 = vpop.f32.mrb[135].mxu1 }
 0xf00   :  { %v3869_v43 = vpack.c.bf16 %v9870_v55, %v9864_v57 }
 0xf04   :  { %v3775_v19 = vpop.f32.mrb[136].mxu1 }
 0xf05   :  { %v3777_v44 = vpop.f32.mrb[137].mxu1 }
 0xf06   :  { %v3779_v6 = vpop.f32.mrb[138].mxu1 }
 0xf07   :  { %v3872_v36 = vpack.c.bf16 %v3779_v6, %v3775_v19  ;;  %v3781_v4 = vpop.f32.mrb[139].mxu1 }
 0xf08   :  { %v3873_v30 = vpack.c.bf16 %v3781_v4, %v3777_v44 }
 0xf0a   :  { %4297 = vmatprep.subr.bf16.mxu1 %v3873_v30 }
 0xf0b   :  { %4298 = vmatpush1.bf16.xpose.msra.mxu1 %v3872_v36 }
 0xf0c   :  { %v3785_v20 = vpop.f32.mrb[140].mxu1 }
 0xf0d   :  { %v3787_v32 = vpop.f32.mrb[141].mxu1 }
 0xf0e   :  { %v3789_v45 = vpop.f32.mrb[142].mxu1 }
 0xf0f   :  { %v3876_v56 = vpack.c.bf16 %v3789_v45, %v3785_v20  ;;  %v3791_v62 = vpop.f32.mrb[143].mxu1 }
 0xf10   :  { %v3877_v21 = vpack.c.bf16 %v3791_v62, %v3787_v32 }
 0xf12   :  { %4299 = vmatprep.subr.bf16.mxu1 %v3877_v21 }
 0xf13   :  { %4300 = vmatpush1.bf16.xpose.msra.mxu1 %v3876_v56 }
 0xf14   :  { %v9874_v26 = vpop.f32.mrb[144].mxu1 }
 0xf15   :  { %v3797_v53 = vpop.f32.mrb[145].mxu1 }
 0xf16   :  { %v9876_v31 = vpop.f32.mrb[146].mxu1 }
 0xf17   :  { %v3880_v52 = vpack.c.bf16 %v9876_v31, %v9874_v26  ;;  %v3801_v49 = vpop.f32.mrb[147].mxu1  ;;  %v11719_v26 = vpack.c.bf16 %v9866_v10, %v9862_v38  ;;  %v7080_v38 = vld [vmem:[%s11486_s5 + $0x10] sm:$0xff]  }
 0xf18   :  { %v3881_v39 = vpack.c.bf16 %v3801_v49, %v3797_v53 }
 0xf1a   :  { %4330 = vmatmul.mubr.bf16.vlgmr.msra.gmra.mrb[176].mxu1 %v3856_v34  ;;  %4448 = vmatprep.subr.bf16.mxu0 %v3881_v39 }
 0xf1b   :  { %4337 = vmatprep.mubr.bf16.mxu1 %v3861_v8 }
 0xf1c   :  { %v9880_v15 = vpop.f32.mrb[148].mxu1 }
 0xf1d   :  { %v9882_v5 = vpop.f32.mrb[149].mxu1 }
 0xf1e   :  { %v9884_v2 = vpop.f32.mrb[150].mxu1 }
 0xf1f   :  { %v3884_v59 = vpack.c.bf16 %v9884_v2, %v9880_v15  ;;  %v9888_v51 = vpop.f32.mrb[151].mxu1 }
 0xf20   :  { %v3885_v42 = vpack.c.bf16 %v9888_v51, %v9882_v5 }
 0xf22   :  { %4338 = vmatmul.mubr.bf16.gmra.mrb[180].mxu1 %v3860_v14 }
 0xf23   :  { %4671 = vmatprep.mubr.bf16.mxu1 %v11632_v48 }
 0xf24   :  { %v3815_v35 = vpop.f32.mrb[152].mxu1 }
 0xf25   :  { %v3817_v41 = vpop.f32.mrb[153].mxu1 }
 0xf26   :  { %v3819_v61 = vpop.f32.mrb[154].mxu1 }
 0xf27   :  { %v3888_v60 = vpack.c.bf16 %v3819_v61, %v3815_v35  ;;  %v3821_v25 = vpop.f32.mrb[155].mxu1  ;;  %v3951_v35 = vsel %vm456_vm2, %v9842_v22, 0.0 }
 0xf28   :  { %v3889_v29 = vpack.c.bf16 %v3821_v25, %v3817_v41 }
 0xf2a   :  { %4639 = vmatprep.subr.bf16.mxu1 %v3889_v29 }
 0xf2b   :  { %4640 = vmatpush1.bf16.msra.mxu1 %v3888_v60 }
 0xf2c   :  { %v3825_v34 = vpop.f32.mrb[156].mxu1 }
 0xf2d   :  { %v3827_v50 = vpop.f32.mrb[157].mxu1 }
 0xf2e   :  { %v3829_v54 = vpop.f32.mrb[158].mxu1 }
 0xf2f   :  { %v3892_v11 = vpack.c.bf16 %v3829_v54, %v3825_v34  ;;  %v3831_v33 = vpop.f32.mrb[159].mxu1  ;;  %v3957_v34 = vsel %vm456_vm2, %v9846_v27, 0.0  ;;  %v3954_v54 = vsel %vm456_vm2, %v9844_v28, 0.0 }
 0xf30   :  { %v3893_v58 = vpack.c.bf16 %v3831_v33, %v3827_v50 }
 0xf32   :  { %4641 = vmatprep.subr.bf16.mxu1 %v3893_v58 }
 0xf33   :  { %4642 = vmatpush1.bf16.msra.mxu1 %v3892_v11  ;;  %v3960_v11 = vsel %vm456_vm2, %v9848_v7, 0.0 }
 0xf34   :  { %v3835_v47 = vpop.f32.mrb[160].mxu1 }
 0xf35   :  { %v3837_v14 = vpop.f32.mrb[161].mxu1 }
 0xf36   :  { %v3839_v8 = vpop.f32.mrb[162].mxu1 }
 0xf37   :  { %v3896_v19 = vpack.c.bf16 %v3839_v8, %v3835_v47  ;;  %v3841_v44 = vpop.f32.mrb[163].mxu1 }
 0xf38   :  { %v3897_v6 = vpack.c.bf16 %v3841_v44, %v3837_v14 }
 0xf3a   :  { %4643 = vmatprep.subr.bf16.mxu1 %v3897_v6 }
 0xf3b   :  { %4644 = vmatpush1.bf16.msra.mxu1 %v3896_v19 }
 0xf3c   :  { %v3845_v36 = vpop.f32.mrb[164].mxu1 }
 0xf3d   :  { %v3847_v4 = vpop.f32.mrb[165].mxu1 }
 0xf3e   :  { %v3849_v30 = vpop.f32.mrb[166].mxu1 }
 0xf3f   :  { %v3900_v20 = vpack.c.bf16 %v3849_v30, %v3845_v36  ;;  %v3851_v32 = vpop.f32.mrb[167].mxu1 }
 0xf40   :  { %v3901_v45 = vpack.c.bf16 %v3851_v32, %v3847_v4 }
 0xf42   :  { %4645 = vmatprep.subr.bf16.mxu1 %v3901_v45 }
 0xf43   :  { %4646 = vmatpush1.bf16.msra.mxu1 %v3900_v20 }
 0xf44   :  { %v4087_v56 = vpop.f32.mrb[168].mxu1 }
 0xf45   :  { %v4089_v62 = vpop.f32.mrb[169].mxu1  ;;  %v4102_v21 = vsel %vm456_vm2, %v4087_v56, 0.0 }
 0xf46   :  { %4103 = vadd.xlane.f32.xlu0 %v4102_v21  ;;  %v4090_v53 = vpop.f32.mrb[170].mxu1 }
 0xf47   :  { %v4092_v49 = vpop.f32.mrb[171].mxu1  ;;  %v4105_v39 = vsel %vm456_vm2, %v4090_v53, 0.0 }
 0xf48   :  { %4106 = vadd.xlane.f32.xlu1 %v4105_v39 }
 0xf4c   :  { %v4095_v41 = vpop.f32.mrb[172].mxu1  ;;  %3952 = vadd.xlane.f32.xlu1 %v3951_v35 }
 0xf4d   :  { %v4097_v61 = vpop.f32.mrb[173].mxu1  ;;  %v4108_v60 = vsel %vm456_vm2, %v4095_v41, 0.0 }
 0xf4e   :  { %4109 = vadd.xlane.f32.xlu0 %v4108_v60  ;;  %v4098_v25 = vpop.f32.mrb[174].mxu1 }
 0xf4f   :  { %v4100_v29 = vpop.f32.mrb[175].mxu1  ;;  %v4111_v50 = vsel %vm456_vm2, %v4098_v25, 0.0 }
 0xf50   :  { %3958 = vadd.xlane.f32.xlu1 %v3957_v34 }
 0xf52   :  { %4112 = vadd.xlane.f32.xlu0 %v4111_v50 }
 0xf56   :  { %3955 = vadd.xlane.f32.xlu0 %v3954_v54 }
 0xf5a   :  { %3961 = vadd.xlane.f32.xlu0 %v3960_v11 }
 0xfd3   :  { %v4104_v33 = vpop.xlane.xlu0 %4103 }
 0xfd5   :  { %v4107_v58 = vpop.xlane.xlu1 %4106 }
 0xfd6   :  { %v4114_v14 = vadd.f32 %v4107_v58, %v4104_v33 }
 0xfd9   :  { %v3953_v19 = vpop.xlane.xlu1 %3952 }
 0xfdb   :  { %v4110_v47 = vpop.xlane.xlu0 %4109 }
 0xfdc   :  { %v4115_v8 = vadd.f32 %v4114_v14, %v4110_v47 }
 0xfdd   :  { %v3959_v32 = vpop.xlane.xlu1 %3958 }
 0xfdf   :  { %v4113_v44 = vpop.xlane.xlu0 %4112 }
 0xfe0   :  { %v4116_v6 = vadd.f32 %v4115_v8, %v4113_v44 }
 0xfe2   :  { %v4117_v36 = vrot.slane %v4116_v6, 4 }
 0xfe3   :  { %v3956_v4 = vpop.xlane.xlu0 %3955 }
 0xfe4   :  { %v4118_v30 = vadd.f32 %v4117_v36, %v4116_v6  ;;  %v3963_v20 = vadd.f32 %v3956_v4, %v3953_v19 }
 0xfe6   :  { %v4119_v45 = vrot.slane %v4118_v30, 2  ;;  %v3964_v62 = vadd.f32 %v3963_v20, %v3959_v32 }
 0xfe7   :  { %v3962_v21 = vpop.xlane.xlu0 %3961 }
 0xfe8   :  { %v4120_v49 = vadd.f32 %v4119_v45, %v4118_v30  ;;  %v3965_v39 = vadd.f32 %v3964_v62, %v3962_v21 }
 0xfea   :  { %v4121_v35 = vrot.slane %v4120_v49, 1  ;;  %v3966_v61 = vrot.slane %v3965_v39, 4 }
 0xfec   :  { %v4122_v60 = vadd.f32 %v4121_v35, %v4120_v49  ;;  %v3967_v29 = vadd.f32 %v3966_v61, %v3965_v39 }
 0xfed   :  { %v9905_v34 = vpop.f32.mrb[176].mxu1 }
 0xfee   :  { %v4123_v50 = vmul.f32 0.0009765625, %v4122_v60  ;;  %v3968_v54 = vrot.slane %v3967_v29, 2  ;;  %v4333_v11 = vpop.f32.mrb[177].mxu1 }
 0xfef   :  { %v9907_v33 = vpop.f32.mrb[178].mxu1 }
 0xff0   :  { %v3969_v58 = vadd.f32 %v3968_v54, %v3967_v29  ;;  %v9909_v47 = vsub.f32 %v4087_v56, %v4123_v50  ;;  %v9911_v14 = vsub.f32 %v4090_v53, %v4123_v50  ;;  %v9913_v8 = vsub.f32 %v4095_v41, %v4123_v50  ;;  %v4336_v19 = vpop.f32.mrb[179].mxu1 }
 0xff1   :  { %v9915_v44 = vsub.f32 %v4098_v25, %v4123_v50 }
 0xff2   :  { %v3970_v6 = vrot.slane %v3969_v58, 1  ;;  %v4128_v36 = vmul.f32 %v9909_v47, %v9909_v47  ;;  %v4129_v4 = vmul.f32 %v9911_v14, %v9911_v14  ;;  %v4130_v30 = vmul.f32 %v9913_v8, %v9913_v8 }
 0xff3   :  { %v4131_v56 = vmul.f32 %v9915_v44, %v9915_v44 }
 0xff4   :  { %v3971_v53 = vadd.f32 %v3970_v6, %v3969_v58  ;;  %v4132_v41 = vsel %vm456_vm2, %v4128_v36, 0.0  ;;  %v4135_v20 = vsel %vm456_vm2, %v4129_v4, 0.0  ;;  %v4138_v62 = vsel %vm456_vm2, %v4130_v30, 0.0 }
 0xff5   :  { %4133 = vadd.xlane.f32.xlu1 %v4132_v41  ;;  %4136 = vadd.xlane.f32.xlu0 %v4135_v20  ;;  %v9927_v25 = vpop.f32.mrb[180].mxu1  ;;  %v4141_v21 = vsel %vm456_vm2, %v4131_v56, 0.0 }
 0xff6   :  { %v3972_v32 = vmul.f32 0.0009765625, %v3971_v53  ;;  %v4341_v45 = vpop.f32.mrb[181].mxu1 }
 0xff7   :  { %v9931_v49 = vpop.f32.mrb[182].mxu1 }
 0xff8   :  { %v9934_v39 = vsub.f32 %v9844_v28, %v3972_v32  ;;  %v9937_v35 = vsub.f32 %v9842_v22, %v3972_v32  ;;  %v9940_v61 = vsub.f32 %v9848_v7, %v3972_v32  ;;  %v9943_v60 = vsub.f32 %v9846_v27, %v3972_v32  ;;  %v4344_v29 = vpop.f32.mrb[183].mxu1 }
 0xff9   :  { %4139 = vadd.xlane.f32.xlu1 %v4138_v62  ;;  %4142 = vadd.xlane.f32.xlu0 %v4141_v21 }
 0xffa   :  { %v3978_v50 = vmul.f32 %v9934_v39, %v9934_v39  ;;  %v3977_v54 = vmul.f32 %v9937_v35, %v9937_v35  ;;  %v3980_v7 = vmul.f32 %v9940_v61, %v9940_v61  ;;  %v3979_v27 = vmul.f32 %v9943_v60, %v9943_v60 }
 0xffc   :  { %v3984_v28 = vsel %vm456_vm2, %v3978_v50, 0.0  ;;  %v3981_v22 = vsel %vm456_vm2, %v3977_v54, 0.0  ;;  %v3990_v11 = vsel %vm456_vm2, %v3980_v7, 0.0  ;;  %v3987_v58 = vsel %vm456_vm2, %v3979_v27, 0.0 }
 0xffd   :  { %3985 = vadd.xlane.f32.xlu0 %v3984_v28  ;;  %3982 = vadd.xlane.f32.xlu1 %v3981_v22 }
0x1001   :  { %3991 = vadd.xlane.f32.xlu0 %v3990_v11  ;;  %3988 = vadd.xlane.f32.xlu1 %v3987_v58 }
0x1082   :  { %v4134_v19 = vpop.xlane.xlu1 %4133  ;;  %v4137_v6 = vpop.xlane.xlu0 %4136 }
0x1083   :  { %v4144_v36 = vadd.f32 %v4137_v6, %v4134_v19 }
0x1086   :  { %v4140_v4 = vpop.xlane.xlu1 %4139  ;;  %v4143_v30 = vpop.xlane.xlu0 %4142 }
0x1087   :  { %v4145_v56 = vadd.f32 %v4144_v36, %v4140_v4 }
0x1089   :  { %v4146_v53 = vadd.f32 %v4145_v56, %v4143_v30 }
0x108a   :  { %v3983_v41 = vpop.xlane.xlu1 %3982  ;;  %v3986_v20 = vpop.xlane.xlu0 %3985 }
0x108b   :  { %v4147_v32 = vrot.slane %v4146_v53, 4  ;;  %v3993_v62 = vadd.f32 %v3986_v20, %v3983_v41 }
0x108d   :  { %v4148_v45 = vadd.f32 %v4147_v32, %v4146_v53 }
0x108e   :  { %v3989_v21 = vpop.xlane.xlu1 %3988  ;;  %v3992_v54 = vpop.xlane.xlu0 %3991 }
0x108f   :  { %v4149_v29 = vrot.slane %v4148_v45, 2  ;;  %v3994_v50 = vadd.f32 %v3993_v62, %v3989_v21 }
0x1091   :  { %v4150_v28 = vadd.f32 %v4149_v29, %v4148_v45  ;;  %v3995_v22 = vadd.f32 %v3994_v50, %v3992_v54 }
0x1093   :  { %v4151_v7 = vrot.slane %v4150_v28, 1  ;;  %v3996_v27 = vrot.slane %v3995_v22, 4 }
0x1095   :  { %v4152_v11 = vadd.f32 %v4151_v7, %v4150_v28  ;;  %v3997_v58 = vadd.f32 %v3996_v27, %v3995_v22 }
0x1097   :  { %v4153_v19 = vmul.f32 0.0009765625, %v4152_v11  ;;  %v3998_v6 = vrot.slane %v3997_v58, 2 }
0x1099   :  { %v4154_v63 = vadd.f32 0.00032, %v4153_v19  ;;  %v3999_v36 = vadd.f32 %v3998_v6, %v3997_v58 }
0x109b   :  { %7318 = vrsqrt.f32 %v4154_v63  ;;  %v4000_v4 = vrot.slane %v3999_v36, 1 }
0x109d   :  { %v4001_v30 = vadd.f32 %v4000_v4, %v3999_v36 }
0x109f   :  { %v4002_v56 = vmul.f32 0.0009765625, %v4001_v30 }
0x10a1   :  { %v4003_v53 = vadd.f32 0.00032, %v4002_v56 }
0x10a3   :  { %7320 = vrsqrt.f32 %v4003_v53 }
0x10a5   :  { %v7319_v41 = vpop.eup %7318 }
0x10a6   :  { %v4157_v20 = vmul.f32 %v7319_v41, %v9911_v14  ;;  %v4156_v32 = vmul.f32 %v7319_v41, %v9909_v47  ;;  %v4159_v21 = vmul.f32 %v7319_v41, %v9915_v44  ;;  %v4158_v29 = vmul.f32 %v7319_v41, %v9913_v8 }
0x10a8   :  { %v4163_v45 = vsel %vm456_vm2, %v4157_v20, -inf  ;;  %v4160_v62 = vsel %vm456_vm2, %v4156_v32, -inf  ;;  %v4169_v63 = vsel %vm456_vm2, %v4159_v21, -inf  ;;  %v4166_v50 = vsel %vm456_vm2, %v4158_v29, -inf }
0x10a9   :  { %4164 = vmax.xlane.f32.xlu0 %v4163_v45  ;;  %4161 = vmax.xlane.f32.xlu1 %v4160_v62 }
0x10ad   :  { %v7321_v54 = vpop.eup %7320  ;;  %4170 = vmax.xlane.f32.xlu0 %v4169_v63  ;;  %4167 = vmax.xlane.f32.xlu1 %v4166_v50 }
0x10ae   :  { %v4006_v14 = vmul.f32 %v7321_v54, %v9934_v39  ;;  %v4005_v47 = vmul.f32 %v7321_v54, %v9937_v35  ;;  %v4008_v44 = vmul.f32 %v7321_v54, %v9940_v61  ;;  %v4007_v8 = vmul.f32 %v7321_v54, %v9943_v60 }
0x10b0   :  { %v4012_v28 = vsel %vm456_vm2, %v4006_v14, -inf  ;;  %v4009_v22 = vsel %vm456_vm2, %v4005_v47, -inf  ;;  %v4018_v7 = vsel %vm456_vm2, %v4008_v44, -inf  ;;  %v4015_v27 = vsel %vm456_vm2, %v4007_v8, -inf }
0x10b1   :  { %4013 = vmax.xlane.f32.xlu0 %v4012_v28  ;;  %4010 = vmax.xlane.f32.xlu1 %v4009_v22 }
0x10b5   :  { %4019 = vmax.xlane.f32.xlu0 %v4018_v7  ;;  %4016 = vmax.xlane.f32.xlu1 %v4015_v27 }
0x1136   :  { %v4162_v11 = vpop.xlane.xlu1 %4161  ;;  %v4165_v39 = vpop.xlane.xlu0 %4164 }
0x1137   :  { %v4172_v58 = vsub.f32 %v4156_v32, %v4162_v11  ;;  %v4173_v35 = vsub.f32 %v4157_v20, %v4165_v39 }
0x1139   :  { %v4176_v19 = vmul.f32 1.442695, %v4172_v58  ;;  %v4178_v6 = vmul.f32 1.442695, %v4173_v35 }
0x113a   :  { %v4168_v36 = vpop.xlane.xlu1 %4167  ;;  %v4171_v4 = vpop.xlane.xlu0 %4170 }
0x113b   :  { %7322 = vpow2.f32 %v4176_v19  ;;  %v4174_v61 = vsub.f32 %v4158_v29, %v4168_v36  ;;  %v4175_v30 = vsub.f32 %v4159_v21, %v4171_v4 }
0x113c   :  { %7324 = vpow2.f32 %v4178_v6 }
0x113d   :  { %v4180_v60 = vmul.f32 1.442695, %v4174_v61  ;;  %v4182_v56 = vmul.f32 1.442695, %v4175_v30 }
0x113e   :  { %v4011_v53 = vpop.xlane.xlu1 %4010  ;;  %v4014_v41 = vpop.xlane.xlu0 %4013 }
0x113f   :  { %7326 = vpow2.f32 %v4180_v60  ;;  %v4021_v45 = vsub.f32 %v4005_v47, %v4011_v53  ;;  %v4022_v62 = vsub.f32 %v4006_v14, %v4014_v41 }
0x1140   :  { %7328 = vpow2.f32 %v4182_v56 }
0x1141   :  { %v4025_v63 = vmul.f32 1.442695, %v4021_v45  ;;  %v4027_v50 = vmul.f32 1.442695, %v4022_v62 }
0x1142   :  { %v4017_v32 = vpop.xlane.xlu1 %4016  ;;  %v4020_v20 = vpop.xlane.xlu0 %4019 }
0x1143   :  { %7330 = vpow2.f32 %v4025_v63  ;;  %v4023_v54 = vsub.f32 %v4007_v8, %v4017_v32  ;;  %v4024_v28 = vsub.f32 %v4008_v44, %v4020_v20 }
0x1144   :  { %7332 = vpow2.f32 %v4027_v50 }
0x1145   :  { %v7323_v22 = vpop.eup %7322  ;;  %v4029_v29 = vmul.f32 1.442695, %v4023_v54  ;;  %v4031_v21 = vmul.f32 1.442695, %v4024_v28 }
0x1146   :  { %v7325_v7 = vpop.eup %7324  ;;  %v4184_v27 = vsel %vm456_vm2, %v7323_v22, 0.0 }
0x1147   :  { %7334 = vpow2.f32 %v4029_v29  ;;  %4185 = vadd.xlane.f32.xlu1 %v4184_v27  ;;  %v4187_v47 = vsel %vm456_vm2, %v7325_v7, 0.0 }
0x1148   :  { %7336 = vpow2.f32 %v4031_v21  ;;  %4188 = vadd.xlane.f32.xlu0 %v4187_v47 }
0x1149   :  { %v7327_v14 = vpop.eup %7326 }
0x114a   :  { %v7329_v11 = vpop.eup %7328  ;;  %v4190_v39 = vsel %vm456_vm2, %v7327_v14, 0.0 }
0x114b   :  { %4191 = vadd.xlane.f32.xlu1 %v4190_v39  ;;  %v4193_v44 = vsel %vm456_vm2, %v7329_v11, 0.0 }
0x114c   :  { %4194 = vadd.xlane.f32.xlu0 %v4193_v44 }
0x114d   :  { %v7331_v8 = vpop.eup %7330 }
0x114e   :  { %v7333_v58 = vpop.eup %7332  ;;  %v4033_v35 = vsel %vm456_vm2, %v7331_v8, 0.0 }
0x114f   :  { %4034 = vadd.xlane.f32.xlu1 %v4033_v35  ;;  %v4036_v19 = vsel %vm456_vm2, %v7333_v58, 0.0 }
0x1150   :  { %4037 = vadd.xlane.f32.xlu0 %v4036_v19 }
0x1151   :  { %v7335_v6 = vpop.eup %7334 }
0x1152   :  { %v7337_v36 = vpop.eup %7336  ;;  %v4039_v4 = vsel %vm456_vm2, %v7335_v6, 0.0 }
0x1153   :  { %4040 = vadd.xlane.f32.xlu1 %v4039_v4  ;;  %v4042_v61 = vsel %vm456_vm2, %v7337_v36, 0.0 }
0x1154   :  { %4043 = vadd.xlane.f32.xlu0 %v4042_v61 }
0x11d4   :  { %v4186_v30 = vpop.xlane.xlu1 %4185 }
0x11d5   :  { %7338 = vrcp.f32 %v4186_v30  ;;  %v4189_v60 = vpop.xlane.xlu0 %4188 }
0x11d6   :  { %7340 = vrcp.f32 %v4189_v60 }
0x11d8   :  { %v4192_v56 = vpop.xlane.xlu1 %4191 }
0x11d9   :  { %7342 = vrcp.f32 %v4192_v56  ;;  %v4195_v53 = vpop.xlane.xlu0 %4194 }
0x11da   :  { %7344 = vrcp.f32 %v4195_v53 }
0x11dc   :  { %v4035_v41 = vpop.xlane.xlu1 %4034 }
0x11dd   :  { %7346 = vrcp.f32 %v4035_v41  ;;  %v4038_v45 = vpop.xlane.xlu0 %4037 }
0x11de   :  { %7348 = vrcp.f32 %v4038_v45 }
0x11df   :  { %v7339_v62 = vpop.eup %7338 }
0x11e0   :  { %v7341_v63 = vpop.eup %7340  ;;  %v4041_v50 = vpop.xlane.xlu1 %4040  ;;  %v4197_v32 = vmul.f32 %v7339_v62, %v7323_v22 }
0x11e1   :  { %7350 = vrcp.f32 %v4041_v50  ;;  %v4044_v20 = vpop.xlane.xlu0 %4043  ;;  %v4199_v54 = vmul.f32 %v7341_v63, %v7325_v7 }
0x11e2   :  { %7352 = vrcp.f32 %v4044_v20 }
0x11e3   :  { %v7343_v28 = vpop.eup %7342  ;;  %v7024_v29 = vpack.i.bf16 %v4199_v54, %v4197_v32 }
0x11e4   :  { %v7345_v21 = vpop.eup %7344  ;;  %v4201_v27 = vmul.f32 %v7343_v28, %v7327_v14 }
0x11e5   :  { %7025 = vrot.lane.b32.xlu1 %v7024_v29, %s7582_s23  ;;  %v4203_v47 = vmul.f32 %v7345_v21, %v7329_v11 }
0x11e7   :  { %v7347_v39 = vpop.eup %7346  ;;  %v7029_v44 = vpack.i.bf16 %v4203_v47, %v4201_v27 }
0x11e8   :  { %v7349_v35 = vpop.eup %7348  ;;  %v4046_v19 = vmul.f32 %v7347_v39, %v7331_v8 }
0x11e9   :  { %7030 = vrot.lane.b32.xlu0 %v7029_v44, %s7582_s23  ;;  %v4048_v4 = vmul.f32 %v7349_v35, %v7333_v58 }
0x11ea   :  { %v4204_v61 = vadd.f32 %v4197_v32, %v4046_v19 }
0x11eb   :  { %v7351_v22 = vpop.eup %7350  ;;  %v4205_v30 = vadd.f32 %v4199_v54, %v4048_v4 }
0x11ec   :  { %v7353_v60 = vpop.eup %7352  ;;  %v4208_v7 = vmul.f32 0.5, %v4204_v61  ;;  %v4050_v56 = vmul.f32 %v7351_v22, %v7335_v6  ;;  %v4346_v61 = vsel %vm456_vm2, %v9905_v34, 0.0  ;;  %v4349_v22 = vsel %vm456_vm2, %v9907_v33, 0.0 }
0x11ed   :  { %v4209_v53 = vmul.f32 0.5, %v4205_v30  ;;  %v4052_v41 = vmul.f32 %v7353_v60, %v7337_v36  ;;  %v4352_v30 = vsel %vm456_vm2, %v9927_v25, 0.0  ;;  %v4355_v60 = vsel %vm456_vm2, %v9931_v49, 0.0 }
0x11ee   :  { %4212 = vst.msk [vmem:[%s11485_s19 + $0x20] sm:$0xff] %vm456_vm2, %v4208_v7  ;;  %v4206_v14 = vadd.f32 %v4201_v27, %v4050_v56  ;;  %v7081_v27 = vld [vmem:[%s11486_s5 + $0x18] sm:$0xff]  }
0x11ef   :  { %4213 = vst.msk [vmem:[%s11485_s19 + $0x28] sm:$0xff] %vm456_vm2, %v4209_v53  ;;  %v4207_v11 = vadd.f32 %v4203_v47, %v4052_v41 }
0x11f0   :  { %v4210_v8 = vmul.f32 0.5, %v4206_v14 }
0x11f1   :  { %v4211_v58 = vmul.f32 0.5, %v4207_v11 }
0x11f2   :  { %4214 = vst.msk [vmem:[%s11485_s19 + $0x30] sm:$0xff] %vm456_vm2, %v4210_v8 }
0x11f3   :  { %4215 = vst.msk [vmem:[%s11485_s19 + $0x38] sm:$0xff] %vm456_vm2, %v4211_v58 }
0x1257   :  { %v7026_v6 = vpop.permute.xlu1 %7025 }
0x1258   :  { %v7028_v36 = vunpack.i.h.bf16 %v7026_v6  ;;  %v7027_v45 = vunpack.i.l.bf16 %v7026_v6 }
0x125a   :  { %v4232_v62 = vsel %vm456_vm2, %v4046_v19, %v7027_v45  ;;  %v4233_v63 = vsel %vm456_vm2, %v4048_v4, %v7028_v36 }
0x125b   :  { %v4236_v50 = vpack.c.bf16 %v4233_v63, %v4232_v62  ;;  %v7031_v32 = vpop.permute.xlu0 %7030 }
0x125c   :  { %v7033_v20 = vunpack.i.h.bf16 %v7031_v32  ;;  %v7032_v54 = vunpack.i.l.bf16 %v7031_v32 }
0x125d   :  { %6901 = vmatmul.mubr.msk.bf16.vlgmr.msra.gmra.mrb[176].mxu0 %vm1183_vm3, %v4236_v50 }
0x125e   :  { %4449 = vmatpush1.bf16.xpose.msra.mxu0 %v3880_v52  ;;  %4286 = vmatprep.mubr.bf16.mxu0 %v11632_v48  ;;  %v4235_v28 = vsel %vm456_vm2, %v4052_v41, %v7033_v20  ;;  %v4234_v29 = vsel %vm456_vm2, %v4050_v56, %v7032_v54 }
0x125f   :  { %4450 = vmatprep.subr.bf16.mxu0 %v3885_v42  ;;  %v4237_v21 = vpack.c.bf16 %v4235_v28, %v4234_v29 }
0x1265   :  { %6902 = vmatmul.mubr.msk.bf16.gmra.mrb[180].mxu0 %vm1183_vm3, %v4237_v21 }
0x1266   :  { %4451 = vmatpush1.bf16.xpose.msra.mxu0 %v3884_v59  ;;  %4480 = vmatprep.mubr.bf16.mxu0 %v3865_v37 }
0x126d   :  { %4481 = vmatmul.mubr.bf16.vlgmr.msra.gmra.mrb[184].mxu0 %v3864_v17 }
0x126e   :  { %4488 = vmatprep.mubr.bf16.mxu0 %v3869_v43 }
0x1275   :  { %4489 = vmatmul.mubr.bf16.gmra.mrb[188].mxu0 %v11719_v26 }
0x1276   :  { %4753 = vmatprep.mubr.bf16.mxu0 %v11632_v48 }
0x1330   :  { %v4278_v31 = vpop.f32.mrb[176].mxu0 }
0x1331   :  { %v4280_v52 = vpop.f32.mrb[177].mxu0 }
0x1332   :  { %v4282_v15 = vpop.f32.mrb[178].mxu0 }
0x1333   :  { %v4697_v5 = vpack.c.bf16 %v4282_v15, %v4278_v31  ;;  %v4284_v12 = vpop.f32.mrb[179].mxu0 }
0x1334   :  { %v4698_v1 = vpack.c.bf16 %v4284_v12, %v4280_v52 }
0x1336   :  { %4721 = vmatprep.subr.bf16.mxu0 %v4698_v1 }
0x1337   :  { %4722 = vmatpush1.bf16.msra.mxu0 %v4697_v5 }
0x1338   :  { %v4288_v23 = vpop.f32.mrb[180].mxu0 }
0x1339   :  { %v4290_v18 = vpop.f32.mrb[181].mxu0 }
0x133a   :  { %v4292_v17 = vpop.f32.mrb[182].mxu0 }
0x133b   :  { %v4701_v37 = vpack.c.bf16 %v4292_v17, %v4288_v23  ;;  %v4294_v57 = vpop.f32.mrb[183].mxu0 }
0x133c   :  { %v4702_v55 = vpack.c.bf16 %v4294_v57, %v4290_v18 }
0x133e   :  { %4723 = vmatprep.subr.bf16.mxu0 %v4702_v55 }
0x133f   :  { %4724 = vmatpush1.bf16.msra.mxu0 %v4701_v37 }
0x1340   :  { %v4482_v10 = vpop.f32.mrb[184].mxu0 }
0x1341   :  { %v4484_v43 = vpop.f32.mrb[185].mxu0  ;;  %v4497_v2 = vsel %vm456_vm2, %v4482_v10, 0.0 }
0x1342   :  { %6915 = vmatmul.mubr.msk.bf16.vlgmr.msra.gmra.mrb[192].mxu0 %vm456_vm2, %v7080_v38  ;;  %4498 = vadd.xlane.f32.xlu1 %v4497_v2  ;;  %v4485_v59 = vpop.f32.mrb[186].mxu0 }
0x1343   :  { %v4487_v51 = vpop.f32.mrb[187].mxu0  ;;  %v4500_v42 = vsel %vm456_vm2, %v4485_v59, 0.0  ;;  %4763 = vmatprep.mubr.bf16.mxu0 %v11632_v48 }
0x1344   :  { %4501 = vadd.xlane.f32.xlu0 %v4500_v42 }
0x1348   :  { %v4490_v47 = vpop.f32.mrb[188].mxu0 }
0x1349   :  { %v4492_v39 = vpop.f32.mrb[189].mxu0  ;;  %v4503_v44 = vsel %vm456_vm2, %v4490_v47, 0.0 }
0x134a   :  { %6916 = vmatmul.mubr.msk.bf16.gmra.mrb[196].mxu0 %vm456_vm2, %v7081_v27  ;;  %4504 = vadd.xlane.f32.xlu1 %v4503_v44  ;;  %v4493_v35 = vpop.f32.mrb[190].mxu0 }
0x134b   :  { %v4495_v19 = vpop.f32.mrb[191].mxu0  ;;  %v4506_v4 = vsel %vm456_vm2, %v4493_v35, 0.0  ;;  %5279 = vmatprep.mubr.bf16.mxu0 %v11632_v48 }
0x134c   :  { %4507 = vadd.xlane.f32.xlu0 %v4506_v4 }
0x134e   :  { %4347 = vadd.xlane.f32.xlu1 %v4346_v61 }
0x1350   :  { %4350 = vadd.xlane.f32.xlu0 %v4349_v22 }
0x1352   :  { %4353 = vadd.xlane.f32.xlu1 %v4352_v30 }
0x1354   :  { %4356 = vadd.xlane.f32.xlu0 %v4355_v60 }
0x13cf   :  { %v4499_v7 = vpop.xlane.xlu1 %4498 }
0x13d1   :  { %v4502_v56 = vpop.xlane.xlu0 %4501 }
0x13d2   :  { %v4509_v53 = vadd.f32 %v4502_v56, %v4499_v7 }
0x13d7   :  { %v4505_v41 = vpop.xlane.xlu1 %4504 }
0x13d8   :  { %v4510_v14 = vadd.f32 %v4509_v53, %v4505_v41 }
0x13d9   :  { %v4508_v11 = vpop.xlane.xlu0 %4507 }
0x13da   :  { %v4511_v8 = vadd.f32 %v4510_v14, %v4508_v11 }
0x13db   :  { %v4348_v58 = vpop.xlane.xlu1 %4347 }
0x13dc   :  { %v4512_v6 = vrot.slane %v4511_v8, 4 }
0x13dd   :  { %v4351_v36 = vpop.xlane.xlu0 %4350 }
0x13de   :  { %v4513_v45 = vadd.f32 %v4512_v6, %v4511_v8  ;;  %v4358_v62 = vadd.f32 %v4351_v36, %v4348_v58 }
0x13df   :  { %v4354_v63 = vpop.xlane.xlu1 %4353 }
0x13e0   :  { %v4514_v50 = vrot.slane %v4513_v45, 2  ;;  %v4359_v32 = vadd.f32 %v4358_v62, %v4354_v63 }
0x13e1   :  { %v4357_v20 = vpop.xlane.xlu0 %4356 }
0x13e2   :  { %v4515_v54 = vadd.f32 %v4514_v50, %v4513_v45  ;;  %v4360_v28 = vadd.f32 %v4359_v32, %v4357_v20 }
0x13e4   :  { %v4516_v29 = vrot.slane %v4515_v54, 1  ;;  %v4361_v21 = vrot.slane %v4360_v28, 4 }
0x13e6   :  { %v4517_v26 = vadd.f32 %v4516_v29, %v4515_v54  ;;  %v4362_v31 = vadd.f32 %v4361_v21, %v4360_v28 }
0x13e8   :  { %v4518_v52 = vmul.f32 0.0009765625, %v4517_v26  ;;  %v4363_v15 = vrot.slane %v4362_v31, 2 }
0x13ea   :  { %v4364_v5 = vadd.f32 %v4363_v15, %v4362_v31  ;;  %v10050_v12 = vsub.f32 %v4485_v59, %v4518_v52  ;;  %v10052_v1 = vsub.f32 %v4482_v10, %v4518_v52  ;;  %v10054_v23 = vsub.f32 %v4493_v35, %v4518_v52 }
0x13eb   :  { %v10056_v18 = vsub.f32 %v4490_v47, %v4518_v52 }
0x13ec   :  { %v4365_v17 = vrot.slane %v4364_v5, 1  ;;  %v4524_v37 = vmul.f32 %v10050_v12, %v10050_v12  ;;  %v4523_v57 = vmul.f32 %v10052_v1, %v10052_v1  ;;  %v4526_v55 = vmul.f32 %v10054_v23, %v10054_v23 }
0x13ed   :  { %v4525_v38 = vmul.f32 %v10056_v18, %v10056_v18 }
0x13ee   :  { %v4366_v43 = vadd.f32 %v4365_v17, %v4364_v5  ;;  %v4530_v10 = vsel %vm456_vm2, %v4524_v37, 0.0  ;;  %v4527_v2 = vsel %vm456_vm2, %v4523_v57, 0.0  ;;  %v4536_v51 = vsel %vm456_vm2, %v4526_v55, 0.0 }
0x13ef   :  { %4531 = vadd.xlane.f32.xlu0 %v4530_v10  ;;  %4528 = vadd.xlane.f32.xlu1 %v4527_v2  ;;  %v4533_v42 = vsel %vm456_vm2, %v4525_v38, 0.0 }
0x13f0   :  { %v4367_v59 = vmul.f32 0.0009765625, %v4366_v43 }
0x13f2   :  { %v10071_v27 = vsub.f32 %v9907_v33, %v4367_v59  ;;  %v10074_v47 = vsub.f32 %v9905_v34, %v4367_v59  ;;  %v10077_v39 = vsub.f32 %v9931_v49, %v4367_v59  ;;  %v10080_v44 = vsub.f32 %v9927_v25, %v4367_v59 }
0x13f3   :  { %4537 = vadd.xlane.f32.xlu0 %v4536_v51  ;;  %4534 = vadd.xlane.f32.xlu1 %v4533_v42 }
0x13f4   :  { %v4373_v35 = vmul.f32 %v10071_v27, %v10071_v27  ;;  %v4372_v19 = vmul.f32 %v10074_v47, %v10074_v47  ;;  %v4375_v34 = vmul.f32 %v10077_v39, %v10077_v39  ;;  %v4374_v49 = vmul.f32 %v10080_v44, %v10080_v44 }
0x13f6   :  { %v4379_v33 = vsel %vm456_vm2, %v4373_v35, 0.0  ;;  %v4376_v4 = vsel %vm456_vm2, %v4372_v19, 0.0  ;;  %v4385_v25 = vsel %vm456_vm2, %v4375_v34, 0.0  ;;  %v4382_v61 = vsel %vm456_vm2, %v4374_v49, 0.0 }
0x13f7   :  { %4380 = vadd.xlane.f32.xlu0 %v4379_v33  ;;  %4377 = vadd.xlane.f32.xlu1 %v4376_v4 }
0x13fb   :  { %4386 = vadd.xlane.f32.xlu0 %v4385_v25  ;;  %4383 = vadd.xlane.f32.xlu1 %v4382_v61 }
0x1415   :  { %v10094_v22 = vpop.f32.mrb[192].mxu0 }
0x1416   :  { %v10096_v30 = vpop.f32.mrb[193].mxu0 }
0x1417   :  { %v10098_v60 = vpop.f32.mrb[194].mxu0 }
0x1418   :  { %v10100_v7 = vpop.f32.mrb[195].mxu0 }
0x141d   :  { %v10102_v56 = vpop.f32.mrb[196].mxu0 }
0x141e   :  { %v10104_v53 = vpop.f32.mrb[197].mxu0 }
0x141f   :  { %v10106_v41 = vpop.f32.mrb[198].mxu0 }
0x1420   :  { %v10108_v14 = vpop.f32.mrb[199].mxu0 }
0x147c   :  { %v4529_v11 = vpop.xlane.xlu1 %4528  ;;  %v4532_v8 = vpop.xlane.xlu0 %4531 }
0x147d   :  { %v4539_v58 = vadd.f32 %v4532_v8, %v4529_v11 }
0x1480   :  { %v4535_v6 = vpop.xlane.xlu1 %4534  ;;  %v4538_v36 = vpop.xlane.xlu0 %4537 }
0x1481   :  { %v4540_v45 = vadd.f32 %v4539_v58, %v4535_v6 }
0x1483   :  { %v4541_v62 = vadd.f32 %v4540_v45, %v4538_v36 }
0x1484   :  { %v4378_v63 = vpop.xlane.xlu1 %4377  ;;  %v4381_v50 = vpop.xlane.xlu0 %4380 }
0x1485   :  { %v4542_v32 = vrot.slane %v4541_v62, 4  ;;  %v4388_v54 = vadd.f32 %v4381_v50, %v4378_v63 }
0x1487   :  { %v4543_v20 = vadd.f32 %v4542_v32, %v4541_v62 }
0x1488   :  { %v4384_v28 = vpop.xlane.xlu1 %4383  ;;  %v4387_v26 = vpop.xlane.xlu0 %4386 }
0x1489   :  { %v4544_v29 = vrot.slane %v4543_v20, 2  ;;  %v4389_v21 = vadd.f32 %v4388_v54, %v4384_v28 }
0x148b   :  { %v4545_v31 = vadd.f32 %v4544_v29, %v4543_v20  ;;  %v4390_v52 = vadd.f32 %v4389_v21, %v4387_v26 }
0x148d   :  { %v4546_v15 = vrot.slane %v4545_v31, 1  ;;  %v4391_v5 = vrot.slane %v4390_v52, 4 }
0x148f   :  { %v4547_v17 = vadd.f32 %v4546_v15, %v4545_v31  ;;  %v4392_v37 = vadd.f32 %v4391_v5, %v4390_v52 }
0x1491   :  { %v4548_v57 = vmul.f32 0.0009765625, %v4547_v17  ;;  %v4393_v55 = vrot.slane %v4392_v37, 2 }
0x1493   :  { %v4549_v38 = vadd.f32 0.00032, %v4548_v57  ;;  %v4394_v43 = vadd.f32 %v4393_v55, %v4392_v37 }
0x1495   :  { %7354 = vrsqrt.f32 %v4549_v38  ;;  %v4395_v10 = vrot.slane %v4394_v43, 1 }
0x1497   :  { %v4396_v2 = vadd.f32 %v4395_v10, %v4394_v43 }
0x1499   :  { %v4397_v59 = vmul.f32 0.0009765625, %v4396_v2 }
0x149b   :  { %v4398_v51 = vadd.f32 0.00032, %v4397_v59 }
0x149d   :  { %7356 = vrsqrt.f32 %v4398_v51 }
0x149f   :  { %v7355_v42 = vpop.eup %7354 }
0x14a0   :  { %v4552_v35 = vmul.f32 %v7355_v42, %v10050_v12  ;;  %v4551_v19 = vmul.f32 %v7355_v42, %v10052_v1  ;;  %v4554_v34 = vmul.f32 %v7355_v42, %v10054_v23  ;;  %v4553_v49 = vmul.f32 %v7355_v42, %v10056_v18 }
0x14a2   :  { %v4558_v33 = vsel %vm456_vm2, %v4552_v35, -inf  ;;  %v4555_v4 = vsel %vm456_vm2, %v4551_v19, -inf  ;;  %v4564_v25 = vsel %vm456_vm2, %v4554_v34, -inf  ;;  %v4561_v61 = vsel %vm456_vm2, %v4553_v49, -inf }
0x14a3   :  { %4559 = vmax.xlane.f32.xlu0 %v4558_v33  ;;  %4556 = vmax.xlane.f32.xlu1 %v4555_v4 }
0x14a7   :  { %v7357_v11 = vpop.eup %7356  ;;  %4565 = vmax.xlane.f32.xlu0 %v4564_v25  ;;  %4562 = vmax.xlane.f32.xlu1 %v4561_v61 }
0x14a8   :  { %v4401_v12 = vmul.f32 %v7357_v11, %v10071_v27  ;;  %v4400_v1 = vmul.f32 %v7357_v11, %v10074_v47  ;;  %v4403_v23 = vmul.f32 %v7357_v11, %v10077_v39  ;;  %v4402_v18 = vmul.f32 %v7357_v11, %v10080_v44 }
0x14aa   :  { %v4407_v8 = vsel %vm456_vm2, %v4401_v12, -inf  ;;  %v4404_v58 = vsel %vm456_vm2, %v4400_v1, -inf  ;;  %v4413_v6 = vsel %vm456_vm2, %v4403_v23, -inf  ;;  %v4410_v36 = vsel %vm456_vm2, %v4402_v18, -inf }
0x14ab   :  { %4408 = vmax.xlane.f32.xlu0 %v4407_v8  ;;  %4405 = vmax.xlane.f32.xlu1 %v4404_v58 }
0x14af   :  { %4414 = vmax.xlane.f32.xlu0 %v4413_v6  ;;  %4411 = vmax.xlane.f32.xlu1 %v4410_v36 }
0x1530   :  { %v4557_v45 = vpop.xlane.xlu1 %4556  ;;  %v4560_v27 = vpop.xlane.xlu0 %4559 }
0x1531   :  { %v4567_v62 = vsub.f32 %v4551_v19, %v4557_v45  ;;  %v4568_v47 = vsub.f32 %v4552_v35, %v4560_v27 }
0x1533   :  { %v4571_v63 = vmul.f32 1.442695, %v4567_v62  ;;  %v4573_v50 = vmul.f32 1.442695, %v4568_v47 }
0x1534   :  { %v4563_v32 = vpop.xlane.xlu1 %4562  ;;  %v4566_v20 = vpop.xlane.xlu0 %4565 }
0x1535   :  { %7358 = vpow2.f32 %v4571_v63  ;;  %v4569_v39 = vsub.f32 %v4553_v49, %v4563_v32  ;;  %v4570_v54 = vsub.f32 %v4554_v34, %v4566_v20 }
0x1536   :  { %7360 = vpow2.f32 %v4573_v50 }
0x1537   :  { %v4575_v44 = vmul.f32 1.442695, %v4569_v39  ;;  %v4577_v28 = vmul.f32 1.442695, %v4570_v54 }
0x1538   :  { %v4406_v29 = vpop.xlane.xlu1 %4405  ;;  %v4409_v21 = vpop.xlane.xlu0 %4408 }
0x1539   :  { %7362 = vpow2.f32 %v4575_v44  ;;  %v4416_v26 = vsub.f32 %v4400_v1, %v4406_v29  ;;  %v4417_v31 = vsub.f32 %v4401_v12, %v4409_v21  ;;  %v6919_v44 = vld [vmem:[%s11487_s6 + $0x20] sm:$0xff] }
0x153a   :  { %7364 = vpow2.f32 %v4577_v28 }
0x153b   :  { %v4420_v52 = vmul.f32 1.442695, %v4416_v26  ;;  %v4422_v15 = vmul.f32 1.442695, %v4417_v31 }
0x153c   :  { %v4412_v5 = vpop.xlane.xlu1 %4411  ;;  %v4415_v17 = vpop.xlane.xlu0 %4414 }
0x153d   :  { %7366 = vpow2.f32 %v4420_v52  ;;  %v4418_v37 = vsub.f32 %v4402_v18, %v4412_v5  ;;  %v4419_v57 = vsub.f32 %v4403_v23, %v4415_v17  ;;  %v6920_v52 = vld [vmem:[%s11487_s6 + $0x28] sm:$0xff] }
0x153e   :  { %7368 = vpow2.f32 %v4422_v15  ;;  %v6923_v15 = vld [vmem:[%s11488_s7 + $0x20] sm:$0xff] }
0x153f   :  { %v7359_v55 = vpop.eup %7358  ;;  %v4424_v38 = vmul.f32 1.442695, %v4418_v37  ;;  %v4426_v43 = vmul.f32 1.442695, %v4419_v57 }
0x1540   :  { %v7361_v10 = vpop.eup %7360  ;;  %v4579_v2 = vsel %vm456_vm2, %v7359_v55, 0.0 }
0x1541   :  { %7370 = vpow2.f32 %v4424_v38  ;;  %4580 = vadd.xlane.f32.xlu1 %v4579_v2  ;;  %v4582_v59 = vsel %vm456_vm2, %v7361_v10, 0.0  ;;  %v6924_v2 = vld [vmem:[%s11488_s7 + $0x28] sm:$0xff] }
0x1542   :  { %7372 = vpow2.f32 %v4426_v43  ;;  %4583 = vadd.xlane.f32.xlu0 %v4582_v59  ;;  %v6921_v59 = vld [vmem:[%s11487_s6 + $0x30] sm:$0xff] }
0x1543   :  { %v7363_v51 = vpop.eup %7362 }
0x1544   :  { %v7365_v42 = vpop.eup %7364  ;;  %v4585_v35 = vsel %vm456_vm2, %v7363_v51, 0.0 }
0x1545   :  { %4586 = vadd.xlane.f32.xlu1 %v4585_v35  ;;  %v4588_v19 = vsel %vm456_vm2, %v7365_v42, 0.0 }
0x1546   :  { %4589 = vadd.xlane.f32.xlu0 %v4588_v19 }
0x1547   :  { %v7367_v33 = vpop.eup %7366 }
0x1548   :  { %v7369_v4 = vpop.eup %7368  ;;  %v4428_v34 = vsel %vm456_vm2, %v7367_v33, 0.0 }
0x1549   :  { %4429 = vadd.xlane.f32.xlu1 %v4428_v34  ;;  %v4431_v49 = vsel %vm456_vm2, %v7369_v4, 0.0  ;;  %v6926_v34 = vld [vmem:[%s11488_s7 + $0x38] sm:$0xff] }
0x154a   :  { %4432 = vadd.xlane.f32.xlu0 %v4431_v49  ;;  %v6943_v49 = vld [vmem:[%s11489_s9 + $0x80] sm:$0xff] }
0x154b   :  { %v7371_v25 = vpop.eup %7370 }
0x154c   :  { %v7373_v61 = vpop.eup %7372  ;;  %v4434_v11 = vsel %vm456_vm2, %v7371_v25, 0.0 }
0x154d   :  { %4435 = vadd.xlane.f32.xlu1 %v4434_v11  ;;  %v4437_v12 = vsel %vm456_vm2, %v7373_v61, 0.0  ;;  %v6946_v11 = vld [vmem:[%s11489_s9 + $0x98] sm:$0xff] }
0x154e   :  { %4438 = vadd.xlane.f32.xlu0 %v4437_v12  ;;  %v6947_v12 = vld [vmem:[%s11489_s9 + $0xa0] sm:$0xff] }
0x15ce   :  { %v4581_v1 = vpop.xlane.xlu1 %4580 }
0x15cf   :  { %7374 = vrcp.f32 %v4581_v1  ;;  %v4584_v8 = vpop.xlane.xlu0 %4583  ;;  %v11720_v1 = vld [vmem:[#allocation3_spill] sm:$0xff] }
0x15d0   :  { %7376 = vrcp.f32 %v4584_v8  ;;  %v10205_v8 = vadd.f32 %v10098_v60, %v11720_v1  ;;  %v11726_v60 = vld [vmem:[#allocation7_spill] sm:$0xff] }
0x15d2   :  { %v4587_v58 = vpop.xlane.xlu1 %4586  ;;  %11721 = vst [vmem:[#allocation14_spill] sm:$0xff] %v10205_v8 }
0x15d3   :  { %7378 = vrcp.f32 %v4587_v58  ;;  %v4590_v23 = vpop.xlane.xlu0 %4589  ;;  %v11722_v58 = vld [vmem:[#allocation2_spill] sm:$0xff] }
0x15d4   :  { %7380 = vrcp.f32 %v4590_v23  ;;  %v10209_v23 = vadd.f32 %v10100_v7, %v11722_v58  ;;  %v6250_v58 = vld [vmem:[%s11494_s13 + $0x8] sm:$0xff] }
0x15d6   :  { %v4430_v18 = vpop.xlane.xlu1 %4429  ;;  %11723 = vst [vmem:[#allocation15_spill] sm:$0xff] %v10209_v23 }
0x15d7   :  { %7382 = vrcp.f32 %v4430_v18  ;;  %v4433_v6 = vpop.xlane.xlu0 %4432  ;;  %v6948_v18 = vld [vmem:[%s11489_s9 + $0xa8] sm:$0xff] }
0x15d8   :  { %7384 = vrcp.f32 %v4433_v6  ;;  %v6949_v6 = vld [vmem:[%s11489_s9 + $0xb0] sm:$0xff] }
0x15d9   :  { %v7375_v36 = vpop.eup %7374 }
0x15da   :  { %v7377_v45 = vpop.eup %7376  ;;  %v4436_v27 = vpop.xlane.xlu1 %4435  ;;  %v4592_v62 = vmul.f32 %v7375_v36, %v7359_v55  ;;  %v11724_v36 = vld [vmem:[#allocation8_spill] sm:$0xff] }
0x15db   :  { %7386 = vrcp.f32 %v4436_v27  ;;  %v4439_v47 = vpop.xlane.xlu0 %4438  ;;  %v4594_v63 = vmul.f32 %v7377_v45, %v7361_v10  ;;  %v10219_v45 = vadd.f32 %v10094_v22, %v11724_v36  ;;  %v10223_v27 = vadd.f32 %v10102_v56, %v11726_v60  ;;  %v6950_v56 = vld [vmem:[%s11489_s9 + $0xb8] sm:$0xff] }
0x15dc   :  { %7388 = vrcp.f32 %v4439_v47  ;;  %v11730_v47 = vld [vmem:[#allocation9_spill] sm:$0xff] }
0x15dd   :  { %v7379_v50 = vpop.eup %7378  ;;  %v7034_v32 = vpack.i.bf16 %v4594_v63, %v4592_v62  ;;  %11725 = vst [vmem:[#allocation16_spill] sm:$0xff] %v10219_v45  ;;  %11727 = vst [vmem:[#allocation17_spill] sm:$0xff] %v10223_v27  ;;  %v6248_v60 = vld [vmem:[%s11493_s12 + $0x18] sm:$0xff] }
0x15de   :  { %v7381_v20 = vpop.eup %7380  ;;  %v4596_v39 = vmul.f32 %v7379_v50, %v7363_v51  ;;  %v4853_v50 = vadd.f32 %v10205_v8, %v10219_v45 }
0x15df   :  { %7035 = vrot.lane.b32.xlu1 %v7034_v32, %s7582_s23  ;;  %v4598_v54 = vmul.f32 %v7381_v20, %v7365_v42 }
0x15e0   :  { %v4854_v32 = vadd.f32 %v4853_v50, %v10223_v27 }
0x15e1   :  { %v7383_v28 = vpop.eup %7382  ;;  %v7039_v29 = vpack.i.bf16 %v4598_v54, %v4596_v39 }
0x15e2   :  { %v7385_v21 = vpop.eup %7384  ;;  %v10138_v26 = vmul.f32 %v7383_v28, %v7367_v33  ;;  %v6922_v33 = vld [vmem:[%s11487_s6 + $0x38] sm:$0xff]  ;;  %v6952_v28 = vld [vmem:[%s11489_s9 + $0xc8] sm:$0xff] }
0x15e3   :  { %4991 = vperm.xlu1 %7003, %v6919_v44   ;;  %7040 = vrot.lane.b32.xlu0 %v7039_v29, %s7582_s23  ;;  %v10141_v31 = vmul.f32 %v7385_v21, %v7369_v4  ;;  %v6925_v4 = vld [vmem:[%s11488_s7 + $0x30] sm:$0xff] }
0x15e4   :  { %v4599_v5 = vadd.f32 %v4592_v62, %v10138_v26  ;;  %v11728_v62 = vld [vmem:[#allocation6_spill] sm:$0xff]  ;;  %v6953_v29 = vld [vmem:[%s11489_s9 + $0xd0] sm:$0xff] }
0x15e5   :  { %v7387_v17 = vpop.eup %7386  ;;  %v4600_v37 = vadd.f32 %v4594_v63, %v10141_v31  ;;  %v10227_v7 = vadd.f32 %v10096_v30, %v11728_v62  ;;  %v10231_v63 = vadd.f32 %v10104_v53, %v11730_v47  ;;  %v6951_v30 = vld [vmem:[%s11489_s9 + $0xc0] sm:$0xff]  ;;  %v6251_v62 = vld [vmem:[%s11494_s13 + $0x10] sm:$0xff] }
0x15e6   :  { %v7389_v57 = vpop.eup %7388  ;;  %v4603_v55 = vmul.f32 0.5, %v4599_v5  ;;  %v10151_v38 = vmul.f32 %v7387_v17, %v7371_v25  ;;  %v6944_v25 = vld [vmem:[%s11489_s9 + $0x88] sm:$0xff]  ;;  %v11732_v53 = vld [vmem:[#allocation10_spill] sm:$0xff] }
0x15e7   :  { %4996 = vperm.xlu1 %7003, %v6920_v52   ;;  %5027 = vperm.xlu0 %7002, %v6923_v15   ;;  %v4604_v43 = vmul.f32 0.5, %v4600_v37  ;;  %v10153_v10 = vmul.f32 %v7389_v57, %v7373_v61  ;;  %v6945_v61 = vld [vmem:[%s11489_s9 + $0x90] sm:$0xff]  ;;  %11729 = vst [vmem:[#allocation18_spill] sm:$0xff] %v10227_v7  ;;  %11731 = vst [vmem:[#allocation19_spill] sm:$0xff] %v10231_v63  ;;  %v4862_v22 = vadd.f32 %v10209_v23, %v10227_v7  ;;  %v6955_v52 = vld [vmem:[%s11489_s9 + $0xe0] sm:$0xff] }
0x15e8   :  { %6903 = vst.msk [vmem:[%s11485_s19 + $0x60] sm:$0xff] %vm456_vm2, %v4603_v55  ;;  %v4601_v51 = vadd.f32 %v4596_v39, %v10151_v38  ;;  %v10246_v20 = vadd.f32 %v10106_v41, %v11732_v53  ;;  %v6956_v17 = vld [vmem:[%s11489_s9 + $0xe8] sm:$0xff]  ;;  %v6957_v37 = vld [vmem:[%s11489_s9 + $0xf0] sm:$0xff] }
0x15e9   :  { %6904 = vst.msk [vmem:[%s11485_s19 + $0x68] sm:$0xff] %vm456_vm2, %v4604_v43  ;;  %v4602_v42 = vadd.f32 %v4598_v54, %v10153_v10  ;;  %v4863_v39 = vadd.f32 %v4862_v22, %v10231_v63  ;;  %v11734_v54 = vld [vmem:[#allocation11_spill] sm:$0xff]  ;;  %v6958_v43 = vld [vmem:[%s11489_s9 + $0xf8] sm:$0xff] }
0x15ea   :  { %v4605_v35 = vmul.f32 0.5, %v4601_v51  ;;  %11733 = vst [vmem:[#allocation20_spill] sm:$0xff] %v10246_v20  ;;  %v10251_v44 = vadd.f32 %v10108_v14, %v11734_v54  ;;  %v4855_v21 = vadd.f32 %v4854_v32, %v10246_v20  ;;  %v6954_v14 = vld [vmem:[%s11489_s9 + $0xd8] sm:$0xff]  ;;  %v6473_v32 = vld [vmem:[%s11495_s15] sm:$0xff] }
0x15eb   :  { %5032 = vperm.xlu1 %7003, %v6924_v2   ;;  %5001 = vperm.xlu0 %7002, %v6921_v59   ;;  %v4606_v19 = vmul.f32 0.5, %v4602_v42  ;;  %v6987_v2 = vld [vmem:[%s11491_s11 + $0x20] sm:$0xff]  ;;  %v6988_v42 = vld [vmem:[%s11491_s11 + $0x28] sm:$0xff] }
0x15ec   :  { %6905 = vst.msk [vmem:[%s11485_s19 + $0x70] sm:$0xff] %vm456_vm2, %v4605_v35  ;;  %11735 = vst [vmem:[#allocation21_spill] sm:$0xff] %v10251_v44  ;;  %v4864_v41 = vadd.f32 %v4863_v39, %v10251_v44  ;;  %v4856_v15 = vrot.slane %v4855_v21, 4  ;;  %v6989_v35 = vld [vmem:[%s11491_s11 + $0x30] sm:$0xff] }
0x15ed   :  { %6906 = vst.msk [vmem:[%s11485_s19 + $0x78] sm:$0xff] %vm456_vm2, %v4606_v19 }
0x15ee   :  { %v4865_v5 = vrot.slane %v4864_v41, 4  ;;  %v4857_v57 = vadd.f32 %v4856_v15, %v4855_v21 }
0x15ef   :  { %5006 = vperm.xlu1 %7003, %v6922_v33   ;;  %5037 = vperm.xlu0 %7002, %v6925_v4   ;;  %v6990_v4 = vld [vmem:[%s11491_s11 + $0x38] sm:$0xff] }
0x15f0   :  { %v4866_v55 = vadd.f32 %v4865_v5, %v4864_v41  ;;  %v4858_v59 = vrot.slane %v4857_v57, 2  ;;  %v6474_v41 = vld [vmem:[%s11495_s15 + $0x8] sm:$0xff] }
0x15f2   :  { %v4867_v51 = vrot.slane %v4866_v55, 2  ;;  %v4859_v19 = vadd.f32 %v4858_v59, %v4857_v57 }
0x15f3   :  { %5042 = vperm.xlu1 %7003, %v6926_v34   ;;  %5105 = vperm.xlu0 %7002, %v6943_v49   ;;  %v6245_v34 = vld [vmem:[%s11493_s12] sm:$0xff] }
0x15f4   :  { %v4868_v33 = vadd.f32 %v4867_v51, %v4866_v55  ;;  %v4860_v49 = vrot.slane %v4859_v19, 1  ;;  %v6476_v55 = vld [vmem:[%s11495_s15 + $0x18] sm:$0xff] }
0x15f7   :  { %5110 = vperm.xlu1 %7003, %v6944_v25   ;;  %5115 = vperm.xlu0 %7002, %v6945_v61   ;;  %v4869_v25 = vrot.slane %v4868_v33, 1  ;;  %v6246_v61 = vld [vmem:[%s11493_s12 + $0x8] sm:$0xff] }
0x15f9   :  { %v4870_v1 = vadd.f32 %v4869_v25, %v4868_v33 }
0x15fb   :  { %5120 = vperm.xlu1 %7003, %v6946_v11   ;;  %5125 = vperm.xlu0 %7002, %v6947_v12   ;;  %v6249_v11 = vld [vmem:[%s11494_s13] sm:$0xff]  ;;  %v4861_v12 = vadd.f32 %v4860_v49, %v4859_v19  ;;  %v4890_v36 = vmul.f32 0.03125, %v4870_v1  ;;  %v6621_v19 = vld [vmem:[%s11496_s16 + $0x10] sm:$0xff] }
0x15fc   :  { %v6659_v49 = vld [vmem:[%s11497_s17] sm:$0xff] }
0x15fd   :  { %v10316_v22 = vsub.f32 %v10227_v7, %v4890_v36  ;;  %v10339_v21 = vsub.f32 %v10231_v63, %v4890_v36 }
0x15ff   :  { %5130 = vperm.xlu1 %7003, %v6948_v18   ;;  %5135 = vperm.xlu0 %7002, %v6949_v6   ;;  %v6247_v18 = vld [vmem:[%s11493_s12 + $0x10] sm:$0xff]  ;;  %v4889_v6 = vmul.f32 0.03125, %v4861_v12  ;;  %v4910_v54 = vmul.f32 %v10316_v22, %v10316_v22  ;;  %v4918_v57 = vmul.f32 %v10339_v21, %v10339_v21 }
0x1600   :  { %v6661_v12 = vld [vmem:[%s11497_s17 + $0x10] sm:$0xff] }
0x1601   :  { %v10310_v47 = vsub.f32 %v10219_v45, %v4889_v6  ;;  %v10313_v50 = vsub.f32 %v10205_v8, %v4889_v6  ;;  %v10348_v5 = vsub.f32 %v10246_v20, %v4889_v6 }
0x1603   :  { %5140 = vperm.xlu1 %7003, %v6950_v56   ;;  %5145 = vperm.xlu0 %7002, %v6951_v30   ;;  %v10319_v56 = vsub.f32 %v10209_v23, %v4890_v36  ;;  %v6252_v30 = vld [vmem:[%s11494_s13 + $0x18] sm:$0xff]  ;;  %v4909_v53 = vmul.f32 %v10310_v47, %v10310_v47  ;;  %v4913_v39 = vmul.f32 %v10313_v50, %v10313_v50 }
0x1604   :  { %v4921_v51 = vmul.f32 %v10348_v5, %v10348_v5 }
0x1607   :  { %5150 = vperm.xlu1 %7003, %v6952_v28   ;;  %5155 = vperm.xlu0 %7002, %v6953_v29   ;;  %v4914_v28 = vmul.f32 %v10319_v56, %v10319_v56  ;;  %v10336_v29 = vsub.f32 %v10223_v27, %v4889_v6 }
0x1609   :  { %v4934_v15 = vadd.f32 %v4914_v28, %v4910_v54 }
0x160b   :  { %5160 = vperm.xlu1 %7003, %v6954_v14   ;;  %5165 = vperm.xlu0 %7002, %v6955_v52   ;;  %v6475_v14 = vld [vmem:[%s11495_s15 + $0x10] sm:$0xff]  ;;  %v4925_v52 = vadd.f32 %v4913_v39, %v4909_v53  ;;  %v4935_v59 = vadd.f32 %v4934_v15, %v4918_v57 }
0x160f   :  { %5170 = vperm.xlu1 %7003, %v6956_v17   ;;  %5175 = vperm.xlu0 %7002, %v6957_v37   ;;  %v4917_v17 = vmul.f32 %v10336_v29, %v10336_v29  ;;  %v10353_v37 = vsub.f32 %v10251_v44, %v4890_v36 }
0x1613   :  { %5180 = vperm.xlu1 %7003, %v6958_v43   ;;  %6093 = vperm.xlu0 %7002, %v6987_v2   ;;  %v6619_v43 = vld [vmem:[%s11496_s16] sm:$0xff]  ;;  %v4926_v2 = vadd.f32 %v4925_v52, %v4917_v17 }
0x1615   :  { %v4927_v33 = vadd.f32 %v4926_v2, %v4921_v51 }
0x1617   :  { %6098 = vperm.xlu1 %7003, %v6988_v42   ;;  %6103 = vperm.xlu0 %7002, %v6989_v35   ;;  %v4922_v42 = vmul.f32 %v10353_v37, %v10353_v37  ;;  %v6620_v35 = vld [vmem:[%s11496_s16 + $0x8] sm:$0xff]  ;;  %v4928_v25 = vrot.slane %v4927_v33, 4 }
0x1619   :  { %v4929_v1 = vadd.f32 %v4928_v25, %v4927_v33 }
0x161b   :  { %6108 = vperm.xlu1 %7003, %v6990_v4   ;;  %6391 = vperm.xlu0 %7002, %v6245_v34   ;;  %v4936_v4 = vadd.f32 %v4935_v59, %v4922_v42  ;;  %v6622_v34 = vld [vmem:[%s11496_s16 + $0x18] sm:$0xff]  ;;  %v4930_v6 = vrot.slane %v4929_v1, 2  ;;  %s11779_s16 = sld [smem:[#allocation35_spill]] }
0x161f   :  { %6396 = vperm.xlu1 %7003, %v6246_v61   ;;  %6427 = vperm.xlu0 %7002, %v6249_v11   ;;  %v4937_v61 = vrot.slane %v4936_v4, 4  ;;  %v6660_v11 = vld [vmem:[%s11497_s17 + $0x8] sm:$0xff] }
0x1623   :  { %6432 = vperm.xlu1 %7003, %v6250_v58   ;;  %6401 = vperm.xlu0 %7002, %v6247_v18   ;;  %v4938_v58 = vadd.f32 %v4937_v61, %v4936_v4  ;;  %v6662_v18 = vld [vmem:[%s11497_s17 + $0x18] sm:$0xff] }
0x1625   :  { %v4939_v36 = vrot.slane %v4938_v58, 2 }
0x1627   :  { %6406 = vperm.xlu1 %7003, %v6248_v60   ;;  %6437 = vperm.xlu0 %7002, %v6251_v62   ;;  %v4931_v60 = vadd.f32 %v4930_v6, %v4929_v1  ;;  %v4940_v62 = vadd.f32 %v4939_v36, %v4938_v58 }
0x162b   :  { %6442 = vperm.xlu1 %7003, %v6252_v30   ;;  %6479 = vperm.xlu0 %7002, %v6473_v32   ;;  %v4932_v30 = vrot.slane %v4931_v60, 1  ;;  %v4941_v32 = vrot.slane %v4940_v62, 1 }
0x162d   :  { %v4933_v53 = vadd.f32 %v4932_v30, %v4931_v60  ;;  %v4942_v39 = vadd.f32 %v4941_v32, %v4940_v62 }
0x162f   :  { %6484 = vperm.xlu1 %7003, %v6474_v41   ;;  %6489 = vperm.xlu0 %7002, %v6475_v14   ;;  %v4961_v54 = vmul.f32 0.03125, %v4933_v53  ;;  %v4962_v41 = vmul.f32 0.03125, %v4942_v39 }
0x1631   :  { %v4965_v57 = vadd.f32 1e-06, %v4961_v54  ;;  %v4966_v2 = vadd.f32 1e-06, %v4962_v41 }
0x1633   :  { %6494 = vperm.xlu1 %7003, %v6476_v55   ;;  %6625 = vperm.xlu0 %7002, %v6619_v43   ;;  %7390 = vrsqrt.f32 %v4965_v57  ;;  %v7082_v57 = vld [vmem:[%s11490_s8 + $0x40] sm:$0xff]  }
0x1634   :  { %7392 = vrsqrt.f32 %v4966_v2  ;;  %v7085_v2 = vld [vmem:[%s11490_s8 + $0x58] sm:$0xff]  }
0x1637   :  { %6630 = vperm.xlu1 %7003, %v6620_v35   ;;  %6635 = vperm.xlu0 %7002, %v6621_v19  }
0x163b   :  { %6640 = vperm.xlu1 %7003, %v6622_v34   ;;  %6665 = vperm.xlu0 %7002, %v6659_v49  }
0x163d   :  { %v7391_v19 = vpop.eup %7390 }
0x163e   :  { %v7393_v33 = vpop.eup %7392  ;;  %v4973_v49 = vmul.f32 %v7391_v19, %v10310_v47  ;;  %v4977_v25 = vmul.f32 %v7391_v19, %v10313_v50  ;;  %v4985_v62 = vmul.f32 %v7391_v19, %v10348_v5  ;;  %v4981_v32 = vmul.f32 %v7391_v19, %v10336_v29 }
0x163f   :  { %6670 = vperm.xlu1 %7003, %v6660_v11   ;;  %6675 = vperm.xlu0 %7002, %v6661_v12   ;;  %v4986_v30 = vmul.f32 %v7393_v33, %v10353_v37  ;;  %v4982_v53 = vmul.f32 %v7393_v33, %v10339_v21 }
0x1643   :  { %6680 = vperm.xlu1 %7003, %v6662_v18  }
0x1651   :  { %v7036_v28 = vpop.permute.xlu1 %7035 }
0x1652   :  { %v7038_v14 = vunpack.i.h.bf16 %v7036_v28  ;;  %v7037_v52 = vunpack.i.l.bf16 %v7036_v28 }
0x1654   :  { %v4627_v15 = vsel %vm456_vm2, %v10138_v26, %v7037_v52  ;;  %v4628_v17 = vsel %vm456_vm2, %v10141_v31, %v7038_v14 }
0x1655   :  { %v4631_v55 = vpack.c.bf16 %v4628_v17, %v4627_v15  ;;  %v7041_v43 = vpop.permute.xlu0 %7040 }
0x1656   :  { %v7043_v59 = vunpack.i.h.bf16 %v7041_v43  ;;  %v7042_v51 = vunpack.i.l.bf16 %v7041_v43  ;;  %v7084_v43 = vld [vmem:[%s11490_s8 + $0x50] sm:$0xff]  }
0x1657   :  { %6907 = vmatmul.mubr.msk.bf16.vlgmr.msra.gmra.mrb[184].mxu1 %vm1183_vm3, %v4631_v55  ;;  %v7083_v55 = vld [vmem:[%s11490_s8 + $0x48] sm:$0xff]  }
0x1658   :  { %4681 = vmatprep.mubr.bf16.mxu1 %v11632_v48  ;;  %v4630_v42 = vsel %vm456_vm2, %v10153_v10, %v7043_v59  ;;  %v4629_v26 = vsel %vm456_vm2, %v10151_v38, %v7042_v51  ;;  %v4974_v10 = vmul.f32 %v7393_v33, %v10316_v22  ;;  %v4978_v38 = vmul.f32 %v7393_v33, %v10319_v56  ;;  %v7086_v59 = vld [vmem:[%s11490_s8 + $0x60] sm:$0xff]   ;;  %v7087_v51 = vld [vmem:[%s11490_s8 + $0x68] sm:$0xff]  }
0x1659   :  { %v4632_v35 = vpack.c.bf16 %v4630_v42, %v4629_v26  ;;  %v7088_v42 = vld [vmem:[%s11490_s8 + $0x70] sm:$0xff]   ;;  %v7089_v26 = vld [vmem:[%s11490_s8 + $0x78] sm:$0xff]  }
0x165f   :  { %6908 = vmatmul.mubr.msk.bf16.gmra.mrb[188].mxu1 %vm1183_vm3, %v4632_v35 }
0x1660   :  { %4806 = vmatprep.mubr.bf16.mxu1 %v11632_v48 }
0x1662   :  { %v10400_v31 = vpop.permute.xlu1 %4991 }
0x1663   :  { %v5009_v61 = vmul.f32 %v10400_v31, %v4973_v49  ;;  %v5010_v11 = vmul.f32 %v10400_v31, %v4974_v10 }
0x1666   :  { %v10402_v4 = vpop.permute.xlu1 %4996  ;;  %v10404_v34 = vpop.permute.xlu0 %5027 }
0x1667   :  { %v5013_v12 = vmul.f32 %v10402_v4, %v4977_v25  ;;  %v5014_v1 = vmul.f32 %v10402_v4, %v4978_v38  ;;  %v5045_v47 = vadd.f32 %v10404_v34, %v5009_v61  ;;  %v5046_v22 = vadd.f32 %v10404_v34, %v5010_v11 }
0x166a   :  { %v10414_v58 = vpop.permute.xlu1 %5032  ;;  %v10416_v18 = vpop.permute.xlu0 %5001 }
0x166b   :  { %v5049_v50 = vadd.f32 %v10414_v58, %v5013_v12  ;;  %v5050_v56 = vadd.f32 %v10414_v58, %v5014_v1  ;;  %v5017_v54 = vmul.f32 %v10416_v18, %v4981_v32  ;;  %v5018_v28 = vmul.f32 %v10416_v18, %v4982_v53 }
0x166d   :  { %v5079_v6 = vpack.c.bf16 %v5050_v56, %v5046_v22  ;;  %v5078_v36 = vpack.c.bf16 %v5049_v50, %v5045_v47  ;;  %v7550_v22 = vld [vmem:[%s11486_s5 + $0x10] sm:$0xff]   ;;  %v7551_v50 = vld [vmem:[%s11486_s5 + $0x18] sm:$0xff]  }
0x166e   :  { %v10422_v60 = vpop.permute.xlu1 %5006  ;;  %v10428_v39 = vpop.permute.xlu0 %5037 }
0x166f   :  { %5247 = vmatprep.subr.bf16.mxu0 %v5079_v6  ;;  %v5021_v41 = vmul.f32 %v10422_v60, %v4985_v62  ;;  %v5022_v14 = vmul.f32 %v10422_v60, %v4986_v30  ;;  %v5053_v5 = vadd.f32 %v10428_v39, %v5017_v54  ;;  %v5054_v29 = vadd.f32 %v10428_v39, %v5018_v28 }
0x1670   :  { %5248 = vmatpush1.bf16.msra.mxu0 %v5078_v36 }
0x1672   :  { %v10434_v52 = vpop.permute.xlu1 %5042  ;;  %v10490_v56 = vpop.permute.xlu0 %5105 }
0x1673   :  { %11736 = vst [vmem:[#allocation22_spill] sm:$0xff] %v10434_v52  ;;  %v5057_v21 = vadd.f32 %v10434_v52, %v5021_v41  ;;  %v5058_v37 = vadd.f32 %v10434_v52, %v5022_v14  ;;  %11737 = vst [vmem:[#allocation23_spill] sm:$0xff] %v10490_v56 }
0x1675   :  { %v5083_v15 = vpack.c.bf16 %v5058_v37, %v5054_v29  ;;  %v5082_v17 = vpack.c.bf16 %v5057_v21, %v5053_v5 }
0x1676   :  { %v10493_v30 = vpop.permute.xlu1 %5110 }
0x1677   :  { %5249 = vmatprep.subr.bf16.mxu0 %v5083_v15  ;;  %11738 = vst [vmem:[#allocation24_spill] sm:$0xff] %v10493_v30 }
0x1678   :  { %5250 = vmatpush1.bf16.msra.mxu0 %v5082_v17 }
0x167b   :  { %6967 = vmatmul.mubr.msk.bf16.vlgmr.msra.gmra.mrb[200].mxu0 %vm456_vm2, %v7082_v57 }
0x167c   :  { %5289 = vmatprep.mubr.bf16.mxu0 %v11632_v48 }
0x1683   :  { %6968 = vmatmul.mubr.msk.bf16.gmra.mrb[204].mxu0 %vm456_vm2, %v7083_v55  ;;  %v10505_v55 = vpop.permute.xlu0 %5115 }
0x1684   :  { %5299 = vmatprep.mubr.bf16.mxu0 %v11632_v48  ;;  %11739 = vst [vmem:[#allocation25_spill] sm:$0xff] %v10505_v55 }
0x168b   :  { %6969 = vmatmul.mubr.msk.bf16.gmra.mrb[208].mxu0 %vm456_vm2, %v7084_v43 }
0x168c   :  { %5309 = vmatprep.mubr.bf16.mxu0 %v11632_v48 }
0x1693   :  { %6970 = vmatmul.mubr.msk.bf16.gmra.mrb[212].mxu0 %vm456_vm2, %v7085_v2 }
0x1694   :  { %5319 = vmatprep.mubr.bf16.mxu0 %v11632_v48 }
0x169b   :  { %6971 = vmatmul.mubr.msk.bf16.gmra.mrb[216].mxu0 %vm456_vm2, %v7086_v59 }
0x169c   :  { %5329 = vmatprep.mubr.bf16.mxu0 %v11632_v48 }
0x16a3   :  { %6972 = vmatmul.mubr.msk.bf16.gmra.mrb[220].mxu0 %vm456_vm2, %v7087_v51 }
0x16a4   :  { %5339 = vmatprep.mubr.bf16.mxu0 %v11632_v48 }
0x16ab   :  { %6973 = vmatmul.mubr.msk.bf16.gmra.mrb[224].mxu0 %vm456_vm2, %v7088_v42 }
0x16ac   :  { %5349 = vmatprep.mubr.bf16.mxu0 %v11632_v48 }
0x16b3   :  { %6974 = vmatmul.mubr.msk.bf16.gmra.mrb[228].mxu0 %vm456_vm2, %v7089_v26 }
0x16b4   :  { %6155 = vmatprep.mubr.bf16.mxu0 %v11632_v48 }
0x172a   :  { %v4673_v35 = vpop.f32.mrb[184].mxu1 }
0x172b   :  { %v4675_v19 = vpop.f32.mrb[185].mxu1 }
0x172c   :  { %v4677_v33 = vpop.f32.mrb[186].mxu1 }
0x172d   :  { %v4699_v49 = vpack.c.bf16 %v4677_v33, %v4673_v35  ;;  %v4679_v10 = vpop.f32.mrb[187].mxu1 }
0x172e   :  { %v4700_v25 = vpack.c.bf16 %v4679_v10, %v4675_v19  ;;  %v10512_v19 = vpop.permute.xlu1 %5120 }
0x172f   :  { %11740 = vst [vmem:[#allocation26_spill] sm:$0xff] %v10512_v19 }
0x1730   :  { %4774 = vmatprep.subr.bf16.mxu1 %v4700_v25 }
0x1731   :  { %4775 = vmatpush1.bf16.msra.mxu1 %v4699_v49 }
0x1732   :  { %v4683_v38 = vpop.f32.mrb[188].mxu1 }
0x1733   :  { %v4685_v61 = vpop.f32.mrb[189].mxu1 }
0x1734   :  { %v4687_v11 = vpop.f32.mrb[190].mxu1 }
0x1735   :  { %v4703_v12 = vpack.c.bf16 %v4687_v11, %v4683_v38  ;;  %v4689_v1 = vpop.f32.mrb[191].mxu1 }
0x1736   :  { %v4704_v47 = vpack.c.bf16 %v4689_v1, %v4685_v61 }
0x1738   :  { %4776 = vmatprep.subr.bf16.mxu1 %v4704_v47 }
0x1739   :  { %4777 = vmatpush1.bf16.msra.mxu1 %v4703_v12 }
0x173c   :  { %6917 = vmatmul.mubr.msk.bf16.vlgmr.msra.gmra.mrb[192].mxu1 %vm456_vm2, %v7550_v22 }
0x173d   :  { %4816 = vmatprep.mubr.bf16.mxu1 %v11632_v48 }
0x1744   :  { %6918 = vmatmul.mubr.msk.bf16.gmra.mrb[196].mxu1 %vm456_vm2, %v7551_v50 }
0x1745   :  { %5392 = vmatprep.mubr.bf16.mxu1 %v11632_v48 }
0x174e   :  { %v5281_v6 = vpop.f32.mrb[200].mxu0 }
0x174f   :  { %v5282_v36 = vadd.f32 %v5281_v6, %v10490_v56  ;;  %v5283_v62 = vpop.f32.mrb[201].mxu0 }
0x1750   :  { %v5284_v32 = vadd.f32 %v5283_v62, %v10490_v56  ;;  %v5285_v53 = vpop.f32.mrb[202].mxu0 }
0x1751   :  { %v5537_v54 = vmul.f32 0.044715, %v5282_v36  ;;  %v10497_v28 = vadd.f32 %v5285_v53, %v10493_v30  ;;  %v5287_v41 = vpop.f32.mrb[203].mxu0 }
0x1752   :  { %v5538_v14 = vmul.f32 0.044715, %v5284_v32  ;;  %v10500_v5 = vadd.f32 %v5287_v41, %v10493_v30 }
0x1753   :  { %v5601_v29 = vmul.f32 %v5537_v54, %v5282_v36  ;;  %v5541_v21 = vmul.f32 0.044715, %v10497_v28 }
0x1754   :  { %v5602_v37 = vmul.f32 %v5538_v14, %v5284_v32  ;;  %v5542_v15 = vmul.f32 0.044715, %v10500_v5 }
0x1755   :  { %v5665_v17 = vmul.f32 %v5601_v29, %v5282_v36  ;;  %v5605_v57 = vmul.f32 %v5541_v21, %v10497_v28 }
0x1756   :  { %v5666_v43 = vmul.f32 %v5602_v37, %v5284_v32  ;;  %v5606_v2 = vmul.f32 %v5542_v15, %v10500_v5  ;;  %v5291_v59 = vpop.f32.mrb[204].mxu0  ;;  %v10527_v15 = vpop.permute.xlu0 %5125 }
0x1757   :  { %v5729_v51 = vadd.f32 %v5665_v17, %v5282_v36  ;;  %v5669_v42 = vmul.f32 %v5605_v57, %v10497_v28  ;;  %v10510_v26 = vadd.f32 %v5291_v59, %v10505_v55  ;;  %v5293_v35 = vpop.f32.mrb[205].mxu0  ;;  %11741 = vst [vmem:[#allocation28_spill] sm:$0xff] %v10527_v15 }
0x1758   :  { %v5670_v33 = vmul.f32 %v5606_v2, %v10500_v5  ;;  %v5294_v49 = vadd.f32 %v5293_v35, %v10505_v55  ;;  %v5295_v10 = vpop.f32.mrb[206].mxu0  ;;  %v5730_v25 = vadd.f32 %v5666_v43, %v5284_v32  ;;  %v5473_v35 = vmul.f32 0.5, %v5282_v36 }
0x1759   :  { %v5793_v38 = vmul.f32 0.7978846, %v5729_v51  ;;  %v5733_v61 = vadd.f32 %v5669_v42, %v10497_v28  ;;  %v5545_v11 = vmul.f32 0.044715, %v10510_v26  ;;  %v10519_v12 = vadd.f32 %v5295_v10, %v10512_v19  ;;  %v5297_v1 = vpop.f32.mrb[207].mxu0 }
0x175a   :  { %v5546_v47 = vmul.f32 0.044715, %v5294_v49  ;;  %v5298_v22 = vadd.f32 %v5297_v1, %v10512_v19  ;;  %v5734_v50 = vadd.f32 %v5670_v33, %v10500_v5  ;;  %v5794_v6 = vmul.f32 0.7978846, %v5730_v25  ;;  %v10534_v33 = vpop.permute.xlu1 %5130 }
0x175b   :  { %7394 = vtanh.f32 %v5793_v38  ;;  %v5797_v62 = vmul.f32 0.7978846, %v5733_v61  ;;  %v5609_v53 = vmul.f32 %v5545_v11, %v10510_v26  ;;  %v5549_v54 = vmul.f32 0.044715, %v10519_v12  ;;  %11742 = vst [vmem:[#allocation12_spill] sm:$0xff] %v10534_v33 }
0x175c   :  { %v5610_v41 = vmul.f32 %v5546_v47, %v5294_v49  ;;  %v5550_v14 = vmul.f32 0.044715, %v5298_v22  ;;  %v5798_v29 = vmul.f32 0.7978846, %v5734_v50  ;;  %7396 = vtanh.f32 %v5794_v6 }
0x175d   :  { %7398 = vtanh.f32 %v5797_v62  ;;  %v5673_v21 = vmul.f32 %v5609_v53, %v10510_v26  ;;  %v5613_v37 = vmul.f32 %v5549_v54, %v10519_v12  ;;  %v5474_v61 = vmul.f32 0.5, %v5284_v32 }
0x175e   :  { %v5674_v17 = vmul.f32 %v5610_v41, %v5294_v49  ;;  %v5614_v57 = vmul.f32 %v5550_v14, %v5298_v22  ;;  %v5301_v43 = vpop.f32.mrb[208].mxu0  ;;  %7400 = vtanh.f32 %v5798_v29  ;;  %v5477_v53 = vmul.f32 0.5, %v10497_v28 }
0x175f   :  { %v5737_v2 = vadd.f32 %v5673_v21, %v10510_v26  ;;  %v5677_v59 = vmul.f32 %v5613_v37, %v10519_v12  ;;  %v10532_v51 = vadd.f32 %v5301_v43, %v10527_v15  ;;  %v5303_v42 = vpop.f32.mrb[209].mxu0  ;;  %v5478_v21 = vmul.f32 0.5, %v10500_v5 }
0x1760   :  { %v5678_v10 = vmul.f32 %v5614_v57, %v5298_v22  ;;  %v10537_v25 = vadd.f32 %v5303_v42, %v10527_v15  ;;  %v5305_v38 = vpop.f32.mrb[210].mxu0  ;;  %v5738_v11 = vadd.f32 %v5674_v17, %v5294_v49  ;;  %v10551_v37 = vmul.f32 0.5, %v5294_v49  ;;  %v10556_v42 = vpop.permute.xlu0 %5135 }
0x1761   :  { %v5801_v1 = vmul.f32 0.7978846, %v5737_v2  ;;  %v5741_v47 = vadd.f32 %v5677_v59, %v10519_v12  ;;  %v5553_v50 = vmul.f32 0.044715, %v10532_v51  ;;  %v10542_v6 = vadd.f32 %v5305_v38, %v10534_v33  ;;  %v5307_v62 = vpop.f32.mrb[211].mxu0  ;;  %11743 = vst [vmem:[#allocation27_spill] sm:$0xff] %v10556_v42 }
0x1762   :  { %v10545_v36 = vadd.f32 %v5307_v62, %v10534_v33  ;;  %v5742_v54 = vadd.f32 %v5678_v10, %v5298_v22  ;;  %v5802_v41 = vmul.f32 0.7978846, %v5738_v11  ;;  %v5554_v28 = vmul.f32 0.044715, %v10537_v25 }
0x1763   :  { %7402 = vtanh.f32 %v5801_v1  ;;  %v5805_v14 = vmul.f32 0.7978846, %v5741_v47  ;;  %v5617_v32 = vmul.f32 %v5553_v50, %v10532_v51  ;;  %v5557_v29 = vmul.f32 0.044715, %v10542_v6 }
0x1764   :  { %v5806_v17 = vmul.f32 0.7978846, %v5742_v54  ;;  %7404 = vtanh.f32 %v5802_v41  ;;  %v5558_v10 = vmul.f32 0.044715, %v10545_v36  ;;  %v10559_v5 = vmul.f32 0.5, %v5298_v22 }
0x1765   :  { %v7395_v57 = vpop.eup %7394  ;;  %7406 = vtanh.f32 %v5805_v14  ;;  %v5681_v43 = vmul.f32 %v5617_v32, %v10532_v51  ;;  %v5621_v2 = vmul.f32 %v5557_v29, %v10542_v6  ;;  %v10567_v54 = vmul.f32 0.5, %v10510_v26  ;;  %v10569_v14 = vpop.permute.xlu1 %5140 }
0x1766   :  { %v7397_v59 = vpop.eup %7396  ;;  %v5311_v38 = vpop.f32.mrb[212].mxu0  ;;  %v5921_v11 = vadd.f32 1.0, %v7395_v57  ;;  %7408 = vtanh.f32 %v5806_v17  ;;  %11744 = vst [vmem:[#allocation29_spill] sm:$0xff] %v10569_v14  ;;  %v10575_v57 = vmul.f32 0.5, %v10519_v12 }
0x1767   :  { %v7399_v49 = vpop.eup %7398  ;;  %v5745_v1 = vadd.f32 %v5681_v43, %v10532_v51  ;;  %v5685_v47 = vmul.f32 %v5621_v2, %v10542_v6  ;;  %v10564_v50 = vadd.f32 %v5311_v38, %v10556_v42  ;;  %v5313_v62 = vpop.f32.mrb[213].mxu0  ;;  %v5922_v29 = vadd.f32 1.0, %v7397_v59 }
0x1768   :  { %v7401_v41 = vpop.eup %7400  ;;  %v10572_v32 = vadd.f32 %v5313_v62, %v10556_v42  ;;  %v5315_v22 = vpop.f32.mrb[214].mxu0  ;;  %v5925_v17 = vadd.f32 1.0, %v7399_v49  ;;  %v5618_v43 = vmul.f32 %v5554_v28, %v10537_v25  ;;  %v5622_v62 = vmul.f32 %v5558_v10, %v10545_v36 }
0x1769   :  { %v5749_v2 = vadd.f32 %v5685_v47, %v10542_v6  ;;  %v5561_v38 = vmul.f32 0.044715, %v10564_v50  ;;  %v10581_v26 = vadd.f32 %v5315_v22, %v10569_v14  ;;  %v5317_v33 = vpop.f32.mrb[215].mxu0  ;;  %v5809_v15 = vmul.f32 0.7978846, %v5745_v1 }
0x176a   :  { %v5926_v42 = vadd.f32 1.0, %v7401_v41  ;;  %v5985_v19 = vmul.f32 %v5921_v11, %v5473_v35  ;;  %v5562_v12 = vmul.f32 0.044715, %v10572_v32  ;;  %v10588_v28 = vadd.f32 %v5317_v33, %v10569_v14  ;;  %v10605_v14 = vpop.permute.xlu1 %5150 }
0x176b   :  { %v5625_v59 = vmul.f32 %v5561_v38, %v10564_v50  ;;  %v5565_v49 = vmul.f32 0.044715, %v10581_v26  ;;  %v5813_v47 = vmul.f32 0.7978846, %v5749_v2  ;;  %v5986_v55 = vmul.f32 %v5922_v29, %v5474_v61  ;;  %v10596_v38 = vpop.permute.xlu0 %5145  ;;  %11746 = vst [vmem:[#allocation5_spill] sm:$0xff] %v10605_v14 }
0x176c   :  { %v5990_v30 = vmul.f32 %v5926_v42, %v5478_v21  ;;  %v5989_v22 = vmul.f32 %v5925_v17, %v5477_v53  ;;  %v5682_v1 = vmul.f32 %v5618_v43, %v10537_v25  ;;  %v10594_v11 = vmul.f32 0.5, %v10537_v25  ;;  %11745 = vst [vmem:[#allocation30_spill] sm:$0xff] %v10596_v38 }
0x176d   :  { %v7403_v56 = vpop.eup %7402  ;;  %v5689_v10 = vmul.f32 %v5625_v59, %v10564_v50  ;;  %v5629_v35 = vmul.f32 %v5565_v49, %v10581_v26  ;;  %7410 = vtanh.f32 %v5809_v15  ;;  %v5686_v33 = vmul.f32 %v5622_v62, %v10545_v36 }
0x176e   :  { %v7405_v41 = vpop.eup %7404  ;;  %v5321_v2 = vpop.f32.mrb[216].mxu0  ;;  %v6055_v61 = vpack.c.bf16 %v5990_v30, %v5986_v55  ;;  %v6054_v21 = vpack.c.bf16 %v5989_v22, %v5985_v19  ;;  %v5626_v29 = vmul.f32 %v5562_v12, %v10572_v32  ;;  %7412 = vtanh.f32 %v5813_v47 }
0x176f   :  { %v7407_v53 = vpop.eup %7406  ;;  %v5753_v42 = vadd.f32 %v5689_v10, %v10564_v50  ;;  %v5693_v17 = vmul.f32 %v5629_v35, %v10581_v26  ;;  %v10603_v43 = vadd.f32 %v5321_v2, %v10596_v38  ;;  %v5323_v59 = vpop.f32.mrb[217].mxu0  ;;  %v5566_v15 = vmul.f32 0.044715, %v10588_v28 }
0x1770   :  { %v7409_v49 = vpop.eup %7408  ;;  %v10609_v30 = vadd.f32 %v5323_v59, %v10596_v38  ;;  %6123 = vmatprep.subr.bf16.mxu0 %v6055_v61  ;;  %v5325_v55 = vpop.f32.mrb[218].mxu0  ;;  %v5930_v19 = vadd.f32 1.0, %v7405_v41  ;;  %v5929_v10 = vadd.f32 1.0, %v7403_v56  ;;  %v5933_v35 = vadd.f32 1.0, %v7407_v53 }
0x1771   :  { %v5569_v62 = vmul.f32 0.044715, %v10603_v43  ;;  %v10613_v12 = vadd.f32 %v5325_v55, %v10605_v14  ;;  %6124 = vmatpush1.bf16.msra.mxu0 %v6054_v21  ;;  %v5327_v22 = vpop.f32.mrb[219].mxu0  ;;  %v5817_v2 = vmul.f32 0.7978846, %v5753_v42  ;;  %v5757_v47 = vadd.f32 %v5693_v17, %v10581_v26 }
0x1772   :  { %v10617_v44 = vadd.f32 %v5327_v22, %v10605_v14  ;;  %v5934_v59 = vadd.f32 1.0, %v7409_v49  ;;  %v5570_v41 = vmul.f32 0.044715, %v10609_v30  ;;  %v10623_v55 = vmul.f32 0.5, %v10545_v36  ;;  %v10633_v14 = vpop.permute.xlu0 %5155 }
0x1773   :  { %v5633_v61 = vmul.f32 %v5569_v62, %v10603_v43  ;;  %v5573_v38 = vmul.f32 0.044715, %v10613_v12  ;;  %v5630_v21 = vmul.f32 %v5566_v15, %v10588_v28  ;;  %v5994_v53 = vmul.f32 %v5930_v19, %v10551_v37  ;;  %11747 = vst [vmem:[#allocation4_spill] sm:$0xff] %v10633_v14 }
0x1774   :  { %v5574_v56 = vmul.f32 0.044715, %v10617_v44  ;;  %v5998_v42 = vmul.f32 %v5934_v59, %v10559_v5  ;;  %v5993_v62 = vmul.f32 %v5929_v10, %v10567_v54  ;;  %v5997_v22 = vmul.f32 %v5933_v35, %v10575_v57  ;;  %v10641_v10 = vpop.permute.xlu1 %5160 }
0x1775   :  { %v5697_v17 = vmul.f32 %v5633_v61, %v10603_v43  ;;  %v5637_v49 = vmul.f32 %v5573_v38, %v10613_v12  ;;  %7414 = vtanh.f32 %v5817_v2  ;;  %v5821_v20 = vmul.f32 0.7978846, %v5757_v47  ;;  %11748 = vst [vmem:[#allocation13_spill] sm:$0xff] %v10641_v10 }
0x1776   :  { %v5331_v63 = vpop.f32.mrb[220].mxu0  ;;  %v6059_v15 = vpack.c.bf16 %v5998_v42, %v5994_v53  ;;  %v5746_v27 = vadd.f32 %v5682_v1, %v10537_v25  ;;  %v5634_v37 = vmul.f32 %v5570_v41, %v10609_v30  ;;  %v6058_v59 = vpack.c.bf16 %v5997_v22, %v5993_v62 }
0x1777   :  { %v5701_v5 = vmul.f32 %v5637_v49, %v10613_v12  ;;  %v10639_v19 = vadd.f32 %v5331_v63, %v10633_v14  ;;  %v5333_v38 = vpop.f32.mrb[221].mxu0  ;;  %v7411_v54 = vpop.eup %7410  ;;  %v5638_v57 = vmul.f32 %v5574_v56, %v10617_v44  ;;  %v5750_v25 = vadd.f32 %v5686_v33, %v10545_v36 }
0x1778   :  { %v10645_v35 = vadd.f32 %v5333_v38, %v10633_v14  ;;  %6125 = vmatprep.subr.bf16.mxu0 %v6059_v15  ;;  %v5335_v2 = vpop.f32.mrb[222].mxu0  ;;  %v5810_v1 = vmul.f32 0.7978846, %v5746_v27  ;;  %v5761_v47 = vadd.f32 %v5697_v17, %v10603_v43  ;;  %v7413_v56 = vpop.eup %7412  ;;  %v5690_v42 = vmul.f32 %v5626_v29, %v10572_v32 }
0x1779   :  { %v5765_v63 = vadd.f32 %v5701_v5, %v10613_v12  ;;  %v5577_v61 = vmul.f32 0.044715, %v10639_v19  ;;  %v10652_v41 = vadd.f32 %v5335_v2, %v10641_v10  ;;  %6126 = vmatpush1.bf16.msra.mxu0 %v6058_v59  ;;  %v5337_v53 = vpop.f32.mrb[223].mxu0  ;;  %v5694_v49 = vmul.f32 %v5630_v21, %v10588_v28  ;;  %v10670_v38 = vpop.permute.xlu0 %5165 }
0x177a   :  { %v5814_v62 = vmul.f32 0.7978846, %v5750_v25  ;;  %7416 = vtanh.f32 %v5810_v1  ;;  %v5578_v36 = vmul.f32 0.044715, %v10645_v35  ;;  %v10660_v17 = vmul.f32 %v5634_v37, %v10609_v30  ;;  %11749 = vst [vmem:[#allocation3_spill] sm:$0xff] %v10670_v38 }
0x177b   :  { %7418 = vtanh.f32 %v5821_v20  ;;  %v5641_v27 = vmul.f32 %v5577_v61, %v10639_v19  ;;  %v5581_v33 = vmul.f32 0.044715, %v10652_v41  ;;  %v10663_v22 = vmul.f32 %v5638_v57, %v10617_v44 }
0x177c   :  { %v10666_v15 = vadd.f32 %v5337_v53, %v10641_v10  ;;  %7420 = vtanh.f32 %v5814_v62  ;;  %v5825_v29 = vmul.f32 0.7978846, %v5761_v47  ;;  %v5829_v21 = vmul.f32 0.7978846, %v5765_v63 }
0x177d   :  { %v5705_v20 = vmul.f32 %v5641_v27, %v10639_v19  ;;  %v5645_v5 = vmul.f32 %v5581_v33, %v10652_v41  ;;  %v5489_v2 = vmul.f32 0.5, %v10532_v51  ;;  %v5493_v37 = vmul.f32 0.5, %v10542_v6  ;;  %v10682_v27 = vpop.permute.xlu1 %5170  ;;  %v10717_v7 = vpop.permute.xlu0 %5175 }
0x177e   :  { %v5341_v59 = vpop.f32.mrb[224].mxu0  ;;  %v5937_v25 = vadd.f32 1.0, %v7411_v54  ;;  %v5941_v57 = vadd.f32 1.0, %v7413_v56  ;;  %v5642_v61 = vmul.f32 %v5578_v36, %v10645_v35  ;;  %11750 = vst [vmem:[#allocation2_spill] sm:$0xff] %v10682_v27  ;;  %v5582_v51 = vmul.f32 0.044715, %v10666_v15 }
0x177f   :  { %v5769_v1 = vadd.f32 %v5705_v20, %v10639_v19  ;;  %v5709_v47 = vmul.f32 %v5645_v5, %v10652_v41  ;;  %v10678_v63 = vadd.f32 %v5341_v59, %v10670_v38  ;;  %v5343_v53 = vpop.f32.mrb[225].mxu0  ;;  %v10680_v62 = vpop.eup %7414  ;;  %7422 = vtanh.f32 %v5825_v29 }
0x1780   :  { %v10686_v6 = vadd.f32 %v5343_v53, %v10670_v38  ;;  %v5345_v54 = vpop.f32.mrb[226].mxu0  ;;  %v10688_v56 = vmul.f32 %v5937_v25, %v5489_v2  ;;  %v10690_v33 = vmul.f32 %v5941_v57, %v5493_v37  ;;  %7424 = vtanh.f32 %v5829_v21 }
0x1781   :  { %v5773_v36 = vadd.f32 %v5709_v47, %v10652_v41  ;;  %v5585_v20 = vmul.f32 0.044715, %v10678_v63  ;;  %v10695_v5 = vadd.f32 %v5345_v54, %v10682_v27  ;;  %v5347_v59 = vpop.f32.mrb[227].mxu0  ;;  %v5833_v10 = vmul.f32 0.7978846, %v5769_v1 }
0x1782   :  { %v6062_v53 = vpack.c.bf16 %v10690_v33, %v10688_v56  ;;  %v10700_v38 = vadd.f32 %v5347_v59, %v10682_v27  ;;  %v10703_v2 = vmul.f32 %v5642_v61, %v10645_v35  ;;  %v5586_v37 = vmul.f32 0.044715, %v10686_v6 }
0x1783   :  { %v5649_v29 = vmul.f32 %v5585_v20, %v10678_v63  ;;  %v5589_v25 = vmul.f32 0.044715, %v10695_v5  ;;  %v5837_v47 = vmul.f32 0.7978846, %v5773_v36  ;;  %v5646_v21 = vmul.f32 %v5582_v51, %v10666_v15 }
0x1784   :  { %v7417_v57 = vpop.eup %7416  ;;  %v5754_v1 = vadd.f32 %v5690_v42, %v10572_v32  ;;  %v5758_v54 = vadd.f32 %v5694_v49, %v10588_v28  ;;  %v5590_v20 = vmul.f32 0.044715, %v10700_v38  ;;  %7426 = vtanh.f32 %v5833_v10 }
0x1785   :  { %v7419_v56 = vpop.eup %7418  ;;  %v5713_v33 = vmul.f32 %v5649_v29, %v10678_v63  ;;  %v5938_v59 = vadd.f32 1.0, %v7417_v57  ;;  %v5653_v61 = vmul.f32 %v5589_v25, %v10695_v5  ;;  %v10715_v23 = vmul.f32 0.5, %v10572_v32 }
0x1786   :  { %v7421_v27 = vpop.eup %7420  ;;  %v5351_v14 = vpop.f32.mrb[228].mxu0  ;;  %v5818_v36 = vmul.f32 0.7978846, %v5754_v1  ;;  %v5822_v51 = vmul.f32 0.7978846, %v5758_v54  ;;  %v5650_v49 = vmul.f32 %v5586_v37, %v10686_v6  ;;  %v10723_v8 = vmul.f32 %v5646_v21, %v10666_v15 }
0x1787   :  { %v5777_v42 = vadd.f32 %v5713_v33, %v10678_v63  ;;  %v5942_v29 = vadd.f32 1.0, %v7421_v27  ;;  %v5717_v57 = vmul.f32 %v5653_v61, %v10695_v5  ;;  %v5353_v25 = vpop.f32.mrb[229].mxu0  ;;  %v10726_v10 = vadd.f32 %v5351_v14, %v10717_v7  ;;  %v10731_v54 = vpop.permute.xlu1 %5180 }
0x1788   :  { %v10729_v32 = vmul.f32 0.5, %v10588_v28  ;;  %7428 = vtanh.f32 %v5818_v36  ;;  %v5355_v1 = vpop.f32.mrb[230].mxu0  ;;  %v6002_v33 = vmul.f32 %v5938_v59, %v10594_v11  ;;  %v5654_v45 = vmul.f32 %v5590_v20, %v10700_v38 }
0x1789   :  { %v6006_v27 = vmul.f32 %v5942_v29, %v10623_v55  ;;  %v5781_v37 = vadd.f32 %v5717_v57, %v10695_v5  ;;  %7430 = vtanh.f32 %v5822_v51  ;;  %v5357_v61 = vpop.f32.mrb[231].mxu0  ;;  %v5841_v21 = vmul.f32 0.7978846, %v5777_v42  ;;  %v7423_v36 = vpop.eup %7422 }
0x178a   :  { %v5593_v14 = vmul.f32 0.044715, %v10726_v10  ;;  %v10739_v28 = vadd.f32 %v5355_v1, %v10731_v54  ;;  %7432 = vtanh.f32 %v5837_v47  ;;  %v10742_v52 = vmul.f32 %v5650_v49, %v10686_v6  ;;  %v7425_v55 = vpop.eup %7424 }
0x178b   :  { %v6063_v11 = vpack.c.bf16 %v6006_v27, %v6002_v33  ;;  %v5845_v59 = vmul.f32 0.7978846, %v5781_v37  ;;  %v10746_v51 = vadd.f32 %v5353_v25, %v10717_v7  ;;  %v5945_v42 = vadd.f32 1.0, %v10680_v62 }
0x178c   :  { %v5657_v29 = vmul.f32 %v5593_v14, %v10726_v10  ;;  %v5597_v20 = vmul.f32 0.044715, %v10739_v28  ;;  %v5497_v57 = vmul.f32 0.5, %v10564_v50  ;;  %v5501_v47 = vmul.f32 0.5, %v10581_v26 }
0x178d   :  { %6127 = vmatprep.subr.bf16.mxu0 %v6063_v11  ;;  %v5949_v1 = vadd.f32 1.0, %v7419_v56  ;;  %v10753_v49 = vadd.f32 %v5357_v61, %v10731_v54  ;;  %7434 = vtanh.f32 %v5841_v21  ;;  %v5718_v33 = vmul.f32 %v5654_v45, %v10700_v38 }
0x178e   :  { %6128 = vmatpush1.bf16.msra.mxu0 %v6062_v53  ;;  %v5721_v25 = vmul.f32 %v5657_v29, %v10726_v10  ;;  %v5661_v27 = vmul.f32 %v5597_v20, %v10739_v28  ;;  %7436 = vtanh.f32 %v5845_v59  ;;  %v6009_v37 = vmul.f32 %v5945_v42, %v5497_v57  ;;  %v7427_v14 = vpop.eup %7426 }
0x178f   :  { %v6013_v62 = vmul.f32 %v5949_v1, %v5501_v47  ;;  %v5762_v50 = vadd.f32 %v10660_v17, %v10609_v30  ;;  %v5594_v56 = vmul.f32 0.044715, %v10746_v51  ;;  %v5766_v45 = vadd.f32 %v10663_v22, %v10617_v44 }
0x1790   :  { %v5785_v26 = vadd.f32 %v5721_v25, %v10726_v10  ;;  %v5725_v61 = vmul.f32 %v5661_v27, %v10739_v28  ;;  %v5598_v21 = vmul.f32 0.044715, %v10753_v49  ;;  %v5505_v59 = vmul.f32 0.5, %v10603_v43 }
0x1791   :  { %v6066_v53 = vpack.c.bf16 %v6013_v62, %v6009_v37  ;;  %v5826_v11 = vmul.f32 0.7978846, %v5762_v50  ;;  %v5830_v42 = vmul.f32 0.7978846, %v5766_v45  ;;  %v5953_v57 = vadd.f32 1.0, %v7423_v36 }
0x1792   :  { %v7429_v29 = vpop.eup %7428  ;;  %v5849_v20 = vmul.f32 0.7978846, %v5785_v26  ;;  %v5789_v17 = vadd.f32 %v5725_v61, %v10739_v28  ;;  %v5509_v25 = vmul.f32 0.5, %v10613_v12  ;;  %v5957_v27 = vadd.f32 1.0, %v7425_v55 }
0x1793   :  { %v7431_v47 = vpop.eup %7430  ;;  %v5946_v1 = vadd.f32 1.0, %v7429_v29  ;;  %7438 = vtanh.f32 %v5826_v11  ;;  %v5658_v22 = vmul.f32 %v5594_v56, %v10746_v51  ;;  %v5662_v43 = vmul.f32 %v5598_v21, %v10753_v49 }
0x1794   :  { %7440 = vtanh.f32 %v5849_v20  ;;  %v5950_v37 = vadd.f32 1.0, %v7431_v47  ;;  %v5853_v62 = vmul.f32 0.7978846, %v5789_v17  ;;  %v7433_v50 = vpop.eup %7432  ;;  %v10771_v26 = vmul.f32 %v5953_v57, %v5505_v59 }
0x1795   :  { %7442 = vtanh.f32 %v5830_v42  ;;  %v10773_v61 = vmul.f32 %v5957_v27, %v5509_v25  ;;  %v6010_v36 = vmul.f32 %v5946_v1, %v10715_v23  ;;  %v5770_v12 = vadd.f32 %v10703_v2, %v10645_v35 }
0x1796   :  { %v6014_v45 = vmul.f32 %v5950_v37, %v10729_v32  ;;  %7444 = vtanh.f32 %v5853_v62  ;;  %v5774_v56 = vadd.f32 %v10723_v8, %v10666_v15  ;;  %v5513_v21 = vmul.f32 0.5, %v10639_v19 }
0x1797   :  { %v6070_v55 = vpack.c.bf16 %v10773_v61, %v10771_v26  ;;  %v5517_v11 = vmul.f32 0.5, %v10652_v41  ;;  %v7435_v59 = vpop.eup %7434  ;;  %v5834_v20 = vmul.f32 0.7978846, %v5770_v12  ;;  %v5961_v23 = vadd.f32 1.0, %v7427_v14 }
0x1798   :  { %v6067_v29 = vpack.c.bf16 %v6014_v45, %v6010_v36  ;;  %v5965_v17 = vadd.f32 1.0, %v7433_v50  ;;  %v7437_v32 = vpop.eup %7436  ;;  %v5722_v42 = vmul.f32 %v5658_v22, %v10746_v51  ;;  %v5726_v2 = vmul.f32 %v5662_v43, %v10753_v49 }
0x1799   :  { %v5838_v57 = vmul.f32 0.7978846, %v5774_v56  ;;  %v5778_v47 = vadd.f32 %v10742_v52, %v10686_v6  ;;  %7446 = vtanh.f32 %v5834_v20  ;;  %v10789_v8 = vmul.f32 %v5961_v23, %v5513_v21 }
0x179a   :  { %6129 = vmatprep.subr.bf16.mxu0 %v6067_v29  ;;  %v10791_v19 = vmul.f32 %v5965_v17, %v5517_v11  ;;  %v5782_v41 = vadd.f32 %v5718_v33, %v10700_v38  ;;  %v5521_v1 = vmul.f32 0.5, %v10678_v63  ;;  %v5525_v25 = vmul.f32 0.5, %v10695_v5 }
0x179b   :  { %6130 = vmatpush1.bf16.msra.mxu0 %v6066_v53  ;;  %7448 = vtanh.f32 %v5838_v57  ;;  %v5842_v14 = vmul.f32 0.7978846, %v5778_v47  ;;  %v5969_v52 = vadd.f32 1.0, %v7435_v59  ;;  %v5973_v37 = vadd.f32 1.0, %v7437_v32 }
0x179c   :  { %v6074_v27 = vpack.c.bf16 %v10791_v19, %v10789_v8  ;;  %v5846_v22 = vmul.f32 0.7978846, %v5782_v41  ;;  %v5786_v50 = vadd.f32 %v5722_v42, %v10746_v51  ;;  %v5506_v63 = vmul.f32 0.5, %v10609_v30 }
0x179d   :  { %v7439_v62 = vpop.eup %7438  ;;  %7450 = vtanh.f32 %v5842_v14  ;;  %v6033_v33 = vmul.f32 %v5969_v52, %v5521_v1  ;;  %v6037_v53 = vmul.f32 %v5973_v37, %v5525_v25  ;;  %v5510_v5 = vmul.f32 0.5, %v10617_v44 }
0x179e   :  { %v7441_v43 = vpop.eup %7440  ;;  %v5954_v36 = vadd.f32 1.0, %v7439_v62  ;;  %7452 = vtanh.f32 %v5846_v22  ;;  %v5790_v12 = vadd.f32 %v5726_v2, %v10753_v49  ;;  %v5850_v56 = vmul.f32 0.7978846, %v5786_v50 }
0x179f   :  { %v7443_v45 = vpop.eup %7442  ;;  %v6078_v59 = vpack.c.bf16 %v6037_v53, %v6033_v33  ;;  %v5529_v29 = vmul.f32 0.5, %v10726_v10  ;;  %v5977_v20 = vadd.f32 1.0, %v7441_v43  ;;  %v5533_v17 = vmul.f32 0.5, %v10739_v28 }
0x17a0   :  { %v7445_v21 = vpop.eup %7444  ;;  %v5958_v11 = vadd.f32 1.0, %v7443_v45  ;;  %v5854_v23 = vmul.f32 0.7978846, %v5790_v12  ;;  %7454 = vtanh.f32 %v5850_v56  ;;  %v6018_v42 = vmul.f32 %v5954_v36, %v5506_v63  ;;  %v7090_v12 = vld [vmem:[%s11492_s10 + $0x10] sm:$0xff]  }
0x17a1   :  { %v5981_v32 = vadd.f32 1.0, %v7445_v21  ;;  %v6041_v30 = vmul.f32 %v5977_v20, %v5529_v29  ;;  %v5514_v14 = vmul.f32 0.5, %v10645_v35  ;;  %v5518_v10 = vmul.f32 0.5, %v10666_v15 }
0x17a2   :  { %v6022_v57 = vmul.f32 %v5958_v11, %v5510_v5  ;;  %7456 = vtanh.f32 %v5854_v23  ;;  %v5522_v62 = vmul.f32 0.5, %v10686_v6  ;;  %v5526_v50 = vmul.f32 0.5, %v10700_v38 }
0x17a3   :  { %v6045_v47 = vmul.f32 %v5981_v32, %v5533_v17  ;;  %v7447_v44 = vpop.eup %7446  ;;  %v5530_v26 = vmul.f32 0.5, %v10746_v51  ;;  %v5534_v61 = vmul.f32 0.5, %v10753_v49  ;;  %v7091_v51 = vld [vmem:[%s11492_s10 + $0x18] sm:$0xff]  }
0x17a4   :  { %v6071_v8 = vpack.c.bf16 %v6022_v57, %v6018_v42  ;;  %v5962_v19 = vadd.f32 1.0, %v7447_v44 }
0x17a5   :  { %v7449_v2 = vpop.eup %7448  ;;  %v6082_v41 = vpack.c.bf16 %v6045_v47, %v6041_v30 }
0x17a6   :  { %6131 = vmatprep.subr.bf16.mxu0 %v6071_v8  ;;  %v5966_v1 = vadd.f32 1.0, %v7449_v2  ;;  %v6026_v22 = vmul.f32 %v5962_v19, %v5514_v14 }
0x17a7   :  { %v7451_v25 = vpop.eup %7450  ;;  %6132 = vmatpush1.bf16.msra.mxu0 %v6070_v55 }
0x17a8   :  { %v7453_v28 = vpop.eup %7452  ;;  %v6030_v52 = vmul.f32 %v5966_v1, %v5518_v10  ;;  %v5970_v37 = vadd.f32 1.0, %v7451_v25 }
0x17a9   :  { %v5974_v43 = vadd.f32 1.0, %v7453_v28 }
0x17aa   :  { %v6075_v36 = vpack.c.bf16 %v6030_v52, %v6026_v22  ;;  %v7455_v33 = vpop.eup %7454  ;;  %v6034_v35 = vmul.f32 %v5970_v37, %v5522_v62 }
0x17ab   :  { %v6038_v53 = vmul.f32 %v5974_v43, %v5526_v50  ;;  %v5978_v15 = vadd.f32 1.0, %v7455_v33 }
0x17ac   :  { %6133 = vmatprep.subr.bf16.mxu0 %v6075_v36  ;;  %v7457_v45 = vpop.eup %7456 }
0x17ad   :  { %6134 = vmatpush1.bf16.msra.mxu0 %v6074_v27  ;;  %v6079_v63 = vpack.c.bf16 %v6038_v53, %v6034_v35  ;;  %v5982_v55 = vadd.f32 1.0, %v7457_v45  ;;  %v6042_v5 = vmul.f32 %v5978_v15, %v5530_v26 }
0x17af   :  { %6135 = vmatprep.subr.bf16.mxu0 %v6079_v63  ;;  %v6046_v6 = vmul.f32 %v5982_v55, %v5534_v61 }
0x17b1   :  { %6136 = vmatpush1.bf16.msra.mxu0 %v6078_v59  ;;  %v6083_v38 = vpack.c.bf16 %v6046_v6, %v6042_v5 }
0x17b3   :  { %6137 = vmatprep.subr.bf16.mxu0 %v6083_v38 }
0x17b5   :  { %6138 = vmatpush1.bf16.msra.mxu0 %v6082_v41 }
0x17b8   :  { %6156 = vmatmul.mubr.bf16.vlgmr.msra.gmra.mrb[232].mxu0 %v7090_v12 }
0x17b9   :  { %6165 = vmatprep.mubr.bf16.mxu0 %v11632_v48 }
0x17c0   :  { %6166 = vmatmul.mubr.bf16.gmra.mrb[236].mxu0 %v7091_v51 }
0x17c1   :  { %6545 = vmatprep.mubr.bf16.mxu0 %v11632_v48 }
0x180f   :  { %v4808_v49 = vpop.f32.mrb[192].mxu1 }
0x1810   :  { %v4810_v27 = vpop.f32.mrb[193].mxu1  ;;  %v10828_v29 = vadd.f32 %v4808_v49, %v9696_v0 }
0x1811   :  { %v4812_v56 = vpop.f32.mrb[194].mxu1  ;;  %v10831_v20 = vadd.f32 %v4810_v27, %v9700_v3 }
0x1812   :  { %v4814_v21 = vpop.f32.mrb[195].mxu1  ;;  %v10822_v11 = vadd.f32 %v4812_v56, %v9690_v13 }
0x1813   :  { %v10825_v59 = vadd.f32 %v4814_v21, %v9693_v16 }
0x1814   :  { %v4871_v17 = vadd.f32 %v10822_v11, %v10828_v29 }
0x1815   :  { %v4880_v13 = vadd.f32 %v10825_v59, %v10831_v20 }
0x1817   :  { %v4818_v23 = vpop.f32.mrb[196].mxu1 }
0x1818   :  { %v10836_v32 = vadd.f32 %v4818_v23, %v9706_v40  ;;  %v4820_v42 = vpop.f32.mrb[197].mxu1 }
0x1819   :  { %v10841_v16 = vadd.f32 %v4820_v42, %v9712_v9  ;;  %v4822_v57 = vpop.f32.mrb[198].mxu1 }
0x181a   :  { %v4872_v0 = vadd.f32 %v4871_v17, %v10836_v32  ;;  %v10845_v3 = vadd.f32 %v4822_v57, %v9717_v24  ;;  %v4824_v30 = vpop.f32.mrb[199].mxu1 }
0x181b   :  { %v4881_v47 = vadd.f32 %v4880_v13, %v10841_v16  ;;  %v10849_v44 = vadd.f32 %v4824_v30, %v9721_v46 }
0x181c   :  { %v4873_v40 = vadd.f32 %v4872_v0, %v10845_v3 }
0x181d   :  { %v4882_v8 = vadd.f32 %v4881_v47, %v10849_v44 }
0x181e   :  { %v4874_v2 = vrot.slane %v4873_v40, 4 }
0x181f   :  { %v4883_v19 = vrot.slane %v4882_v8, 4 }
0x1820   :  { %v4875_v9 = vadd.f32 %v4874_v2, %v4873_v40 }
0x1821   :  { %v4884_v41 = vadd.f32 %v4883_v19, %v4882_v8 }
0x1822   :  { %v4876_v14 = vrot.slane %v4875_v9, 2 }
0x1823   :  { %v4885_v10 = vrot.slane %v4884_v41, 2 }
0x1824   :  { %v4877_v1 = vadd.f32 %v4876_v14, %v4875_v9 }
0x1825   :  { %v4886_v25 = vadd.f32 %v4885_v10, %v4884_v41 }
0x1826   :  { %v4878_v24 = vrot.slane %v4877_v1, 1 }
0x1827   :  { %v4887_v28 = vrot.slane %v4886_v25, 1 }
0x1828   :  { %v4879_v22 = vadd.f32 %v4878_v24, %v4877_v1 }
0x1829   :  { %v4888_v52 = vadd.f32 %v4887_v28, %v4886_v25 }
0x182a   :  { %v4891_v37 = vmul.f32 0.03125, %v4879_v22 }
0x182b   :  { %v4892_v62 = vmul.f32 0.03125, %v4888_v52 }
0x182c   :  { %v4895_v46 = vsub.f32 %v10828_v29, %v4891_v37  ;;  %v4899_v50 = vsub.f32 %v10822_v11, %v4891_v37  ;;  %v4903_v43 = vsub.f32 %v10836_v32, %v4891_v37  ;;  %v4907_v53 = vsub.f32 %v10845_v3, %v4891_v37 }
0x182d   :  { %v4896_v36 = vsub.f32 %v10831_v20, %v4892_v62  ;;  %v4900_v33 = vsub.f32 %v10825_v59, %v4892_v62  ;;  %v4904_v35 = vsub.f32 %v10841_v16, %v4892_v62  ;;  %v4908_v63 = vsub.f32 %v10849_v44, %v4892_v62 }
0x182e   :  { %v4911_v15 = vmul.f32 %v4895_v46, %v4895_v46  ;;  %v4915_v45 = vmul.f32 %v4899_v50, %v4899_v50  ;;  %v4919_v55 = vmul.f32 %v4903_v43, %v4903_v43  ;;  %v4923_v12 = vmul.f32 %v4907_v53, %v4907_v53 }
0x182f   :  { %v4912_v26 = vmul.f32 %v4896_v36, %v4896_v36  ;;  %v4916_v61 = vmul.f32 %v4900_v33, %v4900_v33  ;;  %v4920_v6 = vmul.f32 %v4904_v35, %v4904_v35  ;;  %v4924_v49 = vmul.f32 %v4908_v63, %v4908_v63 }
0x1830   :  { %v4943_v5 = vadd.f32 %v4915_v45, %v4911_v15 }
0x1831   :  { %v4952_v38 = vadd.f32 %v4916_v61, %v4912_v26 }
0x1832   :  { %v4944_v51 = vadd.f32 %v4943_v5, %v4919_v55 }
0x1833   :  { %v4953_v27 = vadd.f32 %v4952_v38, %v4920_v6 }
0x1834   :  { %v4945_v56 = vadd.f32 %v4944_v51, %v4923_v12 }
0x1835   :  { %v4954_v21 = vadd.f32 %v4953_v27, %v4924_v49 }
0x1836   :  { %v4946_v23 = vrot.slane %v4945_v56, 4 }
0x1837   :  { %v4955_v17 = vrot.slane %v4954_v21, 4 }
0x1838   :  { %v4947_v42 = vadd.f32 %v4946_v23, %v4945_v56  ;;  %v7556_v56 = vld [vmem:[%s11490_s8 + $0x60] sm:$0xff]   ;;  %v10906_v23 = vpop.permute.xlu0 %6093 }
0x1839   :  { %v4956_v13 = vadd.f32 %v4955_v17, %v4954_v21  ;;  %v7557_v21 = vld [vmem:[%s11490_s8 + $0x68] sm:$0xff]  }
0x183a   :  { %v4948_v57 = vrot.slane %v4947_v42, 2 }
0x183b   :  { %v4957_v0 = vrot.slane %v4956_v13, 2 }
0x183c   :  { %v4949_v30 = vadd.f32 %v4948_v57, %v4947_v42  ;;  %v10910_v57 = vpop.permute.xlu1 %6098 }
0x183d   :  { %v4958_v47 = vadd.f32 %v4957_v0, %v4956_v13 }
0x183e   :  { %v4950_v40 = vrot.slane %v4949_v30, 1 }
0x183f   :  { %v4959_v8 = vrot.slane %v4958_v47, 1 }
0x1840   :  { %v4951_v2 = vadd.f32 %v4950_v40, %v4949_v30 }
0x1841   :  { %v4960_v19 = vadd.f32 %v4959_v8, %v4958_v47 }
0x1842   :  { %v4963_v9 = vmul.f32 0.03125, %v4951_v2  ;;  %v11752_v2 = vld [vmem:[#allocation16_spill] sm:$0xff] }
0x1843   :  { %v4964_v41 = vmul.f32 0.03125, %v4960_v19 }
0x1844   :  { %v4967_v14 = vadd.f32 1e-06, %v4963_v9  ;;  %v11753_v9 = vld [vmem:[#allocation14_spill] sm:$0xff] }
0x1845   :  { %v4968_v10 = vadd.f32 1e-06, %v4964_v41 }
0x1846   :  { %7458 = vrsqrt.f32 %v4967_v14  ;;  %v11754_v14 = vld [vmem:[#allocation18_spill] sm:$0xff] }
0x1847   :  { %7460 = vrsqrt.f32 %v4968_v10 }
0x1850   :  { %v7459_v1 = vpop.eup %7458 }
0x1851   :  { %v7461_v25 = vpop.eup %7460  ;;  %v4987_v24 = vmul.f32 %v7459_v1, %v4907_v53  ;;  %v4975_v28 = vmul.f32 %v7459_v1, %v4895_v46  ;;  %v4979_v22 = vmul.f32 %v7459_v1, %v4899_v50  ;;  %v4983_v52 = vmul.f32 %v7459_v1, %v4903_v43  ;;  %v11751_v53 = vld [vmem:[#allocation22_spill] sm:$0xff]  ;;  %v11755_v1 = vld [vmem:[#allocation15_spill] sm:$0xff] }
0x1852   :  { %v4988_v37 = vmul.f32 %v7461_v25, %v4908_v63  ;;  %v4976_v62 = vmul.f32 %v7461_v25, %v4896_v36  ;;  %v4980_v15 = vmul.f32 %v7461_v25, %v4900_v33  ;;  %v4984_v45 = vmul.f32 %v7461_v25, %v4904_v35 }
0x1853   :  { %v5011_v26 = vmul.f32 %v10400_v31, %v4975_v28  ;;  %v5015_v61 = vmul.f32 %v10402_v4, %v4979_v22  ;;  %v5023_v46 = vmul.f32 %v10422_v60, %v4987_v24  ;;  %v5019_v36 = vmul.f32 %v10416_v18, %v4983_v52  ;;  %v7558_v28 = vld [vmem:[%s11490_s8 + $0x70] sm:$0xff]   ;;  %v10923_v22 = vpop.permute.xlu0 %6103 }
0x1854   :  { %v5012_v55 = vmul.f32 %v10400_v31, %v4976_v62  ;;  %v5016_v5 = vmul.f32 %v10402_v4, %v4980_v15  ;;  %v5020_v6 = vmul.f32 %v10416_v18, %v4984_v45  ;;  %v5024_v38 = vmul.f32 %v10422_v60, %v4988_v37  ;;  %v7554_v18 = vld [vmem:[%s11490_s8 + $0x50] sm:$0xff]   ;;  %v10927_v45 = vpop.permute.xlu1 %6108 }
0x1855   :  { %v5047_v50 = vadd.f32 %v10404_v34, %v5011_v26  ;;  %v5051_v43 = vadd.f32 %v10414_v58, %v5015_v61  ;;  %v5055_v51 = vadd.f32 %v10428_v39, %v5019_v36  ;;  %v5059_v60 = vadd.f32 %v11751_v53, %v5023_v46  ;;  %v11757_v46 = vld [vmem:[#allocation19_spill] sm:$0xff] }
0x1856   :  { %v5048_v33 = vadd.f32 %v10404_v34, %v5012_v55  ;;  %v5052_v35 = vadd.f32 %v10414_v58, %v5016_v5  ;;  %v5056_v31 = vadd.f32 %v10428_v39, %v5020_v6  ;;  %v5060_v4 = vadd.f32 %v11751_v53, %v5024_v38  ;;  %v7552_v34 = vld [vmem:[%s11490_s8 + $0x40] sm:$0xff]   ;;  %v7553_v58 = vld [vmem:[%s11490_s8 + $0x48] sm:$0xff]   ;;  %v7555_v39 = vld [vmem:[%s11490_s8 + $0x58] sm:$0xff]  }
0x1857   :  { %v5080_v12 = vpack.c.bf16 %v5051_v43, %v5047_v50  ;;  %v5084_v27 = vpack.c.bf16 %v5059_v60, %v5055_v51  ;;  %v11756_v55 = vld [vmem:[#allocation17_spill] sm:$0xff] }
0x1858   :  { %v5081_v63 = vpack.c.bf16 %v5052_v35, %v5048_v33  ;;  %v5085_v49 = vpack.c.bf16 %v5060_v4, %v5056_v31  ;;  %v11758_v33 = vld [vmem:[#allocation20_spill] sm:$0xff]  ;;  %v11759_v53 = vld [vmem:[#allocation21_spill] sm:$0xff] }
0x185a   :  { %5360 = vmatprep.subr.bf16.mxu1 %v5081_v63 }
0x185b   :  { %5361 = vmatpush1.bf16.msra.mxu1 %v5080_v12  ;;  %v7559_v12 = vld [vmem:[%s11490_s8 + $0x78] sm:$0xff]  }
0x185c   :  { %5362 = vmatprep.subr.bf16.mxu1 %v5085_v49 }
0x185f   :  { %5363 = vmatpush1.bf16.msra.mxu1 %v5084_v27 }
0x1862   :  { %6975 = vmatmul.mubr.msk.bf16.vlgmr.msra.gmra.mrb[200].mxu1 %vm456_vm2, %v7552_v34 }
0x1863   :  { %5402 = vmatprep.mubr.bf16.mxu1 %v11632_v48 }
0x186a   :  { %6976 = vmatmul.mubr.msk.bf16.gmra.mrb[204].mxu1 %vm456_vm2, %v7553_v58 }
0x186b   :  { %5412 = vmatprep.mubr.bf16.mxu1 %v11632_v48 }
0x1872   :  { %6977 = vmatmul.mubr.msk.bf16.gmra.mrb[208].mxu1 %vm456_vm2, %v7554_v18 }
0x1873   :  { %5422 = vmatprep.mubr.bf16.mxu1 %v11632_v48 }
0x187a   :  { %6978 = vmatmul.mubr.msk.bf16.gmra.mrb[212].mxu1 %vm456_vm2, %v7555_v39 }
0x187b   :  { %5432 = vmatprep.mubr.bf16.mxu1 %v11632_v48 }
0x1882   :  { %6979 = vmatmul.mubr.msk.bf16.gmra.mrb[216].mxu1 %vm456_vm2, %v7556_v56 }
0x1883   :  { %5442 = vmatprep.mubr.bf16.mxu1 %v11632_v48 }
0x188a   :  { %6980 = vmatmul.mubr.msk.bf16.gmra.mrb[220].mxu1 %vm456_vm2, %v7557_v21 }
0x188b   :  { %v6157_v17 = vpop.f32.mrb[232].mxu0  ;;  %5452 = vmatprep.mubr.bf16.mxu1 %v11632_v48 }
0x188c   :  { %v6158_v42 = vadd.f32 %v6157_v17, %v10906_v23  ;;  %v6159_v13 = vpop.f32.mrb[233].mxu0 }
0x188d   :  { %v6160_v0 = vadd.f32 %v6159_v13, %v10906_v23  ;;  %v6161_v30 = vpop.f32.mrb[234].mxu0 }
0x188e   :  { %v6162_v47 = vadd.f32 %v6161_v30, %v10910_v57  ;;  %v6163_v40 = vpop.f32.mrb[235].mxu0  ;;  %v6229_v19 = vadd.f32 %v6158_v42, %v11752_v2 }
0x188f   :  { %v6164_v8 = vadd.f32 %v6163_v40, %v10910_v57  ;;  %v6230_v10 = vadd.f32 %v6160_v0, %v11754_v14 }
0x1890   :  { %v6233_v41 = vadd.f32 %v6162_v47, %v11753_v9 }
0x1891   :  { %v6234_v25 = vadd.f32 %v6164_v8, %v11755_v1 }
0x1892   :  { %v6253_v24 = vadd.f32 %v6233_v41, %v6229_v19  ;;  %6981 = vmatmul.mubr.msk.bf16.gmra.mrb[224].mxu1 %vm456_vm2, %v7558_v28 }
0x1893   :  { %v6262_v52 = vadd.f32 %v6234_v25, %v6230_v10  ;;  %v6167_v37 = vpop.f32.mrb[236].mxu0  ;;  %5462 = vmatprep.mubr.bf16.mxu1 %v11632_v48 }
0x1894   :  { %v6168_v62 = vadd.f32 %v6167_v37, %v10923_v22  ;;  %v6169_v15 = vpop.f32.mrb[237].mxu0 }
0x1895   :  { %v6170_v26 = vadd.f32 %v6169_v15, %v10923_v22  ;;  %v6171_v61 = vpop.f32.mrb[238].mxu0 }
0x1896   :  { %v6237_v5 = vadd.f32 %v6168_v62, %v11756_v55  ;;  %v6172_v6 = vadd.f32 %v6171_v61, %v10927_v45  ;;  %v6173_v38 = vpop.f32.mrb[239].mxu0 }
0x1897   :  { %v6238_v50 = vadd.f32 %v6170_v26, %v11757_v46  ;;  %v6174_v43 = vadd.f32 %v6173_v38, %v10927_v45 }
0x1898   :  { %v6254_v36 = vadd.f32 %v6253_v24, %v6237_v5  ;;  %v6241_v35 = vadd.f32 %v6172_v6, %v11758_v33 }
0x1899   :  { %v6263_v31 = vadd.f32 %v6262_v52, %v6238_v50  ;;  %v6242_v4 = vadd.f32 %v6174_v43, %v11759_v53 }
0x189a   :  { %v6255_v63 = vadd.f32 %v6254_v36, %v6241_v35  ;;  %6982 = vmatmul.mubr.msk.bf16.gmra.mrb[228].mxu1 %vm456_vm2, %v7559_v12 }
0x189b   :  { %v6264_v51 = vadd.f32 %v6263_v31, %v6242_v4  ;;  %6208 = vmatprep.mubr.bf16.mxu1 %v11632_v48 }
0x189c   :  { %v6256_v60 = vrot.slane %v6255_v63, 4 }
0x189d   :  { %v6265_v49 = vrot.slane %v6264_v51, 4 }
0x189e   :  { %v6257_v27 = vadd.f32 %v6256_v60, %v6255_v63  ;;  %v10943_v60 = vpop.permute.xlu1 %6396 }
0x189f   :  { %v6266_v34 = vadd.f32 %v6265_v49, %v6264_v51  ;;  %v10941_v51 = vpop.permute.xlu0 %6391 }
0x18a0   :  { %v6258_v58 = vrot.slane %v6257_v27, 2 }
0x18a1   :  { %v6267_v18 = vrot.slane %v6266_v34, 2 }
0x18a2   :  { %v6259_v39 = vadd.f32 %v6258_v58, %v6257_v27 }
0x18a3   :  { %v6268_v56 = vadd.f32 %v6267_v18, %v6266_v34  ;;  %v10945_v18 = vpop.permute.xlu0 %6427 }
0x18a4   :  { %v6260_v21 = vrot.slane %v6259_v39, 1  ;;  %11760 = vst [vmem:[#allocation8_spill] sm:$0xff] %v10945_v18 }
0x18a5   :  { %v6269_v17 = vrot.slane %v6268_v56, 1 }
0x18a6   :  { %v6261_v42 = vadd.f32 %v6260_v21, %v6259_v39  ;;  %v10947_v39 = vpop.permute.xlu1 %6432 }
0x18a7   :  { %v6270_v13 = vadd.f32 %v6269_v17, %v6268_v56  ;;  %11761 = vst [vmem:[#allocation7_spill] sm:$0xff] %v10947_v39  ;;  %v10949_v56 = vpop.permute.xlu0 %6401 }
0x18a8   :  { %v6289_v0 = vmul.f32 0.03125, %v6261_v42  ;;  %11762 = vst [vmem:[#allocation6_spill] sm:$0xff] %v10949_v56 }
0x18a9   :  { %v6290_v30 = vmul.f32 0.03125, %v6270_v13 }
0x18aa   :  { %v6293_v47 = vsub.f32 %v6229_v19, %v6289_v0  ;;  %v6297_v40 = vsub.f32 %v6233_v41, %v6289_v0  ;;  %v6301_v8 = vsub.f32 %v6237_v5, %v6289_v0  ;;  %v6305_v2 = vsub.f32 %v6241_v35, %v6289_v0  ;;  %v10951_v21 = vpop.permute.xlu1 %6406 }
0x18ab   :  { %v6294_v9 = vsub.f32 %v6230_v10, %v6290_v30  ;;  %v6298_v14 = vsub.f32 %v6234_v25, %v6290_v30  ;;  %v6302_v1 = vsub.f32 %v6238_v50, %v6290_v30  ;;  %v6306_v24 = vsub.f32 %v6242_v4, %v6290_v30 }
0x18ac   :  { %v6309_v28 = vmul.f32 %v6293_v47, %v6293_v47  ;;  %v6313_v52 = vmul.f32 %v6297_v40, %v6297_v40  ;;  %v6317_v15 = vmul.f32 %v6301_v8, %v6301_v8  ;;  %v6321_v6 = vmul.f32 %v6305_v2, %v6305_v2 }
0x18ad   :  { %v6310_v37 = vmul.f32 %v6294_v9, %v6294_v9  ;;  %v6314_v62 = vmul.f32 %v6298_v14, %v6298_v14  ;;  %v6318_v61 = vmul.f32 %v6302_v1, %v6302_v1  ;;  %v6322_v46 = vmul.f32 %v6306_v24, %v6306_v24 }
0x18ae   :  { %v6325_v26 = vadd.f32 %v6313_v52, %v6309_v28 }
0x18af   :  { %v6334_v55 = vadd.f32 %v6314_v62, %v6310_v37 }
0x18b0   :  { %v6326_v38 = vadd.f32 %v6325_v26, %v6317_v15 }
0x18b1   :  { %v6335_v43 = vadd.f32 %v6334_v55, %v6318_v61 }
0x18b2   :  { %v6327_v19 = vadd.f32 %v6326_v38, %v6321_v6  ;;  %v10957_v38 = vpop.permute.xlu0 %6437 }
0x18b3   :  { %v6336_v41 = vadd.f32 %v6335_v43, %v6322_v46  ;;  %11763 = vst [vmem:[#allocation9_spill] sm:$0xff] %v10957_v38  ;;  %v10959_v46 = vpop.permute.xlu1 %6442 }
0x18b4   :  { %v6328_v5 = vrot.slane %v6327_v19, 4  ;;  %11764 = vst [vmem:[#allocation10_spill] sm:$0xff] %v10959_v46 }
0x18b5   :  { %v6337_v36 = vrot.slane %v6336_v41, 4 }
0x18b6   :  { %v6329_v10 = vadd.f32 %v6328_v5, %v6327_v19 }
0x18b7   :  { %v6338_v25 = vadd.f32 %v6337_v36, %v6336_v41 }
0x18b8   :  { %v6330_v50 = vrot.slane %v6329_v10, 2 }
0x18b9   :  { %v6339_v33 = vrot.slane %v6338_v25, 2 }
0x18ba   :  { %v6331_v35 = vadd.f32 %v6330_v50, %v6329_v10 }
0x18bb   :  { %v6340_v31 = vadd.f32 %v6339_v33, %v6338_v25  ;;  %v7092_v33 = vld [vmem:[%s11498_s14] sm:$0xff]  }
0x18bc   :  { %v6332_v53 = vrot.slane %v6331_v35, 1 }
0x18bd   :  { %v6341_v4 = vrot.slane %v6340_v31, 1 }
0x18be   :  { %v6333_v63 = vadd.f32 %v6332_v53, %v6331_v35  ;;  %v7093_v35 = vld [vmem:[%s11498_s14 + $0x8] sm:$0xff]  }
0x18bf   :  { %v6342_v12 = vadd.f32 %v6341_v4, %v6340_v31  ;;  %v11765_v53 = vld [vmem:[#allocation23_spill] sm:$0xff] }
0x18c0   :  { %v6361_v49 = vmul.f32 0.03125, %v6333_v63 }
0x18c1   :  { %v6362_v27 = vmul.f32 0.03125, %v6342_v12 }
0x18c2   :  { %v6365_v34 = vadd.f32 1e-06, %v6361_v49 }
0x18c3   :  { %v6366_v58 = vadd.f32 1e-06, %v6362_v27 }
0x18c4   :  { %7462 = vrsqrt.f32 %v6365_v34  ;;  %v11766_v34 = vld [vmem:[#allocation24_spill] sm:$0xff] }
0x18c5   :  { %7464 = vrsqrt.f32 %v6366_v58 }
0x18ce   :  { %v7463_v17 = vpop.eup %7462 }
0x18cf   :  { %v7465_v42 = vpop.eup %7464  ;;  %v6385_v13 = vmul.f32 %v7463_v17, %v6305_v2  ;;  %v6373_v0 = vmul.f32 %v7463_v17, %v6293_v47  ;;  %v6377_v30 = vmul.f32 %v7463_v17, %v6297_v40  ;;  %v6381_v28 = vmul.f32 %v7463_v17, %v6301_v8 }
0x18d0   :  { %v6386_v52 = vmul.f32 %v7465_v42, %v6306_v24  ;;  %v6374_v37 = vmul.f32 %v7465_v42, %v6294_v9  ;;  %v6378_v62 = vmul.f32 %v7465_v42, %v6298_v14  ;;  %v6382_v15 = vmul.f32 %v7465_v42, %v6302_v1 }
0x18d1   :  { %v6421_v26 = vmul.f32 %v10951_v21, %v6385_v13  ;;  %v6409_v61 = vmul.f32 %v10941_v51, %v6373_v0  ;;  %v6413_v55 = vmul.f32 %v10943_v60, %v6377_v30  ;;  %v6417_v6 = vmul.f32 %v10949_v56, %v6381_v28 }
0x18d2   :  { %v6410_v47 = vmul.f32 %v10941_v51, %v6374_v37  ;;  %v6414_v40 = vmul.f32 %v10943_v60, %v6378_v62  ;;  %v6418_v8 = vmul.f32 %v10949_v56, %v6382_v15  ;;  %v6422_v2 = vmul.f32 %v10951_v21, %v6386_v52 }
0x18d3   :  { %v6445_v9 = vadd.f32 %v10945_v18, %v6409_v61  ;;  %v6449_v14 = vadd.f32 %v10947_v39, %v6413_v55  ;;  %v6453_v1 = vadd.f32 %v10957_v38, %v6417_v6  ;;  %v6457_v24 = vadd.f32 %v10959_v46, %v6421_v26 }
0x18d4   :  { %v6446_v43 = vadd.f32 %v10945_v18, %v6410_v47  ;;  %v6450_v19 = vadd.f32 %v10947_v39, %v6414_v40  ;;  %v6454_v41 = vadd.f32 %v10957_v38, %v6418_v8  ;;  %v6458_v5 = vadd.f32 %v10959_v46, %v6422_v2  ;;  %v11767_v47 = vld [vmem:[#allocation25_spill] sm:$0xff] }
0x18d5   :  { %v6465_v36 = vpack.c.bf16 %v6449_v14, %v6445_v9  ;;  %v6469_v10 = vpack.c.bf16 %v6457_v24, %v6453_v1 }
0x18d6   :  { %v6466_v25 = vpack.c.bf16 %v6450_v19, %v6446_v43  ;;  %v6470_v50 = vpack.c.bf16 %v6458_v5, %v6454_v41  ;;  %v11768_v41 = vld [vmem:[#allocation26_spill] sm:$0xff] }
0x18d8   :  { %6513 = vmatprep.subr.bf16.mxu0 %v6466_v25 }
0x18d9   :  { %6514 = vmatpush1.bf16.msra.mxu0 %v6465_v36 }
0x18da   :  { %6515 = vmatprep.subr.bf16.mxu0 %v6470_v50 }
0x18dd   :  { %6516 = vmatpush1.bf16.msra.mxu0 %v6469_v10 }
0x18e0   :  { %6995 = vmatmul.mubr.msk.bf16.vlgmr.msra.gmra.mrb[240].mxu0 %vm456_vm2, %v7092_v33 }
0x18e1   :  { %6555 = vmatprep.mubr.bf16.mxu0 %v11632_v48 }
0x18e8   :  { %6996 = vmatmul.mubr.msk.bf16.gmra.mrb[244].mxu0 %vm456_vm2, %v7093_v35 }
0x1935   :  { %v5394_v31 = vpop.f32.mrb[200].mxu1 }
0x1936   :  { %v5395_v4 = vadd.f32 %v5394_v31, %v11765_v53  ;;  %v5396_v63 = vpop.f32.mrb[201].mxu1 }
0x1937   :  { %v5397_v12 = vadd.f32 %v5396_v63, %v11765_v53  ;;  %v5398_v49 = vpop.f32.mrb[202].mxu1 }
0x1938   :  { %v5539_v27 = vmul.f32 0.044715, %v5395_v4  ;;  %v5399_v58 = vadd.f32 %v5398_v49, %v11766_v34  ;;  %v5400_v17 = vpop.f32.mrb[203].mxu1 }
0x1939   :  { %v5540_v42 = vmul.f32 0.044715, %v5397_v12  ;;  %v10986_v13 = vadd.f32 %v5400_v17, %v11766_v34 }
0x193a   :  { %v5603_v0 = vmul.f32 %v5539_v27, %v5395_v4  ;;  %v5543_v30 = vmul.f32 0.044715, %v5399_v58 }
0x193b   :  { %v5604_v28 = vmul.f32 %v5540_v42, %v5397_v12  ;;  %v5544_v52 = vmul.f32 0.044715, %v10986_v13 }
0x193c   :  { %v5667_v37 = vmul.f32 %v5603_v0, %v5395_v4  ;;  %v5607_v62 = vmul.f32 %v5543_v30, %v5399_v58 }
0x193d   :  { %v5668_v15 = vmul.f32 %v5604_v28, %v5397_v12  ;;  %v5608_v26 = vmul.f32 %v5544_v52, %v10986_v13  ;;  %v5404_v61 = vpop.f32.mrb[204].mxu1 }
0x193e   :  { %v5731_v55 = vadd.f32 %v5667_v37, %v5395_v4  ;;  %v5671_v6 = vmul.f32 %v5607_v62, %v5399_v58  ;;  %v10991_v40 = vadd.f32 %v5404_v61, %v11767_v47  ;;  %v5406_v8 = vpop.f32.mrb[205].mxu1  ;;  %v11769_v37 = vld [vmem:[#allocation28_spill] sm:$0xff] }
0x193f   :  { %v5672_v2 = vmul.f32 %v5608_v26, %v10986_v13  ;;  %v5407_v9 = vadd.f32 %v5406_v8, %v11767_v47  ;;  %v5408_v14 = vpop.f32.mrb[206].mxu1  ;;  %v5732_v1 = vadd.f32 %v5668_v15, %v5397_v12  ;;  %v5475_v26 = vmul.f32 0.5, %v5395_v4 }
0x1940   :  { %v5795_v24 = vmul.f32 0.7978846, %v5731_v55  ;;  %v5735_v43 = vadd.f32 %v5671_v6, %v5399_v58  ;;  %v5547_v19 = vmul.f32 0.044715, %v10991_v40  ;;  %v10997_v5 = vadd.f32 %v5408_v14, %v11768_v41  ;;  %v5410_v36 = vpop.f32.mrb[207].mxu1 }
0x1941   :  { %v5548_v10 = vmul.f32 0.044715, %v5407_v9  ;;  %v5411_v25 = vadd.f32 %v5410_v36, %v11768_v41  ;;  %v5736_v50 = vadd.f32 %v5672_v2, %v10986_v13  ;;  %v5796_v33 = vmul.f32 0.7978846, %v5732_v1 }
0x1942   :  { %7466 = vtanh.f32 %v5795_v24  ;;  %v5799_v35 = vmul.f32 0.7978846, %v5735_v43  ;;  %v5611_v31 = vmul.f32 %v5547_v19, %v10991_v40  ;;  %v5551_v53 = vmul.f32 0.044715, %v10997_v5  ;;  %v11770_v24 = vld [vmem:[#allocation12_spill] sm:$0xff] }
0x1943   :  { %v5612_v63 = vmul.f32 %v5548_v10, %v5407_v9  ;;  %v5552_v49 = vmul.f32 0.044715, %v5411_v25  ;;  %v5800_v27 = vmul.f32 0.7978846, %v5736_v50  ;;  %7468 = vtanh.f32 %v5796_v33 }
0x1944   :  { %7470 = vtanh.f32 %v5799_v35  ;;  %v5675_v34 = vmul.f32 %v5611_v31, %v10991_v40  ;;  %v5615_v17 = vmul.f32 %v5551_v53, %v10997_v5  ;;  %v5476_v47 = vmul.f32 0.5, %v5397_v12 }
0x1945   :  { %v5676_v42 = vmul.f32 %v5612_v63, %v5407_v9  ;;  %v5616_v0 = vmul.f32 %v5552_v49, %v5411_v25  ;;  %v5414_v30 = vpop.f32.mrb[208].mxu1  ;;  %7472 = vtanh.f32 %v5800_v27  ;;  %v5479_v4 = vmul.f32 0.5, %v5399_v58 }
0x1946   :  { %v5739_v28 = vadd.f32 %v5675_v34, %v10991_v40  ;;  %v5679_v52 = vmul.f32 %v5615_v17, %v10997_v5  ;;  %v11008_v62 = vadd.f32 %v5414_v30, %v11769_v37  ;;  %v5416_v15 = vpop.f32.mrb[209].mxu1  ;;  %v5480_v35 = vmul.f32 0.5, %v10986_v13 }
0x1947   :  { %v5680_v61 = vmul.f32 %v5616_v0, %v5411_v25  ;;  %v11011_v55 = vadd.f32 %v5416_v15, %v11769_v37  ;;  %v5418_v6 = vpop.f32.mrb[210].mxu1  ;;  %v5740_v8 = vadd.f32 %v5676_v42, %v5407_v9  ;;  %v11024_v31 = vmul.f32 0.5, %v5407_v9 }
0x1948   :  { %v5803_v2 = vmul.f32 0.7978846, %v5739_v28  ;;  %v5743_v14 = vadd.f32 %v5679_v52, %v10997_v5  ;;  %v5555_v1 = vmul.f32 0.044715, %v11008_v62  ;;  %v11016_v43 = vadd.f32 %v5418_v6, %v11770_v24  ;;  %v5420_v19 = vpop.f32.mrb[211].mxu1  ;;  %v11771_v52 = vld [vmem:[#allocation27_spill] sm:$0xff] }
0x1949   :  { %v11019_v41 = vadd.f32 %v5420_v19, %v11770_v24  ;;  %v5744_v36 = vadd.f32 %v5680_v61, %v5411_v25  ;;  %v5804_v10 = vmul.f32 0.7978846, %v5740_v8  ;;  %v5556_v58 = vmul.f32 0.044715, %v11011_v55 }
0x194a   :  { %7474 = vtanh.f32 %v5803_v2  ;;  %v5807_v50 = vmul.f32 0.7978846, %v5743_v14  ;;  %v5619_v12 = vmul.f32 %v5555_v1, %v11008_v62  ;;  %v5559_v33 = vmul.f32 0.044715, %v11016_v43 }
0x194b   :  { %v5808_v53 = vmul.f32 0.7978846, %v5744_v36  ;;  %7476 = vtanh.f32 %v5804_v10  ;;  %v5560_v17 = vmul.f32 0.044715, %v11019_v41  ;;  %v11030_v30 = vmul.f32 0.5, %v5411_v25  ;;  %v11772_v10 = vld [vmem:[#allocation29_spill] sm:$0xff] }
0x194c   :  { %v7467_v63 = vpop.eup %7466  ;;  %7478 = vtanh.f32 %v5807_v50  ;;  %v5683_v49 = vmul.f32 %v5619_v12, %v11008_v62  ;;  %v5623_v27 = vmul.f32 %v5559_v33, %v11016_v43  ;;  %v11038_v61 = vmul.f32 0.5, %v10991_v40 }
0x194d   :  { %v7469_v34 = vpop.eup %7468  ;;  %v5424_v42 = vpop.f32.mrb[212].mxu1  ;;  %v5923_v0 = vadd.f32 1.0, %v7467_v63  ;;  %7480 = vtanh.f32 %v5808_v53  ;;  %v11044_v1 = vmul.f32 0.5, %v10997_v5  ;;  %v5620_v24 = vmul.f32 %v5556_v58, %v11011_v55 }
0x194e   :  { %v7471_v13 = vpop.eup %7470  ;;  %v5747_v9 = vadd.f32 %v5683_v49, %v11008_v62  ;;  %v5687_v28 = vmul.f32 %v5623_v27, %v11016_v43  ;;  %v11035_v37 = vadd.f32 %v5424_v42, %v11771_v52  ;;  %v5426_v15 = vpop.f32.mrb[213].mxu1  ;;  %v5924_v25 = vadd.f32 1.0, %v7469_v34 }
0x194f   :  { %v7473_v6 = vpop.eup %7472  ;;  %v11041_v8 = vadd.f32 %v5426_v15, %v11771_v52  ;;  %v5428_v2 = vpop.f32.mrb[214].mxu1  ;;  %v5927_v14 = vadd.f32 1.0, %v7471_v13  ;;  %v5624_v33 = vmul.f32 %v5560_v17, %v11019_v41  ;;  %v5987_v63 = vmul.f32 %v5923_v0, %v5475_v26 }
0x1950   :  { %v5751_v19 = vadd.f32 %v5687_v28, %v11016_v43  ;;  %v5563_v36 = vmul.f32 0.044715, %v11035_v37  ;;  %v11050_v50 = vadd.f32 %v5428_v2, %v11772_v10  ;;  %v5430_v40 = vpop.f32.mrb[215].mxu1  ;;  %v5811_v12 = vmul.f32 0.7978846, %v5747_v9 }
0x1951   :  { %v5928_v53 = vadd.f32 1.0, %v7473_v6  ;;  %v5564_v5 = vmul.f32 0.044715, %v11041_v8  ;;  %v11057_v58 = vadd.f32 %v5430_v40, %v11772_v10  ;;  %v5988_v42 = vmul.f32 %v5924_v25, %v5476_v47 }
0x1952   :  { %v5627_v49 = vmul.f32 %v5563_v36, %v11035_v37  ;;  %v5567_v27 = vmul.f32 0.044715, %v11050_v50  ;;  %v5815_v34 = vmul.f32 0.7978846, %v5751_v19  ;;  %v5991_v28 = vmul.f32 %v5927_v14, %v5479_v4  ;;  %v11773_v14 = vld [vmem:[#allocation30_spill] sm:$0xff] }
0x1953   :  { %v5992_v13 = vmul.f32 %v5928_v53, %v5480_v35  ;;  %v5684_v9 = vmul.f32 %v5620_v24, %v11011_v55  ;;  %v11063_v0 = vmul.f32 0.5, %v11011_v55  ;;  %7482 = vtanh.f32 %v5811_v12 }
0x1954   :  { %v7475_v52 = vpop.eup %7474  ;;  %v5691_v17 = vmul.f32 %v5627_v49, %v11035_v37  ;;  %v5631_v26 = vmul.f32 %v5567_v27, %v11050_v50  ;;  %v5688_v6 = vmul.f32 %v5624_v33, %v11019_v41  ;;  %v6056_v19 = vpack.c.bf16 %v5991_v28, %v5987_v63  ;;  %v11774_v27 = vld [vmem:[#allocation5_spill] sm:$0xff] }
0x1955   :  { %v7477_v15 = vpop.eup %7476  ;;  %v5434_v2 = vpop.f32.mrb[216].mxu1  ;;  %v6057_v36 = vpack.c.bf16 %v5992_v13, %v5988_v42  ;;  %v5628_v35 = vmul.f32 %v5564_v5, %v11041_v8  ;;  %7484 = vtanh.f32 %v5815_v34  ;;  %v5568_v12 = vmul.f32 0.044715, %v11057_v58 }
0x1956   :  { %v7479_v47 = vpop.eup %7478  ;;  %v5755_v4 = vadd.f32 %v5691_v17, %v11035_v37  ;;  %v5695_v25 = vmul.f32 %v5631_v26, %v11050_v50  ;;  %v11070_v24 = vadd.f32 %v5434_v2, %v11773_v14  ;;  %v5436_v10 = vpop.f32.mrb[217].mxu1  ;;  %v5932_v63 = vadd.f32 1.0, %v7477_v15 }
0x1957   :  { %v7481_v40 = vpop.eup %7480  ;;  %v11074_v33 = vadd.f32 %v5436_v10, %v11773_v14  ;;  %6176 = vmatprep.subr.bf16.mxu1 %v6057_v36  ;;  %v5438_v53 = vpop.f32.mrb[218].mxu1  ;;  %v5931_v13 = vadd.f32 1.0, %v7475_v52  ;;  %v5935_v28 = vadd.f32 1.0, %v7479_v47  ;;  %v11088_v10 = vmul.f32 0.5, %v11019_v41 }
0x1958   :  { %v5571_v49 = vmul.f32 0.044715, %v11070_v24  ;;  %v11078_v5 = vadd.f32 %v5438_v53, %v11774_v27  ;;  %6177 = vmatpush1.bf16.msra.mxu1 %v6056_v19  ;;  %v5440_v42 = vpop.f32.mrb[219].mxu1  ;;  %v5819_v17 = vmul.f32 0.7978846, %v5755_v4  ;;  %v5759_v34 = vadd.f32 %v5695_v25, %v11050_v50 }
0x1959   :  { %v11082_v26 = vadd.f32 %v5440_v42, %v11774_v27  ;;  %v5936_v2 = vadd.f32 1.0, %v7481_v40  ;;  %v5572_v15 = vmul.f32 0.044715, %v11074_v33  ;;  %v5632_v19 = vmul.f32 %v5568_v12, %v11057_v58 }
0x195a   :  { %v5635_v36 = vmul.f32 %v5571_v49, %v11070_v24  ;;  %v5575_v14 = vmul.f32 0.044715, %v11078_v5  ;;  %v5996_v47 = vmul.f32 %v5932_v63, %v11024_v31  ;;  %v5995_v53 = vmul.f32 %v5931_v13, %v11038_v61  ;;  %v11775_v63 = vld [vmem:[#allocation4_spill] sm:$0xff] }
0x195b   :  { %v5576_v52 = vmul.f32 0.044715, %v11082_v26  ;;  %v6000_v4 = vmul.f32 %v5936_v2, %v11030_v30  ;;  %v5999_v49 = vmul.f32 %v5935_v28, %v11044_v1  ;;  %7486 = vtanh.f32 %v5819_v17 }
0x195c   :  { %v5699_v25 = vmul.f32 %v5635_v36, %v11070_v24  ;;  %v5639_v40 = vmul.f32 %v5575_v14, %v11078_v5  ;;  %v5823_v27 = vmul.f32 0.7978846, %v5759_v34  ;;  %v5748_v12 = vadd.f32 %v5684_v9, %v11011_v55 }
0x195d   :  { %v5444_v42 = vpop.f32.mrb[220].mxu1  ;;  %v6061_v46 = vpack.c.bf16 %v6000_v4, %v5996_v47  ;;  %v5636_v38 = vmul.f32 %v5572_v15, %v11074_v33  ;;  %v6060_v36 = vpack.c.bf16 %v5999_v49, %v5995_v53  ;;  %v7483_v14 = vpop.eup %7482  ;;  %v5640_v61 = vmul.f32 %v5576_v52, %v11082_v26  ;;  %v11776_v15 = vld [vmem:[#allocation13_spill] sm:$0xff] }
0x195e   :  { %v5703_v31 = vmul.f32 %v5639_v40, %v11078_v5  ;;  %v11102_v30 = vadd.f32 %v5444_v42, %v11775_v63  ;;  %v5446_v2 = vpop.f32.mrb[221].mxu1  ;;  %v5752_v28 = vadd.f32 %v5688_v6, %v11019_v41  ;;  %v5812_v55 = vmul.f32 0.7978846, %v5748_v12 }
0x195f   :  { %v11106_v1 = vadd.f32 %v5446_v2, %v11775_v63  ;;  %6178 = vmatprep.subr.bf16.mxu1 %v6061_v46  ;;  %v5448_v13 = vpop.f32.mrb[222].mxu1  ;;  %v5763_v9 = vadd.f32 %v5699_v25, %v11070_v24  ;;  %v7485_v52 = vpop.eup %7484  ;;  %v5692_v40 = vmul.f32 %v5628_v35, %v11041_v8  ;;  %v5696_v46 = vmul.f32 %v5632_v19, %v11057_v58 }
0x1960   :  { %v5767_v17 = vadd.f32 %v5703_v31, %v11078_v5  ;;  %v5579_v34 = vmul.f32 0.044715, %v11102_v30  ;;  %v11113_v47 = vadd.f32 %v5448_v13, %v11776_v15  ;;  %6179 = vmatpush1.bf16.msra.mxu1 %v6060_v36  ;;  %v5450_v4 = vpop.f32.mrb[223].mxu1  ;;  %v5816_v53 = vmul.f32 0.7978846, %v5752_v28 }
0x1961   :  { %7488 = vtanh.f32 %v5812_v55  ;;  %v5580_v6 = vmul.f32 0.044715, %v11106_v1  ;;  %v11121_v49 = vmul.f32 %v5636_v38, %v11074_v33  ;;  %v11124_v42 = vmul.f32 %v5640_v61, %v11082_v26 }
0x1962   :  { %7490 = vtanh.f32 %v5823_v27  ;;  %v5643_v41 = vmul.f32 %v5579_v34, %v11102_v30  ;;  %v5583_v25 = vmul.f32 0.044715, %v11113_v47  ;;  %v11127_v12 = vadd.f32 %v5450_v4, %v11776_v15  ;;  %v11777_v34 = vld [vmem:[#allocation3_spill] sm:$0xff] }
0x1963   :  { %7492 = vtanh.f32 %v5816_v53  ;;  %v5827_v35 = vmul.f32 0.7978846, %v5763_v9  ;;  %v5831_v19 = vmul.f32 0.7978846, %v5767_v17  ;;  %v5491_v2 = vmul.f32 0.5, %v11008_v62 }
0x1964   :  { %v5707_v27 = vmul.f32 %v5643_v41, %v11102_v30  ;;  %v5647_v31 = vmul.f32 %v5583_v25, %v11113_v47  ;;  %v5495_v36 = vmul.f32 0.5, %v11016_v43  ;;  %v5939_v38 = vadd.f32 1.0, %v7483_v14 }
0x1965   :  { %v5454_v63 = vpop.f32.mrb[224].mxu1  ;;  %v5943_v13 = vadd.f32 1.0, %v7485_v52  ;;  %v5644_v28 = vmul.f32 %v5580_v6, %v11106_v1  ;;  %v7487_v15 = vpop.eup %7486  ;;  %v5584_v4 = vmul.f32 0.044715, %v11127_v12  ;;  %7494 = vtanh.f32 %v5827_v35  ;;  %v11778_v6 = vld [vmem:[#allocation2_spill] sm:$0xff] }
0x1966   :  { %v5771_v61 = vadd.f32 %v5707_v27, %v11102_v30  ;;  %v5711_v55 = vmul.f32 %v5647_v31, %v11113_v47  ;;  %v11137_v9 = vadd.f32 %v5454_v63, %v11777_v34  ;;  %v5456_v17 = vpop.f32.mrb[225].mxu1  ;;  %v11143_v43 = vmul.f32 %v5939_v38, %v5491_v2 }
0x1967   :  { %v11141_v53 = vadd.f32 %v5456_v17, %v11777_v34  ;;  %v5458_v62 = vpop.f32.mrb[226].mxu1  ;;  %v11145_v14 = vmul.f32 %v5943_v13, %v5495_v36  ;;  %7496 = vtanh.f32 %v5831_v19  ;;  %v11158_v2 = vmul.f32 %v5644_v28, %v11106_v1 }
0x1968   :  { %v5775_v52 = vadd.f32 %v5711_v55, %v11113_v47  ;;  %v5587_v41 = vmul.f32 0.044715, %v11137_v9  ;;  %v11150_v25 = vadd.f32 %v5458_v62, %v11778_v6  ;;  %v5460_v27 = vpop.f32.mrb[227].mxu1  ;;  %v5835_v31 = vmul.f32 0.7978846, %v5771_v61 }
0x1969   :  { %v6064_v63 = vpack.c.bf16 %v11145_v14, %v11143_v43  ;;  %v11155_v34 = vadd.f32 %v5460_v27, %v11778_v6  ;;  %v5588_v36 = vmul.f32 0.044715, %v11141_v53  ;;  %v5648_v19 = vmul.f32 %v5584_v4, %v11127_v12 }
0x196a   :  { %v5651_v35 = vmul.f32 %v5587_v41, %v11137_v9  ;;  %v5591_v38 = vmul.f32 0.044715, %v11150_v25  ;;  %v5839_v55 = vmul.f32 0.7978846, %v5775_v52  ;;  %v5756_v61 = vadd.f32 %v5692_v40, %v11041_v8 }
0x196b   :  { %v7489_v13 = vpop.eup %7488  ;;  %v5760_v17 = vadd.f32 %v5696_v46, %v11057_v58  ;;  %v5592_v41 = vmul.f32 0.044715, %v11155_v34  ;;  %7498 = vtanh.f32 %v5835_v31  ;;  %v11170_v39 = vmul.f32 0.5, %v11041_v8 }
0x196c   :  { %v7491_v62 = vpop.eup %7490  ;;  %v5715_v43 = vmul.f32 %v5651_v35, %v11137_v9  ;;  %v5940_v14 = vadd.f32 1.0, %v7489_v13  ;;  %v5655_v28 = vmul.f32 %v5591_v38, %v11150_v25  ;;  %v5820_v52 = vmul.f32 0.7978846, %v5756_v61 }
0x196d   :  { %v7493_v6 = vpop.eup %7492  ;;  %v5464_v27 = vpop.f32.mrb[228].mxu1  ;;  %v5824_v4 = vmul.f32 0.7978846, %v5760_v17  ;;  %v5652_v46 = vmul.f32 %v5588_v36, %v11141_v53  ;;  %v11176_v38 = vmul.f32 %v5648_v19, %v11127_v12  ;;  %v11182_v31 = vmul.f32 0.5, %v11057_v58 }
0x196e   :  { %v5779_v40 = vadd.f32 %v5715_v43, %v11137_v9  ;;  %v5944_v18 = vadd.f32 1.0, %v7493_v6  ;;  %v5719_v35 = vmul.f32 %v5655_v28, %v11150_v25  ;;  %v5466_v13 = vpop.f32.mrb[229].mxu1  ;;  %v11179_v56 = vadd.f32 %v5464_v27, %v10717_v7 }
0x196f   :  { %7500 = vtanh.f32 %v5820_v52  ;;  %v5468_v8 = vpop.f32.mrb[230].mxu1  ;;  %v6004_v61 = vmul.f32 %v5940_v14, %v11063_v0  ;;  %v5656_v19 = vmul.f32 %v5592_v41, %v11155_v34  ;;  %v7495_v58 = vpop.eup %7494  ;;  %v11193_v52 = vmul.f32 %v5652_v46, %v11141_v53 }
0x1970   :  { %v6008_v17 = vmul.f32 %v5944_v18, %v11088_v10  ;;  %v5783_v36 = vadd.f32 %v5719_v35, %v11150_v25  ;;  %7502 = vtanh.f32 %v5824_v4  ;;  %v5470_v43 = vpop.f32.mrb[231].mxu1  ;;  %v5843_v28 = vmul.f32 0.7978846, %v5779_v40 }
0x1971   :  { %v5595_v6 = vmul.f32 0.044715, %v11179_v56  ;;  %v11190_v27 = vadd.f32 %v5468_v8, %v10731_v54  ;;  %7504 = vtanh.f32 %v5839_v55  ;;  %v7497_v18 = vpop.eup %7496  ;;  %v11197_v4 = vadd.f32 %v5466_v13, %v10717_v7 }
0x1972   :  { %v6065_v0 = vpack.c.bf16 %v6008_v17, %v6004_v61  ;;  %v5847_v14 = vmul.f32 0.7978846, %v5783_v36  ;;  %v5947_v40 = vadd.f32 1.0, %v7487_v15  ;;  %v5499_v35 = vmul.f32 0.5, %v11035_v37 }
0x1973   :  { %v5659_v10 = vmul.f32 %v5595_v6, %v11179_v56  ;;  %v5599_v41 = vmul.f32 0.044715, %v11190_v27  ;;  %v5503_v8 = vmul.f32 0.5, %v11050_v50  ;;  %v5951_v55 = vadd.f32 1.0, %v7491_v62 }
0x1974   :  { %6180 = vmatprep.subr.bf16.mxu1 %v6065_v0  ;;  %v11203_v46 = vadd.f32 %v5470_v43, %v10731_v54  ;;  %7506 = vtanh.f32 %v5843_v28  ;;  %v5720_v61 = vmul.f32 %v5656_v19, %v11155_v34  ;;  %v6011_v13 = vmul.f32 %v5947_v40, %v5499_v35 }
0x1975   :  { %6181 = vmatpush1.bf16.msra.mxu1 %v6064_v63  ;;  %v5723_v17 = vmul.f32 %v5659_v10, %v11179_v56  ;;  %v5663_v7 = vmul.f32 %v5599_v41, %v11190_v27  ;;  %7508 = vtanh.f32 %v5847_v14  ;;  %v6015_v15 = vmul.f32 %v5951_v55, %v5503_v8  ;;  %v7499_v36 = vpop.eup %7498 }
0x1976   :  { %v5764_v37 = vadd.f32 %v11121_v49, %v11074_v33  ;;  %v5596_v54 = vmul.f32 0.044715, %v11197_v4  ;;  %v5768_v63 = vadd.f32 %v11124_v42, %v11082_v26  ;;  %v5600_v28 = vmul.f32 0.044715, %v11203_v46 }
0x1977   :  { %v5787_v50 = vadd.f32 %v5723_v17, %v11179_v56  ;;  %v5727_v62 = vmul.f32 %v5663_v7, %v11190_v27  ;;  %v6068_v43 = vpack.c.bf16 %v6015_v15, %v6011_v13  ;;  %v5507_v6 = vmul.f32 0.5, %v11070_v24 }
0x1978   :  { %v5828_v19 = vmul.f32 0.7978846, %v5764_v37  ;;  %v5832_v10 = vmul.f32 0.7978846, %v5768_v63  ;;  %v5955_v41 = vadd.f32 1.0, %v7495_v58  ;;  %v5511_v8 = vmul.f32 0.5, %v11078_v5 }
0x1979   :  { %v7501_v0 = vpop.eup %7500  ;;  %v5851_v14 = vmul.f32 0.7978846, %v5787_v50  ;;  %v5791_v49 = vadd.f32 %v5727_v62, %v11190_v27  ;;  %v5959_v55 = vadd.f32 1.0, %v7497_v18  ;;  %v5660_v42 = vmul.f32 %v5596_v54, %v11197_v4 }
0x197a   :  { %v7503_v40 = vpop.eup %7502  ;;  %v5948_v35 = vadd.f32 1.0, %v7501_v0  ;;  %7510 = vtanh.f32 %v5828_v19  ;;  %v5664_v24 = vmul.f32 %v5600_v28, %v11203_v46  ;;  %v11221_v15 = vmul.f32 %v5955_v41, %v5507_v6 }
0x197b   :  { %7512 = vtanh.f32 %v5851_v14  ;;  %v5952_v17 = vadd.f32 1.0, %v7503_v40  ;;  %v5855_v7 = vmul.f32 0.7978846, %v5791_v49  ;;  %v7505_v13 = vpop.eup %7504  ;;  %v11223_v37 = vmul.f32 %v5959_v55, %v5511_v8 }
0x197c   :  { %7514 = vtanh.f32 %v5832_v10  ;;  %v6012_v58 = vmul.f32 %v5948_v35, %v11170_v39  ;;  %v5772_v5 = vadd.f32 %v11158_v2, %v11106_v1  ;;  %v5776_v54 = vadd.f32 %v11176_v38, %v11127_v12 }
0x197d   :  { %v6016_v50 = vmul.f32 %v5952_v17, %v11182_v31  ;;  %7516 = vtanh.f32 %v5855_v7  ;;  %v6072_v18 = vpack.c.bf16 %v11223_v37, %v11221_v15  ;;  %v5515_v62 = vmul.f32 0.5, %v11102_v30 }
0x197e   :  { %v5519_v63 = vmul.f32 0.5, %v11113_v47  ;;  %v7507_v28 = vpop.eup %7506  ;;  %v5836_v6 = vmul.f32 0.7978846, %v5772_v5  ;;  %v5963_v39 = vadd.f32 1.0, %v7499_v36  ;;  %v5967_v0 = vadd.f32 1.0, %v7505_v13 }
0x197f   :  { %v6069_v19 = vpack.c.bf16 %v6016_v50, %v6012_v58  ;;  %v7509_v31 = vpop.eup %7508  ;;  %v5724_v14 = vmul.f32 %v5660_v42, %v11197_v4  ;;  %v5728_v2 = vmul.f32 %v5664_v24, %v11203_v46  ;;  %v5840_v49 = vmul.f32 0.7978846, %v5776_v54 }
0x1980   :  { %v5780_v10 = vadd.f32 %v11193_v52, %v11141_v53  ;;  %7518 = vtanh.f32 %v5836_v6  ;;  %v11239_v38 = vmul.f32 %v5963_v39, %v5515_v62  ;;  %v11241_v30 = vmul.f32 %v5967_v0, %v5519_v63 }
0x1981   :  { %6182 = vmatprep.subr.bf16.mxu1 %v6069_v19  ;;  %v5784_v47 = vadd.f32 %v5720_v61, %v11155_v34  ;;  %7520 = vtanh.f32 %v5840_v49  ;;  %v5523_v41 = vmul.f32 0.5, %v11137_v9  ;;  %v5527_v40 = vmul.f32 0.5, %v11150_v25 }
0x1982   :  { %6183 = vmatpush1.bf16.msra.mxu1 %v6068_v43  ;;  %v5844_v36 = vmul.f32 0.7978846, %v5780_v10  ;;  %v6076_v35 = vpack.c.bf16 %v11241_v30, %v11239_v38  ;;  %v5971_v52 = vadd.f32 1.0, %v7507_v28  ;;  %v5975_v55 = vadd.f32 1.0, %v7509_v31 }
0x1983   :  { %v5848_v8 = vmul.f32 0.7978846, %v5784_v47  ;;  %v5788_v17 = vadd.f32 %v5724_v14, %v11197_v4  ;;  %v5508_v9 = vmul.f32 0.5, %v11074_v33  ;;  %v5512_v25 = vmul.f32 0.5, %v11082_v26 }
0x1984   :  { %v7511_v42 = vpop.eup %7510  ;;  %7522 = vtanh.f32 %v5844_v36  ;;  %v6035_v61 = vmul.f32 %v5971_v52, %v5523_v41  ;;  %v6039_v43 = vmul.f32 %v5975_v55, %v5527_v40  ;;  %v5792_v58 = vadd.f32 %v5728_v2, %v11203_v46 }
0x1985   :  { %v7513_v7 = vpop.eup %7512  ;;  %v5956_v13 = vadd.f32 1.0, %v7511_v42  ;;  %7524 = vtanh.f32 %v5848_v8  ;;  %v5852_v50 = vmul.f32 0.7978846, %v5788_v17  ;;  %v5531_v63 = vmul.f32 0.5, %v11179_v56 }
0x1986   :  { %v7515_v24 = vpop.eup %7514  ;;  %v6080_v62 = vpack.c.bf16 %v6039_v43, %v6035_v61  ;;  %v5979_v28 = vadd.f32 1.0, %v7513_v7  ;;  %v5856_v19 = vmul.f32 0.7978846, %v5792_v58  ;;  %v5535_v6 = vmul.f32 0.5, %v11190_v27  ;;  %v7561_v58 = vld [vmem:[%s11492_s10 + $0x18] sm:$0xff]  }
0x1987   :  { %v7517_v5 = vpop.eup %7516  ;;  %v5960_v54 = vadd.f32 1.0, %v7515_v24  ;;  %7526 = vtanh.f32 %v5852_v50  ;;  %v6020_v0 = vmul.f32 %v5956_v13, %v5508_v9  ;;  %v5516_v30 = vmul.f32 0.5, %v11106_v1  ;;  %v11263_v9 = vpop.permute.xlu0 %6479 }
0x1988   :  { %v5983_v39 = vadd.f32 1.0, %v7517_v5  ;;  %7528 = vtanh.f32 %v5856_v19  ;;  %v6043_v33 = vmul.f32 %v5979_v28, %v5531_v63  ;;  %v5520_v56 = vmul.f32 0.5, %v11127_v12 }
0x1989   :  { %v6024_v31 = vmul.f32 %v5960_v54, %v5512_v25  ;;  %v5524_v52 = vmul.f32 0.5, %v11141_v53  ;;  %v5528_v55 = vmul.f32 0.5, %v11155_v34  ;;  %v5532_v15 = vmul.f32 0.5, %v11197_v4  ;;  %v7560_v25 = vld [vmem:[%s11492_s10 + $0x10] sm:$0xff]   ;;  %v11269_v4 = vpop.permute.xlu1 %6484 }
0x198a   :  { %v6047_v14 = vmul.f32 %v5983_v39, %v5535_v6  ;;  %v7519_v26 = vpop.eup %7518  ;;  %v5536_v37 = vmul.f32 0.5, %v11203_v46 }
0x198b   :  { %v6073_v49 = vpack.c.bf16 %v6024_v31, %v6020_v0  ;;  %v7521_v2 = vpop.eup %7520  ;;  %v5964_v10 = vadd.f32 1.0, %v7519_v26  ;;  %v11271_v46 = vpop.permute.xlu0 %6489 }
0x198c   :  { %v6084_v38 = vpack.c.bf16 %v6047_v14, %v6043_v33  ;;  %v5968_v47 = vadd.f32 1.0, %v7521_v2 }
0x198d   :  { %6184 = vmatprep.subr.bf16.mxu1 %v6073_v49  ;;  %v6028_v41 = vmul.f32 %v5964_v10, %v5516_v30 }
0x198e   :  { %v7523_v36 = vpop.eup %7522  ;;  %6185 = vmatpush1.bf16.msra.mxu1 %v6072_v18  ;;  %v6032_v40 = vmul.f32 %v5968_v47, %v5520_v56 }
0x198f   :  { %v7525_v27 = vpop.eup %7524  ;;  %v5972_v8 = vadd.f32 1.0, %v7523_v36  ;;  %v11279_v50 = vpop.permute.xlu0 %6625 }
0x1990   :  { %v5976_v42 = vadd.f32 1.0, %v7525_v27  ;;  %v6077_v17 = vpack.c.bf16 %v6032_v40, %v6028_v41 }
0x1991   :  { %v7527_v7 = vpop.eup %7526  ;;  %v6036_v1 = vmul.f32 %v5972_v8, %v5524_v52  ;;  %v7562_v8 = vld [vmem:[%s11623_s30] sm:$0xff] }
0x1992   :  { %v6040_v13 = vmul.f32 %v5976_v42, %v5528_v55  ;;  %6186 = vmatprep.subr.bf16.mxu1 %v6077_v17  ;;  %v5980_v12 = vadd.f32 1.0, %v7527_v7  ;;  %v7529_v61 = vpop.eup %7528  ;;  %v7563_v7 = vld [vmem:[%s11623_s30 + $0x8] sm:$0xff] }
0x1993   :  { %6187 = vmatpush1.bf16.msra.mxu1 %v6076_v35  ;;  %v5984_v18 = vadd.f32 1.0, %v7529_v61  ;;  %v11273_v35 = vpop.permute.xlu1 %6494  ;;  %v11283_v54 = vpop.permute.xlu0 %6635 }
0x1994   :  { %v6081_v43 = vpack.c.bf16 %v6040_v13, %v6036_v1  ;;  %v6044_v24 = vmul.f32 %v5980_v12, %v5532_v15 }
0x1995   :  { %v6048_v53 = vmul.f32 %v5984_v18, %v5536_v37 }
0x1996   :  { %6188 = vmatprep.subr.bf16.mxu1 %v6081_v43  ;;  %v7564_v43 = vld [vmem:[%s11623_s30 + $0x20] sm:$0xff] }
0x1997   :  { %6189 = vmatpush1.bf16.msra.mxu1 %v6080_v62  ;;  %v6085_v34 = vpack.c.bf16 %v6048_v53, %v6044_v24  ;;  %v11281_v5 = vpop.permute.xlu1 %6630  ;;  %v11291_v14 = vpop.permute.xlu0 %6665 }
0x1999   :  { %6190 = vmatprep.subr.bf16.mxu1 %v6085_v34  ;;  %v7565_v34 = vld [vmem:[%s11623_s30 + $0x28] sm:$0xff] }
0x199b   :  { %6191 = vmatpush1.bf16.msra.mxu1 %v6084_v38  ;;  %v11285_v62 = vpop.permute.xlu1 %6640  ;;  %v11319_v53 = vpop.permute.xlu0 %6675 }
0x199e   :  { %6209 = vmatmul.mubr.bf16.vlgmr.msra.gmra.mrb[232].mxu1 %v7560_v25 }
0x199f   :  { %6218 = vmatprep.mubr.bf16.mxu1 %v11632_v48  ;;  %v11297_v38 = vpop.permute.xlu1 %6670 }
0x19a6   :  { %6219 = vmatmul.mubr.bf16.gmra.mrb[236].mxu1 %v7561_v58 }
0x19a7   :  { %6598 = vmatprep.mubr.bf16.mxu1 %v11632_v48 }
0x19b3   :  { %v6547_v63 = vpop.f32.mrb[240].mxu0 }
0x19b4   :  { %v6548_v28 = vadd.f32 %v6547_v63, %v11263_v9  ;;  %v6549_v19 = vpop.f32.mrb[241].mxu0 }
0x19b5   :  { %v6550_v6 = vadd.f32 %v6549_v19, %v11263_v9  ;;  %v6551_v39 = vpop.f32.mrb[242].mxu0 }
0x19b6   :  { %v6643_v0 = vmul.f32 %v11279_v50, %v6548_v28  ;;  %v6552_v31 = vadd.f32 %v6551_v39, %v11269_v4  ;;  %v6553_v33 = vpop.f32.mrb[243].mxu0 }
0x19b7   :  { %v6644_v26 = vmul.f32 %v11279_v50, %v6550_v6  ;;  %v6554_v49 = vadd.f32 %v6553_v33, %v11269_v4  ;;  %v11334_v6 = vpop.permute.xlu1 %6680 }
0x19b8   :  { %v6683_v2 = vadd.f32 %v11291_v14, %v6643_v0  ;;  %v6647_v10 = vmul.f32 %v11281_v5, %v6552_v31 }
0x19b9   :  { %v6684_v30 = vadd.f32 %v11291_v14, %v6644_v26  ;;  %v6648_v56 = vmul.f32 %v11281_v5, %v6554_v49 }
0x19ba   :  { %v6699_v47 = vmax.f32 %v6683_v2, 0.0  ;;  %v6687_v36 = vadd.f32 %v11297_v38, %v6647_v10  ;;  %v7566_v2 = vld [vmem:[%s11623_s30 + $0x40] sm:$0xff] }
0x19bb   :  { %v6700_v27 = vmax.f32 %v6684_v30, 0.0  ;;  %v6688_v41 = vadd.f32 %v11297_v38, %v6648_v56  ;;  %v6557_v40 = vpop.f32.mrb[244].mxu0  ;;  %v7567_v56 = vld [vmem:[%s11623_s30 + $0x48] sm:$0xff] }
0x19bc   :  { %v6715_v52 = vadd.f32 %v7562_v8, %v6699_v47  ;;  %v6703_v55 = vmax.f32 %v6687_v36, 0.0  ;;  %v6558_v42 = vadd.f32 %v6557_v40, %v11271_v46  ;;  %v6559_v17 = vpop.f32.mrb[245].mxu0  ;;  %v7569_v40 = vld [vmem:[%s11623_s30 + $0x68] sm:$0xff] }
0x19bd   :  { %v6716_v1 = vadd.f32 %v7563_v7, %v6700_v27  ;;  %v6704_v13 = vmax.f32 %v6688_v41, 0.0  ;;  %v6560_v12 = vadd.f32 %v6559_v17, %v11271_v46  ;;  %v6561_v61 = vpop.f32.mrb[246].mxu0  ;;  %v7568_v27 = vld [vmem:[%s11623_s30 + $0x60] sm:$0xff] }
0x19be   :  { %6731 = vst [vmem:[%s11779_s16] sm:$0xff] %v6715_v52  ;;  %v6719_v15 = vadd.f32 %v7564_v43, %v6703_v55  ;;  %v6651_v37 = vmul.f32 %v11283_v54, %v6558_v42  ;;  %v6562_v18 = vadd.f32 %v6561_v61, %v11273_v35  ;;  %v6563_v24 = vpop.f32.mrb[247].mxu0 }
0x19bf   :  { %6732 = vst [vmem:[%s11779_s16 + $0x8] sm:$0xff] %v6716_v1  ;;  %v6720_v25 = vadd.f32 %v7565_v34, %v6704_v13  ;;  %v6652_v58 = vmul.f32 %v11283_v54, %v6560_v12  ;;  %v6564_v63 = vadd.f32 %v6563_v24, %v11273_v35 }
0x19c0   :  { %6735 = vst [vmem:[%s11779_s16 + $0x20] sm:$0xff] %v6719_v15  ;;  %v6691_v28 = vadd.f32 %v11319_v53, %v6651_v37  ;;  %v6655_v19 = vmul.f32 %v11285_v62, %v6562_v18 }
0x19c1   :  { %6736 = vst [vmem:[%s11779_s16 + $0x28] sm:$0xff] %v6720_v25  ;;  %v6692_v39 = vadd.f32 %v11319_v53, %v6652_v58  ;;  %v6656_v0 = vmul.f32 %v11285_v62, %v6564_v63 }
0x19c2   :  { %v6707_v31 = vmax.f32 %v6691_v28, 0.0  ;;  %v6695_v33 = vadd.f32 %v11334_v6, %v6655_v19 }
0x19c3   :  { %v6708_v26 = vmax.f32 %v6692_v39, 0.0  ;;  %v6696_v49 = vadd.f32 %v11334_v6, %v6656_v0 }
0x19c4   :  { %v6723_v10 = vadd.f32 %v7566_v2, %v6707_v31  ;;  %v6711_v30 = vmax.f32 %v6695_v33, 0.0 }
0x19c5   :  { %v6724_v47 = vadd.f32 %v7567_v56, %v6708_v26  ;;  %v6712_v36 = vmax.f32 %v6696_v49, 0.0 }
0x19c6   :  { %6739 = vst [vmem:[%s11779_s16 + $0x40] sm:$0xff] %v6723_v10  ;;  %v6727_v41 = vadd.f32 %v7568_v27, %v6711_v30 }
0x19c7   :  { %6740 = vst [vmem:[%s11779_s16 + $0x48] sm:$0xff] %v6724_v47  ;;  %v6728_v8 = vadd.f32 %v7569_v40, %v6712_v36 }
0x19c8   :  { %6743 = vst [vmem:[%s11779_s16 + $0x60] sm:$0xff] %v6727_v41 }
0x19c9   :  { %6744 = vst [vmem:[%s11779_s16 + $0x68] sm:$0xff] %v6728_v8 }
0x1a71   :  { %v6210_v52 = vpop.f32.mrb[232].mxu1 }
0x1a72   :  { %v6211_v55 = vadd.f32 %v6210_v52, %v10906_v23  ;;  %v6212_v42 = vpop.f32.mrb[233].mxu1 }
0x1a73   :  { %v6213_v17 = vadd.f32 %v6212_v42, %v10906_v23  ;;  %v6214_v7 = vpop.f32.mrb[234].mxu1 }
0x1a74   :  { %v6215_v1 = vadd.f32 %v6214_v7, %v10910_v57  ;;  %v6216_v13 = vpop.f32.mrb[235].mxu1  ;;  %v6231_v61 = vadd.f32 %v6211_v55, %v10828_v29 }
0x1a75   :  { %v6217_v12 = vadd.f32 %v6216_v13, %v10910_v57  ;;  %v6232_v15 = vadd.f32 %v6213_v17, %v10831_v20 }
0x1a76   :  { %v6235_v43 = vadd.f32 %v6215_v1, %v10822_v11 }
0x1a77   :  { %v6236_v37 = vadd.f32 %v6217_v12, %v10825_v59 }
0x1a78   :  { %v6271_v18 = vadd.f32 %v6235_v43, %v6231_v61 }
0x1a79   :  { %v6280_v24 = vadd.f32 %v6236_v37, %v6232_v15  ;;  %v6220_v34 = vpop.f32.mrb[236].mxu1 }
0x1a7a   :  { %v6221_v25 = vadd.f32 %v6220_v34, %v10923_v22  ;;  %v6222_v23 = vpop.f32.mrb[237].mxu1 }
0x1a7b   :  { %v6223_v58 = vadd.f32 %v6222_v23, %v10923_v22  ;;  %v6224_v63 = vpop.f32.mrb[238].mxu1 }
0x1a7c   :  { %v6239_v28 = vadd.f32 %v6221_v25, %v10836_v32  ;;  %v6225_v57 = vadd.f32 %v6224_v63, %v10927_v45  ;;  %v6226_v29 = vpop.f32.mrb[239].mxu1 }
0x1a7d   :  { %v6240_v11 = vadd.f32 %v6223_v58, %v10841_v16  ;;  %v6227_v20 = vadd.f32 %v6226_v29, %v10927_v45 }
0x1a7e   :  { %v6272_v19 = vadd.f32 %v6271_v18, %v6239_v28  ;;  %v6243_v59 = vadd.f32 %v6225_v57, %v10845_v3 }
0x1a7f   :  { %v6281_v39 = vadd.f32 %v6280_v24, %v6240_v11  ;;  %v6244_v0 = vadd.f32 %v6227_v20, %v10849_v44 }
0x1a80   :  { %v6273_v31 = vadd.f32 %v6272_v19, %v6243_v59 }
0x1a81   :  { %v6282_v33 = vadd.f32 %v6281_v39, %v6244_v0 }
0x1a82   :  { %v6274_v26 = vrot.slane %v6273_v31, 4 }
0x1a83   :  { %v6283_v22 = vrot.slane %v6282_v33, 4 }
0x1a84   :  { %v6275_v49 = vadd.f32 %v6274_v26, %v6273_v31 }
0x1a85   :  { %v6284_v2 = vadd.f32 %v6283_v22, %v6282_v33 }
0x1a86   :  { %v6276_v32 = vrot.slane %v6275_v49, 2 }
0x1a87   :  { %v6285_v10 = vrot.slane %v6284_v2, 2 }
0x1a88   :  { %v6277_v30 = vadd.f32 %v6276_v32, %v6275_v49 }
0x1a89   :  { %v6286_v56 = vadd.f32 %v6285_v10, %v6284_v2 }
0x1a8a   :  { %v6278_v47 = vrot.slane %v6277_v30, 1 }
0x1a8b   :  { %v6287_v16 = vrot.slane %v6286_v56, 1 }
0x1a8c   :  { %v6279_v36 = vadd.f32 %v6278_v47, %v6277_v30 }
0x1a8d   :  { %v6288_v45 = vadd.f32 %v6287_v16, %v6286_v56 }
0x1a8e   :  { %v6291_v27 = vmul.f32 0.03125, %v6279_v36 }
0x1a8f   :  { %v6292_v41 = vmul.f32 0.03125, %v6288_v45 }
0x1a90   :  { %v6295_v3 = vsub.f32 %v6231_v61, %v6291_v27  ;;  %v6299_v40 = vsub.f32 %v6235_v43, %v6291_v27  ;;  %v6303_v8 = vsub.f32 %v6239_v28, %v6291_v27  ;;  %v6307_v44 = vsub.f32 %v6243_v59, %v6291_v27 }
0x1a91   :  { %v6296_v52 = vsub.f32 %v6232_v15, %v6292_v41  ;;  %v6300_v55 = vsub.f32 %v6236_v37, %v6292_v41  ;;  %v6304_v42 = vsub.f32 %v6240_v11, %v6292_v41  ;;  %v6308_v17 = vsub.f32 %v6244_v0, %v6292_v41 }
0x1a92   :  { %v6311_v7 = vmul.f32 %v6295_v3, %v6295_v3  ;;  %v6315_v1 = vmul.f32 %v6299_v40, %v6299_v40  ;;  %v6319_v18 = vmul.f32 %v6303_v8, %v6303_v8  ;;  %v6323_v23 = vmul.f32 %v6307_v44, %v6307_v44 }
0x1a93   :  { %v6312_v13 = vmul.f32 %v6296_v52, %v6296_v52  ;;  %v6316_v12 = vmul.f32 %v6300_v55, %v6300_v55  ;;  %v6320_v34 = vmul.f32 %v6304_v42, %v6304_v42  ;;  %v6324_v63 = vmul.f32 %v6308_v17, %v6308_v17 }
0x1a94   :  { %v6343_v24 = vadd.f32 %v6315_v1, %v6311_v7 }
0x1a95   :  { %v6352_v25 = vadd.f32 %v6316_v12, %v6312_v13  ;;  %v11780_v12 = vld [vmem:[#allocation6_spill] sm:$0xff] }
0x1a96   :  { %v6344_v58 = vadd.f32 %v6343_v24, %v6319_v18 }
0x1a97   :  { %v6353_v57 = vadd.f32 %v6352_v25, %v6320_v34  ;;  %v11784_v25 = vld [vmem:[#allocation10_spill] sm:$0xff] }
0x1a98   :  { %v6345_v61 = vadd.f32 %v6344_v58, %v6323_v23 }
0x1a99   :  { %v6354_v43 = vadd.f32 %v6353_v57, %v6324_v63 }
0x1a9a   :  { %v6346_v28 = vrot.slane %v6345_v61, 4 }
0x1a9b   :  { %v6355_v29 = vrot.slane %v6354_v43, 4 }
0x1a9c   :  { %v6347_v15 = vadd.f32 %v6346_v28, %v6345_v61  ;;  %v7570_v28 = vld [vmem:[%s11498_s14] sm:$0xff]  }
0x1a9d   :  { %v6356_v37 = vadd.f32 %v6355_v29, %v6354_v43  ;;  %v7571_v29 = vld [vmem:[%s11498_s14 + $0x8] sm:$0xff]  }
0x1a9e   :  { %v6348_v11 = vrot.slane %v6347_v15, 2 }
0x1a9f   :  { %v6357_v20 = vrot.slane %v6356_v37, 2 }
0x1aa0   :  { %v6349_v19 = vadd.f32 %v6348_v11, %v6347_v15 }
0x1aa1   :  { %v6358_v59 = vadd.f32 %v6357_v20, %v6356_v37 }
0x1aa2   :  { %v6350_v39 = vrot.slane %v6349_v19, 1 }
0x1aa3   :  { %v6359_v0 = vrot.slane %v6358_v59, 1 }
0x1aa4   :  { %v6351_v31 = vadd.f32 %v6350_v39, %v6349_v19 }
0x1aa5   :  { %v6360_v33 = vadd.f32 %v6359_v0, %v6358_v59 }
0x1aa6   :  { %v6363_v26 = vmul.f32 0.03125, %v6351_v31 }
0x1aa7   :  { %v6364_v22 = vmul.f32 0.03125, %v6360_v33 }
0x1aa8   :  { %v6367_v49 = vadd.f32 1e-06, %v6363_v26 }
0x1aa9   :  { %v6368_v2 = vadd.f32 1e-06, %v6364_v22 }
0x1aaa   :  { %7530 = vrsqrt.f32 %v6367_v49 }
0x1aab   :  { %7532 = vrsqrt.f32 %v6368_v2 }
0x1ab4   :  { %v7531_v32 = vpop.eup %7530 }
0x1ab5   :  { %v7533_v10 = vpop.eup %7532  ;;  %v6387_v30 = vmul.f32 %v7531_v32, %v6307_v44  ;;  %v6375_v56 = vmul.f32 %v7531_v32, %v6295_v3  ;;  %v6379_v47 = vmul.f32 %v7531_v32, %v6299_v40  ;;  %v6383_v16 = vmul.f32 %v7531_v32, %v6303_v8  ;;  %v11781_v8 = vld [vmem:[#allocation8_spill] sm:$0xff] }
0x1ab6   :  { %v6388_v36 = vmul.f32 %v7533_v10, %v6308_v17  ;;  %v6376_v45 = vmul.f32 %v7533_v10, %v6296_v52  ;;  %v6380_v27 = vmul.f32 %v7533_v10, %v6300_v55  ;;  %v6384_v41 = vmul.f32 %v7533_v10, %v6304_v42  ;;  %v11782_v52 = vld [vmem:[#allocation7_spill] sm:$0xff]  ;;  %v11783_v42 = vld [vmem:[#allocation9_spill] sm:$0xff] }
0x1ab7   :  { %v6423_v7 = vmul.f32 %v10951_v21, %v6387_v30  ;;  %v6411_v1 = vmul.f32 %v10941_v51, %v6375_v56  ;;  %v6415_v13 = vmul.f32 %v10943_v60, %v6379_v47  ;;  %v6419_v18 = vmul.f32 %v11780_v12, %v6383_v16 }
0x1ab8   :  { %v6412_v24 = vmul.f32 %v10941_v51, %v6376_v45  ;;  %v6416_v34 = vmul.f32 %v10943_v60, %v6380_v27  ;;  %v6420_v3 = vmul.f32 %v11780_v12, %v6384_v41  ;;  %v6424_v40 = vmul.f32 %v10951_v21, %v6388_v36 }
0x1ab9   :  { %v6447_v44 = vadd.f32 %v11781_v8, %v6411_v1  ;;  %v6451_v55 = vadd.f32 %v11782_v52, %v6415_v13  ;;  %v6455_v17 = vadd.f32 %v11783_v42, %v6419_v18  ;;  %v6459_v23 = vadd.f32 %v11784_v25, %v6423_v7 }
0x1aba   :  { %v6448_v58 = vadd.f32 %v11781_v8, %v6412_v24  ;;  %v6452_v63 = vadd.f32 %v11782_v52, %v6416_v34  ;;  %v6456_v51 = vadd.f32 %v11783_v42, %v6420_v3  ;;  %v6460_v60 = vadd.f32 %v11784_v25, %v6424_v40  ;;  %v7577_v25 = vld [vmem:[%s11623_s30 + $0x58] sm:$0xff] }
0x1abb   :  { %v6467_v57 = vpack.c.bf16 %v6451_v55, %v6447_v44  ;;  %v6471_v61 = vpack.c.bf16 %v6459_v23, %v6455_v17  ;;  %v7576_v55 = vld [vmem:[%s11623_s30 + $0x50] sm:$0xff] }
0x1abc   :  { %v6468_v43 = vpack.c.bf16 %v6452_v63, %v6448_v58  ;;  %v6472_v21 = vpack.c.bf16 %v6460_v60, %v6456_v51  ;;  %v7579_v58 = vld [vmem:[%s11623_s30 + $0x78] sm:$0xff] }
0x1abe   :  { %6566 = vmatprep.subr.bf16.mxu1 %v6468_v43 }
0x1abf   :  { %6567 = vmatpush1.bf16.msra.mxu1 %v6467_v57 }
0x1ac0   :  { %6568 = vmatprep.subr.bf16.mxu1 %v6472_v21 }
0x1ac3   :  { %6569 = vmatpush1.bf16.msra.mxu1 %v6471_v61 }
0x1ac6   :  { %6997 = vmatmul.mubr.msk.bf16.vlgmr.msra.gmra.mrb[240].mxu1 %vm456_vm2, %v7570_v28 }
0x1ac7   :  { %6608 = vmatprep.mubr.bf16.mxu1 %v11632_v48 }
0x1ace   :  { %6998 = vmatmul.mubr.msk.bf16.gmra.mrb[244].mxu1 %vm456_vm2, %v7571_v29 }
0x1b99   :  { %v6600_v15 = vpop.f32.mrb[240].mxu1 }
0x1b9a   :  { %v6601_v37 = vadd.f32 %v6600_v15, %v11263_v9  ;;  %v6602_v11 = vpop.f32.mrb[241].mxu1 }
0x1b9b   :  { %v6603_v20 = vadd.f32 %v6602_v11, %v11263_v9  ;;  %v6604_v19 = vpop.f32.mrb[242].mxu1 }
0x1b9c   :  { %v6645_v59 = vmul.f32 %v11279_v50, %v6601_v37  ;;  %v6605_v39 = vadd.f32 %v6604_v19, %v11269_v4  ;;  %v6606_v0 = vpop.f32.mrb[243].mxu1 }
0x1b9d   :  { %v6646_v48 = vmul.f32 %v11279_v50, %v6603_v20  ;;  %v6607_v31 = vadd.f32 %v6606_v0, %v11269_v4  ;;  %v7572_v50 = vld [vmem:[%s11623_s30 + $0x10] sm:$0xff] }
0x1b9e   :  { %v6685_v33 = vadd.f32 %v11291_v14, %v6645_v59  ;;  %v6649_v26 = vmul.f32 %v11281_v5, %v6605_v39 }
0x1b9f   :  { %v6686_v22 = vadd.f32 %v11291_v14, %v6646_v48  ;;  %v6650_v49 = vmul.f32 %v11281_v5, %v6607_v31  ;;  %v7573_v5 = vld [vmem:[%s11623_s30 + $0x18] sm:$0xff] }
0x1ba0   :  { %v6701_v2 = vmax.f32 %v6685_v33, 0.0  ;;  %v6689_v9 = vadd.f32 %v11297_v38, %v6649_v26 }
0x1ba1   :  { %v6702_v32 = vmax.f32 %v6686_v22, 0.0  ;;  %v6690_v10 = vadd.f32 %v11297_v38, %v6650_v49  ;;  %v6610_v30 = vpop.f32.mrb[244].mxu1  ;;  %v7574_v38 = vld [vmem:[%s11623_s30 + $0x30] sm:$0xff] }
0x1ba2   :  { %v6717_v4 = vadd.f32 %v7572_v50, %v6701_v2  ;;  %v6705_v56 = vmax.f32 %v6689_v9, 0.0  ;;  %v6611_v47 = vadd.f32 %v6610_v30, %v11271_v46  ;;  %v6612_v16 = vpop.f32.mrb[245].mxu1 }
0x1ba3   :  { %v6718_v14 = vadd.f32 %v7573_v5, %v6702_v32  ;;  %v6706_v36 = vmax.f32 %v6690_v10, 0.0  ;;  %v6613_v45 = vadd.f32 %v6612_v16, %v11271_v46  ;;  %v6614_v27 = vpop.f32.mrb[246].mxu1  ;;  %v7575_v46 = vld [vmem:[%s11623_s30 + $0x38] sm:$0xff] }
0x1ba4   :  { %6733 = vst [vmem:[%s11779_s16 + $0x10] sm:$0xff] %v6717_v4  ;;  %v6721_v41 = vadd.f32 %v7574_v38, %v6705_v56  ;;  %v6653_v7 = vmul.f32 %v11283_v54, %v6611_v47  ;;  %v6615_v1 = vadd.f32 %v6614_v27, %v11273_v35  ;;  %v6616_v13 = vpop.f32.mrb[247].mxu1 }
0x1ba5   :  { %6734 = vst [vmem:[%s11779_s16 + $0x18] sm:$0xff] %v6718_v14  ;;  %v6722_v12 = vadd.f32 %v7575_v46, %v6706_v36  ;;  %v6654_v18 = vmul.f32 %v11283_v54, %v6613_v45  ;;  %v6617_v24 = vadd.f32 %v6616_v13, %v11273_v35 }
0x1ba6   :  { %6737 = vst [vmem:[%s11779_s16 + $0x30] sm:$0xff] %v6721_v41  ;;  %v6693_v34 = vadd.f32 %v11319_v53, %v6653_v7  ;;  %v6657_v3 = vmul.f32 %v11285_v62, %v6615_v1 }
0x1ba7   :  { %6738 = vst [vmem:[%s11779_s16 + $0x38] sm:$0xff] %v6722_v12  ;;  %v6694_v40 = vadd.f32 %v11319_v53, %v6654_v18  ;;  %v6658_v8 = vmul.f32 %v11285_v62, %v6617_v24  ;;  %v7578_v62 = vld [vmem:[%s11623_s30 + $0x70] sm:$0xff] }
0x1ba8   :  { %v6709_v44 = vmax.f32 %v6693_v34, 0.0  ;;  %v6697_v54 = vadd.f32 %v11334_v6, %v6657_v3 }
0x1ba9   :  { %v6710_v35 = vmax.f32 %v6694_v40, 0.0  ;;  %v6698_v52 = vadd.f32 %v11334_v6, %v6658_v8 }
0x1baa   :  { %v6725_v42 = vadd.f32 %v7576_v55, %v6709_v44  ;;  %v6713_v17 = vmax.f32 %v6697_v54, 0.0 }
0x1bab   :  { %v6726_v23 = vadd.f32 %v7577_v25, %v6710_v35  ;;  %v6714_v53 = vmax.f32 %v6698_v52, 0.0 }
0x1bac   :  { %6741 = vst [vmem:[%s11779_s16 + $0x50] sm:$0xff] %v6725_v42  ;;  %v6729_v6 = vadd.f32 %v7578_v62, %v6713_v17 }
0x1bad   :  { %6742 = vst [vmem:[%s11779_s16 + $0x58] sm:$0xff] %v6726_v23  ;;  %v6730_v63 = vadd.f32 %v7579_v58, %v6714_v53 }
0x1bae   :  { %6745 = vst [vmem:[%s11779_s16 + $0x70] sm:$0xff] %v6729_v6 }
0x1baf   :  { %6746 = vst [vmem:[%s11779_s16 + $0x78] sm:$0xff] %v6730_v63 }

</bundles_post_ra>
